<compile_context>
chip_gen: v7x
topology: tpu7x:2x2x1
jax: 0.10.0
libtpu: 0.0.40
codegen_flags: <defaults>
</compile_context>

<pallas_src>
import functools

import jax
import jax.numpy as jnp
from jax.experimental import pallas as pl
from jax.experimental.pallas import tpu as pltpu

EPS = 1e-5  # PyTorch BatchNorm2d default eps
_VMEM_LIMIT = 32 * 1024 * 1024


def _round_up(x, m):
    return (x + m - 1) // m * m


# ---------------------------------------------------------------------------
# Direct 3x3 / stride-1 / pad-1 conv kernel (taps folded, no im2col in HBM)
#   grid = (batch, cout tiles), both "parallel"
#   x_ref:     (1, H+2, W+2, Cp) bf16   full per-image spatially padded block
#   w_ref:     (3, 3, Cp, tn)    bf16
#   scale/bias:(1, tn)           f32    (folded BatchNorm)
#   res_ref:   (1, H, W, tn)     bf16   (optional residual)
#   o_ref:     (1, H, W, tn)     bf16
#   acc_ref:   (H*W, tn)         f32    VMEM scratch accumulator
# ---------------------------------------------------------------------------
def _conv3x3_body(x_ref, w_ref, scale_ref, bias_ref, res_ref, o_ref, acc_ref,
                  H, W, apply_relu):
    first = True
    for dy in range(3):
        for dx in range(3):
            tap = x_ref[0, dy:dy + H, dx:dx + W, :].reshape(H * W, -1)
            part = jnp.dot(tap, w_ref[dy, dx],
                           preferred_element_type=jnp.float32)
            if first:
                acc_ref[...] = part
                first = False
            else:
                acc_ref[...] += part
    y = acc_ref[...] * scale_ref[...] + bias_ref[...]
    if res_ref is not None:
        y = y + res_ref[...].reshape(H * W, -1).astype(jnp.float32)
    if apply_relu:
        y = jnp.maximum(y, 0.0)
    o_ref[...] = y.reshape(1, H, W, -1).astype(o_ref.dtype)


def _conv3x3_kernel(x_ref, w_ref, scale_ref, bias_ref, o_ref, acc_ref,
                    *, H, W, apply_relu):
    _conv3x3_body(x_ref, w_ref, scale_ref, bias_ref, None, o_ref, acc_ref,
                  H, W, apply_relu)


def _conv3x3_res_kernel(x_ref, w_ref, scale_ref, bias_ref, res_ref, o_ref,
                        acc_ref, *, H, W, apply_relu):
    _conv3x3_body(x_ref, w_ref, scale_ref, bias_ref, res_ref, o_ref, acc_ref,
                  H, W, apply_relu)


def conv3x3_direct(x, prep, residual=None, apply_relu=True):
    """3x3/stride-1/pad-1 conv + folded BN [+ residual add] [+ ReLU].

    x: (N, H, W, Cp) channel-padded bf16 NHWC.  Returns (N, H, W, Np) bf16.
    Activations are read from HBM exactly once (no im2col materialization).
    """
    n, h, w, cp = x.shape
    assert cp == prep["cin_p"], (cp, prep["cin_p"])
    Np = prep["Np"]
    tn = prep["tn"]
    # v7x has two TensorCores: try to give the parallel grid >= 2 programs.
    if n * (Np // tn) < 2 and tn > 128:
        tn //= 2
    xp = jnp.pad(x, ((0, 0), (1, 1), (1, 1), (0, 0)))   # spatial halo, bf16

    in_specs = [
        pl.BlockSpec((1, h + 2, w + 2, cp), lambda b, j: (b, 0, 0, 0)),
        pl.BlockSpec((3, 3, cp, tn), lambda b, j: (0, 0, 0, j)),
        pl.BlockSpec((1, tn), lambda b, j: (0, j)),
        pl.BlockSpec((1, tn), lambda b, j: (0, j)),
    ]
    args = [xp, prep["w"], prep["scale"], prep["bias"]]
    if residual is not None:
        in_specs.append(pl.BlockSpec((1, h, w, tn), lambda b, j: (b, 0, 0, j)))
        args.append(residual)
        kernel = functools.partial(_conv3x3_res_kernel, H=h, W=w,
                                   apply_relu=apply_relu)
    else:
        kernel = functools.partial(_conv3x3_kernel, H=h, W=w,
                                   apply_relu=apply_relu)

    flops = 2 * n * h * w * 9 * cp * Np
    out_bytes = n * h * w * Np * 2
    bytes_accessed = (xp.size * 2 + prep["w"].size * 2 + 2 * Np * 4
                      + out_bytes * (2 if residual is not None else 1))

    # TODO(synk): for very large H*W (e.g. 112x112 stem-adjacent layers) the
    # (H*W, tn) accumulator should be row-tiled with an in-kernel halo.
    return pl.pallas_call(
        kernel,
        out_shape=jax.ShapeDtypeStruct((n, h, w, Np), jnp.bfloat16),
        grid_spec=pltpu.PrefetchScalarGridSpec(
            num_scalar_prefetch=0,
            grid=(n, Np // tn),
            in_specs=in_specs,
            out_specs=pl.BlockSpec((1, h, w, tn), lambda b, j: (b, 0, 0, j)),
            scratch_shapes=[pltpu.VMEM((h * w, tn), jnp.float32)]),
        compiler_params=pltpu.CompilerParams(
            dimension_semantics=("parallel", "parallel"),
            vmem_limit_bytes=_VMEM_LIMIT),
        cost_estimate=pl.CostEstimate(flops=flops, transcendentals=0,
                                      bytes_accessed=bytes_accessed),
    )(*args)


# ---------------------------------------------------------------------------
# Fused matmul kernel (stride-2 conv1 im2col path + 1x1 downsample path)
#   out = maybe_relu((x @ w) * scale + bias), bf16 out, f32 scratch accumulate
# ---------------------------------------------------------------------------
def _matmul_kernel(x_ref, w_ref, scale_ref, bias_ref, o_ref, acc_ref,
                   *, apply_relu):
    k = pl.program_id(2)

    @pl.when(k == 0)
    def _():
        acc_ref[...] = jnp.zeros_like(acc_ref)

    acc_ref[...] += jnp.dot(x_ref[...], w_ref[...],
                            preferred_element_type=jnp.float32)

    @pl.when(k == pl.num_programs(2) - 1)
    def _():
        y = acc_ref[...] * scale_ref[...] + bias_ref[...]
        if apply_relu:
            y = jnp.maximum(y, 0.0)
        o_ref[...] = y.astype(o_ref.dtype)


def fused_matmul(x2d, prep, apply_relu=True):
    """(M, Kp) bf16 @ (Kp, Np) bf16 with fused BN epilogue -> (M, Np) bf16."""
    M, K = x2d.shape
    assert K == prep["Kp"], (K, prep["Kp"])
    Kp, Np, tk, tn = prep["Kp"], prep["Np"], prep["tk"], prep["tn"]

    if M >= 512:
        tm = 512
    elif M >= 256:
        tm = 256
    else:
        tm = _round_up(M, 16)
    Mp = _round_up(M, tm)
    # v7x has two TensorCores: aim for >= 2 programs on the parallel axes.
    if (Mp // tm) * (Np // tn) < 2:
        if tm >= 32:
            tm //= 2
        elif tn > 128:
            tn //= 2
    xp = jnp.pad(x2d, ((0, Mp - M), (0, 0))) if Mp > M else x2d

    flops = 2 * Mp * Kp * Np
    bytes_accessed = Mp * Kp * 2 + Kp * Np * 2 + Mp * Np * 2 + 2 * Np * 4
    out = pl.pallas_call(
        functools.partial(_matmul_kernel, apply_relu=apply_relu),
        out_shape=jax.ShapeDtypeStruct((Mp, Np), jnp.bfloat16),
        grid_spec=pltpu.PrefetchScalarGridSpec(
            num_scalar_prefetch=0,
            grid=(Mp // tm, Np // tn, Kp // tk),
            in_specs=[
                pl.BlockSpec((tm, tk), lambda i, j, k: (i, k)),
                pl.BlockSpec((tk, tn), lambda i, j, k: (k, j)),
                pl.BlockSpec((1, tn), lambda i, j, k: (0, j)),
                pl.BlockSpec((1, tn), lambda i, j, k: (0, j)),
            ],
            out_specs=pl.BlockSpec((tm, tn), lambda i, j, k: (i, j)),
            scratch_shapes=[pltpu.VMEM((tm, tn), jnp.float32)]),
        compiler_params=pltpu.CompilerParams(
            dimension_semantics=("parallel", "parallel", "arbitrary"),
            vmem_limit_bytes=_VMEM_LIMIT),
        cost_estimate=pl.CostEstimate(flops=flops, transcendentals=0,
                                      bytes_accessed=bytes_accessed),
    )(xp, prep["w"], prep["scale"], prep["bias"])
    return out[:M]


# ---------------------------------------------------------------------------
# Parameter prep: fold BN + pad weights once (not per forward call)
# ---------------------------------------------------------------------------
def _fold_bn(p):
    scale = p["gamma"] / jnp.sqrt(p["var"] + EPS)
    bias = p["b"] * scale + p["beta"] - p["mean"] * scale
    return scale.astype(jnp.float32), bias.astype(jnp.float32)


def prepare_conv_bn_direct(p):
    """3x3 stride-1 conv + BN, consumed by the tap-folded direct kernel."""
    w = p["w"]                                  # (3, 3, Cin, Cout)
    kh, kw, cin, cout = w.shape
    assert (kh, kw) == (3, 3)
    cin_p = _round_up(cin, 128)
    Np = _round_up(cout, 128)
    tn = 256 if Np % 256 == 0 else 128
    wp = jnp.pad(w, ((0, 0), (0, 0), (0, cin_p - cin),
                     (0, Np - cout))).astype(jnp.bfloat16)
    scale, bias = _fold_bn(p)
    sp = jnp.pad(scale[None, :], ((0, 0), (0, Np - cout)))
    bp = jnp.pad(bias[None, :], ((0, 0), (0, Np - cout)))
    return {"kind": "direct", "w": wp, "scale": sp, "bias": bp,
            "cin_p": cin_p, "cout": cout, "Np": Np, "tn": tn}


def prepare_conv_bn_matmul(p):
    """kxk conv + BN as a (kh*kw*Cp, Np) matmul (im2col / 1x1 paths)."""
    w = p["w"]                                  # (kh, kw, Cin, Cout)
    kh, kw, cin, cout = w.shape
    cin_p = _round_up(cin, 128)
    Np = _round_up(cout, 128)
    tn = 256 if Np % 256 == 0 else 128
    Kp = kh * kw * cin_p
    if Kp <= 2048:
        tk = Kp                      # single fat K step: no padded K waste
    else:
        tk = 128
        for cand in range(2048, 127, -128):
            if Kp % cand == 0:       # tk always divides Kp (no extra padding)
                tk = cand
                break
    wp = jnp.pad(w, ((0, 0), (0, 0), (0, cin_p - cin),
                     (0, Np - cout))).astype(jnp.bfloat16).reshape(Kp, Np)
    scale, bias = _fold_bn(p)
    sp = jnp.pad(scale[None, :], ((0, 0), (0, Np - cout)))
    bp = jnp.pad(bias[None, :], ((0, 0), (0, Np - cout)))
    return {"kind": "matmul", "kh": kh, "kw": kw, "w": wp, "scale": sp,
            "bias": bp, "cin_p": cin_p, "cout": cout, "Kp": Kp, "Np": Np,
            "tk": tk, "tn": tn}


# ---------------------------------------------------------------------------
# Conv wrappers for the matmul-path convs
# ---------------------------------------------------------------------------
def conv3x3_strided_via_matmul(x, prep, stride, apply_relu=True):
    """3x3 stride>1 conv: bf16 im2col (from channel-padded NHWC) + matmul."""
    # TODO(synk): fold taps in-kernel for the strided path too (needs strided
    # in-kernel slicing); the stride-1 majority paths already avoid im2col.
    n, h, w, cp = x.shape
    assert cp == prep["cin_p"]
    ho = (h + 2 - 3) // stride + 1
    wo = (w + 2 - 3) // stride + 1
    xp = jnp.pad(x, ((0, 0), (1, 1), (1, 1), (0, 0)))     # bf16
    cols = [xp[:, dy:dy + stride * ho:stride, dx:dx + stride * wo:stride, :]
            for dy in range(3) for dx in range(3)]
    patches = jnp.concatenate(cols, axis=-1).reshape(n * ho * wo, 9 * cp)
    out = fused_matmul(patches, prep, apply_relu=apply_relu)
    return out.reshape(n, ho, wo, prep["Np"])


def conv1x1_via_matmul(x, prep, stride, apply_relu=False):
    """1x1 (strided) conv + BN for the downsample shortcut (no im2col blowup)."""
    n, h, w, cp = x.shape
    assert cp == prep["cin_p"]
    xs = x[:, ::stride, ::stride, :]
    _, ho, wo, _ = xs.shape
    out = fused_matmul(xs.reshape(n * ho * wo, cp), prep, apply_relu=apply_relu)
    return out.reshape(n, ho, wo, prep["Np"])


# ---------------------------------------------------------------------------
# Residual block (activations stay channel-padded NHWC bf16 between convs)
# ---------------------------------------------------------------------------
def residual_block_apply(prep, x):
    """x: (N, H, W, Cp) bf16, Cp = round_up(in_channels, 128)."""
    # TODO(synk): BatchNorm2d is eval-mode only (running stats folded into a
    # per-channel scale/bias); training-mode batch statistics are not modeled.
    stride = prep["stride"]
    if prep["conv1"]["kind"] == "direct":
        out = conv3x3_direct(x, prep["conv1"], residual=None, apply_relu=True)
    else:
        out = conv3x3_strided_via_matmul(x, prep["conv1"], stride,
                                         apply_relu=True)
    if "down" in prep:
        residual = conv1x1_via_matmul(x, prep["down"], stride, apply_relu=False)
    else:
        residual = x
    # conv2 + bn2 + residual add + final ReLU fused in one kernel call.
    return conv3x3_direct(out, prep["conv2"], residual=residual,
                          apply_relu=True)


def nchw_to_padded_nhwc(x_nchw):
    x = jnp.transpose(x_nchw, (0, 2, 3, 1)).astype(jnp.bfloat16)
    c = x.shape[-1]
    return jnp.pad(x, ((0, 0), (0, 0), (0, 0), (0, _round_up(c, 128) - c)))


def padded_nhwc_to_nchw(y, cout):
    return jnp.transpose(y[..., :cout].astype(jnp.float32), (0, 3, 1, 2))


def residual_block_forward(prep, x_nchw):
    """Single-block NCHW -> NCHW convenience wrapper."""
    y = residual_block_apply(prep, nchw_to_padded_nhwc(x_nchw))
    return padded_nhwc_to_nchw(y, prep["conv2"]["cout"])


# ---------------------------------------------------------------------------
# Deterministic synthetic parameters
# ---------------------------------------------------------------------------
def _conv_bn_params(key, idx, kh, kw, cin, cout):
    def k(i):
        return jax.random.fold_in(key, idx * 16 + i)
    fan_in = kh * kw * cin
    return {
        "w": jax.random.normal(k(0), (kh, kw, cin, cout), jnp.float32)
        / jnp.sqrt(fan_in),
        "b": 0.05 * jax.random.normal(k(1), (cout,), jnp.float32),
        "gamma": 1.0 + 0.1 * jax.random.normal(k(2), (cout,), jnp.float32),
        "beta": 0.1 * jax.random.normal(k(3), (cout,), jnp.float32),
        "mean": 0.1 * jax.random.normal(k(4), (cout,), jnp.float32),
        "var": 1.0 + 0.1 * jax.random.uniform(k(5), (cout,), jnp.float32),
    }


def init_residual_block_params(key, cin, cout, stride):
    params = {"conv1": _conv_bn_params(key, 0, 3, 3, cin, cout),
              "conv2": _conv_bn_params(key, 1, 3, 3, cout, cout),
              "stride": stride}
    if stride != 1 or cin != cout:
        # PyTorch-style downsample: 1x1 conv (stride) + BatchNorm.
        params["down"] = _conv_bn_params(key, 2, 1, 1, cin, cout)
    return params


def prepare_residual_block(params):
    stride = params["stride"]
    prep = {"stride": stride}
    prep["conv1"] = (prepare_conv_bn_direct(params["conv1"]) if stride == 1
                     else prepare_conv_bn_matmul(params["conv1"]))
    prep["conv2"] = prepare_conv_bn_direct(params["conv2"])
    if "down" in params:
        prep["down"] = prepare_conv_bn_matmul(params["down"])
    return prep


# ---------------------------------------------------------------------------
# Plain-JAX reference (PyTorch eval-mode semantics) for correctness check
# ---------------------------------------------------------------------------
def _ref_conv_bn(x, p, stride, pad, relu):
    y = jax.lax.conv_general_dilated(
        x, p["w"], (stride, stride), ((pad, pad), (pad, pad)),
        dimension_numbers=("NHWC", "HWIO", "NHWC"))
    y = y + p["b"]
    y = (y - p["mean"]) / jnp.sqrt(p["var"] + EPS) * p["gamma"] + p["beta"]
    return jnp.maximum(y, 0.0) if relu else y


def ref_residual_block(params, x_nchw):
    x = jnp.transpose(x_nchw, (0, 2, 3, 1)).astype(jnp.float32)
    s = params["stride"]
    out = _ref_conv_bn(x, params["conv1"], s, 1, True)
    out = _ref_conv_bn(out, params["conv2"], 1, 1, False)
    if "down" in params:
        res = _ref_conv_bn(x, params["down"], s, 0, False)
    else:
        res = x
    y = jnp.maximum(out + res, 0.0)
    return jnp.transpose(y, (0, 3, 1, 2))


if __name__ == "__main__":
    key = jax.random.PRNGKey(0)
    x = jax.random.normal(jax.random.fold_in(key, 0), (2, 4, 16, 16),
                          jnp.float32)  # NCHW, PyTorch convention

    # Block 1: identity shortcut (stride=1, 4 -> 4 channels).
    params1 = init_residual_block_params(jax.random.fold_in(key, 1), 4, 4, 1)
    # Block 2: downsample shortcut (stride=2, 4 -> 8 channels).
    params2 = init_residual_block_params(jax.random.fold_in(key, 2), 4, 8, 2)
    prep1 = prepare_residual_block(params1)
    prep2 = prepare_residual_block(params2)

    @jax.jit
    def forward(x_nchw):
        # Convert NCHW -> channel-padded NHWC bf16 once, keep that layout
        # between blocks, convert back once (no per-block slice/pad round trip).
        h = nchw_to_padded_nhwc(x_nchw)
        h = residual_block_apply(prep1, h)
        h = residual_block_apply(prep2, h)
        return padded_nhwc_to_nchw(h, prep2["conv2"]["cout"])

    y = forward(x)
    jax.block_until_ready(y)

    assert y.shape == (2, 8, 8, 8), y.shape
    assert bool(jnp.all(jnp.isfinite(y)))

    # Reference check (bf16 MXU operands + bf16 inter-layer activations,
    # f32 accumulation -> loose tolerance).
    y_ref = ref_residual_block(params2, ref_residual_block(params1, x))
    max_err = float(jnp.max(jnp.abs(y - y_ref)))
    assert max_err < 2e-1, max_err

    print("KERNEL_OK")
</pallas_src>

<mosaic_0001>
module attributes {stable_mosaic.version = 11 : i64} {
  func.func @_conv3x3_res_kernel(%arg0: i32, %arg1: i32, %arg2: memref<1x18x18x128xbf16, #tpu.memory_space<vmem>>, %arg3: memref<3x3x128x128xbf16, #tpu.memory_space<vmem>>, %arg4: memref<1x128xf32, #tpu.memory_space<vmem>>, %arg5: memref<1x128xf32, #tpu.memory_space<vmem>>, %arg6: memref<1x16x16x128xbf16, #tpu.memory_space<vmem>>, %arg7: memref<1x16x16x128xbf16, #tpu.memory_space<vmem>>, %arg8: memref<256x128xf32, #tpu.memory_space<vmem>>) attributes {dimension_semantics = [#tpu.dimension_semantics<parallel>, #tpu.dimension_semantics<parallel>], iteration_bounds = array<i64: 2, 1>, scalar_prefetch = 0 : i64, scratch_operands = 1 : i64, tpu.core_type = #tpu.core_type<tc>, window_params = [{transform_indices = @transform_0, window_bounds = array<i64: 1, 18, 18, 128>}, {transform_indices = @transform_1, window_bounds = array<i64: 3, 3, 128, 128>}, {transform_indices = @transform_2, window_bounds = array<i64: 1, 128>}, {transform_indices = @transform_3, window_bounds = array<i64: 1, 128>}, {transform_indices = @transform_4, window_bounds = array<i64: 1, 16, 16, 128>}, {transform_indices = @transform_5, window_bounds = array<i64: 1, 16, 16, 128>}]} {
    %c0 = arith.constant 0 : index
    %c0_0 = arith.constant 0 : index
    %c0_1 = arith.constant 0 : index
    %c0_2 = arith.constant 0 : index
    %0 = vector.load %arg2[%c0, %c0_0, %c0_1, %c0_2] : memref<1x18x18x128xbf16, #tpu.memory_space<vmem>>, vector<1x16x16x128xbf16>
    %1 = vector.shape_cast %0 : vector<1x16x16x128xbf16> to vector<16x16x128xbf16>
    %2 = vector.shape_cast %1 : vector<16x16x128xbf16> to vector<256x128xbf16>
    %c0_3 = arith.constant 0 : index
    %c0_4 = arith.constant 0 : index
    %c0_5 = arith.constant 0 : index
    %c0_6 = arith.constant 0 : index
    %3 = vector.load %arg3[%c0_3, %c0_4, %c0_5, %c0_6] : memref<3x3x128x128xbf16, #tpu.memory_space<vmem>>, vector<1x1x128x128xbf16>
    %4 = vector.shape_cast %3 : vector<1x1x128x128xbf16> to vector<128x128xbf16>
    %cst = arith.constant dense<0.000000e+00> : vector<256x128xf32>
    %5 = tpu.matmul %2, %4, %cst {dimension_numbers = #tpu.dot_dimension_numbers<[1], [0], [0], [1], [0, 0, 1, 1], [], []>} : vector<256x128xbf16>, vector<128x128xbf16>, vector<256x128xf32> -> vector<256x128xf32>
    %c0_7 = arith.constant 0 : index
    %c0_8 = arith.constant 0 : index
    %6 = vector.load %arg8[%c0_7, %c0_8] : memref<256x128xf32, #tpu.memory_space<vmem>>, vector<256x128xf32>
    tpu.vector_store %arg8[%c0_7, %c0_8], %5 {strides = array<i32>} : memref<256x128xf32, #tpu.memory_space<vmem>>, vector<256x128xf32>,
    %c0_9 = arith.constant 0 : index
    %c0_10 = arith.constant 0 : index
    %c1 = arith.constant 1 : index
    %c0_11 = arith.constant 0 : index
    %7 = vector.load %arg2[%c0_9, %c0_10, %c1, %c0_11] : memref<1x18x18x128xbf16, #tpu.memory_space<vmem>>, vector<1x16x16x128xbf16>
    %8 = vector.shape_cast %7 : vector<1x16x16x128xbf16> to vector<16x16x128xbf16>
    %9 = vector.shape_cast %8 : vector<16x16x128xbf16> to vector<256x128xbf16>
    %c0_12 = arith.constant 0 : index
    %c1_13 = arith.constant 1 : index
    %c0_14 = arith.constant 0 : index
    %c0_15 = arith.constant 0 : index
    %10 = vector.load %arg3[%c0_12, %c1_13, %c0_14, %c0_15] : memref<3x3x128x128xbf16, #tpu.memory_space<vmem>>, vector<1x1x128x128xbf16>
    %11 = vector.shape_cast %10 : vector<1x1x128x128xbf16> to vector<128x128xbf16>
    %cst_16 = arith.constant dense<0.000000e+00> : vector<256x128xf32>
    %12 = tpu.matmul %9, %11, %cst_16 {dimension_numbers = #tpu.dot_dimension_numbers<[1], [0], [0], [1], [0, 0, 1, 1], [], []>} : vector<256x128xbf16>, vector<128x128xbf16>, vector<256x128xf32> -> vector<256x128xf32>
    %c0_17 = arith.constant 0 : index
    %c0_18 = arith.constant 0 : index
    %13 = vector.load %arg8[%c0_17, %c0_18] : memref<256x128xf32, #tpu.memory_space<vmem>>, vector<256x128xf32>
    %14 = arith.addf %13, %12 : vector<256x128xf32>
    %c0_19 = arith.constant 0 : index
    %c0_20 = arith.constant 0 : index
    %15 = vector.load %arg8[%c0_19, %c0_20] : memref<256x128xf32, #tpu.memory_space<vmem>>, vector<256x128xf32>
    tpu.vector_store %arg8[%c0_19, %c0_20], %14 {strides = array<i32>} : memref<256x128xf32, #tpu.memory_space<vmem>>, vector<256x128xf32>,
    %c0_21 = arith.constant 0 : index
    %c0_22 = arith.constant 0 : index
    %c2 = arith.constant 2 : index
    %c0_23 = arith.constant 0 : index
    %16 = vector.load %arg2[%c0_21, %c0_22, %c2, %c0_23] : memref<1x18x18x128xbf16, #tpu.memory_space<vmem>>, vector<1x16x16x128xbf16>
    %17 = vector.shape_cast %16 : vector<1x16x16x128xbf16> to vector<16x16x128xbf16>
    %18 = vector.shape_cast %17 : vector<16x16x128xbf16> to vector<256x128xbf16>
    %c0_24 = arith.constant 0 : index
    %c2_25 = arith.constant 2 : index
    %c0_26 = arith.constant 0 : index
    %c0_27 = arith.constant 0 : index
    %19 = vector.load %arg3[%c0_24, %c2_25, %c0_26, %c0_27] : memref<3x3x128x128xbf16, #tpu.memory_space<vmem>>, vector<1x1x128x128xbf16>
    %20 = vector.shape_cast %19 : vector<1x1x128x128xbf16> to vector<128x128xbf16>
    %cst_28 = arith.constant dense<0.000000e+00> : vector<256x128xf32>
    %21 = tpu.matmul %18, %20, %cst_28 {dimension_numbers = #tpu.dot_dimension_numbers<[1], [0], [0], [1], [0, 0, 1, 1], [], []>} : vector<256x128xbf16>, vector<128x128xbf16>, vector<256x128xf32> -> vector<256x128xf32>
    %c0_29 = arith.constant 0 : index
    %c0_30 = arith.constant 0 : index
    %22 = vector.load %arg8[%c0_29, %c0_30] : memref<256x128xf32, #tpu.memory_space<vmem>>, vector<256x128xf32>
    %23 = arith.addf %22, %21 : vector<256x128xf32>
    %c0_31 = arith.constant 0 : index
    %c0_32 = arith.constant 0 : index
    %24 = vector.load %arg8[%c0_31, %c0_32] : memref<256x128xf32, #tpu.memory_space<vmem>>, vector<256x128xf32>
    tpu.vector_store %arg8[%c0_31, %c0_32], %23 {strides = array<i32>} : memref<256x128xf32, #tpu.memory_space<vmem>>, vector<256x128xf32>,
    %c0_33 = arith.constant 0 : index
    %c1_34 = arith.constant 1 : index
    %c0_35 = arith.constant 0 : index
    %c0_36 = arith.constant 0 : index
    %25 = vector.load %arg2[%c0_33, %c1_34, %c0_35, %c0_36] : memref<1x18x18x128xbf16, #tpu.memory_space<vmem>>, vector<1x16x16x128xbf16>
    %26 = vector.shape_cast %25 : vector<1x16x16x128xbf16> to vector<16x16x128xbf16>
    %27 = vector.shape_cast %26 : vector<16x16x128xbf16> to vector<256x128xbf16>
    %c1_37 = arith.constant 1 : index
    %c0_38 = arith.constant 0 : index
    %c0_39 = arith.constant 0 : index
    %c0_40 = arith.constant 0 : index
    %28 = vector.load %arg3[%c1_37, %c0_38, %c0_39, %c0_40] : memref<3x3x128x128xbf16, #tpu.memory_space<vmem>>, vector<1x1x128x128xbf16>
    %29 = vector.shape_cast %28 : vector<1x1x128x128xbf16> to vector<128x128xbf16>
    %cst_41 = arith.constant dense<0.000000e+00> : vector<256x128xf32>
    %30 = tpu.matmul %27, %29, %cst_41 {dimension_numbers = #tpu.dot_dimension_numbers<[1], [0], [0], [1], [0, 0, 1, 1], [], []>} : vector<256x128xbf16>, vector<128x128xbf16>, vector<256x128xf32> -> vector<256x128xf32>
    %c0_42 = arith.constant 0 : index
    %c0_43 = arith.constant 0 : index
    %31 = vector.load %arg8[%c0_42, %c0_43] : memref<256x128xf32, #tpu.memory_space<vmem>>, vector<256x128xf32>
    %32 = arith.addf %31, %30 : vector<256x128xf32>
    %c0_44 = arith.constant 0 : index
    %c0_45 = arith.constant 0 : index
    %33 = vector.load %arg8[%c0_44, %c0_45] : memref<256x128xf32, #tpu.memory_space<vmem>>, vector<256x128xf32>
    tpu.vector_store %arg8[%c0_44, %c0_45], %32 {strides = array<i32>} : memref<256x128xf32, #tpu.memory_space<vmem>>, vector<256x128xf32>,
    %c0_46 = arith.constant 0 : index
    %c1_47 = arith.constant 1 : index
    %c1_48 = arith.constant 1 : index
    %c0_49 = arith.constant 0 : index
    %34 = vector.load %arg2[%c0_46, %c1_47, %c1_48, %c0_49] : memref<1x18x18x128xbf16, #tpu.memory_space<vmem>>, vector<1x16x16x128xbf16>
    %35 = vector.shape_cast %34 : vector<1x16x16x128xbf16> to vector<16x16x128xbf16>
    %36 = vector.shape_cast %35 : vector<16x16x128xbf16> to vector<256x128xbf16>
    %c1_50 = arith.constant 1 : index
    %c1_51 = arith.constant 1 : index
    %c0_52 = arith.constant 0 : index
    %c0_53 = arith.constant 0 : index
    %37 = vector.load %arg3[%c1_50, %c1_51, %c0_52, %c0_53] : memref<3x3x128x128xbf16, #tpu.memory_space<vmem>>, vector<1x1x128x128xbf16>
    %38 = vector.shape_cast %37 : vector<1x1x128x128xbf16> to vector<128x128xbf16>
    %cst_54 = arith.constant dense<0.000000e+00> : vector<256x128xf32>
    %39 = tpu.matmul %36, %38, %cst_54 {dimension_numbers = #tpu.dot_dimension_numbers<[1], [0], [0], [1], [0, 0, 1, 1], [], []>} : vector<256x128xbf16>, vector<128x128xbf16>, vector<256x128xf32> -> vector<256x128xf32>
    %c0_55 = arith.constant 0 : index
    %c0_56 = arith.constant 0 : index
    %40 = vector.load %arg8[%c0_55, %c0_56] : memref<256x128xf32, #tpu.memory_space<vmem>>, vector<256x128xf32>
    %41 = arith.addf %40, %39 : vector<256x128xf32>
    %c0_57 = arith.constant 0 : index
    %c0_58 = arith.constant 0 : index
    %42 = vector.load %arg8[%c0_57, %c0_58] : memref<256x128xf32, #tpu.memory_space<vmem>>, vector<256x128xf32>
    tpu.vector_store %arg8[%c0_57, %c0_58], %41 {strides = array<i32>} : memref<256x128xf32, #tpu.memory_space<vmem>>, vector<256x128xf32>,
    %c0_59 = arith.constant 0 : index
    %c1_60 = arith.constant 1 : index
    %c2_61 = arith.constant 2 : index
    %c0_62 = arith.constant 0 : index
    %43 = vector.load %arg2[%c0_59, %c1_60, %c2_61, %c0_62] : memref<1x18x18x128xbf16, #tpu.memory_space<vmem>>, vector<1x16x16x128xbf16>
    %44 = vector.shape_cast %43 : vector<1x16x16x128xbf16> to vector<16x16x128xbf16>
    %45 = vector.shape_cast %44 : vector<16x16x128xbf16> to vector<256x128xbf16>
    %c1_63 = arith.constant 1 : index
    %c2_64 = arith.constant 2 : index
    %c0_65 = arith.constant 0 : index
    %c0_66 = arith.constant 0 : index
    %46 = vector.load %arg3[%c1_63, %c2_64, %c0_65, %c0_66] : memref<3x3x128x128xbf16, #tpu.memory_space<vmem>>, vector<1x1x128x128xbf16>
    %47 = vector.shape_cast %46 : vector<1x1x128x128xbf16> to vector<128x128xbf16>
    %cst_67 = arith.constant dense<0.000000e+00> : vector<256x128xf32>
    %48 = tpu.matmul %45, %47, %cst_67 {dimension_numbers = #tpu.dot_dimension_numbers<[1], [0], [0], [1], [0, 0, 1, 1], [], []>} : vector<256x128xbf16>, vector<128x128xbf16>, vector<256x128xf32> -> vector<256x128xf32>
    %c0_68 = arith.constant 0 : index
    %c0_69 = arith.constant 0 : index
    %49 = vector.load %arg8[%c0_68, %c0_69] : memref<256x128xf32, #tpu.memory_space<vmem>>, vector<256x128xf32>
    %50 = arith.addf %49, %48 : vector<256x128xf32>
    %c0_70 = arith.constant 0 : index
    %c0_71 = arith.constant 0 : index
    %51 = vector.load %arg8[%c0_70, %c0_71] : memref<256x128xf32, #tpu.memory_space<vmem>>, vector<256x128xf32>
    tpu.vector_store %arg8[%c0_70, %c0_71], %50 {strides = array<i32>} : memref<256x128xf32, #tpu.memory_space<vmem>>, vector<256x128xf32>,
    %c0_72 = arith.constant 0 : index
    %c2_73 = arith.constant 2 : index
    %c0_74 = arith.constant 0 : index
    %c0_75 = arith.constant 0 : index
    %52 = vector.load %arg2[%c0_72, %c2_73, %c0_74, %c0_75] : memref<1x18x18x128xbf16, #tpu.memory_space<vmem>>, vector<1x16x16x128xbf16>
    %53 = vector.shape_cast %52 : vector<1x16x16x128xbf16> to vector<16x16x128xbf16>
    %54 = vector.shape_cast %53 : vector<16x16x128xbf16> to vector<256x128xbf16>
    %c2_76 = arith.constant 2 : index
    %c0_77 = arith.constant 0 : index
    %c0_78 = arith.constant 0 : index
    %c0_79 = arith.constant 0 : index
    %55 = vector.load %arg3[%c2_76, %c0_77, %c0_78, %c0_79] : memref<3x3x128x128xbf16, #tpu.memory_space<vmem>>, vector<1x1x128x128xbf16>
    %56 = vector.shape_cast %55 : vector<1x1x128x128xbf16> to vector<128x128xbf16>
    %cst_80 = arith.constant dense<0.000000e+00> : vector<256x128xf32>
    %57 = tpu.matmul %54, %56, %cst_80 {dimension_numbers = #tpu.dot_dimension_numbers<[1], [0], [0], [1], [0, 0, 1, 1], [], []>} : vector<256x128xbf16>, vector<128x128xbf16>, vector<256x128xf32> -> vector<256x128xf32>
    %c0_81 = arith.constant 0 : index
    %c0_82 = arith.constant 0 : index
    %58 = vector.load %arg8[%c0_81, %c0_82] : memref<256x128xf32, #tpu.memory_space<vmem>>, vector<256x128xf32>
    %59 = arith.addf %58, %57 : vector<256x128xf32>
    %c0_83 = arith.constant 0 : index
    %c0_84 = arith.constant 0 : index
    %60 = vector.load %arg8[%c0_83, %c0_84] : memref<256x128xf32, #tpu.memory_space<vmem>>, vector<256x128xf32>
    tpu.vector_store %arg8[%c0_83, %c0_84], %59 {strides = array<i32>} : memref<256x128xf32, #tpu.memory_space<vmem>>, vector<256x128xf32>,
    %c0_85 = arith.constant 0 : index
    %c2_86 = arith.constant 2 : index
    %c1_87 = arith.constant 1 : index
    %c0_88 = arith.constant 0 : index
    %61 = vector.load %arg2[%c0_85, %c2_86, %c1_87, %c0_88] : memref<1x18x18x128xbf16, #tpu.memory_space<vmem>>, vector<1x16x16x128xbf16>
    %62 = vector.shape_cast %61 : vector<1x16x16x128xbf16> to vector<16x16x128xbf16>
    %63 = vector.shape_cast %62 : vector<16x16x128xbf16> to vector<256x128xbf16>
    %c2_89 = arith.constant 2 : index
    %c1_90 = arith.constant 1 : index
    %c0_91 = arith.constant 0 : index
    %c0_92 = arith.constant 0 : index
    %64 = vector.load %arg3[%c2_89, %c1_90, %c0_91, %c0_92] : memref<3x3x128x128xbf16, #tpu.memory_space<vmem>>, vector<1x1x128x128xbf16>
    %65 = vector.shape_cast %64 : vector<1x1x128x128xbf16> to vector<128x128xbf16>
    %cst_93 = arith.constant dense<0.000000e+00> : vector<256x128xf32>
    %66 = tpu.matmul %63, %65, %cst_93 {dimension_numbers = #tpu.dot_dimension_numbers<[1], [0], [0], [1], [0, 0, 1, 1], [], []>} : vector<256x128xbf16>, vector<128x128xbf16>, vector<256x128xf32> -> vector<256x128xf32>
    %c0_94 = arith.constant 0 : index
    %c0_95 = arith.constant 0 : index
    %67 = vector.load %arg8[%c0_94, %c0_95] : memref<256x128xf32, #tpu.memory_space<vmem>>, vector<256x128xf32>
    %68 = arith.addf %67, %66 : vector<256x128xf32>
    %c0_96 = arith.constant 0 : index
    %c0_97 = arith.constant 0 : index
    %69 = vector.load %arg8[%c0_96, %c0_97] : memref<256x128xf32, #tpu.memory_space<vmem>>, vector<256x128xf32>
    tpu.vector_store %arg8[%c0_96, %c0_97], %68 {strides = array<i32>} : memref<256x128xf32, #tpu.memory_space<vmem>>, vector<256x128xf32>,
    %c0_98 = arith.constant 0 : index
    %c2_99 = arith.constant 2 : index
    %c2_100 = arith.constant 2 : index
    %c0_101 = arith.constant 0 : index
    %70 = vector.load %arg2[%c0_98, %c2_99, %c2_100, %c0_101] : memref<1x18x18x128xbf16, #tpu.memory_space<vmem>>, vector<1x16x16x128xbf16>
    %71 = vector.shape_cast %70 : vector<1x16x16x128xbf16> to vector<16x16x128xbf16>
    %72 = vector.shape_cast %71 : vector<16x16x128xbf16> to vector<256x128xbf16>
    %c2_102 = arith.constant 2 : index
    %c2_103 = arith.constant 2 : index
    %c0_104 = arith.constant 0 : index
    %c0_105 = arith.constant 0 : index
    %73 = vector.load %arg3[%c2_102, %c2_103, %c0_104, %c0_105] : memref<3x3x128x128xbf16, #tpu.memory_space<vmem>>, vector<1x1x128x128xbf16>
    %74 = vector.shape_cast %73 : vector<1x1x128x128xbf16> to vector<128x128xbf16>
    %cst_106 = arith.constant dense<0.000000e+00> : vector<256x128xf32>
    %75 = tpu.matmul %72, %74, %cst_106 {dimension_numbers = #tpu.dot_dimension_numbers<[1], [0], [0], [1], [0, 0, 1, 1], [], []>} : vector<256x128xbf16>, vector<128x128xbf16>, vector<256x128xf32> -> vector<256x128xf32>
    %c0_107 = arith.constant 0 : index
    %c0_108 = arith.constant 0 : index
    %76 = vector.load %arg8[%c0_107, %c0_108] : memref<256x128xf32, #tpu.memory_space<vmem>>, vector<256x128xf32>
    %77 = arith.addf %76, %75 : vector<256x128xf32>
    %c0_109 = arith.constant 0 : index
    %c0_110 = arith.constant 0 : index
    %78 = vector.load %arg8[%c0_109, %c0_110] : memref<256x128xf32, #tpu.memory_space<vmem>>, vector<256x128xf32>
    tpu.vector_store %arg8[%c0_109, %c0_110], %77 {strides = array<i32>} : memref<256x128xf32, #tpu.memory_space<vmem>>, vector<256x128xf32>,
    %c0_111 = arith.constant 0 : index
    %c0_112 = arith.constant 0 : index
    %79 = vector.load %arg8[%c0_111, %c0_112] : memref<256x128xf32, #tpu.memory_space<vmem>>, vector<256x128xf32>
    %c0_113 = arith.constant 0 : index
    %c0_114 = arith.constant 0 : index
    %80 = vector.load %arg4[%c0_113, %c0_114] : memref<1x128xf32, #tpu.memory_space<vmem>>, vector<1x128xf32>
    %81 = vector.broadcast %80 : vector<1x128xf32> to vector<256x128xf32>
    %82 = arith.mulf %79, %81 : vector<256x128xf32>
    %c0_115 = arith.constant 0 : index
    %c0_116 = arith.constant 0 : index
    %83 = vector.load %arg5[%c0_115, %c0_116] : memref<1x128xf32, #tpu.memory_space<vmem>>, vector<1x128xf32>
    %84 = vector.broadcast %83 : vector<1x128xf32> to vector<256x128xf32>
    %85 = arith.addf %82, %84 : vector<256x128xf32>
    %c0_117 = arith.constant 0 : index
    %c0_118 = arith.constant 0 : index
    %c0_119 = arith.constant 0 : index
    %c0_120 = arith.constant 0 : index
    %86 = vector.load %arg6[%c0_117, %c0_118, %c0_119, %c0_120] : memref<1x16x16x128xbf16, #tpu.memory_space<vmem>>, vector<1x16x16x128xbf16>
    %87 = vector.shape_cast %86 : vector<1x16x16x128xbf16> to vector<256x128xbf16>
    %88 = arith.extf %87 : vector<256x128xbf16> to vector<256x128xf32>
    %89 = arith.addf %85, %88 : vector<256x128xf32>
    %cst_121 = arith.constant 0.000000e+00 : f32
    %90 = vector.broadcast %cst_121 : f32 to vector<256x128xf32>
    %91 = arith.maximumf %89, %90 : vector<256x128xf32>
    %92 = vector.shape_cast %91 : vector<256x128xf32> to vector<1x16x16x128xf32>
    %93 = arith.truncf %92 : vector<1x16x16x128xf32> to vector<1x16x16x128xbf16>
    %c0_122 = arith.constant 0 : index
    %c0_123 = arith.constant 0 : index
    %c0_124 = arith.constant 0 : index
    %c0_125 = arith.constant 0 : index
    %94 = vector.load %arg7[%c0_122, %c0_123, %c0_124, %c0_125] : memref<1x16x16x128xbf16, #tpu.memory_space<vmem>>, vector<1x16x16x128xbf16>
    tpu.vector_store %arg7[%c0_122, %c0_123, %c0_124, %c0_125], %93 {strides = array<i32>} : memref<1x16x16x128xbf16, #tpu.memory_space<vmem>>, vector<1x16x16x128xbf16>,
    return
  }
  func.func @transform_0(%arg0: i32, %arg1: i32) -> (i32, i32, i32, i32) {
    %c0_i32 = arith.constant 0 : i32
    %c0_i32_0 = arith.constant 0 : i32
    %c0_i32_1 = arith.constant 0 : i32
    %c0_i32_2 = arith.constant 0 : i32
    return %arg0, %c0_i32, %c0_i32_0, %c0_i32_1 : i32, i32, i32, i32
  }
  func.func @transform_1(%arg0: i32, %arg1: i32) -> (i32, i32, i32, i32) {
    %c0_i32 = arith.constant 0 : i32
    %c0_i32_0 = arith.constant 0 : i32
    %c0_i32_1 = arith.constant 0 : i32
    %c0_i32_2 = arith.constant 0 : i32
    return %c0_i32, %c0_i32_0, %c0_i32_1, %arg1 : i32, i32, i32, i32
  }
  func.func @transform_2(%arg0: i32, %arg1: i32) -> (i32, i32) {
    %c0_i32 = arith.constant 0 : i32
    %c0_i32_0 = arith.constant 0 : i32
    return %c0_i32, %arg1 : i32, i32
  }
  func.func @transform_3(%arg0: i32, %arg1: i32) -> (i32, i32) {
    %c0_i32 = arith.constant 0 : i32
    %c0_i32_0 = arith.constant 0 : i32
    return %c0_i32, %arg1 : i32, i32
  }
  func.func @transform_4(%arg0: i32, %arg1: i32) -> (i32, i32, i32, i32) {
    %c0_i32 = arith.constant 0 : i32
    %c0_i32_0 = arith.constant 0 : i32
    %c0_i32_1 = arith.constant 0 : i32
    return %arg0, %c0_i32, %c0_i32_0, %arg1 : i32, i32, i32, i32
  }
  func.func @transform_5(%arg0: i32, %arg1: i32) -> (i32, i32, i32, i32) {
    %c0_i32 = arith.constant 0 : i32
    %c0_i32_0 = arith.constant 0 : i32
    %c0_i32_1 = arith.constant 0 : i32
    return %arg0, %c0_i32, %c0_i32_0, %arg1 : i32, i32, i32, i32
  }
}

module attributes {stable_mosaic.version = 11 : i64} {
  func.func @_matmul_kernel(%arg0: i32, %arg1: i32, %arg2: i32, %arg3: memref<64x128xbf16, #tpu.memory_space<vmem>>, %arg4: memref<128x128xbf16, #tpu.memory_space<vmem>>, %arg5: memref<1x128xf32, #tpu.memory_space<vmem>>, %arg6: memref<1x128xf32, #tpu.memory_space<vmem>>, %arg7: memref<64x128xbf16, #tpu.memory_space<vmem>>, %arg8: memref<64x128xf32, #tpu.memory_space<vmem>>) attributes {dimension_semantics = [#tpu.dimension_semantics<parallel>, #tpu.dimension_semantics<parallel>, #tpu.dimension_semantics<arbitrary>], iteration_bounds = array<i64: 2, 1, 1>, scalar_prefetch = 0 : i64, scratch_operands = 1 : i64, tpu.core_type = #tpu.core_type<tc>, window_params = [{transform_indices = @transform_0, window_bounds = array<i64: 64, 128>}, {transform_indices = @transform_1, window_bounds = array<i64: 128, 128>}, {transform_indices = @transform_2, window_bounds = array<i64: 1, 128>}, {transform_indices = @transform_3, window_bounds = array<i64: 1, 128>}, {transform_indices = @transform_4, window_bounds = array<i64: 64, 128>}]} {
    %c0_i32 = arith.constant 0 : i32
    %0 = arith.cmpi eq, %arg2, %c0_i32 : i32
    %1 = arith.extui %0 : i1 to i32
    %c0_i32_0 = arith.constant 0 : i32
    %2 = arith.cmpi ne, %1, %c0_i32_0 : i32
    scf.if %2 {
      %cst_10 = arith.constant 0.000000e+00 : f32
      %12 = vector.broadcast %cst_10 : f32 to vector<64x128xf32>
      %c0_11 = arith.constant 0 : index
      %c0_12 = arith.constant 0 : index
      %13 = vector.load %arg8[%c0_11, %c0_12] : memref<64x128xf32, #tpu.memory_space<vmem>>, vector<64x128xf32>
      tpu.vector_store %arg8[%c0_11, %c0_12], %12 {strides = array<i32>} : memref<64x128xf32, #tpu.memory_space<vmem>>, vector<64x128xf32>,
    } else {
    }
    %c0 = arith.constant 0 : index
    %c0_1 = arith.constant 0 : index
    %3 = vector.load %arg8[%c0, %c0_1] : memref<64x128xf32, #tpu.memory_space<vmem>>, vector<64x128xf32>
    %c0_2 = arith.constant 0 : index
    %c0_3 = arith.constant 0 : index
    %4 = vector.load %arg3[%c0_2, %c0_3] : memref<64x128xbf16, #tpu.memory_space<vmem>>, vector<64x128xbf16>
    %c0_4 = arith.constant 0 : index
    %c0_5 = arith.constant 0 : index
    %5 = vector.load %arg4[%c0_4, %c0_5] : memref<128x128xbf16, #tpu.memory_space<vmem>>, vector<128x128xbf16>
    %cst = arith.constant dense<0.000000e+00> : vector<64x128xf32>
    %6 = tpu.matmul %4, %5, %cst {dimension_numbers = #tpu.dot_dimension_numbers<[1], [0], [0], [1], [0, 0, 1, 1], [], []>} : vector<64x128xbf16>, vector<128x128xbf16>, vector<64x128xf32> -> vector<64x128xf32>
    %7 = arith.addf %3, %6 : vector<64x128xf32>
    %c0_6 = arith.constant 0 : index
    %c0_7 = arith.constant 0 : index
    %8 = vector.load %arg8[%c0_6, %c0_7] : memref<64x128xf32, #tpu.memory_space<vmem>>, vector<64x128xf32>
    tpu.vector_store %arg8[%c0_6, %c0_7], %7 {strides = array<i32>} : memref<64x128xf32, #tpu.memory_space<vmem>>, vector<64x128xf32>,
    %c0_i32_8 = arith.constant 0 : i32
    %9 = arith.cmpi eq, %arg2, %c0_i32_8 : i32
    %10 = arith.extui %9 : i1 to i32
    %c0_i32_9 = arith.constant 0 : i32
    %11 = arith.cmpi ne, %10, %c0_i32_9 : i32
    scf.if %11 {
      %c0_10 = arith.constant 0 : index
      %c0_11 = arith.constant 0 : index
      %12 = vector.load %arg8[%c0_10, %c0_11] : memref<64x128xf32, #tpu.memory_space<vmem>>, vector<64x128xf32>
      %c0_12 = arith.constant 0 : index
      %c0_13 = arith.constant 0 : index
      %13 = vector.load %arg5[%c0_12, %c0_13] : memref<1x128xf32, #tpu.memory_space<vmem>>, vector<1x128xf32>
      %14 = vector.broadcast %13 : vector<1x128xf32> to vector<64x128xf32>
      %15 = arith.mulf %12, %14 : vector<64x128xf32>
      %c0_14 = arith.constant 0 : index
      %c0_15 = arith.constant 0 : index
      %16 = vector.load %arg6[%c0_14, %c0_15] : memref<1x128xf32, #tpu.memory_space<vmem>>, vector<1x128xf32>
      %17 = vector.broadcast %16 : vector<1x128xf32> to vector<64x128xf32>
      %18 = arith.addf %15, %17 : vector<64x128xf32>
      %19 = arith.truncf %18 : vector<64x128xf32> to vector<64x128xbf16>
      %c0_16 = arith.constant 0 : index
      %c0_17 = arith.constant 0 : index
      %20 = vector.load %arg7[%c0_16, %c0_17] : memref<64x128xbf16, #tpu.memory_space<vmem>>, vector<64x128xbf16>
      tpu.vector_store %arg7[%c0_16, %c0_17], %19 {strides = array<i32>} : memref<64x128xbf16, #tpu.memory_space<vmem>>, vector<64x128xbf16>,
    } else {
    }
    return
  }
  func.func @transform_0(%arg0: i32, %arg1: i32, %arg2: i32) -> (i32, i32) {
    %c0_i32 = arith.constant 0 : i32
    return %arg0, %arg2 : i32, i32
  }
  func.func @transform_1(%arg0: i32, %arg1: i32, %arg2: i32) -> (i32, i32) {
    %c0_i32 = arith.constant 0 : i32
    return %arg2, %arg1 : i32, i32
  }
  func.func @transform_2(%arg0: i32, %arg1: i32, %arg2: i32) -> (i32, i32) {
    %c0_i32 = arith.constant 0 : i32
    %c0_i32_0 = arith.constant 0 : i32
    return %c0_i32, %arg1 : i32, i32
  }
  func.func @transform_3(%arg0: i32, %arg1: i32, %arg2: i32) -> (i32, i32) {
    %c0_i32 = arith.constant 0 : i32
    %c0_i32_0 = arith.constant 0 : i32
    return %c0_i32, %arg1 : i32, i32
  }
  func.func @transform_4(%arg0: i32, %arg1: i32, %arg2: i32) -> (i32, i32) {
    %c0_i32 = arith.constant 0 : i32
    return %arg0, %arg1 : i32, i32
  }
}

module attributes {stable_mosaic.version = 11 : i64} {
  func.func @_conv3x3_kernel(%arg0: i32, %arg1: i32, %arg2: memref<1x18x18x128xbf16, #tpu.memory_space<vmem>>, %arg3: memref<3x3x128x128xbf16, #tpu.memory_space<vmem>>, %arg4: memref<1x128xf32, #tpu.memory_space<vmem>>, %arg5: memref<1x128xf32, #tpu.memory_space<vmem>>, %arg6: memref<1x16x16x128xbf16, #tpu.memory_space<vmem>>, %arg7: memref<256x128xf32, #tpu.memory_space<vmem>>) attributes {dimension_semantics = [#tpu.dimension_semantics<parallel>, #tpu.dimension_semantics<parallel>], iteration_bounds = array<i64: 2, 1>, scalar_prefetch = 0 : i64, scratch_operands = 1 : i64, tpu.core_type = #tpu.core_type<tc>, window_params = [{transform_indices = @transform_0, window_bounds = array<i64: 1, 18, 18, 128>}, {transform_indices = @transform_1, window_bounds = array<i64: 3, 3, 128, 128>}, {transform_indices = @transform_2, window_bounds = array<i64: 1, 128>}, {transform_indices = @transform_3, window_bounds = array<i64: 1, 128>}, {transform_indices = @transform_4, window_bounds = array<i64: 1, 16, 16, 128>}]} {
    %c0 = arith.constant 0 : index
    %c0_0 = arith.constant 0 : index
    %c0_1 = arith.constant 0 : index
    %c0_2 = arith.constant 0 : index
    %0 = vector.load %arg2[%c0, %c0_0, %c0_1, %c0_2] : memref<1x18x18x128xbf16, #tpu.memory_space<vmem>>, vector<1x16x16x128xbf16>
    %1 = vector.shape_cast %0 : vector<1x16x16x128xbf16> to vector<16x16x128xbf16>
    %2 = vector.shape_cast %1 : vector<16x16x128xbf16> to vector<256x128xbf16>
    %c0_3 = arith.constant 0 : index
    %c0_4 = arith.constant 0 : index
    %c0_5 = arith.constant 0 : index
    %c0_6 = arith.constant 0 : index
    %3 = vector.load %arg3[%c0_3, %c0_4, %c0_5, %c0_6] : memref<3x3x128x128xbf16, #tpu.memory_space<vmem>>, vector<1x1x128x128xbf16>
    %4 = vector.shape_cast %3 : vector<1x1x128x128xbf16> to vector<128x128xbf16>
    %cst = arith.constant dense<0.000000e+00> : vector<256x128xf32>
    %5 = tpu.matmul %2, %4, %cst {dimension_numbers = #tpu.dot_dimension_numbers<[1], [0], [0], [1], [0, 0, 1, 1], [], []>} : vector<256x128xbf16>, vector<128x128xbf16>, vector<256x128xf32> -> vector<256x128xf32>
    %c0_7 = arith.constant 0 : index
    %c0_8 = arith.constant 0 : index
    %6 = vector.load %arg7[%c0_7, %c0_8] : memref<256x128xf32, #tpu.memory_space<vmem>>, vector<256x128xf32>
    tpu.vector_store %arg7[%c0_7, %c0_8], %5 {strides = array<i32>} : memref<256x128xf32, #tpu.memory_space<vmem>>, vector<256x128xf32>,
    %c0_9 = arith.constant 0 : index
    %c0_10 = arith.constant 0 : index
    %c1 = arith.constant 1 : index
    %c0_11 = arith.constant 0 : index
    %7 = vector.load %arg2[%c0_9, %c0_10, %c1, %c0_11] : memref<1x18x18x128xbf16, #tpu.memory_space<vmem>>, vector<1x16x16x128xbf16>
    %8 = vector.shape_cast %7 : vector<1x16x16x128xbf16> to vector<16x16x128xbf16>
    %9 = vector.shape_cast %8 : vector<16x16x128xbf16> to vector<256x128xbf16>
    %c0_12 = arith.constant 0 : index
    %c1_13 = arith.constant 1 : index
    %c0_14 = arith.constant 0 : index
    %c0_15 = arith.constant 0 : index
    %10 = vector.load %arg3[%c0_12, %c1_13, %c0_14, %c0_15] : memref<3x3x128x128xbf16, #tpu.memory_space<vmem>>, vector<1x1x128x128xbf16>
    %11 = vector.shape_cast %10 : vector<1x1x128x128xbf16> to vector<128x128xbf16>
    %cst_16 = arith.constant dense<0.000000e+00> : vector<256x128xf32>
    %12 = tpu.matmul %9, %11, %cst_16 {dimension_numbers = #tpu.dot_dimension_numbers<[1], [0], [0], [1], [0, 0, 1, 1], [], []>} : vector<256x128xbf16>, vector<128x128xbf16>, vector<256x128xf32> -> vector<256x128xf32>
    %c0_17 = arith.constant 0 : index
    %c0_18 = arith.constant 0 : index
    %13 = vector.load %arg7[%c0_17, %c0_18] : memref<256x128xf32, #tpu.memory_space<vmem>>, vector<256x128xf32>
    %14 = arith.addf %13, %12 : vector<256x128xf32>
    %c0_19 = arith.constant 0 : index
    %c0_20 = arith.constant 0 : index
    %15 = vector.load %arg7[%c0_19, %c0_20] : memref<256x128xf32, #tpu.memory_space<vmem>>, vector<256x128xf32>
    tpu.vector_store %arg7[%c0_19, %c0_20], %14 {strides = array<i32>} : memref<256x128xf32, #tpu.memory_space<vmem>>, vector<256x128xf32>,
    %c0_21 = arith.constant 0 : index
    %c0_22 = arith.constant 0 : index
    %c2 = arith.constant 2 : index
    %c0_23 = arith.constant 0 : index
    %16 = vector.load %arg2[%c0_21, %c0_22, %c2, %c0_23] : memref<1x18x18x128xbf16, #tpu.memory_space<vmem>>, vector<1x16x16x128xbf16>
    %17 = vector.shape_cast %16 : vector<1x16x16x128xbf16> to vector<16x16x128xbf16>
    %18 = vector.shape_cast %17 : vector<16x16x128xbf16> to vector<256x128xbf16>
    %c0_24 = arith.constant 0 : index
    %c2_25 = arith.constant 2 : index
    %c0_26 = arith.constant 0 : index
    %c0_27 = arith.constant 0 : index
    %19 = vector.load %arg3[%c0_24, %c2_25, %c0_26, %c0_27] : memref<3x3x128x128xbf16, #tpu.memory_space<vmem>>, vector<1x1x128x128xbf16>
    %20 = vector.shape_cast %19 : vector<1x1x128x128xbf16> to vector<128x128xbf16>
    %cst_28 = arith.constant dense<0.000000e+00> : vector<256x128xf32>
    %21 = tpu.matmul %18, %20, %cst_28 {dimension_numbers = #tpu.dot_dimension_numbers<[1], [0], [0], [1], [0, 0, 1, 1], [], []>} : vector<256x128xbf16>, vector<128x128xbf16>, vector<256x128xf32> -> vector<256x128xf32>
    %c0_29 = arith.constant 0 : index
    %c0_30 = arith.constant 0 : index
    %22 = vector.load %arg7[%c0_29, %c0_30] : memref<256x128xf32, #tpu.memory_space<vmem>>, vector<256x128xf32>
    %23 = arith.addf %22, %21 : vector<256x128xf32>
    %c0_31 = arith.constant 0 : index
    %c0_32 = arith.constant 0 : index
    %24 = vector.load %arg7[%c0_31, %c0_32] : memref<256x128xf32, #tpu.memory_space<vmem>>, vector<256x128xf32>
    tpu.vector_store %arg7[%c0_31, %c0_32], %23 {strides = array<i32>} : memref<256x128xf32, #tpu.memory_space<vmem>>, vector<256x128xf32>,
    %c0_33 = arith.constant 0 : index
    %c1_34 = arith.constant 1 : index
    %c0_35 = arith.constant 0 : index
    %c0_36 = arith.constant 0 : index
    %25 = vector.load %arg2[%c0_33, %c1_34, %c0_35, %c0_36] : memref<1x18x18x128xbf16, #tpu.memory_space<vmem>>, vector<1x16x16x128xbf16>
    %26 = vector.shape_cast %25 : vector<1x16x16x128xbf16> to vector<16x16x128xbf16>
    %27 = vector.shape_cast %26 : vector<16x16x128xbf16> to vector<256x128xbf16>
    %c1_37 = arith.constant 1 : index
    %c0_38 = arith.constant 0 : index
    %c0_39 = arith.constant 0 : index
    %c0_40 = arith.constant 0 : index
    %28 = vector.load %arg3[%c1_37, %c0_38, %c0_39, %c0_40] : memref<3x3x128x128xbf16, #tpu.memory_space<vmem>>, vector<1x1x128x128xbf16>
    %29 = vector.shape_cast %28 : vector<1x1x128x128xbf16> to vector<128x128xbf16>
    %cst_41 = arith.constant dense<0.000000e+00> : vector<256x128xf32>
    %30 = tpu.matmul %27, %29, %cst_41 {dimension_numbers = #tpu.dot_dimension_numbers<[1], [0], [0], [1], [0, 0, 1, 1], [], []>} : vector<256x128xbf16>, vector<128x128xbf16>, vector<256x128xf32> -> vector<256x128xf32>
    %c0_42 = arith.constant 0 : index
    %c0_43 = arith.constant 0 : index
    %31 = vector.load %arg7[%c0_42, %c0_43] : memref<256x128xf32, #tpu.memory_space<vmem>>, vector<256x128xf32>
    %32 = arith.addf %31, %30 : vector<256x128xf32>
    %c0_44 = arith.constant 0 : index
    %c0_45 = arith.constant 0 : index
    %33 = vector.load %arg7[%c0_44, %c0_45] : memref<256x128xf32, #tpu.memory_space<vmem>>, vector<256x128xf32>
    tpu.vector_store %arg7[%c0_44, %c0_45], %32 {strides = array<i32>} : memref<256x128xf32, #tpu.memory_space<vmem>>, vector<256x128xf32>,
    %c0_46 = arith.constant 0 : index
    %c1_47 = arith.constant 1 : index
    %c1_48 = arith.constant 1 : index
    %c0_49 = arith.constant 0 : index
    %34 = vector.load %arg2[%c0_46, %c1_47, %c1_48, %c0_49] : memref<1x18x18x128xbf16, #tpu.memory_space<vmem>>, vector<1x16x16x128xbf16>
    %35 = vector.shape_cast %34 : vector<1x16x16x128xbf16> to vector<16x16x128xbf16>
    %36 = vector.shape_cast %35 : vector<16x16x128xbf16> to vector<256x128xbf16>
    %c1_50 = arith.constant 1 : index
    %c1_51 = arith.constant 1 : index
    %c0_52 = arith.constant 0 : index
    %c0_53 = arith.constant 0 : index
    %37 = vector.load %arg3[%c1_50, %c1_51, %c0_52, %c0_53] : memref<3x3x128x128xbf16, #tpu.memory_space<vmem>>, vector<1x1x128x128xbf16>
    %38 = vector.shape_cast %37 : vector<1x1x128x128xbf16> to vector<128x128xbf16>
    %cst_54 = arith.constant dense<0.000000e+00> : vector<256x128xf32>
    %39 = tpu.matmul %36, %38, %cst_54 {dimension_numbers = #tpu.dot_dimension_numbers<[1], [0], [0], [1], [0, 0, 1, 1], [], []>} : vector<256x128xbf16>, vector<128x128xbf16>, vector<256x128xf32> -> vector<256x128xf32>
    %c0_55 = arith.constant 0 : index
    %c0_56 = arith.constant 0 : index
    %40 = vector.load %arg7[%c0_55, %c0_56] : memref<256x128xf32, #tpu.memory_space<vmem>>, vector<256x128xf32>
    %41 = arith.addf %40, %39 : vector<256x128xf32>
    %c0_57 = arith.constant 0 : index
    %c0_58 = arith.constant 0 : index
    %42 = vector.load %arg7[%c0_57, %c0_58] : memref<256x128xf32, #tpu.memory_space<vmem>>, vector<256x128xf32>
    tpu.vector_store %arg7[%c0_57, %c0_58], %41 {strides = array<i32>} : memref<256x128xf32, #tpu.memory_space<vmem>>, vector<256x128xf32>,
    %c0_59 = arith.constant 0 : index
    %c1_60 = arith.constant 1 : index
    %c2_61 = arith.constant 2 : index
    %c0_62 = arith.constant 0 : index
    %43 = vector.load %arg2[%c0_59, %c1_60, %c2_61, %c0_62] : memref<1x18x18x128xbf16, #tpu.memory_space<vmem>>, vector<1x16x16x128xbf16>
    %44 = vector.shape_cast %43 : vector<1x16x16x128xbf16> to vector<16x16x128xbf16>
    %45 = vector.shape_cast %44 : vector<16x16x128xbf16> to vector<256x128xbf16>
    %c1_63 = arith.constant 1 : index
    %c2_64 = arith.constant 2 : index
    %c0_65 = arith.constant 0 : index
    %c0_66 = arith.constant 0 : index
    %46 = vector.load %arg3[%c1_63, %c2_64, %c0_65, %c0_66] : memref<3x3x128x128xbf16, #tpu.memory_space<vmem>>, vector<1x1x128x128xbf16>
    %47 = vector.shape_cast %46 : vector<1x1x128x128xbf16> to vector<128x128xbf16>
    %cst_67 = arith.constant dense<0.000000e+00> : vector<256x128xf32>
    %48 = tpu.matmul %45, %47, %cst_67 {dimension_numbers = #tpu.dot_dimension_numbers<[1], [0], [0], [1], [0, 0, 1, 1], [], []>} : vector<256x128xbf16>, vector<128x128xbf16>, vector<256x128xf32> -> vector<256x128xf32>
    %c0_68 = arith.constant 0 : index
    %c0_69 = arith.constant 0 : index
    %49 = vector.load %arg7[%c0_68, %c0_69] : memref<256x128xf32, #tpu.memory_space<vmem>>, vector<256x128xf32>
    %50 = arith.addf %49, %48 : vector<256x128xf32>
    %c0_70 = arith.constant 0 : index
    %c0_71 = arith.constant 0 : index
    %51 = vector.load %arg7[%c0_70, %c0_71] : memref<256x128xf32, #tpu.memory_space<vmem>>, vector<256x128xf32>
    tpu.vector_store %arg7[%c0_70, %c0_71], %50 {strides = array<i32>} : memref<256x128xf32, #tpu.memory_space<vmem>>, vector<256x128xf32>,
    %c0_72 = arith.constant 0 : index
    %c2_73 = arith.constant 2 : index
    %c0_74 = arith.constant 0 : index
    %c0_75 = arith.constant 0 : index
    %52 = vector.load %arg2[%c0_72, %c2_73, %c0_74, %c0_75] : memref<1x18x18x128xbf16, #tpu.memory_space<vmem>>, vector<1x16x16x128xbf16>
    %53 = vector.shape_cast %52 : vector<1x16x16x128xbf16> to vector<16x16x128xbf16>
    %54 = vector.shape_cast %53 : vector<16x16x128xbf16> to vector<256x128xbf16>
    %c2_76 = arith.constant 2 : index
    %c0_77 = arith.constant 0 : index
    %c0_78 = arith.constant 0 : index
    %c0_79 = arith.constant 0 : index
    %55 = vector.load %arg3[%c2_76, %c0_77, %c0_78, %c0_79] : memref<3x3x128x128xbf16, #tpu.memory_space<vmem>>, vector<1x1x128x128xbf16>
    %56 = vector.shape_cast %55 : vector<1x1x128x128xbf16> to vector<128x128xbf16>
    %cst_80 = arith.constant dense<0.000000e+00> : vector<256x128xf32>
    %57 = tpu.matmul %54, %56, %cst_80 {dimension_numbers = #tpu.dot_dimension_numbers<[1], [0], [0], [1], [0, 0, 1, 1], [], []>} : vector<256x128xbf16>, vector<128x128xbf16>, vector<256x128xf32> -> vector<256x128xf32>
    %c0_81 = arith.constant 0 : index
    %c0_82 = arith.constant 0 : index
    %58 = vector.load %arg7[%c0_81, %c0_82] : memref<256x128xf32, #tpu.memory_space<vmem>>, vector<256x128xf32>
    %59 = arith.addf %58, %57 : vector<256x128xf32>
    %c0_83 = arith.constant 0 : index
    %c0_84 = arith.constant 0 : index
    %60 = vector.load %arg7[%c0_83, %c0_84] : memref<256x128xf32, #tpu.memory_space<vmem>>, vector<256x128xf32>
    tpu.vector_store %arg7[%c0_83, %c0_84], %59 {strides = array<i32>} : memref<256x128xf32, #tpu.memory_space<vmem>>, vector<256x128xf32>,
    %c0_85 = arith.constant 0 : index
    %c2_86 = arith.constant 2 : index
    %c1_87 = arith.constant 1 : index
    %c0_88 = arith.constant 0 : index
    %61 = vector.load %arg2[%c0_85, %c2_86, %c1_87, %c0_88] : memref<1x18x18x128xbf16, #tpu.memory_space<vmem>>, vector<1x16x16x128xbf16>
    %62 = vector.shape_cast %61 : vector<1x16x16x128xbf16> to vector<16x16x128xbf16>
    %63 = vector.shape_cast %62 : vector<16x16x128xbf16> to vector<256x128xbf16>
    %c2_89 = arith.constant 2 : index
    %c1_90 = arith.constant 1 : index
    %c0_91 = arith.constant 0 : index
    %c0_92 = arith.constant 0 : index
    %64 = vector.load %arg3[%c2_89, %c1_90, %c0_91, %c0_92] : memref<3x3x128x128xbf16, #tpu.memory_space<vmem>>, vector<1x1x128x128xbf16>
    %65 = vector.shape_cast %64 : vector<1x1x128x128xbf16> to vector<128x128xbf16>
    %cst_93 = arith.constant dense<0.000000e+00> : vector<256x128xf32>
    %66 = tpu.matmul %63, %65, %cst_93 {dimension_numbers = #tpu.dot_dimension_numbers<[1], [0], [0], [1], [0, 0, 1, 1], [], []>} : vector<256x128xbf16>, vector<128x128xbf16>, vector<256x128xf32> -> vector<256x128xf32>
    %c0_94 = arith.constant 0 : index
    %c0_95 = arith.constant 0 : index
    %67 = vector.load %arg7[%c0_94, %c0_95] : memref<256x128xf32, #tpu.memory_space<vmem>>, vector<256x128xf32>
    %68 = arith.addf %67, %66 : vector<256x128xf32>
    %c0_96 = arith.constant 0 : index
    %c0_97 = arith.constant 0 : index
    %69 = vector.load %arg7[%c0_96, %c0_97] : memref<256x128xf32, #tpu.memory_space<vmem>>, vector<256x128xf32>
    tpu.vector_store %arg7[%c0_96, %c0_97], %68 {strides = array<i32>} : memref<256x128xf32, #tpu.memory_space<vmem>>, vector<256x128xf32>,
    %c0_98 = arith.constant 0 : index
    %c2_99 = arith.constant 2 : index
    %c2_100 = arith.constant 2 : index
    %c0_101 = arith.constant 0 : index
    %70 = vector.load %arg2[%c0_98, %c2_99, %c2_100, %c0_101] : memref<1x18x18x128xbf16, #tpu.memory_space<vmem>>, vector<1x16x16x128xbf16>
    %71 = vector.shape_cast %70 : vector<1x16x16x128xbf16> to vector<16x16x128xbf16>
    %72 = vector.shape_cast %71 : vector<16x16x128xbf16> to vector<256x128xbf16>
    %c2_102 = arith.constant 2 : index
    %c2_103 = arith.constant 2 : index
    %c0_104 = arith.constant 0 : index
    %c0_105 = arith.constant 0 : index
    %73 = vector.load %arg3[%c2_102, %c2_103, %c0_104, %c0_105] : memref<3x3x128x128xbf16, #tpu.memory_space<vmem>>, vector<1x1x128x128xbf16>
    %74 = vector.shape_cast %73 : vector<1x1x128x128xbf16> to vector<128x128xbf16>
    %cst_106 = arith.constant dense<0.000000e+00> : vector<256x128xf32>
    %75 = tpu.matmul %72, %74, %cst_106 {dimension_numbers = #tpu.dot_dimension_numbers<[1], [0], [0], [1], [0, 0, 1, 1], [], []>} : vector<256x128xbf16>, vector<128x128xbf16>, vector<256x128xf32> -> vector<256x128xf32>
    %c0_107 = arith.constant 0 : index
    %c0_108 = arith.constant 0 : index
    %76 = vector.load %arg7[%c0_107, %c0_108] : memref<256x128xf32, #tpu.memory_space<vmem>>, vector<256x128xf32>
    %77 = arith.addf %76, %75 : vector<256x128xf32>
    %c0_109 = arith.constant 0 : index
    %c0_110 = arith.constant 0 : index
    %78 = vector.load %arg7[%c0_109, %c0_110] : memref<256x128xf32, #tpu.memory_space<vmem>>, vector<256x128xf32>
    tpu.vector_store %arg7[%c0_109, %c0_110], %77 {strides = array<i32>} : memref<256x128xf32, #tpu.memory_space<vmem>>, vector<256x128xf32>,
    %c0_111 = arith.constant 0 : index
    %c0_112 = arith.constant 0 : index
    %79 = vector.load %arg7[%c0_111, %c0_112] : memref<256x128xf32, #tpu.memory_space<vmem>>, vector<256x128xf32>
    %c0_113 = arith.constant 0 : index
    %c0_114 = arith.constant 0 : index
    %80 = vector.load %arg4[%c0_113, %c0_114] : memref<1x128xf32, #tpu.memory_space<vmem>>, vector<1x128xf32>
    %81 = vector.broadcast %80 : vector<1x128xf32> to vector<256x128xf32>
    %82 = arith.mulf %79, %81 : vector<256x128xf32>
    %c0_115 = arith.constant 0 : index
    %c0_116 = arith.constant 0 : index
    %83 = vector.load %arg5[%c0_115, %c0_116] : memref<1x128xf32, #tpu.memory_space<vmem>>, vector<1x128xf32>
    %84 = vector.broadcast %83 : vector<1x128xf32> to vector<256x128xf32>
    %85 = arith.addf %82, %84 : vector<256x128xf32>
    %cst_117 = arith.constant 0.000000e+00 : f32
    %86 = vector.broadcast %cst_117 : f32 to vector<256x128xf32>
    %87 = arith.maximumf %85, %86 : vector<256x128xf32>
    %88 = vector.shape_cast %87 : vector<256x128xf32> to vector<1x16x16x128xf32>
    %89 = arith.truncf %88 : vector<1x16x16x128xf32> to vector<1x16x16x128xbf16>
    %c0_118 = arith.constant 0 : index
    %c0_119 = arith.constant 0 : index
    %c0_120 = arith.constant 0 : index
    %c0_121 = arith.constant 0 : index
    %90 = vector.load %arg6[%c0_118, %c0_119, %c0_120, %c0_121] : memref<1x16x16x128xbf16, #tpu.memory_space<vmem>>, vector<1x16x16x128xbf16>
    tpu.vector_store %arg6[%c0_118, %c0_119, %c0_120, %c0_121], %89 {strides = array<i32>} : memref<1x16x16x128xbf16, #tpu.memory_space<vmem>>, vector<1x16x16x128xbf16>,
    return
  }
  func.func @transform_0(%arg0: i32, %arg1: i32) -> (i32, i32, i32, i32) {
    %c0_i32 = arith.constant 0 : i32
    %c0_i32_0 = arith.constant 0 : i32
    %c0_i32_1 = arith.constant 0 : i32
    %c0_i32_2 = arith.constant 0 : i32
    return %arg0, %c0_i32, %c0_i32_0, %c0_i32_1 : i32, i32, i32, i32
  }
  func.func @transform_1(%arg0: i32, %arg1: i32) -> (i32, i32, i32, i32) {
    %c0_i32 = arith.constant 0 : i32
    %c0_i32_0 = arith.constant 0 : i32
    %c0_i32_1 = arith.constant 0 : i32
    %c0_i32_2 = arith.constant 0 : i32
    return %c0_i32, %c0_i32_0, %c0_i32_1, %arg1 : i32, i32, i32, i32
  }
  func.func @transform_2(%arg0: i32, %arg1: i32) -> (i32, i32) {
    %c0_i32 = arith.constant 0 : i32
    %c0_i32_0 = arith.constant 0 : i32
    return %c0_i32, %arg1 : i32, i32
  }
  func.func @transform_3(%arg0: i32, %arg1: i32) -> (i32, i32) {
    %c0_i32 = arith.constant 0 : i32
    %c0_i32_0 = arith.constant 0 : i32
    return %c0_i32, %arg1 : i32, i32
  }
  func.func @transform_4(%arg0: i32, %arg1: i32) -> (i32, i32, i32, i32) {
    %c0_i32 = arith.constant 0 : i32
    %c0_i32_0 = arith.constant 0 : i32
    %c0_i32_1 = arith.constant 0 : i32
    return %arg0, %c0_i32, %c0_i32_0, %arg1 : i32, i32, i32, i32
  }
}

module attributes {stable_mosaic.version = 11 : i64} {
  func.func @_matmul_kernel(%arg0: i32, %arg1: i32, %arg2: i32, %arg3: memref<64x1152xbf16, #tpu.memory_space<vmem>>, %arg4: memref<1152x128xbf16, #tpu.memory_space<vmem>>, %arg5: memref<1x128xf32, #tpu.memory_space<vmem>>, %arg6: memref<1x128xf32, #tpu.memory_space<vmem>>, %arg7: memref<64x128xbf16, #tpu.memory_space<vmem>>, %arg8: memref<64x128xf32, #tpu.memory_space<vmem>>) attributes {dimension_semantics = [#tpu.dimension_semantics<parallel>, #tpu.dimension_semantics<parallel>, #tpu.dimension_semantics<arbitrary>], iteration_bounds = array<i64: 2, 1, 1>, scalar_prefetch = 0 : i64, scratch_operands = 1 : i64, tpu.core_type = #tpu.core_type<tc>, window_params = [{transform_indices = @transform_0, window_bounds = array<i64: 64, 1152>}, {transform_indices = @transform_1, window_bounds = array<i64: 1152, 128>}, {transform_indices = @transform_2, window_bounds = array<i64: 1, 128>}, {transform_indices = @transform_3, window_bounds = array<i64: 1, 128>}, {transform_indices = @transform_4, window_bounds = array<i64: 64, 128>}]} {
    %c0_i32 = arith.constant 0 : i32
    %0 = arith.cmpi eq, %arg2, %c0_i32 : i32
    %1 = arith.extui %0 : i1 to i32
    %c0_i32_0 = arith.constant 0 : i32
    %2 = arith.cmpi ne, %1, %c0_i32_0 : i32
    scf.if %2 {
      %cst_10 = arith.constant 0.000000e+00 : f32
      %12 = vector.broadcast %cst_10 : f32 to vector<64x128xf32>
      %c0_11 = arith.constant 0 : index
      %c0_12 = arith.constant 0 : index
      %13 = vector.load %arg8[%c0_11, %c0_12] : memref<64x128xf32, #tpu.memory_space<vmem>>, vector<64x128xf32>
      tpu.vector_store %arg8[%c0_11, %c0_12], %12 {strides = array<i32>} : memref<64x128xf32, #tpu.memory_space<vmem>>, vector<64x128xf32>,
    } else {
    }
    %c0 = arith.constant 0 : index
    %c0_1 = arith.constant 0 : index
    %3 = vector.load %arg8[%c0, %c0_1] : memref<64x128xf32, #tpu.memory_space<vmem>>, vector<64x128xf32>
    %c0_2 = arith.constant 0 : index
    %c0_3 = arith.constant 0 : index
    %4 = vector.load %arg3[%c0_2, %c0_3] : memref<64x1152xbf16, #tpu.memory_space<vmem>>, vector<64x1152xbf16>
    %c0_4 = arith.constant 0 : index
    %c0_5 = arith.constant 0 : index
    %5 = vector.load %arg4[%c0_4, %c0_5] : memref<1152x128xbf16, #tpu.memory_space<vmem>>, vector<1152x128xbf16>
    %cst = arith.constant dense<0.000000e+00> : vector<64x128xf32>
    %6 = tpu.matmul %4, %5, %cst {dimension_numbers = #tpu.dot_dimension_numbers<[1], [0], [0], [1], [0, 0, 1, 1], [], []>} : vector<64x1152xbf16>, vector<1152x128xbf16>, vector<64x128xf32> -> vector<64x128xf32>
    %7 = arith.addf %3, %6 : vector<64x128xf32>
    %c0_6 = arith.constant 0 : index
    %c0_7 = arith.constant 0 : index
    %8 = vector.load %arg8[%c0_6, %c0_7] : memref<64x128xf32, #tpu.memory_space<vmem>>, vector<64x128xf32>
    tpu.vector_store %arg8[%c0_6, %c0_7], %7 {strides = array<i32>} : memref<64x128xf32, #tpu.memory_space<vmem>>, vector<64x128xf32>,
    %c0_i32_8 = arith.constant 0 : i32
    %9 = arith.cmpi eq, %arg2, %c0_i32_8 : i32
    %10 = arith.extui %9 : i1 to i32
    %c0_i32_9 = arith.constant 0 : i32
    %11 = arith.cmpi ne, %10, %c0_i32_9 : i32
    scf.if %11 {
      %c0_10 = arith.constant 0 : index
      %c0_11 = arith.constant 0 : index
      %12 = vector.load %arg8[%c0_10, %c0_11] : memref<64x128xf32, #tpu.memory_space<vmem>>, vector<64x128xf32>
      %c0_12 = arith.constant 0 : index
      %c0_13 = arith.constant 0 : index
      %13 = vector.load %arg5[%c0_12, %c0_13] : memref<1x128xf32, #tpu.memory_space<vmem>>, vector<1x128xf32>
      %14 = vector.broadcast %13 : vector<1x128xf32> to vector<64x128xf32>
      %15 = arith.mulf %12, %14 : vector<64x128xf32>
      %c0_14 = arith.constant 0 : index
      %c0_15 = arith.constant 0 : index
      %16 = vector.load %arg6[%c0_14, %c0_15] : memref<1x128xf32, #tpu.memory_space<vmem>>, vector<1x128xf32>
      %17 = vector.broadcast %16 : vector<1x128xf32> to vector<64x128xf32>
      %18 = arith.addf %15, %17 : vector<64x128xf32>
      %cst_16 = arith.constant 0.000000e+00 : f32
      %19 = vector.broadcast %cst_16 : f32 to vector<64x128xf32>
      %20 = arith.maximumf %18, %19 : vector<64x128xf32>
      %21 = arith.truncf %20 : vector<64x128xf32> to vector<64x128xbf16>
      %c0_17 = arith.constant 0 : index
      %c0_18 = arith.constant 0 : index
      %22 = vector.load %arg7[%c0_17, %c0_18] : memref<64x128xbf16, #tpu.memory_space<vmem>>, vector<64x128xbf16>
      tpu.vector_store %arg7[%c0_17, %c0_18], %21 {strides = array<i32>} : memref<64x128xbf16, #tpu.memory_space<vmem>>, vector<64x128xbf16>,
    } else {
    }
    return
  }
  func.func @transform_0(%arg0: i32, %arg1: i32, %arg2: i32) -> (i32, i32) {
    %c0_i32 = arith.constant 0 : i32
    return %arg0, %arg2 : i32, i32
  }
  func.func @transform_1(%arg0: i32, %arg1: i32, %arg2: i32) -> (i32, i32) {
    %c0_i32 = arith.constant 0 : i32
    return %arg2, %arg1 : i32, i32
  }
  func.func @transform_2(%arg0: i32, %arg1: i32, %arg2: i32) -> (i32, i32) {
    %c0_i32 = arith.constant 0 : i32
    %c0_i32_0 = arith.constant 0 : i32
    return %c0_i32, %arg1 : i32, i32
  }
  func.func @transform_3(%arg0: i32, %arg1: i32, %arg2: i32) -> (i32, i32) {
    %c0_i32 = arith.constant 0 : i32
    %c0_i32_0 = arith.constant 0 : i32
    return %c0_i32, %arg1 : i32, i32
  }
  func.func @transform_4(%arg0: i32, %arg1: i32, %arg2: i32) -> (i32, i32) {
    %c0_i32 = arith.constant 0 : i32
    return %arg0, %arg1 : i32, i32
  }
}

module attributes {stable_mosaic.version = 11 : i64} {
  func.func @_conv3x3_res_kernel(%arg0: i32, %arg1: i32, %arg2: memref<1x10x10x128xbf16, #tpu.memory_space<vmem>>, %arg3: memref<3x3x128x128xbf16, #tpu.memory_space<vmem>>, %arg4: memref<1x128xf32, #tpu.memory_space<vmem>>, %arg5: memref<1x128xf32, #tpu.memory_space<vmem>>, %arg6: memref<1x8x8x128xbf16, #tpu.memory_space<vmem>>, %arg7: memref<1x8x8x128xbf16, #tpu.memory_space<vmem>>, %arg8: memref<64x128xf32, #tpu.memory_space<vmem>>) attributes {dimension_semantics = [#tpu.dimension_semantics<parallel>, #tpu.dimension_semantics<parallel>], iteration_bounds = array<i64: 2, 1>, scalar_prefetch = 0 : i64, scratch_operands = 1 : i64, tpu.core_type = #tpu.core_type<tc>, window_params = [{transform_indices = @transform_0, window_bounds = array<i64: 1, 10, 10, 128>}, {transform_indices = @transform_1, window_bounds = array<i64: 3, 3, 128, 128>}, {transform_indices = @transform_2, window_bounds = array<i64: 1, 128>}, {transform_indices = @transform_3, window_bounds = array<i64: 1, 128>}, {transform_indices = @transform_4, window_bounds = array<i64: 1, 8, 8, 128>}, {transform_indices = @transform_5, window_bounds = array<i64: 1, 8, 8, 128>}]} {
    %c0 = arith.constant 0 : index
    %c0_0 = arith.constant 0 : index
    %c0_1 = arith.constant 0 : index
    %c0_2 = arith.constant 0 : index
    %0 = vector.load %arg2[%c0, %c0_0, %c0_1, %c0_2] : memref<1x10x10x128xbf16, #tpu.memory_space<vmem>>, vector<1x8x8x128xbf16>
    %1 = vector.shape_cast %0 : vector<1x8x8x128xbf16> to vector<8x8x128xbf16>
    %2 = vector.shape_cast %1 : vector<8x8x128xbf16> to vector<64x128xbf16>
    %c0_3 = arith.constant 0 : index
    %c0_4 = arith.constant 0 : index
    %c0_5 = arith.constant 0 : index
    %c0_6 = arith.constant 0 : index
    %3 = vector.load %arg3[%c0_3, %c0_4, %c0_5, %c0_6] : memref<3x3x128x128xbf16, #tpu.memory_space<vmem>>, vector<1x1x128x128xbf16>
    %4 = vector.shape_cast %3 : vector<1x1x128x128xbf16> to vector<128x128xbf16>
    %cst = arith.constant dense<0.000000e+00> : vector<64x128xf32>
    %5 = tpu.matmul %2, %4, %cst {dimension_numbers = #tpu.dot_dimension_numbers<[1], [0], [0], [1], [0, 0, 1, 1], [], []>} : vector<64x128xbf16>, vector<128x128xbf16>, vector<64x128xf32> -> vector<64x128xf32>
    %c0_7 = arith.constant 0 : index
    %c0_8 = arith.constant 0 : index
    %6 = vector.load %arg8[%c0_7, %c0_8] : memref<64x128xf32, #tpu.memory_space<vmem>>, vector<64x128xf32>
    tpu.vector_store %arg8[%c0_7, %c0_8], %5 {strides = array<i32>} : memref<64x128xf32, #tpu.memory_space<vmem>>, vector<64x128xf32>,
    %c0_9 = arith.constant 0 : index
    %c0_10 = arith.constant 0 : index
    %c1 = arith.constant 1 : index
    %c0_11 = arith.constant 0 : index
    %7 = vector.load %arg2[%c0_9, %c0_10, %c1, %c0_11] : memref<1x10x10x128xbf16, #tpu.memory_space<vmem>>, vector<1x8x8x128xbf16>
    %8 = vector.shape_cast %7 : vector<1x8x8x128xbf16> to vector<8x8x128xbf16>
    %9 = vector.shape_cast %8 : vector<8x8x128xbf16> to vector<64x128xbf16>
    %c0_12 = arith.constant 0 : index
    %c1_13 = arith.constant 1 : index
    %c0_14 = arith.constant 0 : index
    %c0_15 = arith.constant 0 : index
    %10 = vector.load %arg3[%c0_12, %c1_13, %c0_14, %c0_15] : memref<3x3x128x128xbf16, #tpu.memory_space<vmem>>, vector<1x1x128x128xbf16>
    %11 = vector.shape_cast %10 : vector<1x1x128x128xbf16> to vector<128x128xbf16>
    %cst_16 = arith.constant dense<0.000000e+00> : vector<64x128xf32>
    %12 = tpu.matmul %9, %11, %cst_16 {dimension_numbers = #tpu.dot_dimension_numbers<[1], [0], [0], [1], [0, 0, 1, 1], [], []>} : vector<64x128xbf16>, vector<128x128xbf16>, vector<64x128xf32> -> vector<64x128xf32>
    %c0_17 = arith.constant 0 : index
    %c0_18 = arith.constant 0 : index
    %13 = vector.load %arg8[%c0_17, %c0_18] : memref<64x128xf32, #tpu.memory_space<vmem>>, vector<64x128xf32>
    %14 = arith.addf %13, %12 : vector<64x128xf32>
    %c0_19 = arith.constant 0 : index
    %c0_20 = arith.constant 0 : index
    %15 = vector.load %arg8[%c0_19, %c0_20] : memref<64x128xf32, #tpu.memory_space<vmem>>, vector<64x128xf32>
    tpu.vector_store %arg8[%c0_19, %c0_20], %14 {strides = array<i32>} : memref<64x128xf32, #tpu.memory_space<vmem>>, vector<64x128xf32>,
    %c0_21 = arith.constant 0 : index
    %c0_22 = arith.constant 0 : index
    %c2 = arith.constant 2 : index
    %c0_23 = arith.constant 0 : index
    %16 = vector.load %arg2[%c0_21, %c0_22, %c2, %c0_23] : memref<1x10x10x128xbf16, #tpu.memory_space<vmem>>, vector<1x8x8x128xbf16>
    %17 = vector.shape_cast %16 : vector<1x8x8x128xbf16> to vector<8x8x128xbf16>
    %18 = vector.shape_cast %17 : vector<8x8x128xbf16> to vector<64x128xbf16>
    %c0_24 = arith.constant 0 : index
    %c2_25 = arith.constant 2 : index
    %c0_26 = arith.constant 0 : index
    %c0_27 = arith.constant 0 : index
    %19 = vector.load %arg3[%c0_24, %c2_25, %c0_26, %c0_27] : memref<3x3x128x128xbf16, #tpu.memory_space<vmem>>, vector<1x1x128x128xbf16>
    %20 = vector.shape_cast %19 : vector<1x1x128x128xbf16> to vector<128x128xbf16>
    %cst_28 = arith.constant dense<0.000000e+00> : vector<64x128xf32>
    %21 = tpu.matmul %18, %20, %cst_28 {dimension_numbers = #tpu.dot_dimension_numbers<[1], [0], [0], [1], [0, 0, 1, 1], [], []>} : vector<64x128xbf16>, vector<128x128xbf16>, vector<64x128xf32> -> vector<64x128xf32>
    %c0_29 = arith.constant 0 : index
    %c0_30 = arith.constant 0 : index
    %22 = vector.load %arg8[%c0_29, %c0_30] : memref<64x128xf32, #tpu.memory_space<vmem>>, vector<64x128xf32>
    %23 = arith.addf %22, %21 : vector<64x128xf32>
    %c0_31 = arith.constant 0 : index
    %c0_32 = arith.constant 0 : index
    %24 = vector.load %arg8[%c0_31, %c0_32] : memref<64x128xf32, #tpu.memory_space<vmem>>, vector<64x128xf32>
    tpu.vector_store %arg8[%c0_31, %c0_32], %23 {strides = array<i32>} : memref<64x128xf32, #tpu.memory_space<vmem>>, vector<64x128xf32>,
    %c0_33 = arith.constant 0 : index
    %c1_34 = arith.constant 1 : index
    %c0_35 = arith.constant 0 : index
    %c0_36 = arith.constant 0 : index
    %25 = vector.load %arg2[%c0_33, %c1_34, %c0_35, %c0_36] : memref<1x10x10x128xbf16, #tpu.memory_space<vmem>>, vector<1x8x8x128xbf16>
    %26 = vector.shape_cast %25 : vector<1x8x8x128xbf16> to vector<8x8x128xbf16>
    %27 = vector.shape_cast %26 : vector<8x8x128xbf16> to vector<64x128xbf16>
    %c1_37 = arith.constant 1 : index
    %c0_38 = arith.constant 0 : index
    %c0_39 = arith.constant 0 : index
    %c0_40 = arith.constant 0 : index
    %28 = vector.load %arg3[%c1_37, %c0_38, %c0_39, %c0_40] : memref<3x3x128x128xbf16, #tpu.memory_space<vmem>>, vector<1x1x128x128xbf16>
    %29 = vector.shape_cast %28 : vector<1x1x128x128xbf16> to vector<128x128xbf16>
    %cst_41 = arith.constant dense<0.000000e+00> : vector<64x128xf32>
    %30 = tpu.matmul %27, %29, %cst_41 {dimension_numbers = #tpu.dot_dimension_numbers<[1], [0], [0], [1], [0, 0, 1, 1], [], []>} : vector<64x128xbf16>, vector<128x128xbf16>, vector<64x128xf32> -> vector<64x128xf32>
    %c0_42 = arith.constant 0 : index
    %c0_43 = arith.constant 0 : index
    %31 = vector.load %arg8[%c0_42, %c0_43] : memref<64x128xf32, #tpu.memory_space<vmem>>, vector<64x128xf32>
    %32 = arith.addf %31, %30 : vector<64x128xf32>
    %c0_44 = arith.constant 0 : index
    %c0_45 = arith.constant 0 : index
    %33 = vector.load %arg8[%c0_44, %c0_45] : memref<64x128xf32, #tpu.memory_space<vmem>>, vector<64x128xf32>
    tpu.vector_store %arg8[%c0_44, %c0_45], %32 {strides = array<i32>} : memref<64x128xf32, #tpu.memory_space<vmem>>, vector<64x128xf32>,
    %c0_46 = arith.constant 0 : index
    %c1_47 = arith.constant 1 : index
    %c1_48 = arith.constant 1 : index
    %c0_49 = arith.constant 0 : index
    %34 = vector.load %arg2[%c0_46, %c1_47, %c1_48, %c0_49] : memref<1x10x10x128xbf16, #tpu.memory_space<vmem>>, vector<1x8x8x128xbf16>
    %35 = vector.shape_cast %34 : vector<1x8x8x128xbf16> to vector<8x8x128xbf16>
    %36 = vector.shape_cast %35 : vector<8x8x128xbf16> to vector<64x128xbf16>
    %c1_50 = arith.constant 1 : index
    %c1_51 = arith.constant 1 : index
    %c0_52 = arith.constant 0 : index
    %c0_53 = arith.constant 0 : index
    %37 = vector.load %arg3[%c1_50, %c1_51, %c0_52, %c0_53] : memref<3x3x128x128xbf16, #tpu.memory_space<vmem>>, vector<1x1x128x128xbf16>
    %38 = vector.shape_cast %37 : vector<1x1x128x128xbf16> to vector<128x128xbf16>
    %cst_54 = arith.constant dense<0.000000e+00> : vector<64x128xf32>
    %39 = tpu.matmul %36, %38, %cst_54 {dimension_numbers = #tpu.dot_dimension_numbers<[1], [0], [0], [1], [0, 0, 1, 1], [], []>} : vector<64x128xbf16>, vector<128x128xbf16>, vector<64x128xf32> -> vector<64x128xf32>
    %c0_55 = arith.constant 0 : index
    %c0_56 = arith.constant 0 : index
    %40 = vector.load %arg8[%c0_55, %c0_56] : memref<64x128xf32, #tpu.memory_space<vmem>>, vector<64x128xf32>
    %41 = arith.addf %40, %39 : vector<64x128xf32>
    %c0_57 = arith.constant 0 : index
    %c0_58 = arith.constant 0 : index
    %42 = vector.load %arg8[%c0_57, %c0_58] : memref<64x128xf32, #tpu.memory_space<vmem>>, vector<64x128xf32>
    tpu.vector_store %arg8[%c0_57, %c0_58], %41 {strides = array<i32>} : memref<64x128xf32, #tpu.memory_space<vmem>>, vector<64x128xf32>,
    %c0_59 = arith.constant 0 : index
    %c1_60 = arith.constant 1 : index
    %c2_61 = arith.constant 2 : index
    %c0_62 = arith.constant 0 : index
    %43 = vector.load %arg2[%c0_59, %c1_60, %c2_61, %c0_62] : memref<1x10x10x128xbf16, #tpu.memory_space<vmem>>, vector<1x8x8x128xbf16>
    %44 = vector.shape_cast %43 : vector<1x8x8x128xbf16> to vector<8x8x128xbf16>
    %45 = vector.shape_cast %44 : vector<8x8x128xbf16> to vector<64x128xbf16>
    %c1_63 = arith.constant 1 : index
    %c2_64 = arith.constant 2 : index
    %c0_65 = arith.constant 0 : index
    %c0_66 = arith.constant 0 : index
    %46 = vector.load %arg3[%c1_63, %c2_64, %c0_65, %c0_66] : memref<3x3x128x128xbf16, #tpu.memory_space<vmem>>, vector<1x1x128x128xbf16>
    %47 = vector.shape_cast %46 : vector<1x1x128x128xbf16> to vector<128x128xbf16>
    %cst_67 = arith.constant dense<0.000000e+00> : vector<64x128xf32>
    %48 = tpu.matmul %45, %47, %cst_67 {dimension_numbers = #tpu.dot_dimension_numbers<[1], [0], [0], [1], [0, 0, 1, 1], [], []>} : vector<64x128xbf16>, vector<128x128xbf16>, vector<64x128xf32> -> vector<64x128xf32>
    %c0_68 = arith.constant 0 : index
    %c0_69 = arith.constant 0 : index
    %49 = vector.load %arg8[%c0_68, %c0_69] : memref<64x128xf32, #tpu.memory_space<vmem>>, vector<64x128xf32>
    %50 = arith.addf %49, %48 : vector<64x128xf32>
    %c0_70 = arith.constant 0 : index
    %c0_71 = arith.constant 0 : index
    %51 = vector.load %arg8[%c0_70, %c0_71] : memref<64x128xf32, #tpu.memory_space<vmem>>, vector<64x128xf32>
    tpu.vector_store %arg8[%c0_70, %c0_71], %50 {strides = array<i32>} : memref<64x128xf32, #tpu.memory_space<vmem>>, vector<64x128xf32>,
    %c0_72 = arith.constant 0 : index
    %c2_73 = arith.constant 2 : index
    %c0_74 = arith.constant 0 : index
    %c0_75 = arith.constant 0 : index
    %52 = vector.load %arg2[%c0_72, %c2_73, %c0_74, %c0_75] : memref<1x10x10x128xbf16, #tpu.memory_space<vmem>>, vector<1x8x8x128xbf16>
    %53 = vector.shape_cast %52 : vector<1x8x8x128xbf16> to vector<8x8x128xbf16>
    %54 = vector.shape_cast %53 : vector<8x8x128xbf16> to vector<64x128xbf16>
    %c2_76 = arith.constant 2 : index
    %c0_77 = arith.constant 0 : index
    %c0_78 = arith.constant 0 : index
    %c0_79 = arith.constant 0 : index
    %55 = vector.load %arg3[%c2_76, %c0_77, %c0_78, %c0_79] : memref<3x3x128x128xbf16, #tpu.memory_space<vmem>>, vector<1x1x128x128xbf16>
    %56 = vector.shape_cast %55 : vector<1x1x128x128xbf16> to vector<128x128xbf16>
    %cst_80 = arith.constant dense<0.000000e+00> : vector<64x128xf32>
    %57 = tpu.matmul %54, %56, %cst_80 {dimension_numbers = #tpu.dot_dimension_numbers<[1], [0], [0], [1], [0, 0, 1, 1], [], []>} : vector<64x128xbf16>, vector<128x128xbf16>, vector<64x128xf32> -> vector<64x128xf32>
    %c0_81 = arith.constant 0 : index
    %c0_82 = arith.constant 0 : index
    %58 = vector.load %arg8[%c0_81, %c0_82] : memref<64x128xf32, #tpu.memory_space<vmem>>, vector<64x128xf32>
    %59 = arith.addf %58, %57 : vector<64x128xf32>
    %c0_83 = arith.constant 0 : index
    %c0_84 = arith.constant 0 : index
    %60 = vector.load %arg8[%c0_83, %c0_84] : memref<64x128xf32, #tpu.memory_space<vmem>>, vector<64x128xf32>
    tpu.vector_store %arg8[%c0_83, %c0_84], %59 {strides = array<i32>} : memref<64x128xf32, #tpu.memory_space<vmem>>, vector<64x128xf32>,
    %c0_85 = arith.constant 0 : index
    %c2_86 = arith.constant 2 : index
    %c1_87 = arith.constant 1 : index
    %c0_88 = arith.constant 0 : index
    %61 = vector.load %arg2[%c0_85, %c2_86, %c1_87, %c0_88] : memref<1x10x10x128xbf16, #tpu.memory_space<vmem>>, vector<1x8x8x128xbf16>
    %62 = vector.shape_cast %61 : vector<1x8x8x128xbf16> to vector<8x8x128xbf16>
    %63 = vector.shape_cast %62 : vector<8x8x128xbf16> to vector<64x128xbf16>
    %c2_89 = arith.constant 2 : index
    %c1_90 = arith.constant 1 : index
    %c0_91 = arith.constant 0 : index
    %c0_92 = arith.constant 0 : index
    %64 = vector.load %arg3[%c2_89, %c1_90, %c0_91, %c0_92] : memref<3x3x128x128xbf16, #tpu.memory_space<vmem>>, vector<1x1x128x128xbf16>
    %65 = vector.shape_cast %64 : vector<1x1x128x128xbf16> to vector<128x128xbf16>
    %cst_93 = arith.constant dense<0.000000e+00> : vector<64x128xf32>
    %66 = tpu.matmul %63, %65, %cst_93 {dimension_numbers = #tpu.dot_dimension_numbers<[1], [0], [0], [1], [0, 0, 1, 1], [], []>} : vector<64x128xbf16>, vector<128x128xbf16>, vector<64x128xf32> -> vector<64x128xf32>
    %c0_94 = arith.constant 0 : index
    %c0_95 = arith.constant 0 : index
    %67 = vector.load %arg8[%c0_94, %c0_95] : memref<64x128xf32, #tpu.memory_space<vmem>>, vector<64x128xf32>
    %68 = arith.addf %67, %66 : vector<64x128xf32>
    %c0_96 = arith.constant 0 : index
    %c0_97 = arith.constant 0 : index
    %69 = vector.load %arg8[%c0_96, %c0_97] : memref<64x128xf32, #tpu.memory_space<vmem>>, vector<64x128xf32>
    tpu.vector_store %arg8[%c0_96, %c0_97], %68 {strides = array<i32>} : memref<64x128xf32, #tpu.memory_space<vmem>>, vector<64x128xf32>,
    %c0_98 = arith.constant 0 : index
    %c2_99 = arith.constant 2 : index
    %c2_100 = arith.constant 2 : index
    %c0_101 = arith.constant 0 : index
    %70 = vector.load %arg2[%c0_98, %c2_99, %c2_100, %c0_101] : memref<1x10x10x128xbf16, #tpu.memory_space<vmem>>, vector<1x8x8x128xbf16>
    %71 = vector.shape_cast %70 : vector<1x8x8x128xbf16> to vector<8x8x128xbf16>
    %72 = vector.shape_cast %71 : vector<8x8x128xbf16> to vector<64x128xbf16>
    %c2_102 = arith.constant 2 : index
    %c2_103 = arith.constant 2 : index
    %c0_104 = arith.constant 0 : index
    %c0_105 = arith.constant 0 : index
    %73 = vector.load %arg3[%c2_102, %c2_103, %c0_104, %c0_105] : memref<3x3x128x128xbf16, #tpu.memory_space<vmem>>, vector<1x1x128x128xbf16>
    %74 = vector.shape_cast %73 : vector<1x1x128x128xbf16> to vector<128x128xbf16>
    %cst_106 = arith.constant dense<0.000000e+00> : vector<64x128xf32>
    %75 = tpu.matmul %72, %74, %cst_106 {dimension_numbers = #tpu.dot_dimension_numbers<[1], [0], [0], [1], [0, 0, 1, 1], [], []>} : vector<64x128xbf16>, vector<128x128xbf16>, vector<64x128xf32> -> vector<64x128xf32>
    %c0_107 = arith.constant 0 : index
    %c0_108 = arith.constant 0 : index
    %76 = vector.load %arg8[%c0_107, %c0_108] : memref<64x128xf32, #tpu.memory_space<vmem>>, vector<64x128xf32>
    %77 = arith.addf %76, %75 : vector<64x128xf32>
    %c0_109 = arith.constant 0 : index
    %c0_110 = arith.constant 0 : index
    %78 = vector.load %arg8[%c0_109, %c0_110] : memref<64x128xf32, #tpu.memory_space<vmem>>, vector<64x128xf32>
    tpu.vector_store %arg8[%c0_109, %c0_110], %77 {strides = array<i32>} : memref<64x128xf32, #tpu.memory_space<vmem>>, vector<64x128xf32>,
    %c0_111 = arith.constant 0 : index
    %c0_112 = arith.constant 0 : index
    %79 = vector.load %arg8[%c0_111, %c0_112] : memref<64x128xf32, #tpu.memory_space<vmem>>, vector<64x128xf32>
    %c0_113 = arith.constant 0 : index
    %c0_114 = arith.constant 0 : index
    %80 = vector.load %arg4[%c0_113, %c0_114] : memref<1x128xf32, #tpu.memory_space<vmem>>, vector<1x128xf32>
    %81 = vector.broadcast %80 : vector<1x128xf32> to vector<64x128xf32>
    %82 = arith.mulf %79, %81 : vector<64x128xf32>
    %c0_115 = arith.constant 0 : index
    %c0_116 = arith.constant 0 : index
    %83 = vector.load %arg5[%c0_115, %c0_116] : memref<1x128xf32, #tpu.memory_space<vmem>>, vector<1x128xf32>
    %84 = vector.broadcast %83 : vector<1x128xf32> to vector<64x128xf32>
    %85 = arith.addf %82, %84 : vector<64x128xf32>
    %c0_117 = arith.constant 0 : index
    %c0_118 = arith.constant 0 : index
    %c0_119 = arith.constant 0 : index
    %c0_120 = arith.constant 0 : index
    %86 = vector.load %arg6[%c0_117, %c0_118, %c0_119, %c0_120] : memref<1x8x8x128xbf16, #tpu.memory_space<vmem>>, vector<1x8x8x128xbf16>
    %87 = vector.shape_cast %86 : vector<1x8x8x128xbf16> to vector<64x128xbf16>
    %88 = arith.extf %87 : vector<64x128xbf16> to vector<64x128xf32>
    %89 = arith.addf %85, %88 : vector<64x128xf32>
    %cst_121 = arith.constant 0.000000e+00 : f32
    %90 = vector.broadcast %cst_121 : f32 to vector<64x128xf32>
    %91 = arith.maximumf %89, %90 : vector<64x128xf32>
    %92 = vector.shape_cast %91 : vector<64x128xf32> to vector<1x8x8x128xf32>
    %93 = arith.truncf %92 : vector<1x8x8x128xf32> to vector<1x8x8x128xbf16>
    %c0_122 = arith.constant 0 : index
    %c0_123 = arith.constant 0 : index
    %c0_124 = arith.constant 0 : index
    %c0_125 = arith.constant 0 : index
    %94 = vector.load %arg7[%c0_122, %c0_123, %c0_124, %c0_125] : memref<1x8x8x128xbf16, #tpu.memory_space<vmem>>, vector<1x8x8x128xbf16>
    tpu.vector_store %arg7[%c0_122, %c0_123, %c0_124, %c0_125], %93 {strides = array<i32>} : memref<1x8x8x128xbf16, #tpu.memory_space<vmem>>, vector<1x8x8x128xbf16>,
    return
  }
  func.func @transform_0(%arg0: i32, %arg1: i32) -> (i32, i32, i32, i32) {
    %c0_i32 = arith.constant 0 : i32
    %c0_i32_0 = arith.constant 0 : i32
    %c0_i32_1 = arith.constant 0 : i32
    %c0_i32_2 = arith.constant 0 : i32
    return %arg0, %c0_i32, %c0_i32_0, %c0_i32_1 : i32, i32, i32, i32
  }
  func.func @transform_1(%arg0: i32, %arg1: i32) -> (i32, i32, i32, i32) {
    %c0_i32 = arith.constant 0 : i32
    %c0_i32_0 = arith.constant 0 : i32
    %c0_i32_1 = arith.constant 0 : i32
    %c0_i32_2 = arith.constant 0 : i32
    return %c0_i32, %c0_i32_0, %c0_i32_1, %arg1 : i32, i32, i32, i32
  }
  func.func @transform_2(%arg0: i32, %arg1: i32) -> (i32, i32) {
    %c0_i32 = arith.constant 0 : i32
    %c0_i32_0 = arith.constant 0 : i32
    return %c0_i32, %arg1 : i32, i32
  }
  func.func @transform_3(%arg0: i32, %arg1: i32) -> (i32, i32) {
    %c0_i32 = arith.constant 0 : i32
    %c0_i32_0 = arith.constant 0 : i32
    return %c0_i32, %arg1 : i32, i32
  }
  func.func @transform_4(%arg0: i32, %arg1: i32) -> (i32, i32, i32, i32) {
    %c0_i32 = arith.constant 0 : i32
    %c0_i32_0 = arith.constant 0 : i32
    %c0_i32_1 = arith.constant 0 : i32
    return %arg0, %c0_i32, %c0_i32_0, %arg1 : i32, i32, i32, i32
  }
  func.func @transform_5(%arg0: i32, %arg1: i32) -> (i32, i32, i32, i32) {
    %c0_i32 = arith.constant 0 : i32
    %c0_i32_0 = arith.constant 0 : i32
    %c0_i32_1 = arith.constant 0 : i32
    return %arg0, %c0_i32, %c0_i32_0, %arg1 : i32, i32, i32, i32
  }
}

</mosaic_0001>

<bundles_post_ra>
// kernel: forward.8
= control target key start
LH: loop header
LB: loop body
LE: loop exit
PB: predicated region body
PF: predicated region fallthrough
CT: control target
= control target key end

     0   :  { %s906_s15 = smov 0   ;;  %s908_s16 = smov 0   ;;  %s982_s0 = inlined_call_operand.vmem [shape: bf16[128,128], index: 0, kind: input, shape index: {}]   ;;  %s983_s1 = inlined_call_operand.vmem [shape: bf16[128,128], index: 1, kind: input, shape index: {}]   ;;  %s984_s2 = inlined_call_operand.vmem [shape: f32[1,128], index: 2, kind: input, shape index: {}]   ;;  %s985_s3 = inlined_call_operand.vmem [shape: f32[1,128], index: 3, kind: input, shape index: {}]   ;;  %s986_s4 = inlined_call_operand.vmem [shape: bf16[128,128], index: 4, kind: output, shape index: {}]  }
   0x1   :  { %s910_s17 = smov 0  }
   0x2 LB: > { %s33_s18 = sadd.s32 1, %s875_s16  ;;  %p709_p0 = scmp.ge.s32.totalorder %s879_s17, 1  ;;  %s879_s17 = sphi %s910_s17, %s14_s17   ;;  %s875_s16 = sphi %s908_s16, %s988_s16   ;;  %s871_s15 = sphi %s906_s15, %s987_s15  }
   0x3   : > { %p35_p1 = scmp.ge.s32.totalorder %s33_s18, 2  ;;  %p221_p2 = scmp.lt.s32.totalorder %s879_s17, 3 }
   0x5   : > { %s990_s18 = smov (%p35_p1, %s33_s18), 0  ;;  %p222_p3 = pnand %p709_p0, %p221_p2 }
   0x6   : > { %v845_v0 = vld [vmem:[%s983_s1] sm:$0xff] (!%p222_p3)   ;;  %s710_s21 = sshll.u32 (!%p222_p3), %s871_s15, 3  ;;  %v846_v1 = vld [vmem:[%s983_s1 + $0x8] sm:$0xff] (!%p222_p3)   ;;  %v847_v2 = vld [vmem:[%s983_s1 + $0x10] sm:$0xff] (!%p222_p3)  }
   0x7   : > { %225 = sbr.rel (%p222_p3) target bundleno = 261 (0x105), region = 36  ;;  %p268_p4 = scmp.lt.s32.totalorder (!%p222_p3), %s710_s21, 15  ;;  %781 = vmatprep.subr.bf16.mxu0 (!%p222_p3), %v845_v0  ;;  %805 = vmatprep.subr.bf16.mxu1 (!%p222_p3), %v845_v0  ;;  %v848_v3 = vld [vmem:[%s983_s1 + $0x18] sm:$0xff] (!%p222_p3)   ;;  %v849_v6 = vld [vmem:[%s983_s1 + $0x20] sm:$0xff] (!%p222_p3)   ;;  %v850_v7 = vld [vmem:[%s983_s1 + $0x28] sm:$0xff] (!%p222_p3)  }
   0x8   : > { %782 = vmatpush3.bf16.msra.mxu0 (!%p222_p3), %v845_v0  ;;  %813 = vmatpush3.bf16.msra.mxu1 (!%p222_p3), %v845_v0  ;;  %v851_v8 = vld [vmem:[%s983_s1 + $0x30] sm:$0xff] (!%p222_p3)   ;;  %v852_v9 = vld [vmem:[%s983_s1 + $0x38] sm:$0xff] (!%p222_p3)   ;;  %v726_v12 = vld [vmem:[%s984_s2] ss:$0 sm:$0xff] (!%p222_p3) }
   0x9   : > { %783 = vmatprep.subr.bf16.mxu0 (!%p222_p3), %v846_v1  ;;  %806 = vmatprep.subr.bf16.mxu1 (!%p222_p3), %v846_v1  ;;  %v727_v19 = vld [vmem:[%s985_s3] ss:$0 sm:$0xff] (!%p222_p3) }
   0xc   : > { %784 = vmatpush3.bf16.msra.mxu0 (!%p222_p3), %v846_v1  ;;  %814 = vmatpush3.bf16.msra.mxu1 (!%p222_p3), %v846_v1 }
   0xd   : > { %785 = vmatprep.subr.bf16.mxu0 (!%p222_p3), %v847_v2  ;;  %807 = vmatprep.subr.bf16.mxu1 (!%p222_p3), %v847_v2 }
   0xe   : > { %s992_s21 = smov (!%p268_p4, %s710_s21), 15 }
   0xf   : > { %s711_s26 = sshll.u32 %s992_s21, 2 }
  0x10   : > { %s941_s29 = scalar_lea.vmem %s982_s0, %s711_s26  ;;  %786 = vmatpush3.bf16.msra.mxu0 %v847_v2  ;;  %815 = vmatpush3.bf16.msra.mxu1 %v847_v2  ;;  %s298_s24 = scalar_lea.vmem %s986_s4, %s711_s26 }
  0x11   : > { %v853_v4 = vld [vmem:[%s941_s29] sm:$0xff]   ;;  %v854_v5 = vld [vmem:[%s941_s29 + $0x10] sm:$0xff]   ;;  %787 = vmatprep.subr.bf16.mxu0 %v848_v3  ;;  %808 = vmatprep.subr.bf16.mxu1 %v848_v3  ;;  %v855_v10 = vld [vmem:[%s941_s29 + $0x8] sm:$0xff]  }
  0x12   : > { %797 = vmatprep.mubr.bf16.mxu0 %v853_v4  ;;  %801 = vmatprep.mubr.bf16.mxu1 %v854_v5  ;;  %v856_v11 = vld [vmem:[%s941_s29 + $0x18] sm:$0xff]  }
  0x14   : > { %788 = vmatpush3.bf16.msra.mxu0 %v848_v3  ;;  %816 = vmatpush3.bf16.msra.mxu1 %v848_v3 }
  0x15   : > { %789 = vmatprep.subr.bf16.mxu0 %v849_v6  ;;  %809 = vmatprep.subr.bf16.mxu1 %v849_v6 }
  0x18   : > { %790 = vmatpush3.bf16.msra.mxu0 %v849_v6  ;;  %817 = vmatpush3.bf16.msra.mxu1 %v849_v6 }
  0x19   : > { %791 = vmatprep.subr.bf16.mxu0 %v850_v7  ;;  %810 = vmatprep.subr.bf16.mxu1 %v850_v7 }
  0x1c   : > { %792 = vmatpush3.bf16.msra.mxu0 %v850_v7  ;;  %818 = vmatpush3.bf16.msra.mxu1 %v850_v7 }
  0x1d   : > { %793 = vmatprep.subr.bf16.mxu0 %v851_v8  ;;  %811 = vmatprep.subr.bf16.mxu1 %v851_v8 }
  0x20   : > { %794 = vmatpush3.bf16.msra.mxu0 %v851_v8  ;;  %819 = vmatpush3.bf16.msra.mxu1 %v851_v8 }
  0x21   : > { %795 = vmatprep.subr.bf16.mxu0 %v852_v9  ;;  %812 = vmatprep.subr.bf16.mxu1 %v852_v9 }
  0x24   : > { %796 = vmatpush3.bf16.msra.mxu0 %v852_v9  ;;  %820 = vmatpush3.bf16.msra.mxu1 %v852_v9 }
  0x27   : > { %798 = vmatmul.mubr.bf16.vlgmr.msra.gmra.mrb[0].mxu0 %v855_v10  ;;  %802 = vmatmul.mubr.bf16.vlgmr.msra.gmra.mrb[0].mxu1 %v856_v11 }
  0xfa   : > { %v799_v13 = vpop.f32.mrb[0].mxu0  ;;  %v803_v14 = vpop.f32.mrb[0].mxu1 }
  0xfb   : > { %v518_v15 = vmul.f32 %v799_v13, %v726_v12  ;;  %v522_v16 = vmul.f32 %v803_v14, %v726_v12  ;;  %v451_v17 = vpop.f32.mrb[1].mxu0  ;;  %v467_v18 = vpop.f32.mrb[1].mxu1 }
  0xfc   : > { %v516_v20 = vmul.f32 %v726_v12, %v451_v17  ;;  %v520_v21 = vmul.f32 %v726_v12, %v467_v18  ;;  %v800_v22 = vpop.f32.mrb[2].mxu0  ;;  %v804_v23 = vpop.f32.mrb[2].mxu1 }
  0xfd   : > { %v519_v24 = vmul.f32 %v800_v22, %v726_v12  ;;  %v523_v25 = vmul.f32 %v804_v23, %v726_v12  ;;  %v454_v26 = vpop.f32.mrb[3].mxu0  ;;  %v470_v27 = vpop.f32.mrb[3].mxu1  ;;  %v533_v30 = vadd.f32 %v727_v19, %v518_v15  ;;  %v537_v31 = vadd.f32 %v727_v19, %v522_v16 }
  0xfe   : > { %v517_v28 = vmul.f32 %v726_v12, %v454_v26  ;;  %v521_v29 = vmul.f32 %v726_v12, %v470_v27  ;;  %v531_v34 = vadd.f32 %v727_v19, %v516_v20  ;;  %v535_v35 = vadd.f32 %v727_v19, %v520_v21 }
  0xff   : > { %v534_v32 = vadd.f32 %v727_v19, %v519_v24  ;;  %v538_v33 = vadd.f32 %v727_v19, %v523_v25 }
 0x100   : > { %v532_v36 = vadd.f32 %v727_v19, %v517_v28  ;;  %v536_v37 = vadd.f32 %v727_v19, %v521_v29 }
 0x101   : > { %v754_v38 = vpack.c.bf16 %v534_v32, %v533_v30  ;;  %v764_v39 = vpack.c.bf16 %v538_v33, %v537_v31 }
 0x102   : > { %v749_v40 = vpack.c.bf16 %v532_v36, %v531_v34  ;;  %v759_v41 = vpack.c.bf16 %v536_v37, %v535_v35 }
 0x103   : > { %766 = vst [vmem:[%s298_s24 + $0x8] sm:$0xff] %v754_v38   ;;  %768 = vst [vmem:[%s298_s24 + $0x18] sm:$0xff] %v764_v39  }
 0x104   : > { %750 = vst [vmem:[%s298_s24] sm:$0xff] %v749_v40   ;;  %767 = vst [vmem:[%s298_s24 + $0x10] sm:$0xff] %v759_v41  }
 0x105 PF: > { %s14_s17 = sadd.s32 1, %s879_s17   ;;  %s987_s15 = smov %s875_s16 }
 0x106   : > { %p11_p5 = scmp.ge.s32.totalorder %s14_s17, 4   ;;  %s988_s16 = smov %s990_s18 }
 0x108   :  { %13 = sbr.rel (!%p11_p5) target bundleno = 2 (0x2), region = 83 }

// kernel: forward.7
= control target key start
LH: loop header
LB: loop body
LE: loop exit
PB: predicated region body
PF: predicated region fallthrough
CT: control target
= control target key end

     0   :  { %s2258_s15 = smov 0   ;;  %s2260_s16 = smov 0   ;;  %s2561_s0 = inlined_call_operand.vmem [shape: bf16[128,1152], index: 0, kind: input, shape index: {}]   ;;  %s2562_s1 = inlined_call_operand.vmem [shape: bf16[1152,128], index: 1, kind: input, shape index: {}]   ;;  %s2563_s2 = inlined_call_operand.vmem [shape: f32[1,128], index: 2, kind: input, shape index: {}]   ;;  %s2564_s3 = inlined_call_operand.vmem [shape: f32[1,128], index: 3, kind: input, shape index: {}]   ;;  %s2565_s4 = inlined_call_operand.vmem [shape: bf16[128,128], index: 4, kind: output, shape index: {}]  }
   0x1   :  { %s2262_s17 = smov 0  }
   0x2 LB: > { %s33_s18 = sadd.s32 1, %s2227_s16  ;;  %p1692_p0 = scmp.ge.s32.totalorder %s2231_s17, 1  ;;  %s2231_s17 = sphi %s2262_s17, %s14_s17   ;;  %s2227_s16 = sphi %s2260_s16, %s2567_s16   ;;  %s2223_s15 = sphi %s2258_s15, %s2566_s15  }
   0x3   : > { %p35_p1 = scmp.ge.s32.totalorder %s33_s18, 2  ;;  %p224_p2 = scmp.lt.s32.totalorder %s2231_s17, 3 }
   0x5   : > { %s2569_s18 = smov (%p35_p1, %s33_s18), 0  ;;  %p225_p3 = pnand %p1692_p0, %p224_p2 }
   0x6   : > { %v2085_v0 = vld [vmem:[%s2562_s1 + $0x40] sm:$0xff] (!%p225_p3)   ;;  %v2089_v4 = vld [vmem:[%s2562_s1 + $0x48] sm:$0xff] (!%p225_p3)   ;;  %v2093_v8 = vld [vmem:[%s2562_s1 + $0x50] sm:$0xff] (!%p225_p3)   ;;  %s1693_s27 = sshll.u32 (!%p225_p3), %s2223_s15, 3 }
   0x7   : > { %228 = sbr.rel (%p225_p3) target bundleno = 332 (0x14c), region = 36  ;;  %v2086_v1 = vld [vmem:[%s2562_s1 + $0xc0] sm:$0xff] (!%p225_p3)   ;;  %1848 = vmatprep.subr.bf16.mxu0 (!%p225_p3), %v2085_v0  ;;  %v2090_v5 = vld [vmem:[%s2562_s1 + $0xc8] sm:$0xff] (!%p225_p3)   ;;  %v2094_v9 = vld [vmem:[%s2562_s1 + $0xd0] sm:$0xff] (!%p225_p3)   ;;  %p274_p4 = scmp.lt.s32.totalorder (!%p225_p3), %s1693_s27, 15 }
   0x8   : > { %v2087_v2 = vld [vmem:[%s2562_s1] sm:$0xff] (!%p225_p3)   ;;  %1888 = vmatprep.subr.bf16.mxu1 (!%p225_p3), %v2086_v1  ;;  %v2091_v6 = vld [vmem:[%s2562_s1 + $0x8] sm:$0xff] (!%p225_p3)   ;;  %v2095_v10 = vld [vmem:[%s2562_s1 + $0x10] sm:$0xff] (!%p225_p3)  }
   0x9   : > { %v2088_v3 = vld [vmem:[%s2562_s1 + $0x80] sm:$0xff] (!%p225_p3)   ;;  %1849 = vmatpush3.bf16.msra.mxu0 (!%p225_p3), %v2087_v2  ;;  %v2092_v7 = vld [vmem:[%s2562_s1 + $0x88] sm:$0xff] (!%p225_p3)   ;;  %v2096_v11 = vld [vmem:[%s2562_s1 + $0x90] sm:$0xff] (!%p225_p3)  }
   0xa   : > { %1889 = vmatpush3.bf16.msra.mxu1 (!%p225_p3), %v2088_v3  ;;  %1850 = vmatprep.subr.bf16.mxu0 (!%p225_p3), %v2089_v4  ;;  %v2097_v12 = vld [vmem:[%s2562_s1 + $0x58] sm:$0xff] (!%p225_p3)   ;;  %v2101_v16 = vld [vmem:[%s2562_s1 + $0x60] sm:$0xff] (!%p225_p3)   ;;  %v2105_v20 = vld [vmem:[%s2562_s1 + $0x68] sm:$0xff] (!%p225_p3)  }
   0xb   : > { %1890 = vmatprep.subr.bf16.mxu1 (!%p225_p3), %v2090_v5  ;;  %v2098_v13 = vld [vmem:[%s2562_s1 + $0xd8] sm:$0xff] (!%p225_p3)   ;;  %v2102_v17 = vld [vmem:[%s2562_s1 + $0xe0] sm:$0xff] (!%p225_p3)   ;;  %v2106_v21 = vld [vmem:[%s2562_s1 + $0xe8] sm:$0xff] (!%p225_p3)  }
   0xc   : > { %v2099_v14 = vld [vmem:[%s2562_s1 + $0x18] sm:$0xff] (!%p225_p3)   ;;  %v2103_v18 = vld [vmem:[%s2562_s1 + $0x20] sm:$0xff] (!%p225_p3)   ;;  %v2107_v22 = vld [vmem:[%s2562_s1 + $0x28] sm:$0xff] (!%p225_p3)  }
   0xd   : > { %1851 = vmatpush3.bf16.msra.mxu0 (!%p225_p3), %v2091_v6  ;;  %v2100_v15 = vld [vmem:[%s2562_s1 + $0x98] sm:$0xff] (!%p225_p3)   ;;  %v2104_v19 = vld [vmem:[%s2562_s1 + $0xa0] sm:$0xff] (!%p225_p3)   ;;  %v2108_v23 = vld [vmem:[%s2562_s1 + $0xa8] sm:$0xff] (!%p225_p3)  }
   0xe   : > { %1891 = vmatpush3.bf16.msra.mxu1 %v2092_v7  ;;  %1852 = vmatprep.subr.bf16.mxu0 %v2093_v8  ;;  %s2571_s27 = smov (!%p274_p4, %s1693_s27), 15  ;;  %v2109_v24 = vld [vmem:[%s2562_s1 + $0x70] sm:$0xff]   ;;  %v2113_v28 = vld [vmem:[%s2562_s1 + $0x78] sm:$0xff]   ;;  %v2123_v36 = vld [vmem:[%s2562_s1 + $0x140] sm:$0xff]  }
   0xf   : > { %1892 = vmatprep.subr.bf16.mxu1 %v2094_v9  ;;  %v2110_v25 = vld [vmem:[%s2562_s1 + $0xf0] sm:$0xff]   ;;  %s2060_s28 = smul.u32 36, %s2571_s27  ;;  %v2114_v29 = vld [vmem:[%s2562_s1 + $0xf8] sm:$0xff]   ;;  %v2124_v37 = vld [vmem:[%s2562_s1 + $0x1c0] sm:$0xff]   ;;  %s1696_s20 = sshll.u32 %s2571_s27, 2 }
  0x10   : > { %v2111_v26 = vld [vmem:[%s2562_s1 + $0x30] sm:$0xff]   ;;  %v2115_v30 = vld [vmem:[%s2562_s1 + $0x38] sm:$0xff]   ;;  %v2125_v38 = vld [vmem:[%s2562_s1 + $0x100] sm:$0xff]   ;;  %s306_s23 = scalar_lea.vmem %s2565_s4, %s1696_s20 }
  0x11   : > { %1853 = vmatpush3.bf16.msra.mxu0 %v2095_v10  ;;  %v2112_v27 = vld [vmem:[%s2562_s1 + $0xb0] sm:$0xff]   ;;  %s2375_s12 = scalar_lea.vmem %s2561_s0, %s2060_s28  ;;  %v2116_v31 = vld [vmem:[%s2562_s1 + $0xb8] sm:$0xff]   ;;  %v2126_v39 = vld [vmem:[%s2562_s1 + $0x180] sm:$0xff]  }
  0x12   : > { %1893 = vmatpush3.bf16.msra.mxu1 %v2096_v11  ;;  %1854 = vmatprep.subr.bf16.mxu0 %v2097_v12  ;;  %v2117_v32 = vld [vmem:[%s2375_s12] ss:$36 sps:$4 sm:$0xff]   ;;  %v2120_v34 = vld [vmem:[%s2375_s12 + $0x8] ss:$36 sps:$4 sm:$0xff]   ;;  %v2133_v45 = vld [vmem:[%s2375_s12 + $0x54] ss:$36 sps:$4 sm:$0xff]  }
  0x13   : > { %1894 = vmatprep.subr.bf16.mxu1 %v2098_v13  ;;  %v2119_v33 = vld [vmem:[%s2375_s12 + $0x4] ss:$36 sps:$4 sm:$0xff]   ;;  %v2122_v35 = vld [vmem:[%s2375_s12 + $0xc] ss:$36 sps:$4 sm:$0xff]   ;;  %v2141_v52 = vld [vmem:[%s2562_s1 + $0x158] sm:$0xff]  }
  0x14   : > { %1161 = vmatprep.mubr.bf16.mxu0 %v2119_v33  ;;  %1226 = vmatprep.mubr.bf16.mxu1 %v2122_v35  ;;  %v2127_v40 = vld [vmem:[%s2562_s1 + $0x148] sm:$0xff]   ;;  %v2136_v47 = vld [vmem:[%s2375_s12 + $0x50] ss:$36 sps:$4 sm:$0xff]   ;;  %v2142_v53 = vld [vmem:[%s2562_s1 + $0x1d8] sm:$0xff]  }
  0x15   : > { %1855 = vmatpush3.bf16.msra.mxu0 %v2099_v14  ;;  %v2128_v41 = vld [vmem:[%s2562_s1 + $0x1c8] sm:$0xff]   ;;  %v2137_v48 = vld [vmem:[%s2562_s1 + $0x150] sm:$0xff]   ;;  %v2143_v54 = vld [vmem:[%s2562_s1 + $0x118] sm:$0xff]  }
  0x16   : > { %1895 = vmatpush3.bf16.msra.mxu1 %v2100_v15  ;;  %1856 = vmatprep.subr.bf16.mxu0 %v2101_v16  ;;  %v2129_v42 = vld [vmem:[%s2562_s1 + $0x108] sm:$0xff]   ;;  %v2138_v49 = vld [vmem:[%s2562_s1 + $0x1d0] sm:$0xff]   ;;  %v2144_v55 = vld [vmem:[%s2562_s1 + $0x198] sm:$0xff]  }
  0x17   : > { %1896 = vmatprep.subr.bf16.mxu1 %v2102_v17  ;;  %v2130_v43 = vld [vmem:[%s2562_s1 + $0x188] sm:$0xff]   ;;  %v2139_v50 = vld [vmem:[%s2562_s1 + $0x110] sm:$0xff]   ;;  %v2147_v57 = vld [vmem:[%s2375_s12 + $0x9c] ss:$36 sps:$4 sm:$0xff]  }
  0x18   : > { %v2131_v44 = vld [vmem:[%s2375_s12 + $0x4c] ss:$36 sps:$4 sm:$0xff]   ;;  %v2145_v56 = vld [vmem:[%s2375_s12 + $0x94] ss:$36 sps:$4 sm:$0xff]   ;;  %v2151_v60 = vld [vmem:[%s2562_s1 + $0x160] sm:$0xff]  }
  0x19   : > { %1857 = vmatpush3.bf16.msra.mxu0 %v2103_v18  ;;  %v2135_v46 = vld [vmem:[%s2375_s12 + $0x48] ss:$36 sps:$4 sm:$0xff]   ;;  %v2140_v51 = vld [vmem:[%s2562_s1 + $0x190] sm:$0xff]   ;;  %v2150_v59 = vld [vmem:[%s2375_s12 + $0x98] ss:$36 sps:$4 sm:$0xff]  }
  0x1a   : > { %1897 = vmatpush3.bf16.msra.mxu1 %v2104_v19  ;;  %1858 = vmatprep.subr.bf16.mxu0 %v2105_v20  ;;  %v2149_v58 = vld [vmem:[%s2375_s12 + $0x90] ss:$36 sps:$4 sm:$0xff]   ;;  %v2152_v61 = vld [vmem:[%s2562_s1 + $0x1e0] sm:$0xff]   ;;  %v2155_v0 = vld [vmem:[%s2562_s1 + $0x168] sm:$0xff]  }
  0x1b   : > { %1898 = vmatprep.subr.bf16.mxu1 %v2106_v21  ;;  %v2153_v62 = vld [vmem:[%s2562_s1 + $0x120] sm:$0xff]   ;;  %v2156_v1 = vld [vmem:[%s2562_s1 + $0x1e8] sm:$0xff]   ;;  %v2163_v6 = vld [vmem:[%s2375_s12 + $0xd8] ss:$36 sps:$4 sm:$0xff]  }
  0x1c   : > { %v2154_v63 = vld [vmem:[%s2562_s1 + $0x1a0] sm:$0xff]   ;;  %v2157_v2 = vld [vmem:[%s2562_s1 + $0x128] sm:$0xff]   ;;  %v2165_v8 = vld [vmem:[%s2562_s1 + $0x170] sm:$0xff]  }
  0x1d   : > { %1859 = vmatpush3.bf16.msra.mxu0 %v2107_v22  ;;  %v2158_v3 = vld [vmem:[%s2562_s1 + $0x1a8] sm:$0xff]   ;;  %v2159_v4 = vld [vmem:[%s2375_s12 + $0xdc] ss:$36 sps:$4 sm:$0xff]   ;;  %v2166_v9 = vld [vmem:[%s2562_s1 + $0x1f0] sm:$0xff]  }
  0x1e   : > { %1899 = vmatpush3.bf16.msra.mxu1 %v2108_v23  ;;  %1860 = vmatprep.subr.bf16.mxu0 %v2109_v24  ;;  %v2161_v5 = vld [vmem:[%s2375_s12 + $0xe4] ss:$36 sps:$4 sm:$0xff]   ;;  %v2167_v10 = vld [vmem:[%s2562_s1 + $0x130] sm:$0xff]   ;;  %v2169_v12 = vld [vmem:[%s2562_s1 + $0x178] sm:$0xff]  }
  0x1f   : > { %1900 = vmatprep.subr.bf16.mxu1 %v2110_v25  ;;  %v2164_v7 = vld [vmem:[%s2375_s12 + $0xe0] ss:$36 sps:$4 sm:$0xff]   ;;  %v2168_v11 = vld [vmem:[%s2562_s1 + $0x1b0] sm:$0xff]   ;;  %v2170_v13 = vld [vmem:[%s2562_s1 + $0x1f8] sm:$0xff]  }
  0x20   : > { %v2171_v14 = vld [vmem:[%s2562_s1 + $0x138] sm:$0xff]   ;;  %v2173_v16 = vld [vmem:[%s2375_s12 + $0x10] ss:$36 sps:$4 sm:$0xff]   ;;  %v2179_v20 = vld [vmem:[%s2562_s1 + $0x200] sm:$0xff]  }
  0x21   : > { %1861 = vmatpush3.bf16.msra.mxu0 %v2111_v26  ;;  %v2172_v15 = vld [vmem:[%s2562_s1 + $0x1b8] sm:$0xff]   ;;  %v2180_v21 = vld [vmem:[%s2562_s1 + $0x208] sm:$0xff]   ;;  %v2186_v25 = vld [vmem:[%s2375_s12 + $0x60] ss:$36 sps:$4 sm:$0xff]  }
  0x22   : > { %1901 = vmatpush3.bf16.msra.mxu1 %v2112_v27  ;;  %1862 = vmatprep.subr.bf16.mxu0 %v2113_v28  ;;  %v2175_v17 = vld [vmem:[%s2375_s12 + $0x14] ss:$36 sps:$4 sm:$0xff]   ;;  %v2178_v19 = vld [vmem:[%s2375_s12 + $0x1c] ss:$36 sps:$4 sm:$0xff]   ;;  %v2183_v23 = vld [vmem:[%s2375_s12 + $0x64] ss:$36 sps:$4 sm:$0xff]  }
  0x23   : > { %1902 = vmatprep.subr.bf16.mxu1 %v2114_v29  ;;  %v2176_v18 = vld [vmem:[%s2375_s12 + $0x18] ss:$36 sps:$4 sm:$0xff]   ;;  %v2187_v26 = vld [vmem:[%s2562_s1 + $0x210] sm:$0xff]   ;;  %v2189_v27 = vld [vmem:[%s2375_s12 + $0xa4] ss:$36 sps:$4 sm:$0xff]  }
  0x24   : > { %v2181_v22 = vld [vmem:[%s2375_s12 + $0x5c] ss:$36 sps:$4 sm:$0xff]   ;;  %v2191_v28 = vld [vmem:[%s2375_s12 + $0xac] ss:$36 sps:$4 sm:$0xff]  }
  0x25   : > { %1863 = vmatpush3.bf16.msra.mxu0 %v2115_v30  ;;  %v2185_v24 = vld [vmem:[%s2375_s12 + $0x58] ss:$36 sps:$4 sm:$0xff]   ;;  %v2193_v30 = vld [vmem:[%s2375_s12 + $0xa0] ss:$36 sps:$4 sm:$0xff]   ;;  %v2197_v33 = vld [vmem:[%s2375_s12 + $0xec] ss:$36 sps:$4 sm:$0xff]  }
  0x26   : > { %1903 = vmatpush3.bf16.msra.mxu1 %v2116_v31  ;;  %1928 = vmatprep.subr.bf16.mxu0 %v2123_v36  ;;  %v2188_v29 = vld [vmem:[%s2562_s1 + $0x218] sm:$0xff]   ;;  %v2194_v31 = vld [vmem:[%s2375_s12 + $0xa8] ss:$36 sps:$4 sm:$0xff]  }
  0x27   : > { %1968 = vmatprep.subr.bf16.mxu1 %v2124_v37  ;;  %v2196_v35 = vld [vmem:[%s2562_s1 + $0x228] sm:$0xff]   ;;  %v2203_v37 = vld [vmem:[%s2562_s1 + $0x230] sm:$0xff]  }
  0x28   : > { %1162 = vmatmul.mubr.bf16.vlgmr.msra.gmra.mrb[0].mxu0 %v2117_v32  ;;  %v2195_v32 = vld [vmem:[%s2562_s1 + $0x220] sm:$0xff]   ;;  %v2201_v36 = vld [vmem:[%s2375_s12 + $0xe8] ss:$36 sps:$4 sm:$0xff]  }
  0x29   : > { %1227 = vmatmul.mubr.bf16.vlgmr.msra.gmra.mrb[0].mxu1 %v2120_v34  ;;  %1929 = vmatpush3.bf16.msra.mxu0 %v2125_v38  ;;  %v2199_v34 = vld [vmem:[%s2375_s12 + $0xf4] ss:$36 sps:$4 sm:$0xff]  }
  0x2a   : > { %1969 = vmatpush3.bf16.msra.mxu1 %v2126_v39  ;;  %1930 = vmatprep.subr.bf16.mxu0 %v2127_v40  ;;  %v2202_v38 = vld [vmem:[%s2375_s12 + $0xf0] ss:$36 sps:$4 sm:$0xff]   ;;  %v2205_v39 = vld [vmem:[%s2375_s12 + $0x20] ss:$36 sps:$4 sm:$0xff]  }
  0x2b   : > { %1970 = vmatprep.subr.bf16.mxu1 %v2128_v41  ;;  %1169 = vmatprep.mubr.bf16.mxu0 %v2131_v44  ;;  %v2206_v40 = vld [vmem:[%s2375_s12 + $0xb0] ss:$36 sps:$4 sm:$0xff]   ;;  %v2204_v41 = vld [vmem:[%s2562_s1 + $0x238] sm:$0xff]  }
  0x2c   : > { %1234 = vmatprep.mubr.bf16.mxu1 %v2133_v45 }
  0x2d   : > { %1931 = vmatpush3.bf16.msra.mxu0 %v2129_v42  ;;  %v2207_v42 = vld [vmem:[%s2375_s12 + $0x68] ss:$36 sps:$4 sm:$0xff]  }
  0x2e   : > { %1971 = vmatpush3.bf16.msra.mxu1 %v2130_v43  ;;  %1932 = vmatprep.subr.bf16.mxu0 %v2137_v48  ;;  %v2208_v43 = vld [vmem:[%s2375_s12 + $0xf8] ss:$36 sps:$4 sm:$0xff]  }
  0x2f   : > { %1972 = vmatprep.subr.bf16.mxu1 %v2138_v49 }
  0x30   : > { %1170 = vmatmul.mubr.bf16.gmra.mrb[4].mxu0 %v2135_v46 }
  0x31   : > { %1235 = vmatmul.mubr.bf16.gmra.mrb[4].mxu1 %v2136_v47  ;;  %1933 = vmatpush3.bf16.msra.mxu0 %v2139_v50 }
  0x32   : > { %1973 = vmatpush3.bf16.msra.mxu1 %v2140_v51  ;;  %1934 = vmatprep.subr.bf16.mxu0 %v2141_v52 }
  0x33   : > { %1974 = vmatprep.subr.bf16.mxu1 %v2142_v53  ;;  %1177 = vmatprep.mubr.bf16.mxu0 %v2145_v56 }
  0x34   : > { %1242 = vmatprep.mubr.bf16.mxu1 %v2147_v57 }
  0x35   : > { %1935 = vmatpush3.bf16.msra.mxu0 %v2143_v54 }
  0x36   : > { %1975 = vmatpush3.bf16.msra.mxu1 %v2144_v55  ;;  %1936 = vmatprep.subr.bf16.mxu0 %v2151_v60 }
  0x37   : > { %1976 = vmatprep.subr.bf16.mxu1 %v2152_v61 }
  0x38   : > { %1178 = vmatmul.mubr.bf16.gmra.mrb[8].mxu0 %v2149_v58 }
  0x39   : > { %1243 = vmatmul.mubr.bf16.gmra.mrb[8].mxu1 %v2150_v59  ;;  %1937 = vmatpush3.bf16.msra.mxu0 %v2153_v62 }
  0x3a   : > { %1977 = vmatpush3.bf16.msra.mxu1 %v2154_v63  ;;  %1938 = vmatprep.subr.bf16.mxu0 %v2155_v0 }
  0x3b   : > { %1978 = vmatprep.subr.bf16.mxu1 %v2156_v1  ;;  %1185 = vmatprep.mubr.bf16.mxu0 %v2159_v4 }
  0x3c   : > { %1250 = vmatprep.mubr.bf16.mxu1 %v2161_v5 }
  0x3d   : > { %1939 = vmatpush3.bf16.msra.mxu0 %v2157_v2 }
  0x3e   : > { %1979 = vmatpush3.bf16.msra.mxu1 %v2158_v3  ;;  %1940 = vmatprep.subr.bf16.mxu0 %v2165_v8 }
  0x3f   : > { %1980 = vmatprep.subr.bf16.mxu1 %v2166_v9 }
  0x40   : > { %1186 = vmatmul.mubr.bf16.gmra.mrb[12].mxu0 %v2163_v6 }
  0x41   : > { %1251 = vmatmul.mubr.bf16.gmra.mrb[12].mxu1 %v2164_v7  ;;  %1941 = vmatpush3.bf16.msra.mxu0 %v2167_v10 }
  0x42   : > { %1981 = vmatpush3.bf16.msra.mxu1 %v2168_v11  ;;  %1942 = vmatprep.subr.bf16.mxu0 %v2169_v12 }
  0x43   : > { %1982 = vmatprep.subr.bf16.mxu1 %v2170_v13  ;;  %1291 = vmatprep.mubr.bf16.mxu0 %v2175_v17 }
  0x44   : > { %1356 = vmatprep.mubr.bf16.mxu1 %v2178_v19 }
  0x45   : > { %1943 = vmatpush3.bf16.msra.mxu0 %v2171_v14 }
  0x46   : > { %1983 = vmatpush3.bf16.msra.mxu1 %v2172_v15  ;;  %2020 = vmatprep.subr.bf16.mxu0 %v2179_v20 }
  0x47   : > { %2044 = vmatprep.subr.bf16.mxu1 %v2179_v20 }
  0x48   : > { %1292 = vmatmul.mubr.bf16.vlgmr.msra.gmra.mrb[16].mxu0 %v2173_v16 }
  0x49   : > { %1357 = vmatmul.mubr.bf16.vlgmr.msra.gmra.mrb[16].mxu1 %v2176_v18  ;;  %2021 = vmatpush3.bf16.msra.mxu0 %v2179_v20 }
  0x4a   : > { %2052 = vmatpush3.bf16.msra.mxu1 %v2179_v20  ;;  %2022 = vmatprep.subr.bf16.mxu0 %v2180_v21 }
  0x4b   : > { %2045 = vmatprep.subr.bf16.mxu1 %v2180_v21  ;;  %1299 = vmatprep.mubr.bf16.mxu0 %v2181_v22 }
  0x4c   : > { %1364 = vmatprep.mubr.bf16.mxu1 %v2183_v23 }
  0x4d   : > { %2023 = vmatpush3.bf16.msra.mxu0 %v2180_v21 }
  0x4e   : > { %2053 = vmatpush3.bf16.msra.mxu1 %v2180_v21  ;;  %2024 = vmatprep.subr.bf16.mxu0 %v2187_v26 }
  0x4f   : > { %2046 = vmatprep.subr.bf16.mxu1 %v2187_v26 }
  0x50   : > { %1300 = vmatmul.mubr.bf16.gmra.mrb[20].mxu0 %v2185_v24 }
  0x51   : > { %1365 = vmatmul.mubr.bf16.gmra.mrb[20].mxu1 %v2186_v25  ;;  %1307 = vmatprep.mubr.bf16.mxu0 %v2189_v27 }
  0x52   : > { %2025 = vmatpush3.bf16.msra.mxu0 %v2187_v26  ;;  %1372 = vmatprep.mubr.bf16.mxu1 %v2191_v28 }
  0x53   : > { %2054 = vmatpush3.bf16.msra.mxu1 %v2187_v26  ;;  %2026 = vmatprep.subr.bf16.mxu0 %v2188_v29 }
  0x54   : > { %2047 = vmatprep.subr.bf16.mxu1 %v2188_v29 }
  0x56   : > { %2027 = vmatpush3.bf16.msra.mxu0 %v2188_v29 }
  0x57   : > { %2055 = vmatpush3.bf16.msra.mxu1 %v2188_v29  ;;  %2028 = vmatprep.subr.bf16.mxu0 %v2195_v32 }
  0x58   : > { %1308 = vmatmul.mubr.bf16.gmra.mrb[24].mxu0 %v2193_v30  ;;  %2048 = vmatprep.subr.bf16.mxu1 %v2195_v32 }
  0x59   : > { %1373 = vmatmul.mubr.bf16.gmra.mrb[24].mxu1 %v2194_v31  ;;  %1315 = vmatprep.mubr.bf16.mxu0 %v2197_v33 }
  0x5a   : > { %2029 = vmatpush3.bf16.msra.mxu0 %v2195_v32  ;;  %1380 = vmatprep.mubr.bf16.mxu1 %v2199_v34 }
  0x5b   : > { %2056 = vmatpush3.bf16.msra.mxu1 %v2195_v32  ;;  %2030 = vmatprep.subr.bf16.mxu0 %v2196_v35 }
  0x5c   : > { %2049 = vmatprep.subr.bf16.mxu1 %v2196_v35 }
  0x5e   : > { %2031 = vmatpush3.bf16.msra.mxu0 %v2196_v35 }
  0x5f   : > { %2057 = vmatpush3.bf16.msra.mxu1 %v2196_v35  ;;  %2032 = vmatprep.subr.bf16.mxu0 %v2203_v37 }
  0x60   : > { %1316 = vmatmul.mubr.bf16.gmra.mrb[28].mxu0 %v2201_v36  ;;  %2050 = vmatprep.subr.bf16.mxu1 %v2203_v37 }
  0x61   : > { %1381 = vmatmul.mubr.bf16.gmra.mrb[28].mxu1 %v2202_v38  ;;  %2036 = vmatprep.mubr.bf16.mxu0 %v2205_v39 }
  0x62   : > { %2033 = vmatpush3.bf16.msra.mxu0 %v2203_v37  ;;  %2040 = vmatprep.mubr.bf16.mxu1 %v2206_v40 }
  0x63   : > { %2058 = vmatpush3.bf16.msra.mxu1 %v2203_v37  ;;  %2034 = vmatprep.subr.bf16.mxu0 %v2204_v41 }
  0x64   : > { %2051 = vmatprep.subr.bf16.mxu1 %v2204_v41 }
  0x66   : > { %2035 = vmatpush3.bf16.msra.mxu0 %v2204_v41 }
  0x67   : > { %2059 = vmatpush3.bf16.msra.mxu1 %v2204_v41 }
  0x69   : > { %2037 = vmatmul.mubr.bf16.vlgmr.msra.gmra.mrb[32].mxu0 %v2207_v42 }
  0x6a   : > { %2041 = vmatmul.mubr.bf16.vlgmr.msra.gmra.mrb[32].mxu1 %v2208_v43 }
  0xfb   : > { %v1864_v44 = vpop.f32.mrb[0].mxu0 }
  0xfc   : > { %v1904_v45 = vpop.f32.mrb[0].mxu1  ;;  %v1865_v46 = vpop.f32.mrb[1].mxu0 }
  0xfd   : > { %v1866_v47 = vadd.f32 %v1865_v46, %v1864_v44  ;;  %v1905_v48 = vpop.f32.mrb[1].mxu1  ;;  %v1867_v49 = vpop.f32.mrb[2].mxu0 }
  0xfe   : > { %v1906_v50 = vadd.f32 %v1905_v48, %v1904_v45  ;;  %v1907_v51 = vpop.f32.mrb[2].mxu1  ;;  %v1868_v52 = vpop.f32.mrb[3].mxu0 }
  0xff   : > { %v1869_v53 = vadd.f32 %v1868_v52, %v1867_v49  ;;  %v1908_v54 = vpop.f32.mrb[3].mxu1 }
 0x100   : > { %v1229_v55 = vadd.f32 %v1906_v50, %v1866_v47  ;;  %v1909_v56 = vadd.f32 %v1908_v54, %v1907_v51 }
 0x102   : > { %v1232_v57 = vadd.f32 %v1909_v56, %v1869_v53 }
 0x103   : > { %v1870_v58 = vpop.f32.mrb[4].mxu0 }
 0x104   : > { %v1910_v59 = vpop.f32.mrb[4].mxu1  ;;  %v1871_v60 = vpop.f32.mrb[5].mxu0 }
 0x105   : > { %v1872_v61 = vadd.f32 %v1871_v60, %v1870_v58  ;;  %v1911_v62 = vpop.f32.mrb[5].mxu1  ;;  %v1873_v63 = vpop.f32.mrb[6].mxu0 }
 0x106   : > { %v1912_v0 = vadd.f32 %v1911_v62, %v1910_v59  ;;  %v1913_v1 = vpop.f32.mrb[6].mxu1  ;;  %v1874_v2 = vpop.f32.mrb[7].mxu0 }
 0x107   : > { %v1875_v3 = vadd.f32 %v1874_v2, %v1873_v63  ;;  %v1914_v4 = vpop.f32.mrb[7].mxu1 }
 0x108   : > { %v1237_v5 = vadd.f32 %v1912_v0, %v1872_v61  ;;  %v1915_v6 = vadd.f32 %v1914_v4, %v1913_v1 }
 0x10a   : > { %v1240_v7 = vadd.f32 %v1915_v6, %v1875_v3 }
 0x10b   : > { %v1876_v8 = vpop.f32.mrb[8].mxu0 }
 0x10c   : > { %v1916_v9 = vpop.f32.mrb[8].mxu1  ;;  %v1877_v10 = vpop.f32.mrb[9].mxu0 }
 0x10d   : > { %v1878_v11 = vadd.f32 %v1877_v10, %v1876_v8  ;;  %v1917_v12 = vpop.f32.mrb[9].mxu1  ;;  %v1879_v13 = vpop.f32.mrb[10].mxu0 }
 0x10e   : > { %v1918_v14 = vadd.f32 %v1917_v12, %v1916_v9  ;;  %v1919_v15 = vpop.f32.mrb[10].mxu1  ;;  %v1880_v16 = vpop.f32.mrb[11].mxu0 }
 0x10f   : > { %v1881_v17 = vadd.f32 %v1880_v16, %v1879_v13  ;;  %v1920_v18 = vpop.f32.mrb[11].mxu1 }
 0x110   : > { %v1245_v19 = vadd.f32 %v1918_v14, %v1878_v11  ;;  %v1921_v20 = vadd.f32 %v1920_v18, %v1919_v15 }
 0x112   : > { %v1248_v21 = vadd.f32 %v1921_v20, %v1881_v17 }
 0x113   : > { %v1882_v22 = vpop.f32.mrb[12].mxu0 }
 0x114   : > { %v1922_v23 = vpop.f32.mrb[12].mxu1  ;;  %v1883_v24 = vpop.f32.mrb[13].mxu0 }
 0x115   : > { %v1923_v25 = vpop.f32.mrb[13].mxu1  ;;  %v1884_v26 = vadd.f32 %v1883_v24, %v1882_v22  ;;  %v1885_v28 = vpop.f32.mrb[14].mxu0 }
 0x116   : > { %v1924_v27 = vadd.f32 %v1923_v25, %v1922_v23  ;;  %v1925_v29 = vpop.f32.mrb[14].mxu1  ;;  %v1886_v30 = vpop.f32.mrb[15].mxu0 }
 0x117   : > { %v1926_v31 = vpop.f32.mrb[15].mxu1  ;;  %v1887_v33 = vadd.f32 %v1886_v30, %v1885_v28 }
 0x118   : > { %v1253_v32 = vadd.f32 %v1924_v27, %v1884_v26  ;;  %v1927_v34 = vadd.f32 %v1926_v31, %v1925_v29 }
 0x11a   : > { %v1256_v35 = vadd.f32 %v1927_v34, %v1887_v33 }
 0x11b   : > { %v1944_v36 = vpop.f32.mrb[16].mxu0 }
 0x11c   : > { %v1945_v37 = vpop.f32.mrb[17].mxu0  ;;  %v1984_v38 = vpop.f32.mrb[16].mxu1 }
 0x11d   : > { %v1946_v39 = vadd.f32 %v1945_v37, %v1944_v36  ;;  %v1947_v40 = vpop.f32.mrb[18].mxu0  ;;  %v1985_v41 = vpop.f32.mrb[17].mxu1 }
 0x11e   : > { %v1948_v42 = vpop.f32.mrb[19].mxu0  ;;  %v1986_v44 = vadd.f32 %v1985_v41, %v1984_v38  ;;  %v1987_v45 = vpop.f32.mrb[18].mxu1 }
 0x11f   : > { %v1294_v43 = vadd.f32 %v1946_v39, %v1229_v55  ;;  %v1949_v46 = vadd.f32 %v1948_v42, %v1947_v40  ;;  %v1988_v47 = vpop.f32.mrb[19].mxu1  ;;  %v1805_v39 = vld [vmem:[%s2563_s2] ss:$0 sm:$0xff] }
 0x120   : > { %v1989_v49 = vadd.f32 %v1988_v47, %v1987_v45 }
 0x121   : > { %v1297_v48 = vadd.f32 %v1949_v46, %v1232_v57  ;;  %v1359_v50 = vadd.f32 %v1986_v44, %v1294_v43 }
 0x123   : > { %v1950_v51 = vpop.f32.mrb[20].mxu0  ;;  %v2539_v52 = vadd.f32 %v1989_v49, %v1297_v48 }
 0x124   : > { %v1951_v53 = vpop.f32.mrb[21].mxu0  ;;  %v1990_v54 = vpop.f32.mrb[20].mxu1 }
 0x125   : > { %v1952_v56 = vadd.f32 %v1951_v53, %v1950_v51  ;;  %v1953_v58 = vpop.f32.mrb[22].mxu0  ;;  %v1991_v59 = vpop.f32.mrb[21].mxu1 }
 0x126   : > { %v1954_v60 = vpop.f32.mrb[23].mxu0  ;;  %v1992_v62 = vadd.f32 %v1991_v59, %v1990_v54  ;;  %v1993_v63 = vpop.f32.mrb[22].mxu1 }
 0x127   : > { %v1302_v61 = vadd.f32 %v1952_v56, %v1237_v5  ;;  %v1955_v55 = vadd.f32 %v1954_v60, %v1953_v58  ;;  %v1994_v0 = vpop.f32.mrb[23].mxu1 }
 0x128   : > { %v1995_v2 = vadd.f32 %v1994_v0, %v1993_v63 }
 0x129   : > { %v1305_v1 = vadd.f32 %v1955_v55, %v1240_v7  ;;  %v1367_v3 = vadd.f32 %v1992_v62, %v1302_v61 }
 0x12b   : > { %v1956_v57 = vpop.f32.mrb[24].mxu0  ;;  %v1370_v4 = vadd.f32 %v1995_v2, %v1305_v1 }
 0x12c   : > { %v1957_v6 = vpop.f32.mrb[25].mxu0  ;;  %v1996_v8 = vpop.f32.mrb[24].mxu1 }
 0x12d   : > { %v1958_v9 = vadd.f32 %v1957_v6, %v1956_v57  ;;  %v1959_v10 = vpop.f32.mrb[26].mxu0  ;;  %v1997_v11 = vpop.f32.mrb[25].mxu1 }
 0x12e   : > { %v1960_v12 = vpop.f32.mrb[27].mxu0  ;;  %v1998_v14 = vadd.f32 %v1997_v11, %v1996_v8  ;;  %v1999_v15 = vpop.f32.mrb[26].mxu1 }
 0x12f   : > { %v1310_v13 = vadd.f32 %v1958_v9, %v1245_v19  ;;  %v1961_v16 = vadd.f32 %v1960_v12, %v1959_v10  ;;  %v2000_v5 = vpop.f32.mrb[27].mxu1 }
 0x130   : > { %v2001_v18 = vadd.f32 %v2000_v5, %v1999_v15 }
 0x131   : > { %v1313_v17 = vadd.f32 %v1961_v16, %v1248_v21  ;;  %v1375_v20 = vadd.f32 %v1998_v14, %v1310_v13 }
 0x133   : > { %v1962_v22 = vpop.f32.mrb[28].mxu0  ;;  %v1378_v7 = vadd.f32 %v2001_v18, %v1313_v17 }
 0x134   : > { %v1963_v23 = vpop.f32.mrb[29].mxu0  ;;  %v2002_v24 = vpop.f32.mrb[28].mxu1 }
 0x135   : > { %v1964_v25 = vadd.f32 %v1963_v23, %v1962_v22  ;;  %v1965_v26 = vpop.f32.mrb[30].mxu0  ;;  %v2003_v27 = vpop.f32.mrb[29].mxu1 }
 0x136   : > { %v1966_v28 = vpop.f32.mrb[31].mxu0  ;;  %v2004_v30 = vadd.f32 %v2003_v27, %v2002_v24  ;;  %v2005_v31 = vpop.f32.mrb[30].mxu1 }
 0x137   : > { %v1318_v29 = vadd.f32 %v1964_v25, %v1253_v32  ;;  %v1967_v33 = vadd.f32 %v1966_v28, %v1965_v26  ;;  %v2006_v19 = vpop.f32.mrb[31].mxu1  ;;  %v1806_v32 = vld [vmem:[%s2564_s3] ss:$0 sm:$0xff] }
 0x138   : > { %v2007_v36 = vadd.f32 %v2006_v19, %v2005_v31 }
 0x139   : > { %v1321_v34 = vadd.f32 %v1967_v33, %v1256_v35  ;;  %v1383_v37 = vadd.f32 %v2004_v30, %v1318_v29 }
 0x13b   : > { %v1386_v38 = vadd.f32 %v2007_v36, %v1321_v34 }
 0x13c   : > { %v2038_v21 = vpop.f32.mrb[32].mxu0 }
 0x13d   : > { %v1432_v40 = vadd.f32 %v2038_v21, %v1367_v3  ;;  %v2042_v41 = vpop.f32.mrb[32].mxu1  ;;  %v1423_v42 = vpop.f32.mrb[33].mxu0 }
 0x13e   : > { %v1448_v43 = vadd.f32 %v2042_v41, %v1383_v37  ;;  %v1424_v44 = vadd.f32 %v1423_v42, %v1359_v50  ;;  %v1439_v45 = vpop.f32.mrb[33].mxu1  ;;  %v2039_v46 = vpop.f32.mrb[34].mxu0 }
 0x13f   : > { %v1490_v35 = vmul.f32 %v1805_v39, %v1432_v40  ;;  %v1440_v47 = vadd.f32 %v1439_v45, %v1375_v20  ;;  %v1435_v48 = vadd.f32 %v2039_v46, %v1370_v4  ;;  %v2043_v49 = vpop.f32.mrb[34].mxu1  ;;  %v1426_v51 = vpop.f32.mrb[35].mxu0 }
 0x140   : > { %v1494_v53 = vmul.f32 %v1805_v39, %v1448_v43  ;;  %v1488_v54 = vmul.f32 %v1805_v39, %v1424_v44  ;;  %v1451_v56 = vadd.f32 %v2043_v49, %v1386_v38  ;;  %v1427_v58 = vadd.f32 %v1426_v51, %v2539_v52  ;;  %v1442_v59 = vpop.f32.mrb[35].mxu1 }
 0x141   : > { %v1505_v60 = vadd.f32 %v1806_v32, %v1490_v35  ;;  %v1492_v61 = vmul.f32 %v1805_v39, %v1440_v47  ;;  %v1491_v62 = vmul.f32 %v1805_v39, %v1435_v48  ;;  %v1443_v63 = vadd.f32 %v1442_v59, %v1378_v7 }
 0x142   : > { %v1509_v55 = vadd.f32 %v1806_v32, %v1494_v53  ;;  %v1503_v50 = vadd.f32 %v1806_v32, %v1488_v54  ;;  %v1495_v0 = vmul.f32 %v1805_v39, %v1451_v56  ;;  %v1489_v1 = vmul.f32 %v1805_v39, %v1427_v58 }
 0x143   : > { %v1507_v2 = vadd.f32 %v1806_v32, %v1492_v61  ;;  %v1506_v3 = vadd.f32 %v1806_v32, %v1491_v62  ;;  %v1493_v57 = vmul.f32 %v1805_v39, %v1443_v63  ;;  %v1513_v8 = vmax.f32 %v1505_v60, 0.0 }
 0x144   : > { %v1510_v4 = vadd.f32 %v1806_v32, %v1495_v0  ;;  %v1504_v6 = vadd.f32 %v1806_v32, %v1489_v1  ;;  %v1517_v11 = vmax.f32 %v1509_v55, 0.0  ;;  %v1511_v52 = vmax.f32 %v1503_v50, 0.0 }
 0x145   : > { %v1514_v9 = vmax.f32 %v1506_v3, 0.0  ;;  %v1508_v10 = vadd.f32 %v1806_v32, %v1493_v57  ;;  %v1515_v14 = vmax.f32 %v1507_v2, 0.0 }
 0x146   : > { %v1518_v12 = vmax.f32 %v1510_v4, 0.0  ;;  %v1512_v13 = vmax.f32 %v1504_v6, 0.0 }
 0x147   : > { %v1833_v15 = vpack.c.bf16 %v1514_v9, %v1513_v8  ;;  %v1516_v16 = vmax.f32 %v1508_v10, 0.0 }
 0x148   : > { %v1843_v5 = vpack.c.bf16 %v1518_v12, %v1517_v11  ;;  %v1828_v17 = vpack.c.bf16 %v1512_v13, %v1511_v52 }
 0x149   : > { %1845 = vst [vmem:[%s306_s23 + $0x8] sm:$0xff] %v1833_v15   ;;  %v1838_v18 = vpack.c.bf16 %v1516_v16, %v1515_v14 }
 0x14a   : > { %1847 = vst [vmem:[%s306_s23 + $0x18] sm:$0xff] %v1843_v5   ;;  %1829 = vst [vmem:[%s306_s23] sm:$0xff] %v1828_v17  }
 0x14b   : > { %1846 = vst [vmem:[%s306_s23 + $0x10] sm:$0xff] %v1838_v18  }
 0x14c PF: > { %s14_s17 = sadd.s32 1, %s2231_s17   ;;  %s2566_s15 = smov %s2227_s16 }
 0x14d   : > { %p11_p5 = scmp.ge.s32.totalorder %s14_s17, 4   ;;  %s2567_s16 = smov %s2569_s18 }
 0x14f   :  { %13 = sbr.rel (!%p11_p5) target bundleno = 2 (0x2), region = 83 }

// kernel: forward.9
= control target key start
LH: loop header
LB: loop body
LE: loop exit
PB: predicated region body
PF: predicated region fallthrough
CT: control target
= control target key end

     0   :  { %s3656_s18 = smov 0   ;;  %s3658_s19 = smov 0   ;;  %s4140_s0 = inlined_call_operand.vmem [shape: bf16[2,10,10,128], index: 0, kind: input, shape index: {}]   ;;  %s4141_s1 = inlined_call_operand.vmem [shape: bf16[3,3,128,128], index: 1, kind: input, shape index: {}]   ;;  %s4142_s2 = inlined_call_operand.vmem [shape: f32[1,128], index: 2, kind: input, shape index: {}]   ;;  %s4143_s3 = inlined_call_operand.vmem [shape: f32[1,128], index: 3, kind: input, shape index: {}]   ;;  %s4144_s4 = inlined_call_operand.vmem [shape: bf16[2,8,8,128], index: 4, kind: input, shape index: {}]   ;;  %s4145_s5 = inlined_call_operand.vmem [shape: bf16[2,8,8,128], index: 5, kind: output, shape index: {}]  }
   0x1   :  { %s3660_s20 = smov 0  }
   0x2 LB: > { %s27_s21 = sadd.s32 1, %s3620_s19  ;;  %p2695_p0 = scmp.ge.s32.totalorder %s3624_s20, 1  ;;  %s3624_s20 = sphi %s3660_s20, %s15_s20   ;;  %s3620_s19 = sphi %s3658_s19, %s4151_s19   ;;  %s3616_s18 = sphi %s3656_s18, %s4150_s18  }
   0x3   : > { %p29_p1 = scmp.ge.s32.totalorder %s27_s21, 2  ;;  %p241_p2 = scmp.lt.s32.totalorder %s3624_s20, 3 }
   0x5   : > { %s4153_s21 = smov (%p29_p1, %s27_s21), 0  ;;  %p242_p3 = pnand %p2695_p0, %p241_p2 }
   0x6   : > { %v3518_v0 = vld [vmem:[%s4141_s1] sm:$0xff] (!%p242_p3)   ;;  %v3520_v2 = vld [vmem:[%s4141_s1 + $0x8] sm:$0xff] (!%p242_p3)   ;;  %p290_p4 = scmp.lt.s32.totalorder (!%p242_p3), %s3616_s18, 1  ;;  %v3522_v4 = vld [vmem:[%s4141_s1 + $0x10] sm:$0xff] (!%p242_p3)   ;;  %vm507_vm0 = vsmask.f32 (!%p242_p3), 3328 }
   0x7   : > { %245 = sbr.rel (%p242_p3) target bundleno = 396 (0x18c), region = 40  ;;  %v3519_v1 = vld [vmem:[%s4141_s1 + $0x100] sm:$0xff] (!%p242_p3)   ;;  %3197 = vmatprep.subr.bf16.mxu1 (!%p242_p3), %v3518_v0  ;;  %v3521_v3 = vld [vmem:[%s4141_s1 + $0x108] sm:$0xff] (!%p242_p3)   ;;  %v3523_v5 = vld [vmem:[%s4141_s1 + $0x110] sm:$0xff] (!%p242_p3)   ;;  %vm508_vm1 = vsmask.f32 (!%p242_p3), 7440 }
   0x8   : > { %3293 = vmatprep.subr.bf16.mxu0 (!%p242_p3), %v3519_v1  ;;  %3198 = vmatpush3.bf16.msra.mxu1 (!%p242_p3), %v3518_v0  ;;  %v3524_v6 = vld [vmem:[%s4141_s1 + $0x18] sm:$0xff] (!%p242_p3)   ;;  %v3526_v8 = vld [vmem:[%s4141_s1 + $0x20] sm:$0xff] (!%p242_p3)   ;;  %v3528_v10 = vld [vmem:[%s4141_s1 + $0x28] sm:$0xff] (!%p242_p3)   ;;  %vm824_vm3 = vcmask (!%p242_p3), 1042432   ;;  %vm825_vm4 = vcmask (!%p242_p3), 1046532  }
   0x9   : > { %3294 = vmatpush3.bf16.msra.mxu0 (!%p242_p3), %v3519_v1  ;;  %3199 = vmatprep.subr.bf16.mxu1 (!%p242_p3), %v3520_v2  ;;  %v3525_v7 = vld [vmem:[%s4141_s1 + $0x118] sm:$0xff] (!%p242_p3)   ;;  %v3527_v9 = vld [vmem:[%s4141_s1 + $0x120] sm:$0xff] (!%p242_p3)   ;;  %v3529_v12 = vld [vmem:[%s4141_s1 + $0x128] sm:$0xff] (!%p242_p3)  }
   0xa   : > { %3295 = vmatprep.subr.bf16.mxu0 (!%p242_p3), %v3521_v3  ;;  %v3530_v18 = vld [vmem:[%s4141_s1 + $0x30] sm:$0xff] (!%p242_p3)   ;;  %v3532_v27 = vld [vmem:[%s4141_s1 + $0x38] sm:$0xff] (!%p242_p3)   ;;  %vm3737_vm2 = vmor (!%p242_p3), %vm507_vm0, %vm508_vm1 }
   0xb   : > { %v3531_v23 = vld [vmem:[%s4141_s1 + $0x130] sm:$0xff] (!%p242_p3)   ;;  %v3533_v30 = vld [vmem:[%s4141_s1 + $0x138] sm:$0xff] (!%p242_p3)   ;;  %v3535_v46 = vld [vmem:[%s4141_s1 + $0x40] sm:$0xff] (!%p242_p3)  }
   0xc   : > { %3200 = vmatpush3.bf16.msra.mxu1 (!%p242_p3), %v3520_v2  ;;  %v3536_v52 = vld [vmem:[%s4141_s1 + $0x140] sm:$0xff] (!%p242_p3)   ;;  %v3538_v63 = vld [vmem:[%s4141_s1 + $0x48] sm:$0xff] (!%p242_p3)   ;;  %vm3824_vm5 = vmor (!%p242_p3), %vm824_vm3, %vm825_vm4 }
   0xd   : > { %3296 = vmatpush3.bf16.msra.mxu0 (!%p242_p3), %v3521_v3  ;;  %3201 = vmatprep.subr.bf16.mxu1 (!%p242_p3), %v3522_v4  ;;  %v3539_v3 = vld [vmem:[%s4141_s1 + $0x148] sm:$0xff] (!%p242_p3)  }
   0xe   : > { %s4155_s18 = smov (!%p290_p4, %s3616_s18), 1  ;;  %3297 = vmatprep.subr.bf16.mxu0 %v3523_v5 }
   0xf   : > { %s3493_s13 = smul.u32 80, %s4155_s18 }
  0x10   : > { %3202 = vmatpush3.bf16.msra.mxu1 %v3522_v4 }
  0x11   : > { %3298 = vmatpush3.bf16.msra.mxu0 %v3523_v5  ;;  %3203 = vmatprep.subr.bf16.mxu1 %v3524_v6  ;;  %s3713_s26 = scalar_lea.vmem %s4140_s0, %s3493_s13  ;;  %v3540_v5 = vld [vmem:[%s4141_s1 + $0x50] sm:$0xff]  }
  0x12   : > { %3299 = vmatprep.subr.bf16.mxu0 %v3525_v7  ;;  %v3534_v11 = vld [vmem:[%s3713_s26] ss:$8 sps:$4 sm:$0xff]   ;;  %v2814_v14 = vld [vmem:[%s3713_s26 + $0xc] sm:$0x1]  ;;  %v2815_v15 = vld [vmem:[%s3713_s26 + $0x10] sm:$0xf] }
  0x13   : > { %3213 = vmatprep.mubr.bf16.mxu1 %v3534_v11  ;;  %v2813_v13 = vld [vmem:[%s3713_s26 + $0x8] sm:$0xf]  ;;  %v2816_v19 = vld [vmem:[%s3713_s26 + $0x14] sm:$0x1]  ;;  %v1242_v20 = vshll.u32 %v2814_v14, 16  ;;  %v1247_v21 = vshrl.u32 %v2815_v15, 16 }
  0x14   : > { %3204 = vmatpush3.bf16.msra.mxu1 %v3524_v6  ;;  %v1233_v16 = vshrl.u32 %v2813_v13, 16  ;;  %v1236_v17 = vshll.u32 %v2813_v13, 16  ;;  %v1250_v22 = vshll.u32 %v2815_v15, 16  ;;  %v1256_v26 = vshll.u32 %v2816_v19, 16  ;;  %v2817_v36 = vld [vmem:[%s3713_s26 + $0x18] sm:$0xf] }
  0x15   : > { %3300 = vmatpush3.bf16.msra.mxu0 %v3525_v7  ;;  %3205 = vmatprep.subr.bf16.mxu1 %v3526_v8  ;;  %v1249_v28 = vrot.slane %v1247_v21, 4  ;;  %v1244_v32 = vrot.slane %v1242_v20, 5  ;;  %v2818_v37 = vld [vmem:[%s3713_s26 + $0x1c] sm:$0x1]  ;;  %v2819_v39 = vld [vmem:[%s3713_s26 + $0x20] sm:$0xf] }
  0x16   : > { %3301 = vmatprep.subr.bf16.mxu0 %v3527_v9  ;;  %v1235_v24 = vrot.slane %v1233_v16, 4  ;;  %v1238_v25 = vrot.slane %v1236_v17, 5  ;;  %v1252_v29 = vrot.slane %v1250_v22, 5  ;;  %v1258_v35 = vrot.slane %v1256_v26, 5  ;;  %v2820_v40 = vld [vmem:[%s3713_s26 + $0x24] sm:$0x1] }
  0x17   : > { %v1261_v41 = vshrl.u32 %v2817_v36, 16  ;;  %v1264_v43 = vshll.u32 %v2817_v36, 16  ;;  %v1270_v44 = vshll.u32 %v2818_v37, 16  ;;  %v1275_v45 = vshrl.u32 %v2819_v39, 16  ;;  %v3537_v53 = vld [vmem:[%s3713_s26 + $0x10] ss:$8 sps:$4 sm:$0xff]  }
  0x18   : > { %3206 = vmatpush3.bf16.msra.mxu1 %v3526_v8  ;;  %v1239_v31 = vor.u32 %v1238_v25, %v1235_v24  ;;  %v1253_v34 = vor.u32 %v1252_v29, %v1249_v28  ;;  %v1278_v49 = vshll.u32 %v2819_v39, 16  ;;  %v1284_v50 = vshll.u32 %v2820_v40, 16  ;;  %v3548_v6 = vld [vmem:[%s3713_s26 + $0x20] ss:$8 sps:$4 sm:$0xff]   ;;  %v3541_v7 = vld [vmem:[%s4141_s1 + $0x150] sm:$0xff]   ;;  %v3542_v8 = vld [vmem:[%s4141_s1 + $0x58] sm:$0xff]  }
  0x19   : > { %3302 = vmatpush3.bf16.msra.mxu0 %v3527_v9  ;;  %3207 = vmatprep.subr.bf16.mxu1 %v3528_v10  ;;  %v1263_v48 = vrot.slane %v1261_v41, 4  ;;  %v1266_v54 = vrot.slane %v1264_v43, 5  ;;  %v1272_v55 = vrot.slane %v1270_v44, 5  ;;  %v1277_v56 = vrot.slane %v1275_v45, 4  ;;  %v2821_v9 = vld [vmem:[%s3713_s26 + $0x28] sm:$0xf] }
  0x1a   : > { %3303 = vmatprep.subr.bf16.mxu0 %v3529_v12  ;;  %v1240_v38 = vrot.slane %v1239_v31, 4  ;;  %v1254_v42 = vrot.slane %v1253_v34, 4  ;;  %v1280_v58 = vrot.slane %v1278_v49, 5  ;;  %v1286_v59 = vrot.slane %v1284_v50, 5  ;;  %v2823_v11 = vld [vmem:[%s3713_s26 + $0x30] sm:$0xf] }
  0x1b   : > { %v1267_v60 = vor.u32 %v1266_v54, %v1263_v48  ;;  %v1289_v13 = vshrl.u32 %v2821_v9, 16  ;;  %v1292_v14 = vshll.u32 %v2821_v9, 16  ;;  %v1303_v16 = vshrl.u32 %v2823_v11, 16  ;;  %v3543_v19 = vld [vmem:[%s4141_s1 + $0x158] sm:$0xff]   ;;  %v3544_v20 = vld [vmem:[%s4141_s1 + $0x60] sm:$0xff]  }
  0x1c   : > { %3208 = vmatpush3.bf16.msra.mxu1 %v3528_v10  ;;  %v1245_v47 = vsel %vm3737_vm2, %v1240_v38, %v1244_v32  ;;  %v1259_v51 = vsel %vm3737_vm2, %v1254_v42, %v1258_v35  ;;  %v1281_v61 = vor.u32 %v1280_v58, %v1277_v56  ;;  %v2822_v10 = vld [vmem:[%s3713_s26 + $0x2c] sm:$0x1]  ;;  %v1306_v17 = vshll.u32 %v2823_v11, 16  ;;  %v2825_v29 = vld [vmem:[%s3713_s26 + $0x38] sm:$0xf]  ;;  %v3545_v38 = vld [vmem:[%s4141_s1 + $0x160] sm:$0xff]  }
  0x1d   : > { %3304 = vmatpush3.bf16.msra.mxu0 %v3529_v12  ;;  %3209 = vmatprep.subr.bf16.mxu1 %v3530_v18  ;;  %v2845_v57 = vcombine.low %v1245_v47, %v1259_v51  ;;  %v1268_v62 = vrot.slane %v1267_v60, 4  ;;  %v2824_v12 = vld [vmem:[%s3713_s26 + $0x34] sm:$0x1]  ;;  %v1298_v15 = vshll.u32 %v2822_v10, 16  ;;  %v1291_v21 = vrot.slane %v1289_v13, 4  ;;  %v3546_v47 = vld [vmem:[%s4141_s1 + $0x68] sm:$0xff]  }
  0x1e   : > { %3305 = vmatprep.subr.bf16.mxu0 %v3531_v23  ;;  %v1282_v0 = vrot.slane %v1281_v61, 4  ;;  %v1294_v22 = vrot.slane %v1292_v14, 5  ;;  %v1305_v24 = vrot.slane %v1303_v16, 4  ;;  %v1308_v25 = vrot.slane %v1306_v17, 5  ;;  %v2827_v31 = vld [vmem:[%s3713_s26 + $0x40] sm:$0xf] }
  0x1f   : > { %3309 = vmatprep.mubr.bf16.mxu0 %v2845_v57  ;;  %v1273_v1 = vsel %vm3737_vm2, %v1268_v62, %v1272_v55  ;;  %v2828_v34 = vld [vmem:[%s3713_s26 + $0x44] sm:$0x1]  ;;  %v1317_v35 = vshrl.u32 %v2825_v29, 16  ;;  %v1320_v36 = vshll.u32 %v2825_v29, 16  ;;  %v1331_v40 = vshrl.u32 %v2827_v31, 16  ;;  %v3547_v56 = vld [vmem:[%s4141_s1 + $0x168] sm:$0xff]  }
  0x20   : > { %3210 = vmatpush3.bf16.msra.mxu1 %v3530_v18  ;;  %v1287_v2 = vsel %vm3737_vm2, %v1282_v0, %v1286_v59  ;;  %v1312_v18 = vshll.u32 %v2824_v12, 16  ;;  %v1295_v28 = vor.u32 %v1294_v22, %v1291_v21  ;;  %v1309_v32 = vor.u32 %v1308_v25, %v1305_v24  ;;  %v491_v54 = vld [vmem:[%s3713_s26] sm:$0xf]  ;;  %v492_v55 = vld [vmem:[%s3713_s26 + $0x4] sm:$0x1]  ;;  %v3549_v57 = vld [vmem:[%s4141_s1 + $0x70] sm:$0xff]  }
  0x21   : > { %3306 = vmatpush3.bf16.msra.mxu0 %v3531_v23  ;;  %3211 = vmatprep.subr.bf16.mxu1 %v3532_v27  ;;  %v2846_v4 = vcombine.low %v1273_v1, %v1287_v2  ;;  %v1300_v23 = vrot.slane %v1298_v15, 5  ;;  %v1334_v41 = vshll.u32 %v2827_v31, 16  ;;  %v1340_v42 = vshll.u32 %v2828_v34, 16  ;;  %v493_v60 = vld [vmem:[%s3713_s26 + $0x8] sm:$0xf]  ;;  %v3550_v13 = vld [vmem:[%s4141_s1 + $0x170] sm:$0xff]  }
  0x22   : > { %3307 = vmatprep.subr.bf16.mxu0 %v3533_v30  ;;  %v1314_v26 = vrot.slane %v1312_v18, 5  ;;  %v1296_v39 = vrot.slane %v1295_v28, 4  ;;  %v1310_v43 = vrot.slane %v1309_v32, 4  ;;  %v1319_v44 = vrot.slane %v1317_v35, 4  ;;  %v494_v61 = vld [vmem:[%s3713_s26 + $0xc] sm:$0x1] }
  0x23   : > { %v1322_v45 = vrot.slane %v1320_v36, 5  ;;  %v1333_v49 = vrot.slane %v1331_v40, 4  ;;  %v1336_v50 = vrot.slane %v1334_v41, 5  ;;  %v1342_v51 = vrot.slane %v1340_v42, 5  ;;  %v2857_v12 = vld [vmem:[%s3713_s26 + $0x8] sm:$0xe] }
  0x24   : > { %3212 = vmatpush3.bf16.msra.mxu1 %v3532_v27  ;;  %v3551_v27 = vld [vmem:[%s3713_s26 + $0x30] ss:$8 sps:$4 sm:$0xff]   ;;  %v1301_v48 = vsel %vm3737_vm2, %v1296_v39, %v1300_v23  ;;  %v511_v62 = vshrl.u32 %v491_v54, 16  ;;  %v520_v1 = vshll.u32 %v492_v55, 16  ;;  %v525_v2 = vshrl.u32 %v493_v60, 16 }
  0x25   : > { %3308 = vmatpush3.bf16.msra.mxu0 %v3533_v30  ;;  %3221 = vmatprep.subr.bf16.mxu1 %v3535_v46  ;;  %v2826_v30 = vld [vmem:[%s3713_s26 + $0x3c] sm:$0x1]  ;;  %v1337_v59 = vor.u32 %v1336_v50, %v1333_v49  ;;  %v2873_v21 = vrot.slane %v2857_v12, 9  ;;  %v2860_v24 = vld [vmem:[%s3713_s26 + $0x14] sm:$0x1]  ;;  %v3554_v50 = vld [vmem:[%s4141_s1 + $0x80] sm:$0xff]  }
  0x26   : > { %3317 = vmatprep.subr.bf16.mxu0 %v3536_v52  ;;  %v1326_v37 = vshll.u32 %v2826_v30, 16  ;;  %v522_v9 = vrot.slane %v520_v1, 5  ;;  %v527_v10 = vrot.slane %v525_v2, 4  ;;  %v3552_v15 = vld [vmem:[%s4141_s1 + $0x78] sm:$0xff]   ;;  %v1552_v28 = vrot.slane %v2860_v24, 5  ;;  %v3558_v12 = vld [vmem:[%s4141_s1 + $0x90] sm:$0xff]  }
  0x27   : > { %3214 = vmatmul.mubr.bf16.vlgmr.msra.gmra.mrb[0].mxu1 %v3537_v53  ;;  %v1323_v53 = vor.u32 %v1322_v45, %v1319_v44  ;;  %v495_v29 = vld [vmem:[%s3713_s26 + $0x10] sm:$0xf]  ;;  %v496_v32 = vld [vmem:[%s3713_s26 + $0x14] sm:$0x1]  ;;  %v497_v34 = vld [vmem:[%s3713_s26 + $0x18] sm:$0xf] }
  0x28   : > { %3222 = vmatpush3.bf16.msra.mxu1 %v3535_v46  ;;  %3310 = vmatmul.mubr.bf16.vlgmr.msra.gmra.mrb[0].mxu0 %v2846_v4  ;;  %v1328_v46 = vrot.slane %v1326_v37, 5  ;;  %v1338_v4 = vrot.slane %v1337_v59, 4  ;;  %v539_v35 = vshrl.u32 %v495_v29, 16  ;;  %v3553_v36 = vld [vmem:[%s4141_s1 + $0x178] sm:$0xff]   ;;  %v542_v40 = vshll.u32 %v495_v29, 16 }
  0x29   : > { %3223 = vmatprep.subr.bf16.mxu1 %v3538_v63  ;;  %3318 = vmatpush3.bf16.msra.mxu0 %v3536_v52  ;;  %v1315_v52 = vsel %vm3737_vm2, %v1310_v43, %v1314_v26  ;;  %v1324_v0 = vrot.slane %v1323_v53, 4  ;;  %v498_v39 = vld [vmem:[%s3713_s26 + $0x1c] sm:$0x1]  ;;  %v548_v41 = vshll.u32 %v496_v32, 16  ;;  %v2861_v42 = vld [vmem:[%s3713_s26 + $0x18] sm:$0xe] }
  0x2a   : > { %3319 = vmatprep.subr.bf16.mxu0 %v3539_v3  ;;  %3217 = vmatprep.mubr.bf16.mxu1 %v3548_v6  ;;  %v2847_v58 = vcombine.low %v1301_v48, %v1315_v52  ;;  %v1343_v14 = vsel %vm3737_vm2, %v1338_v4, %v1342_v51  ;;  %v541_v45 = vrot.slane %v539_v35, 4  ;;  %v2863_v48 = vld [vmem:[%s3713_s26 + $0x20] sm:$0xe]  ;;  %v544_v51 = vrot.slane %v542_v40, 5  ;;  %v2865_v29 = vld [vmem:[%s3713_s26 + $0x28] sm:$0xe] }
  0x2b   : > { %v550_v52 = vrot.slane %v548_v41, 5  ;;  %v556_v53 = vshll.u32 %v497_v34, 16  ;;  %v2866_v32 = vld [vmem:[%s3713_s26 + $0x2c] sm:$0x1]  ;;  %v3560_v35 = vld [vmem:[%s4141_s1 + $0x98] sm:$0xff]  }
  0x2c   : > { %3224 = vmatpush3.bf16.msra.mxu1 %v3538_v63  ;;  %v514_v63 = vshll.u32 %v491_v54, 16  ;;  %3313 = vmatprep.mubr.bf16.mxu0 %v2847_v58  ;;  %v2864_v54 = vld [vmem:[%s3713_s26 + $0x24] sm:$0x1]  ;;  %v545_v59 = vor.u32 %v544_v51, %v541_v45  ;;  %v3000_v33 = vld [vmem:[%s3713_s26 + $0x3c] sm:$0x1] }
  0x2d   : > { %3225 = vmatprep.subr.bf16.mxu1 %v3540_v5  ;;  %3320 = vmatpush3.bf16.msra.mxu0 %v3539_v3  ;;  %v528_v3 = vshll.u32 %v493_v60, 16  ;;  %v558_v60 = vrot.slane %v556_v53, 5  ;;  %v3563_v45 = vld [vmem:[%s4141_s1 + $0x1a0] sm:$0xff]   ;;  %v506_v53 = vld [vmem:[%s3713_s26 + $0x3c] sm:$0x1] }
  0x2e   : > { %3321 = vmatprep.subr.bf16.mxu0 %v3541_v7  ;;  %v516_v6 = vrot.slane %v514_v63, 5  ;;  %v3555_v63 = vld [vmem:[%s4141_s1 + $0x180] sm:$0xff]   ;;  %v546_v1 = vrot.slane %v545_v59, 4  ;;  %v2869_v59 = vld [vmem:[%s3713_s26 + $0x38] sm:$0xe] }
  0x2f   : > { %3218 = vmatmul.mubr.bf16.gmra.mrb[4].mxu1 %v3551_v27  ;;  %v530_v11 = vrot.slane %v528_v3, 5 }
  0x30   : > { %3226 = vmatpush3.bf16.msra.mxu1 %v3540_v5  ;;  %v513_v5 = vrot.slane %v511_v62, 4  ;;  %v1560_v62 = vrot.slane %v2864_v54, 5 }
  0x31   : > { %3227 = vmatprep.subr.bf16.mxu1 %v3542_v8  ;;  %3322 = vmatpush3.bf16.msra.mxu0 %v3541_v7  ;;  %v534_v7 = vshll.u32 %v494_v61, 16  ;;  %v531_v23 = vor.u32 %v530_v11, %v527_v10  ;;  %v2876_v61 = vrot.slane %v2863_v48, 9  ;;  %v3556_v11 = vld [vmem:[%s4141_s1 + $0x88] sm:$0xff]   ;;  %v503_v48 = vld [vmem:[%s3713_s26 + $0x30] sm:$0xf] }
  0x32   : > { %3323 = vmatprep.subr.bf16.mxu0 %v3543_v19  ;;  %v517_v16 = vor.u32 %v516_v6, %v513_v5  ;;  %v551_v5 = vsel %vm3737_vm2, %v546_v1, %v550_v52  ;;  %v505_v52 = vld [vmem:[%s3713_s26 + $0x38] sm:$0xf]  ;;  %v595_v54 = vshrl.u32 %v503_v48, 16  ;;  %v2871_v1 = vld [vmem:[%s3713_s26 + $0x40] sm:$0xe] }
  0x33   : > { %v536_v17 = vrot.slane %v534_v7, 5  ;;  %v532_v30 = vrot.slane %v531_v23, 4  ;;  %v1561_v4 = vsel %vm3824_vm5, %v2876_v61, %v1560_v62 }
  0x34   : > { %3228 = vmatpush3.bf16.msra.mxu1 %v3542_v8  ;;  %v1329_v8 = vsel %vm3737_vm2, %v1324_v0, %v1328_v46  ;;  %v518_v27 = vrot.slane %v517_v16, 4  ;;  %v553_v46 = vshrl.u32 %v497_v34, 16  ;;  %v501_v16 = vld [vmem:[%s3713_s26 + $0x28] sm:$0xf]  ;;  %v2867_v34 = vld [vmem:[%s3713_s26 + $0x30] sm:$0xe] }
  0x35   : > { %3229 = vmatprep.subr.bf16.mxu1 %v3544_v20  ;;  %3324 = vmatpush3.bf16.msra.mxu0 %v3543_v19  ;;  %v2858_v19 = vld [vmem:[%s3713_s26 + $0xc] sm:$0x1]  ;;  %v2848_v22 = vcombine.low %v1329_v8, %v1343_v14  ;;  %v537_v43 = vsel %vm3737_vm2, %v532_v30, %v536_v17  ;;  %v499_v14 = vld [vmem:[%s3713_s26 + $0x20] sm:$0xf]  ;;  %v584_v23 = vshll.u32 %v501_v16, 16  ;;  %v2878_v40 = vrot.slane %v2867_v34, 9 }
  0x36   : > { %3325 = vmatprep.subr.bf16.mxu0 %v3545_v38  ;;  %v1548_v25 = vrot.slane %v2858_v19, 5  ;;  %v523_v37 = vsel %vm3737_vm2, %v518_v27, %v522_v9  ;;  %v555_v55 = vrot.slane %v553_v46, 4  ;;  %v3557_v9 = vld [vmem:[%s4141_s1 + $0x188] sm:$0xff]   ;;  %v567_v19 = vshrl.u32 %v499_v14, 16 }
  0x37   : > { %3314 = vmatmul.mubr.bf16.gmra.mrb[4].mxu0 %v2848_v22  ;;  %v2729_v49 = vcombine.low %v523_v37, %v537_v43  ;;  %v502_v17 = vld [vmem:[%s3713_s26 + $0x2c] sm:$0x1]  ;;  %v581_v22 = vshrl.u32 %v501_v16, 16  ;;  %v2868_v37 = vld [vmem:[%s3713_s26 + $0x34] sm:$0x1]  ;;  %v597_v62 = vrot.slane %v595_v54, 4 }
  0x38   : > { %3230 = vmatpush3.bf16.msra.mxu1 %v3544_v20  ;;  %v2859_v20 = vld [vmem:[%s3713_s26 + $0x10] sm:$0xe]  ;;  %v1549_v31 = vsel %vm3824_vm5, %v2873_v21, %v1548_v25  ;;  %v559_v2 = vor.u32 %v558_v60, %v555_v55  ;;  %v590_v24 = vshll.u32 %v502_v17, 16  ;;  %v3561_v25 = vld [vmem:[%s4141_s1 + $0x198] sm:$0xff]   ;;  %v1568_v43 = vrot.slane %v2868_v37, 5 }
  0x39   : > { %3231 = vmatprep.subr.bf16.mxu1 %v3546_v47  ;;  %3326 = vmatpush3.bf16.msra.mxu0 %v3545_v38  ;;  %v2874_v26 = vrot.slane %v2859_v20, 9  ;;  %v570_v20 = vshll.u32 %v499_v14, 16  ;;  %v2870_v60 = vld [vmem:[%s3713_s26 + $0x3c] sm:$0x1] }
  0x3a   : > { %3327 = vmatprep.subr.bf16.mxu0 %v3547_v56  ;;  %3237 = vmatprep.mubr.bf16.mxu1 %v2729_v49  ;;  %v560_v6 = vrot.slane %v559_v2, 4  ;;  %v504_v49 = vld [vmem:[%s3713_s26 + $0x34] sm:$0x1]  ;;  %v1569_v51 = vsel %vm3824_vm5, %v2878_v40, %v1568_v43  ;;  %v3565_v2 = vld [vmem:[%s4141_s1 + $0x1a8] sm:$0xff]   ;;  %v3569_v37 = vld [vmem:[%s4141_s1 + $0x1b8] sm:$0xff]  }
  0x3b   : > { %v1553_v38 = vsel %vm3824_vm5, %v2874_v26, %v1552_v28  ;;  %v569_v26 = vrot.slane %v567_v19, 4  ;;  %v572_v27 = vrot.slane %v570_v20, 5  ;;  %v583_v28 = vrot.slane %v581_v22, 4  ;;  %v792_v20 = vld [vmem:[%s3713_s26] sm:$0xe] }
  0x3c   : > { %3232 = vmatpush3.bf16.msra.mxu1 %v3546_v47  ;;  %v2897_v44 = vcombine.low %v1549_v31, %v1553_v38  ;;  %v2862_v47 = vld [vmem:[%s3713_s26 + $0x1c] sm:$0x1]  ;;  %v586_v31 = vrot.slane %v584_v23, 5  ;;  %v2877_v38 = vrot.slane %v2865_v29, 9  ;;  %v793_v23 = vld [vmem:[%s3713_s26 + $0x4] sm:$0x1] }
  0x3d   : > { %3233 = vmatprep.subr.bf16.mxu1 %v3549_v57  ;;  %3328 = vmatpush3.bf16.msra.mxu0 %v3547_v56  ;;  %v562_v56 = vshll.u32 %v498_v39, 16  ;;  %v1556_v58 = vrot.slane %v2862_v47, 5  ;;  %v1564_v39 = vrot.slane %v2866_v32, 5  ;;  %v795_v29 = vld [vmem:[%s3713_s26 + $0xc] sm:$0x1]  ;;  %v3566_v32 = vld [vmem:[%s4141_s1 + $0xb0] sm:$0xff]  }
  0x3e   : > { %3329 = vmatprep.subr.bf16.mxu0 %v3550_v13  ;;  %3333 = vmatprep.mubr.bf16.mxu0 %v2897_v44  ;;  %v587_v41 = vor.u32 %v586_v31, %v583_v28  ;;  %v3562_v44 = vld [vmem:[%s4141_s1 + $0xa0] sm:$0xff]   ;;  %v796_v43 = vld [vmem:[%s3713_s26 + $0x10] sm:$0xe] }
  0x3f   : > { %v564_v3 = vrot.slane %v562_v56, 5  ;;  %v1565_v47 = vsel %vm3824_vm5, %v2877_v38, %v1564_v39  ;;  %v3571_v39 = vld [vmem:[%s3713_s26 + $0x10] ss:$8 sps:$4 sm:$0xff]  }
  0x40   : > { %3234 = vmatpush3.bf16.msra.mxu1 %v3549_v57  ;;  %v2875_v57 = vrot.slane %v2861_v42, 9  ;;  %v592_v42 = vrot.slane %v590_v24, 5  ;;  %v2899_v56 = vcombine.low %v1565_v47, %v1569_v51  ;;  %v794_v24 = vld [vmem:[%s3713_s26 + $0x8] sm:$0xe]  ;;  %v799_v47 = vld [vmem:[%s3713_s26 + $0x1c] sm:$0x1] }
  0x41   : > { %3235 = vmatprep.subr.bf16.mxu1 %v3552_v15  ;;  %3330 = vmatpush3.bf16.msra.mxu0 %v3550_v13  ;;  %v565_v8 = vsel %vm3737_vm2, %v560_v6, %v564_v3  ;;  %v3559_v13 = vld [vmem:[%s4141_s1 + $0x190] sm:$0xff]   ;;  %v618_v6 = vshll.u32 %v506_v53, 16  ;;  %v2742_v31 = vrot.slane %v794_v24, 9  ;;  %v841_v51 = vrot.slane %v799_v47, 5  ;;  %v3570_v53 = vld [vmem:[%s4141_s1 + $0xc0] sm:$0xff]  }
  0x42   : > { %v1557_v0 = vsel %vm3824_vm5, %v2875_v57, %v1556_v58  ;;  %3331 = vmatprep.subr.bf16.mxu0 %v3553_v36  ;;  %v2730_v10 = vcombine.low %v551_v5, %v565_v8  ;;  %v598_v57 = vshll.u32 %v503_v48, 16  ;;  %v604_v58 = vshll.u32 %v504_v49, 16  ;;  %v2949_v47 = vld [vmem:[%s3713_s26 + $0x20] sm:$0xf] }
  0x43   : > { %v2898_v7 = vcombine.low %v1557_v0, %v1561_v4  ;;  %v612_v0 = vshll.u32 %v505_v52, 16  ;;  %v620_v14 = vrot.slane %v618_v6, 5  ;;  %v2743_v48 = vrot.slane %v796_v43, 9  ;;  %v3579_v6 = vld [vmem:[%s4141_s1 + $0x1d8] sm:$0xff]  }
  0x44   : > { %3236 = vmatpush3.bf16.msra.mxu1 %v3552_v15  ;;  %v500_v15 = vld [vmem:[%s3713_s26 + $0x24] sm:$0x1]  ;;  %v600_v4 = vrot.slane %v598_v57, 5  ;;  %v606_v5 = vrot.slane %v604_v58, 5  ;;  %v3575_v58 = vld [vmem:[%s4141_s1 + $0x1c8] sm:$0xff]  }
  0x45   : > { %3245 = vmatprep.subr.bf16.mxu1 %v3554_v50  ;;  %3332 = vmatpush3.bf16.msra.mxu0 %v3553_v36  ;;  %v576_v21 = vshll.u32 %v500_v15, 16  ;;  %v573_v36 = vor.u32 %v572_v27, %v569_v26  ;;  %v2880_v15 = vrot.slane %v2871_v1, 9  ;;  %v3567_v26 = vld [vmem:[%s4141_s1 + $0x1b0] sm:$0xff]   ;;  %v803_v1 = vld [vmem:[%s3713_s26 + $0x2c] sm:$0x1] }
  0x46   : > { %3341 = vmatprep.subr.bf16.mxu0 %v3555_v63 }
  0x47   : > { %3238 = vmatmul.mubr.bf16.vlgmr.msra.gmra.mrb[0].mxu1 %v2730_v10  ;;  %v578_v30 = vrot.slane %v576_v21, 5  ;;  %v574_v46 = vrot.slane %v573_v36, 4  ;;  %v2879_v10 = vrot.slane %v2869_v59, 9  ;;  %v3574_v59 = vld [vmem:[%s4141_s1 + $0xc8] sm:$0xff]  }
  0x48   : > { %3334 = vmatmul.mubr.bf16.vlgmr.msra.gmra.mrb[0].mxu0 %v2898_v7  ;;  %3246 = vmatpush3.bf16.msra.mxu1 %v3554_v50  ;;  %v588_v50 = vrot.slane %v587_v41, 4  ;;  %v2872_v7 = vld [vmem:[%s3713_s26 + $0x44] sm:$0x1]  ;;  %v3568_v41 = vld [vmem:[%s4141_s1 + $0xb8] sm:$0xff]  }
  0x49   : > { %3342 = vmatpush3.bf16.msra.mxu0 %v3555_v63  ;;  %3247 = vmatprep.subr.bf16.mxu1 %v3556_v11  ;;  %v579_v55 = vsel %vm3737_vm2, %v574_v46, %v578_v30  ;;  %v609_v63 = vshrl.u32 %v505_v52, 16  ;;  %v1576_v16 = vrot.slane %v2872_v7, 5  ;;  %v829_v30 = vrot.slane %v793_v23, 5  ;;  %v798_v46 = vld [vmem:[%s3713_s26 + $0x18] sm:$0xe]  ;;  %v3572_v52 = vld [vmem:[%s4141_s1 + $0x1c0] sm:$0xff]  }
  0x4a   : > { %3343 = vmatprep.subr.bf16.mxu0 %v3557_v9  ;;  %v593_v61 = vsel %vm3737_vm2, %v588_v50, %v592_v42  ;;  %3337 = vmatprep.mubr.bf16.mxu0 %v2899_v56  ;;  %v2744_v50 = vrot.slane %v798_v46, 9  ;;  %v3573_v56 = vld [vmem:[%s3713_s26 + $0x20] ss:$8 sps:$4 sm:$0xff]  }
  0x4b   : > { %v2731_v3 = vcombine.low %v579_v55, %v593_v61  ;;  %v611_v8 = vrot.slane %v609_v63, 4  ;;  %v1577_v22 = vsel %vm3824_vm5, %v2880_v15, %v1576_v16  ;;  %v3577_v61 = vld [vmem:[%s4141_s1 + $0x1d0] sm:$0xff]   ;;  %v801_v63 = vld [vmem:[%s3713_s26 + $0x24] sm:$0x1]  ;;  %v3586_v23 = vld [vmem:[%s3713_s26 + $0x40] ss:$8 sps:$4 sm:$0xff]  }
  0x4c   : > { %3248 = vmatpush3.bf16.msra.mxu1 %v3556_v11  ;;  %v1572_v11 = vrot.slane %v2870_v60, 5  ;;  %v842_v55 = vsel %vm3824_vm5, %v2744_v50, %v841_v51  ;;  %v3576_v60 = vld [vmem:[%s4141_s1 + $0xd0] sm:$0xff]   ;;  %v2950_v50 = vld [vmem:[%s3713_s26 + $0x24] sm:$0x1]  ;;  %v2951_v51 = vld [vmem:[%s3713_s26 + $0x28] sm:$0xf] }
  0x4d   : > { %3344 = vmatpush3.bf16.msra.mxu0 %v3557_v9  ;;  %3249 = vmatprep.subr.bf16.mxu1 %v3558_v12  ;;  %v614_v9 = vrot.slane %v612_v0, 5  ;;  %v802_v0 = vld [vmem:[%s3713_s26 + $0x28] sm:$0xe] }
  0x4e   : > { %3345 = vmatprep.subr.bf16.mxu0 %v3559_v13  ;;  %3241 = vmatprep.mubr.bf16.mxu1 %v2731_v3  ;;  %v1573_v19 = vsel %vm3824_vm5, %v2879_v10, %v1572_v11  ;;  %v845_v3 = vrot.slane %v801_v63, 5  ;;  %v805_v10 = vld [vmem:[%s3713_s26 + $0x34] sm:$0x1] }
  0x4f   : > { %v615_v17 = vor.u32 %v614_v9, %v611_v8  ;;  %v2900_v28 = vcombine.low %v1573_v19, %v1577_v22  ;;  %v3584_v8 = vld [vmem:[%s3713_s26 + $0x30] ss:$8 sps:$4 sm:$0xff]   ;;  %v853_v15 = vrot.slane %v805_v10, 5 }
  0x50   : > { %3250 = vmatpush3.bf16.msra.mxu1 %v3558_v12  ;;  %v3564_v12 = vld [vmem:[%s4141_s1 + $0xa8] sm:$0xff]   ;;  %v804_v9 = vld [vmem:[%s3713_s26 + $0x30] sm:$0xe] }
  0x51   : > { %3346 = vmatpush3.bf16.msra.mxu0 %v3559_v13  ;;  %3251 = vmatprep.subr.bf16.mxu1 %v3560_v35  ;;  %v601_v13 = vor.u32 %v600_v4, %v597_v62  ;;  %v616_v27 = vrot.slane %v615_v17, 4  ;;  %v800_v62 = vld [vmem:[%s3713_s26 + $0x20] sm:$0xe]  ;;  %v2746_v4 = vrot.slane %v802_v0, 9 }
  0x52   : > { %3347 = vmatprep.subr.bf16.mxu0 %v3561_v25  ;;  %3338 = vmatmul.mubr.bf16.gmra.mrb[4].mxu0 %v2900_v28  ;;  %v3590_v28 = vld [vmem:[%s3713_s26 + $0x8] ss:$8 sps:$4 sm:$0xff]  }
  0x53   : > { %v602_v21 = vrot.slane %v601_v13, 4  ;;  %v621_v36 = vsel %vm3737_vm2, %v616_v27, %v620_v14  ;;  %3357 = vmatprep.mubr.bf16.mxu0 %v3571_v39  ;;  %v807_v13 = vld [vmem:[%s3713_s26 + $0x3c] sm:$0x1]  ;;  %v2747_v14 = vrot.slane %v804_v9, 9  ;;  %v3583_v27 = vld [vmem:[%s4141_s1 + $0x1e8] sm:$0xff]  }
  0x54   : > { %3252 = vmatpush3.bf16.msra.mxu1 %v3560_v35  ;;  %v833_v35 = vrot.slane %v795_v29, 5  ;;  %v857_v19 = vrot.slane %v807_v13, 5  ;;  %v2945_v29 = vld [vmem:[%s3713_s26 + $0x10] sm:$0xf]  ;;  %v2954_v13 = vld [vmem:[%s3713_s26 + $0x34] sm:$0x1] }
  0x55   : > { %3348 = vmatpush3.bf16.msra.mxu0 %v3561_v25  ;;  %3253 = vmatprep.subr.bf16.mxu1 %v3562_v44  ;;  %v2741_v25 = vrot.slane %v792_v20, 9  ;;  %v607_v34 = vsel %vm3737_vm2, %v602_v21, %v606_v5  ;;  %v849_v5 = vrot.slane %v803_v1, 5  ;;  %v3578_v20 = vld [vmem:[%s4141_s1 + $0xd8] sm:$0xff]   ;;  %v854_v21 = vsel %vm3824_vm5, %v2747_v14, %v853_v15 }
  0x56   : > { %3349 = vmatprep.subr.bf16.mxu0 %v3563_v45  ;;  %v2732_v40 = vcombine.low %v607_v34, %v621_v36  ;;  %v834_v42 = vsel %vm3824_vm5, %v2742_v31, %v833_v35  ;;  %v2947_v31 = vld [vmem:[%s3713_s26 + $0x18] sm:$0xf]  ;;  %v1952_v34 = vshrl.u32 %v2945_v29, 16  ;;  %v1955_v35 = vshll.u32 %v2945_v29, 16 }
  0x57   : > { %v830_v38 = vsel %vm3824_vm5, %v2741_v25, %v829_v30  ;;  %v850_v11 = vsel %vm3824_vm5, %v2746_v4, %v849_v5  ;;  %v3581_v25 = vld [vmem:[%s4141_s1 + $0x1e0] sm:$0xff]   ;;  %v2946_v30 = vld [vmem:[%s3713_s26 + $0x14] sm:$0x1]  ;;  %v3588_v1 = vld [vmem:[%s4141_s1 + $0xf8] sm:$0xff]  }
  0x58   : > { %3254 = vmatpush3.bf16.msra.mxu1 %v3562_v44  ;;  %v2765_v44 = vcombine.low %v830_v38, %v834_v42  ;;  %v1961_v36 = vshll.u32 %v2946_v30, 16  ;;  %v1969_v38 = vshll.u32 %v2947_v31, 16  ;;  %v1957_v42 = vrot.slane %v1955_v35, 5  ;;  %v2955_v14 = vld [vmem:[%s3713_s26 + $0x38] sm:$0xf] }
  0x59   : > { %3350 = vmatpush3.bf16.msra.mxu0 %v3563_v45  ;;  %3255 = vmatprep.subr.bf16.mxu1 %v3564_v12  ;;  %v797_v45 = vld [vmem:[%s3713_s26 + $0x14] sm:$0x1]  ;;  %v3591_v30 = vld [vmem:[%s3713_s26 + $0x18] ss:$8 sps:$4 sm:$0xff]  }
  0x5a   : > { %3351 = vmatprep.subr.bf16.mxu0 %v3565_v2  ;;  %3242 = vmatmul.mubr.bf16.gmra.mrb[4].mxu1 %v2732_v40  ;;  %v837_v49 = vrot.slane %v797_v45, 5  ;;  %v3582_v40 = vld [vmem:[%s4141_s1 + $0xe8] sm:$0xff]   ;;  %v1963_v43 = vrot.slane %v1961_v36, 5  ;;  %v1971_v45 = vrot.slane %v1969_v38, 5  ;;  %v2957_v38 = vld [vmem:[%s3713_s26 + $0x40] sm:$0xf] }
  0x5b   : > { %3261 = vmatprep.mubr.bf16.mxu1 %v2765_v44 }
  0x5c   : > { %3256 = vmatpush3.bf16.msra.mxu1 %v3564_v12  ;;  %v838_v54 = vsel %vm3824_vm5, %v2743_v48, %v837_v49  ;;  %v806_v12 = vld [vmem:[%s3713_s26 + $0x38] sm:$0xe]  ;;  %v3585_v48 = vld [vmem:[%s4141_s1 + $0xf0] sm:$0xff]  }
  0x5d   : > { %3352 = vmatpush3.bf16.msra.mxu0 %v3565_v2  ;;  %3257 = vmatprep.subr.bf16.mxu1 %v3566_v32  ;;  %v2766_v57 = vcombine.low %v838_v54, %v842_v55  ;;  %v2745_v2 = vrot.slane %v800_v62, 9  ;;  %v2748_v17 = vrot.slane %v806_v12, 9  ;;  %v1980_v55 = vshrl.u32 %v2949_v47, 16  ;;  %v2953_v12 = vld [vmem:[%s3713_s26 + $0x30] sm:$0xf] }
  0x5e   : > { %3353 = vmatprep.subr.bf16.mxu0 %v3567_v26 }
  0x5f   : > { %v846_v7 = vsel %vm3824_vm5, %v2745_v2, %v845_v3  ;;  %v858_v22 = vsel %vm3824_vm5, %v2748_v17, %v857_v19  ;;  %v1982_v63 = vrot.slane %v1980_v55, 4  ;;  %v3589_v2 = vld [vmem:[%s4141_s1 + $0x1f8] sm:$0xff]   ;;  %v2008_v17 = vshrl.u32 %v2953_v12, 16 }
  0x60   : > { %3258 = vmatpush3.bf16.msra.mxu1 %v3566_v32  ;;  %v2767_v16 = vcombine.low %v846_v7, %v850_v11  ;;  %v2768_v24 = vcombine.low %v854_v21, %v858_v22  ;;  %v2948_v32 = vld [vmem:[%s3713_s26 + $0x1c] sm:$0x1]  ;;  %v2011_v19 = vshll.u32 %v2953_v12, 16  ;;  %v2022_v22 = vshrl.u32 %v2955_v14, 16 }
  0x61   : > { %3354 = vmatpush3.bf16.msra.mxu0 %v3567_v26  ;;  %3259 = vmatprep.subr.bf16.mxu1 %v3568_v41  ;;  %v3580_v26 = vld [vmem:[%s4141_s1 + $0xe0] sm:$0xff]   ;;  %v1975_v39 = vshll.u32 %v2948_v32, 16 }
  0x62   : > { %3355 = vmatprep.subr.bf16.mxu0 %v3569_v37  ;;  %v2024_v32 = vrot.slane %v2022_v22, 4 }
  0x63   : > { %v1977_v46 = vrot.slane %v1975_v39, 5  ;;  %v2958_v39 = vld [vmem:[%s3713_s26 + $0x44] sm:$0x1] }
  0x64   : > { %3260 = vmatpush3.bf16.msra.mxu1 %v3568_v41  ;;  %v1954_v41 = vrot.slane %v1952_v34, 4 }
  0x65   : > { %3356 = vmatpush3.bf16.msra.mxu0 %v3569_v37  ;;  %3269 = vmatprep.subr.bf16.mxu1 %v3570_v53  ;;  %v1966_v37 = vshrl.u32 %v2947_v31, 16 }
  0x66   : > { %3365 = vmatprep.subr.bf16.mxu0 %v3572_v52  ;;  %v1958_v49 = vor.u32 %v1957_v42, %v1954_v41  ;;  %v3593_v41 = vld [vmem:[%s4141_s1 + $0x208] sm:$0xff]  }
  0x67   : > { %3262 = vmatmul.mubr.bf16.vlgmr.msra.gmra.mrb[0].mxu1 %v2766_v57  ;;  %v1968_v44 = vrot.slane %v1966_v37, 4  ;;  %v1989_v57 = vshll.u32 %v2950_v50, 16  ;;  %v3594_v42 = vld [vmem:[%s3713_s26 + $0x28] ss:$8 sps:$4 sm:$0xff]  }
  0x68   : > { %3358 = vmatmul.mubr.bf16.vlgmr.msra.gmra.mrb[0].mxu0 %v3573_v56  ;;  %3270 = vmatpush3.bf16.msra.mxu1 %v3570_v53  ;;  %v3587_v53 = vld [vmem:[%s4141_s1 + $0x1f0] sm:$0xff]   ;;  %v1983_v56 = vshll.u32 %v2949_v47, 16  ;;  %v2045_v47 = vshll.u32 %v2958_v39, 16  ;;  %v3002_v39 = vld [vmem:[%s3713_s26 + $0x44] sm:$0x1] }
  0x69   : > { %3366 = vmatpush3.bf16.msra.mxu0 %v3572_v52  ;;  %3271 = vmatprep.subr.bf16.mxu1 %v3574_v59  ;;  %v2952_v52 = vld [vmem:[%s3713_s26 + $0x2c] sm:$0x1]  ;;  %v1972_v54 = vor.u32 %v1971_v45, %v1968_v44  ;;  %v2036_v45 = vshrl.u32 %v2957_v38, 16 }
  0x6a   : > { %3367 = vmatprep.subr.bf16.mxu0 %v3575_v58  ;;  %3361 = vmatprep.mubr.bf16.mxu0 %v3584_v8  ;;  %v1985_v0 = vrot.slane %v1983_v56, 5  ;;  %v1991_v8 = vrot.slane %v1989_v57, 5  ;;  %v2960_v44 = vld [vmem:[%s3713_s26 + $0x4c] sm:$0x1]  ;;  %v2047_v55 = vrot.slane %v2045_v47, 5  ;;  %v2291_v47 = vrot.slane %v3002_v39, 5 }
  0x6b   : > { %3265 = vmatprep.mubr.bf16.mxu1 %v2767_v16  ;;  %v1973_v62 = vrot.slane %v1972_v54, 4  ;;  %v2956_v16 = vld [vmem:[%s3713_s26 + $0x3c] sm:$0x1] }
  0x6c   : > { %3272 = vmatpush3.bf16.msra.mxu1 %v3574_v59  ;;  %v1994_v59 = vshrl.u32 %v2951_v51, 16  ;;  %v1986_v7 = vor.u32 %v1985_v0, %v1982_v63 }
  0x6d   : > { %3368 = vmatpush3.bf16.msra.mxu0 %v3575_v58  ;;  %3273 = vmatprep.subr.bf16.mxu1 %v3576_v60  ;;  %v1959_v58 = vrot.slane %v1958_v49, 4 }
  0x6e   : > { %3369 = vmatprep.subr.bf16.mxu0 %v3577_v61  ;;  %v1996_v4 = vrot.slane %v1994_v59, 4  ;;  %v1987_v15 = vrot.slane %v1986_v7, 4  ;;  %v2991_v7 = vld [vmem:[%s3713_s26 + $0x18] sm:$0xe] }
  0x6f   : > { %3266 = vmatmul.mubr.bf16.gmra.mrb[4].mxu1 %v2768_v24  ;;  %v1964_v3 = vsel %vm3737_vm2, %v1959_v58, %v1963_v43  ;;  %v2031_v24 = vshll.u32 %v2956_v16, 16 }
  0x70   : > { %3274 = vmatpush3.bf16.msra.mxu1 %v3576_v60  ;;  %3362 = vmatmul.mubr.bf16.gmra.mrb[4].mxu0 %v3586_v23  ;;  %v1997_v60 = vshll.u32 %v2951_v51, 16  ;;  %v2025_v23 = vshll.u32 %v2955_v14, 16  ;;  %v2059_v51 = vshll.u32 %v2960_v44, 16  ;;  %v2997_v14 = vld [vmem:[%s3713_s26 + $0x30] sm:$0xe] }
  0x71   : > { %3370 = vmatpush3.bf16.msra.mxu0 %v3577_v61  ;;  %3275 = vmatprep.subr.bf16.mxu1 %v3578_v20  ;;  %v2003_v61 = vshll.u32 %v2952_v52, 16  ;;  %v2033_v35 = vrot.slane %v2031_v24, 5 }
  0x72   : > { %3371 = vmatprep.subr.bf16.mxu0 %v3579_v6  ;;  %3285 = vmatprep.mubr.bf16.mxu1 %v3590_v28  ;;  %v1999_v5 = vrot.slane %v1997_v60, 5  ;;  %v2013_v28 = vrot.slane %v2011_v19, 5  ;;  %v2027_v34 = vrot.slane %v2025_v23, 5  ;;  %v2061_v59 = vrot.slane %v2059_v51, 5  ;;  %v3596_v60 = vld [vmem:[%s4141_s1 + $0x210] sm:$0xff]  }
  0x73   : > { %v2005_v9 = vrot.slane %v2003_v61, 5  ;;  %v2999_v19 = vld [vmem:[%s3713_s26 + $0x38] sm:$0xe] }
  0x74   : > { %3276 = vmatpush3.bf16.msra.mxu1 %v3578_v20  ;;  %v2000_v11 = vor.u32 %v1999_v5, %v1996_v4  ;;  %v2017_v20 = vshll.u32 %v2954_v13, 16  ;;  %v2028_v43 = vor.u32 %v2027_v34, %v2024_v32  ;;  %v2989_v4 = vld [vmem:[%s3713_s26 + $0x10] sm:$0xe]  ;;  %v3006_v13 = vrot.slane %v2991_v7, 9  ;;  %v2993_v34 = vld [vmem:[%s3713_s26 + $0x20] sm:$0xe] }
  0x75   : > { %3372 = vmatpush3.bf16.msra.mxu0 %v3579_v6  ;;  %3277 = vmatprep.subr.bf16.mxu1 %v3580_v26  ;;  %v1978_v6 = vsel %vm3737_vm2, %v1973_v62, %v1977_v46  ;;  %v2039_v46 = vshll.u32 %v2957_v38, 16  ;;  %v3010_v23 = vrot.slane %v2999_v19, 9  ;;  %v3600_v32 = vld [vmem:[%s4141_s1 + $0x230] sm:$0xff]   ;;  %v3001_v38 = vld [vmem:[%s3713_s26 + $0x40] sm:$0xe] }
  0x76   : > { %3373 = vmatprep.subr.bf16.mxu0 %v3581_v25  ;;  %v2977_v10 = vcombine.low %v1964_v3, %v1978_v6  ;;  %v2001_v21 = vrot.slane %v2000_v11, 4  ;;  %v2019_v29 = vrot.slane %v2017_v20, 5  ;;  %v2029_v52 = vrot.slane %v2028_v43, 4  ;;  %v2990_v6 = vld [vmem:[%s3713_s26 + $0x14] sm:$0x1] }
  0x77   : > { %v2041_v54 = vrot.slane %v2039_v46, 5  ;;  %v3005_v11 = vrot.slane %v2989_v4, 9  ;;  %v2267_v12 = vrot.slane %v2990_v6, 5  ;;  %v3009_v20 = vrot.slane %v2997_v14, 9 }
  0x78   : > { %3278 = vmatpush3.bf16.msra.mxu1 %v3580_v26  ;;  %3381 = vmatprep.mubr.bf16.mxu0 %v2977_v10  ;;  %v3592_v26 = vld [vmem:[%s4141_s1 + $0x200] sm:$0xff]   ;;  %v2006_v31 = vsel %vm3737_vm2, %v2001_v21, %v2005_v9  ;;  %v2034_v61 = vsel %vm3737_vm2, %v2029_v52, %v2033_v35  ;;  %v3597_v10 = vld [vmem:[%s4141_s1 + $0x218] sm:$0xff]   ;;  %v3011_v46 = vrot.slane %v3001_v38, 9 }
  0x79   : > { %3374 = vmatpush3.bf16.msra.mxu0 %v3581_v25  ;;  %3279 = vmatprep.subr.bf16.mxu1 %v3582_v40  ;;  %v1992_v25 = vsel %vm3737_vm2, %v1987_v15, %v1991_v8  ;;  %v2992_v8 = vld [vmem:[%s3713_s26 + $0x1c] sm:$0x1]  ;;  %v2268_v21 = vsel %vm3824_vm5, %v3005_v11, %v2267_v12  ;;  %v2994_v35 = vld [vmem:[%s3713_s26 + $0x24] sm:$0x1] }
  0x7a   : > { %3375 = vmatprep.subr.bf16.mxu0 %v3583_v27  ;;  %v2978_v36 = vcombine.low %v1992_v25, %v2006_v31  ;;  %v2271_v16 = vrot.slane %v2992_v8, 5  ;;  %v2287_v25 = vrot.slane %v3000_v33, 5  ;;  %v3599_v31 = vld [vmem:[%s4141_s1 + $0x228] sm:$0xff]   ;;  %v2275_v43 = vrot.slane %v2994_v35, 5 }
  0x7c   : > { %3280 = vmatpush3.bf16.msra.mxu1 %v3582_v40  ;;  %v2959_v40 = vld [vmem:[%s3713_s26 + $0x48] sm:$0xf]  ;;  %v2272_v24 = vsel %vm3824_vm5, %v3006_v13, %v2271_v16  ;;  %v3041_v13 = vld [vmem:[%s4142_s2] ss:$0 sm:$0xff] }
  0x7d   : > { %3376 = vmatpush3.bf16.msra.mxu0 %v3583_v27  ;;  %3281 = vmatprep.subr.bf16.mxu1 %v3585_v48  ;;  %v2010_v27 = vrot.slane %v2008_v17, 4  ;;  %v2050_v49 = vshrl.u32 %v2959_v40, 16  ;;  %v2053_v50 = vshll.u32 %v2959_v40, 16  ;;  %v2998_v17 = vld [vmem:[%s3713_s26 + $0x34] sm:$0x1] }
  0x7e   : > { %3377 = vmatprep.subr.bf16.mxu0 %v3587_v53  ;;  %v2283_v22 = vrot.slane %v2998_v17, 5  ;;  %v3003_v40 = vld [vmem:[%s3713_s26 + $0x48] sm:$0xe] }
  0x7f   : > { %v2014_v37 = vor.u32 %v2013_v28, %v2010_v27  ;;  %v2052_v57 = vrot.slane %v2050_v49, 4  ;;  %v2055_v58 = vrot.slane %v2053_v50, 5  ;;  %v3598_v28 = vld [vmem:[%s4141_s1 + $0x220] sm:$0xff]   ;;  %v3601_v50 = vld [vmem:[%s4141_s1 + $0x238] sm:$0xff]  }
  0x80   : > { %3282 = vmatpush3.bf16.msra.mxu1 %v3585_v48  ;;  %v2284_v27 = vsel %vm3824_vm5, %v3009_v20, %v2283_v22 }
  0x81   : > { %3378 = vmatpush3.bf16.msra.mxu0 %v3587_v53  ;;  %3283 = vmatprep.subr.bf16.mxu1 %v3588_v1  ;;  %v2015_v48 = vrot.slane %v2014_v37, 4  ;;  %v2038_v53 = vrot.slane %v2036_v45, 4  ;;  %v2056_v0 = vor.u32 %v2055_v58, %v2052_v57  ;;  %v2996_v37 = vld [vmem:[%s3713_s26 + $0x2c] sm:$0x1] }
  0x82   : > { %3379 = vmatprep.subr.bf16.mxu0 %v3589_v2  ;;  %v2279_v45 = vrot.slane %v2996_v37, 5 }
  0x83   : > { %v2020_v56 = vsel %vm3737_vm2, %v2015_v48, %v2019_v29  ;;  %v2042_v62 = vor.u32 %v2041_v54, %v2038_v53  ;;  %v2057_v3 = vrot.slane %v2056_v0, 4  ;;  %v2288_v29 = vsel %vm3824_vm5, %v3010_v23, %v2287_v25  ;;  %v3042_v25 = vld [vmem:[%s4143_s3] ss:$0 sm:$0xff] }
  0x84   : > { %3284 = vmatpush3.bf16.msra.mxu1 %v3588_v1  ;;  %v2979_v63 = vcombine.low %v2020_v56, %v2034_v61  ;;  %v3595_v1 = vld [vmem:[%s3713_s26 + $0x38] ss:$8 sps:$4 sm:$0xff]   ;;  %v3012_v48 = vrot.slane %v3003_v40, 9  ;;  %v2292_v53 = vsel %vm3824_vm5, %v3011_v46, %v2291_v47 }
  0x85   : > { %3380 = vmatpush3.bf16.msra.mxu0 %v3589_v2  ;;  %3413 = vmatprep.subr.bf16.mxu1 %v3592_v26  ;;  %v2043_v2 = vrot.slane %v2042_v62, 4  ;;  %v2062_v9 = vsel %vm3737_vm2, %v2057_v3, %v2061_v59 }
  0x86   : > { %3389 = vmatprep.subr.bf16.mxu0 %v3592_v26 }
  0x87   : > { %3286 = vmatmul.mubr.bf16.vlgmr.msra.gmra.mrb[0].mxu1 %v3591_v30  ;;  %v2048_v5 = vsel %vm3737_vm2, %v2043_v2, %v2047_v55  ;;  %v3031_v30 = vcombine.low %v2284_v27, %v2288_v29 }
  0x88   : > { %3382 = vmatmul.mubr.bf16.vlgmr.msra.gmra.mrb[0].mxu0 %v2978_v36  ;;  %3421 = vmatpush3.bf16.msra.mxu1 %v3592_v26  ;;  %v2980_v15 = vcombine.low %v2048_v5, %v2062_v9  ;;  %v2995_v36 = vld [vmem:[%s3713_s26 + $0x28] sm:$0xe] }
  0x89   : > { %3390 = vmatpush3.bf16.msra.mxu0 %v3592_v26  ;;  %3414 = vmatprep.subr.bf16.mxu1 %v3593_v41  ;;  %v3029_v26 = vcombine.low %v2268_v21, %v2272_v24  ;;  %v3008_v44 = vrot.slane %v2995_v36, 9 }
  0x8a   : > { %3391 = vmatprep.subr.bf16.mxu0 %v3593_v41  ;;  %3289 = vmatprep.mubr.bf16.mxu1 %v3594_v42  ;;  %v3007_v42 = vrot.slane %v2993_v34, 9 }
  0x8b   : > { %3385 = vmatprep.mubr.bf16.mxu0 %v2979_v63  ;;  %v2280_v52 = vsel %vm3824_vm5, %v3008_v44, %v2279_v45 }
  0x8c   : > { %3422 = vmatpush3.bf16.msra.mxu1 %v3593_v41  ;;  %v2276_v51 = vsel %vm3824_vm5, %v3007_v42, %v2275_v43 }
  0x8d   : > { %3392 = vmatpush3.bf16.msra.mxu0 %v3593_v41  ;;  %3415 = vmatprep.subr.bf16.mxu1 %v3596_v60  ;;  %v3004_v41 = vld [vmem:[%s3713_s26 + $0x4c] sm:$0x1]  ;;  %v3030_v55 = vcombine.low %v2276_v51, %v2280_v52  ;;  %s3045_s26 = sshll.u32 %s4155_s18, 5 }
  0x8e   : > { %3393 = vmatprep.subr.bf16.mxu0 %v3596_v60  ;;  %v2295_v49 = vrot.slane %v3004_v41, 5  ;;  %s312_s6 = scalar_lea.vmem %s4144_s4, %s3045_s26  ;;  %s320_s13 = scalar_lea.vmem %s4145_s5, %s3045_s26 }
  0x8f   : > { %3290 = vmatmul.mubr.bf16.gmra.mrb[4].mxu1 %v3595_v1  ;;  %v3083_v8 = vld [vmem:[%s312_s6 + $0x8] sm:$0xff]   ;;  %v3085_v9 = vld [vmem:[%s312_s6 + $0x18] sm:$0xff]   ;;  %v3084_v11 = vld [vmem:[%s312_s6 + $0x10] sm:$0xff]  }
  0x90   : > { %3386 = vmatmul.mubr.bf16.gmra.mrb[4].mxu0 %v2980_v15  ;;  %3423 = vmatpush3.bf16.msra.mxu1 %v3596_v60  ;;  %v2296_v54 = vsel %vm3824_vm5, %v3012_v48, %v2295_v49  ;;  %v3053_v14 = vunpack.c.l.bf16 %v3083_v8  ;;  %v3061_v16 = vunpack.c.l.bf16 %v3085_v9  ;;  %v3057_v19 = vunpack.c.l.bf16 %v3084_v11 }
  0x91   : > { %3394 = vmatpush3.bf16.msra.mxu0 %v3596_v60  ;;  %3416 = vmatprep.subr.bf16.mxu1 %v3597_v10  ;;  %v3032_v56 = vcombine.low %v2292_v53, %v2296_v54  ;;  %v3054_v23 = vunpack.c.h.bf16 %v3083_v8  ;;  %v3062_v24 = vunpack.c.h.bf16 %v3085_v9 }
  0x92   : > { %3395 = vmatprep.subr.bf16.mxu0 %v3597_v10  ;;  %3405 = vmatprep.mubr.bf16.mxu0 %v3029_v26 }
  0x93   : > { %3409 = vmatprep.mubr.bf16.mxu1 %v3031_v30 }
  0x94   : > { %3424 = vmatpush3.bf16.msra.mxu1 %v3597_v10 }
  0x95   : > { %3396 = vmatpush3.bf16.msra.mxu0 %v3597_v10  ;;  %3417 = vmatprep.subr.bf16.mxu1 %v3598_v28  ;;  %v3048_v10 = vld [vmem:[%s312_s6] sm:$0xff]  }
  0x96   : > { %3397 = vmatprep.subr.bf16.mxu0 %v3598_v28  ;;  %v3049_v17 = vunpack.c.l.bf16 %v3048_v10  ;;  %v3050_v30 = vunpack.c.h.bf16 %v3048_v10 }
  0x98   : > { %3425 = vmatpush3.bf16.msra.mxu1 %v3598_v28 }
  0x99   : > { %3398 = vmatpush3.bf16.msra.mxu0 %v3598_v28  ;;  %3418 = vmatprep.subr.bf16.mxu1 %v3599_v31 }
  0x9a   : > { %3399 = vmatprep.subr.bf16.mxu0 %v3599_v31 }
  0x9c   : > { %3426 = vmatpush3.bf16.msra.mxu1 %v3599_v31 }
  0x9d   : > { %3400 = vmatpush3.bf16.msra.mxu0 %v3599_v31  ;;  %3419 = vmatprep.subr.bf16.mxu1 %v3600_v32  ;;  %v3058_v31 = vunpack.c.h.bf16 %v3084_v11 }
  0x9e   : > { %3401 = vmatprep.subr.bf16.mxu0 %v3600_v32 }
  0xa0   : > { %3427 = vmatpush3.bf16.msra.mxu1 %v3600_v32 }
  0xa1   : > { %3402 = vmatpush3.bf16.msra.mxu0 %v3600_v32  ;;  %3420 = vmatprep.subr.bf16.mxu1 %v3601_v50 }
  0xa2   : > { %3403 = vmatprep.subr.bf16.mxu0 %v3601_v50 }
  0xa4   : > { %3428 = vmatpush3.bf16.msra.mxu1 %v3601_v50 }
  0xa5   : > { %3404 = vmatpush3.bf16.msra.mxu0 %v3601_v50 }
  0xa7   : > { %3410 = vmatmul.mubr.bf16.vlgmr.msra.gmra.mrb[8].mxu1 %v3032_v56 }
  0xa8   : > { %3406 = vmatmul.mubr.bf16.vlgmr.msra.gmra.mrb[0].mxu0 %v3030_v55 }
 0x15a   : > { %v3287_v57 = vpop.f32.mrb[0].mxu1 }
 0x15b   : > { %v1161_v58 = vpop.f32.mrb[1].mxu1 }
 0x15c   : > { %v3288_v59 = vpop.f32.mrb[2].mxu1 }
 0x15d   : > { %v1164_v60 = vpop.f32.mrb[3].mxu1 }
 0x162   : > { %v3291_v61 = vpop.f32.mrb[4].mxu1 }
 0x163   : > { %v3387_v62 = vpop.f32.mrb[4].mxu0  ;;  %v1177_v0 = vpop.f32.mrb[5].mxu1 }
 0x164   : > { %v3433_v63 = vadd.f32 %v3387_v62, %v3291_v61  ;;  %v2194_v18 = vpop.f32.mrb[5].mxu0  ;;  %v3292_v2 = vpop.f32.mrb[6].mxu1 }
 0x165   : > { %v3435_v1 = vadd.f32 %v2194_v18, %v1177_v0  ;;  %v3388_v3 = vpop.f32.mrb[6].mxu0  ;;  %v1180_v5 = vpop.f32.mrb[7].mxu1 }
 0x166   : > { %v3437_v4 = vadd.f32 %v3388_v3, %v3292_v2  ;;  %v2197_v6 = vpop.f32.mrb[7].mxu0 }
 0x167   : > { %v3439_v7 = vadd.f32 %v2197_v6, %v1180_v5 }
 0x17a   : > { %v3411_v15 = vpop.f32.mrb[8].mxu1 }
 0x17b   : > { %v3407_v12 = vpop.f32.mrb[0].mxu0  ;;  %v3434_v21 = vadd.f32 %v3433_v63, %v3411_v15  ;;  %v2428_v22 = vpop.f32.mrb[9].mxu1 }
 0x17c   : > { %v3429_v20 = vadd.f32 %v3407_v12, %v3287_v57  ;;  %v2412_v33 = vpop.f32.mrb[1].mxu0  ;;  %v3436_v27 = vadd.f32 %v3435_v1, %v2428_v22  ;;  %v3412_v29 = vpop.f32.mrb[10].mxu1 }
 0x17d   : > { %v3430_v26 = vadd.f32 %v2412_v33, %v1161_v58  ;;  %v3408_v28 = vpop.f32.mrb[2].mxu0  ;;  %v2488_v34 = vmul.f32 %v3434_v21, %v3041_v13  ;;  %v3438_v36 = vadd.f32 %v3437_v4, %v3412_v29  ;;  %v2431_v38 = vpop.f32.mrb[11].mxu1 }
 0x17e   : > { %v2484_v32 = vmul.f32 %v3429_v20, %v3041_v13  ;;  %v3431_v35 = vadd.f32 %v3408_v28, %v3288_v59  ;;  %v2415_v37 = vpop.f32.mrb[3].mxu0  ;;  %v2486_v40 = vmul.f32 %v3436_v27, %v3041_v13  ;;  %v3440_v42 = vadd.f32 %v3439_v7, %v2431_v38 }
 0x17f   : > { %v2482_v39 = vmul.f32 %v3430_v26, %v3041_v13  ;;  %v3432_v41 = vadd.f32 %v2415_v37, %v1164_v60  ;;  %v2503_v44 = vadd.f32 %v3042_v25, %v2488_v34  ;;  %v2489_v46 = vmul.f32 %v3438_v36, %v3041_v13 }
 0x180   : > { %v2499_v43 = vadd.f32 %v3042_v25, %v2484_v32  ;;  %v2485_v45 = vmul.f32 %v3431_v35, %v3041_v13  ;;  %v2501_v48 = vadd.f32 %v3042_v25, %v2486_v40  ;;  %v2487_v50 = vmul.f32 %v3440_v42, %v3041_v13 }
 0x181   : > { %v2497_v47 = vadd.f32 %v3042_v25, %v2482_v39  ;;  %v2483_v49 = vmul.f32 %v3432_v41, %v3041_v13  ;;  %v2527_v52 = vadd.f32 %v3061_v16, %v2503_v44  ;;  %v2504_v54 = vadd.f32 %v3042_v25, %v2489_v46 }
 0x182   : > { %v2523_v51 = vadd.f32 %v3053_v14, %v2499_v43  ;;  %v2500_v53 = vadd.f32 %v3042_v25, %v2485_v45  ;;  %v2525_v56 = vadd.f32 %v3057_v19, %v2501_v48  ;;  %v2502_v58 = vadd.f32 %v3042_v25, %v2487_v50 }
 0x183   : > { %v2521_v55 = vadd.f32 %v3049_v17, %v2497_v47  ;;  %v2498_v57 = vadd.f32 %v3042_v25, %v2483_v49  ;;  %v2528_v60 = vadd.f32 %v3062_v24, %v2504_v54  ;;  %v2535_v0 = vmax.f32 %v2527_v52, 0.0 }
 0x184   : > { %v2524_v59 = vadd.f32 %v3054_v23, %v2500_v53  ;;  %v2526_v62 = vadd.f32 %v3058_v31, %v2502_v58  ;;  %v2531_v63 = vmax.f32 %v2523_v51, 0.0  ;;  %v2533_v3 = vmax.f32 %v2525_v56, 0.0 }
 0x185   : > { %v2522_v61 = vadd.f32 %v3050_v30, %v2498_v57  ;;  %v2536_v1 = vmax.f32 %v2528_v60, 0.0  ;;  %v2529_v2 = vmax.f32 %v2521_v55, 0.0 }
 0x186   : > { %v2532_v18 = vmax.f32 %v2524_v59, 0.0  ;;  %v2534_v5 = vmax.f32 %v2526_v62, 0.0 }
 0x187   : > { %v2530_v4 = vmax.f32 %v2522_v61, 0.0  ;;  %v3081_v7 = vpack.c.bf16 %v2536_v1, %v2535_v0 }
 0x188   : > { %v3071_v6 = vpack.c.bf16 %v2532_v18, %v2531_v63  ;;  %v3076_v9 = vpack.c.bf16 %v2534_v5, %v2533_v3 }
 0x189   : > { %v3066_v8 = vpack.c.bf16 %v2530_v4, %v2529_v2  ;;  %3088 = vst [vmem:[%s320_s13 + $0x18] sm:$0xff] %v3081_v7  }
 0x18a   : > { %3086 = vst [vmem:[%s320_s13 + $0x8] sm:$0xff] %v3071_v6   ;;  %3087 = vst [vmem:[%s320_s13 + $0x10] sm:$0xff] %v3076_v9  }
 0x18b   : > { %3067 = vst [vmem:[%s320_s13] sm:$0xff] %v3066_v8  }
 0x18c PF: > { %s15_s20 = sadd.s32 1, %s3624_s20   ;;  %s4150_s18 = smov %s3620_s19 }
 0x18d   : > { %p12_p5 = scmp.ge.s32.totalorder %s15_s20, 4   ;;  %s4151_s19 = smov %s4153_s21 }
 0x18f   :  { %14 = sbr.rel (!%p12_p5) target bundleno = 2 (0x2), region = 92 }

// kernel: forward.6
= control target key start
LH: loop header
LB: loop body
LE: loop exit
PB: predicated region body
PF: predicated region fallthrough
CT: control target
= control target key end

     0   :  { %s8416_s18 = smov 0   ;;  %s8418_s19 = smov 0   ;;  %s9669_s0 = inlined_call_operand.vmem [shape: bf16[2,18,18,128], index: 0, kind: input, shape index: {}]   ;;  %s9670_s1 = inlined_call_operand.vmem [shape: bf16[3,3,128,128], index: 1, kind: input, shape index: {}]   ;;  %s9671_s2 = inlined_call_operand.vmem [shape: f32[1,128], index: 2, kind: input, shape index: {}]   ;;  %s9672_s3 = inlined_call_operand.vmem [shape: f32[1,128], index: 3, kind: input, shape index: {}]   ;;  %s9673_s4 = inlined_call_operand.vmem [shape: bf16[2,16,16,128], index: 4, kind: input, shape index: {}]   ;;  %s9674_s5 = inlined_call_operand.vmem [shape: bf16[2,16,16,128], index: 5, kind: output, shape index: {}]  }
   0x1   :  { %s8420_s20 = smov 0  }
   0x2 LB: > { %s27_s21 = sadd.s32 1, %s8380_s19  ;;  %p6391_p0 = scmp.ge.s32.totalorder %s8384_s20, 1  ;;  %s8384_s20 = sphi %s8420_s20, %s15_s20   ;;  %s8380_s19 = sphi %s8418_s19, %s9680_s19   ;;  %s8376_s18 = sphi %s8416_s18, %s9679_s18  }
   0x3   : > { %p29_p1 = scmp.ge.s32.totalorder %s27_s21, 2  ;;  %p241_p2 = scmp.lt.s32.totalorder %s8384_s20, 3 }
   0x5   : > { %s9682_s21 = smov (%p29_p1, %s27_s21), 0  ;;  %p242_p3 = pnand %p6391_p0, %p241_p2 }
   0x6   : > { %v8234_v0 = vld [vmem:[%s9670_s1] sm:$0xff] (!%p242_p3)   ;;  %v8236_v2 = vld [vmem:[%s9670_s1 + $0x8] sm:$0xff] (!%p242_p3)   ;;  %p290_p4 = scmp.lt.s32.totalorder (!%p242_p3), %s8376_s18, 1  ;;  %v8238_v4 = vld [vmem:[%s9670_s1 + $0x10] sm:$0xff] (!%p242_p3)   ;;  %vm755_vm0 = vsmask.f32 (!%p242_p3), 3328 }
   0x7   : > { %245 = sbr.rel (%p242_p3) target bundleno = 562 (0x232), region = 40  ;;  %v8235_v1 = vld [vmem:[%s9670_s1 + $0x100] sm:$0xff] (!%p242_p3)   ;;  %7505 = vmatprep.subr.bf16.mxu1 (!%p242_p3), %v8234_v0  ;;  %v8237_v3 = vld [vmem:[%s9670_s1 + $0x108] sm:$0xff] (!%p242_p3)   ;;  %v8239_v5 = vld [vmem:[%s9670_s1 + $0x110] sm:$0xff] (!%p242_p3)   ;;  %vm756_vm1 = vsmask.f32 (!%p242_p3), 7440 }
   0x8   : > { %7697 = vmatprep.subr.bf16.mxu0 (!%p242_p3), %v8235_v1  ;;  %7506 = vmatpush3.bf16.msra.mxu1 (!%p242_p3), %v8234_v0  ;;  %v8240_v6 = vld [vmem:[%s9670_s1 + $0x18] sm:$0xff] (!%p242_p3)   ;;  %v8242_v8 = vld [vmem:[%s9670_s1 + $0x20] sm:$0xff] (!%p242_p3)   ;;  %v8244_v10 = vld [vmem:[%s9670_s1 + $0x28] sm:$0xff] (!%p242_p3)   ;;  %vm1624_vm3 = vcmask (!%p242_p3), 1042432   ;;  %vm1625_vm4 = vcmask (!%p242_p3), 1046532  }
   0x9   : > { %7698 = vmatpush3.bf16.msra.mxu0 (!%p242_p3), %v8235_v1  ;;  %7507 = vmatprep.subr.bf16.mxu1 (!%p242_p3), %v8236_v2  ;;  %v8241_v7 = vld [vmem:[%s9670_s1 + $0x118] sm:$0xff] (!%p242_p3)   ;;  %v8243_v9 = vld [vmem:[%s9670_s1 + $0x120] sm:$0xff] (!%p242_p3)   ;;  %v8245_v11 = vld [vmem:[%s9670_s1 + $0x128] sm:$0xff] (!%p242_p3)  }
   0xa   : > { %7699 = vmatprep.subr.bf16.mxu0 (!%p242_p3), %v8237_v3  ;;  %v8246_v18 = vld [vmem:[%s9670_s1 + $0x30] sm:$0xff] (!%p242_p3)   ;;  %v8248_v32 = vld [vmem:[%s9670_s1 + $0x38] sm:$0xff] (!%p242_p3)   ;;  %vm8496_vm2 = vmor (!%p242_p3), %vm755_vm0, %vm756_vm1 }
   0xb   : > { %v8247_v24 = vld [vmem:[%s9670_s1 + $0x130] sm:$0xff] (!%p242_p3)   ;;  %v8249_v38 = vld [vmem:[%s9670_s1 + $0x138] sm:$0xff] (!%p242_p3)   ;;  %v8252_v47 = vld [vmem:[%s9670_s1 + $0x40] sm:$0xff] (!%p242_p3)  }
   0xc   : > { %7508 = vmatpush3.bf16.msra.mxu1 (!%p242_p3), %v8236_v2  ;;  %v8253_v52 = vld [vmem:[%s9670_s1 + $0x140] sm:$0xff] (!%p242_p3)   ;;  %vm8596_vm5 = vmor (!%p242_p3), %vm1624_vm3, %vm1625_vm4 }
   0xd   : > { %7700 = vmatpush3.bf16.msra.mxu0 (!%p242_p3), %v8237_v3  ;;  %7509 = vmatprep.subr.bf16.mxu1 (!%p242_p3), %v8238_v4 }
   0xe   : > { %s9684_s18 = smov (!%p290_p4, %s8376_s18), 1  ;;  %7701 = vmatprep.subr.bf16.mxu0 %v8239_v5 }
   0xf   : > { %s8209_s13 = smul.u32 216, %s9684_s18 }
  0x10   : > { %7510 = vmatpush3.bf16.msra.mxu1 %v8238_v4 }
  0x11   : > { %7702 = vmatpush3.bf16.msra.mxu0 %v8239_v5  ;;  %7511 = vmatprep.subr.bf16.mxu1 %v8240_v6  ;;  %s8473_s26 = scalar_lea.vmem %s9669_s0, %s8209_s13 }
  0x12   : > { %7703 = vmatprep.subr.bf16.mxu0 %v8241_v7  ;;  %v8250_v12 = vld [vmem:[%s8473_s26] sm:$0xff]   ;;  %v6589_v13 = vld [vmem:[%s8473_s26 + $0xc] sm:$0xf]  ;;  %v6590_v14 = vld [vmem:[%s8473_s26 + $0x10] sm:$0xf] }
  0x13   : > { %7521 = vmatprep.mubr.bf16.mxu1 %v8250_v12  ;;  %v6591_v15 = vld [vmem:[%s8473_s26 + $0x14] sm:$0x1]  ;;  %v2625_v16 = vshrl.u32 %v6589_v13, 16  ;;  %v2628_v17 = vshll.u32 %v6589_v13, 16  ;;  %v2634_v19 = vshll.u32 %v6590_v14, 16  ;;  %v2638_v20 = vshrl.u32 %v6590_v14, 16 }
  0x14   : > { %7512 = vmatpush3.bf16.msra.mxu1 %v8240_v6  ;;  %v2644_v21 = vshll.u32 %v6591_v15, 16  ;;  %v6592_v29 = vld [vmem:[%s8473_s26 + $0x18] sm:$0xf]  ;;  %v6593_v30 = vld [vmem:[%s8473_s26 + $0x1c] sm:$0xf]  ;;  %v8251_v55 = vld [vmem:[%s8473_s26 + $0xc] sm:$0xff]  }
  0x15   : > { %7704 = vmatpush3.bf16.msra.mxu0 %v8241_v7  ;;  %7513 = vmatprep.subr.bf16.mxu1 %v8242_v8  ;;  %v2627_v22 = vrot.slane %v2625_v16, 4  ;;  %v2630_v23 = vrot.slane %v2628_v17, 5  ;;  %v2636_v25 = vrot.slane %v2634_v19, 5  ;;  %v2640_v26 = vrot.slane %v2638_v20, 4  ;;  %v6594_v31 = vld [vmem:[%s8473_s26 + $0x20] sm:$0x1] }
  0x16   : > { %7705 = vmatprep.subr.bf16.mxu0 %v8243_v9  ;;  %v2646_v27 = vrot.slane %v2644_v21, 5  ;;  %v2649_v35 = vshrl.u32 %v6592_v29, 16  ;;  %v2652_v36 = vshll.u32 %v6592_v29, 16  ;;  %v2658_v37 = vshll.u32 %v6593_v30, 16  ;;  %v6595_v53 = vld [vmem:[%s8473_s26 + $0x24] sm:$0xf] }
  0x17   : > { %v2631_v28 = vor.u32 %v2630_v23, %v2627_v22  ;;  %v2641_v34 = vor.u32 %v2640_v26, %v2636_v25  ;;  %v2662_v40 = vshrl.u32 %v6593_v30, 16  ;;  %v2668_v41 = vshll.u32 %v6594_v31, 16  ;;  %v6596_v57 = vld [vmem:[%s8473_s26 + $0x28] sm:$0xf]  ;;  %v6597_v58 = vld [vmem:[%s8473_s26 + $0x2c] sm:$0x1] }
  0x18   : > { %7514 = vmatpush3.bf16.msra.mxu1 %v8242_v8  ;;  %v2651_v43 = vrot.slane %v2649_v35, 4  ;;  %v2654_v44 = vrot.slane %v2652_v36, 5  ;;  %v2660_v45 = vrot.slane %v2658_v37, 5  ;;  %v2673_v59 = vshrl.u32 %v6595_v53, 16  ;;  %v8255_v2 = vld [vmem:[%s8473_s26 + $0x18] sm:$0xff]   ;;  %v8254_v6 = vld [vmem:[%s9670_s1 + $0x148] sm:$0xff]  }
  0x19   : > { %7706 = vmatpush3.bf16.msra.mxu0 %v8243_v9  ;;  %7515 = vmatprep.subr.bf16.mxu1 %v8244_v10  ;;  %v2632_v39 = vrot.slane %v2631_v28, 4  ;;  %v2642_v42 = vrot.slane %v2641_v34, 4  ;;  %v2664_v48 = vrot.slane %v2662_v40, 4  ;;  %v2670_v51 = vrot.slane %v2668_v41, 5  ;;  %v6598_v13 = vld [vmem:[%s8473_s26 + $0x30] sm:$0xf] }
  0x1a   : > { %7707 = vmatprep.subr.bf16.mxu0 %v8245_v11  ;;  %v2655_v50 = vor.u32 %v2654_v44, %v2651_v43  ;;  %v2676_v60 = vshll.u32 %v6595_v53, 16  ;;  %v2682_v62 = vshll.u32 %v6596_v57, 16  ;;  %v2686_v63 = vshrl.u32 %v6596_v57, 16  ;;  %v6599_v14 = vld [vmem:[%s8473_s26 + $0x34] sm:$0xf]  ;;  %v8256_v28 = vld [vmem:[%s8473_s26 + $0x24] sm:$0xff]  }
  0x1b   : > { %v2637_v46 = vsel %vm8496_vm2, %v2632_v39, %v2636_v25  ;;  %v2647_v49 = vsel %vm8496_vm2, %v2642_v42, %v2646_v27  ;;  %v2665_v56 = vor.u32 %v2664_v48, %v2660_v45  ;;  %v2692_v0 = vshll.u32 %v6597_v58, 16  ;;  %v6600_v17 = vld [vmem:[%s8473_s26 + $0x38] sm:$0x1]  ;;  %v8258_v31 = vld [vmem:[%s9670_s1 + $0x150] sm:$0xff]   ;;  %v6601_v39 = vld [vmem:[%s8473_s26 + $0x3c] sm:$0xf] }
  0x1c   : > { %7516 = vmatpush3.bf16.msra.mxu1 %v8244_v10  ;;  %v6653_v54 = vcombine.low %v2637_v46, %v2647_v49  ;;  %v2656_v61 = vrot.slane %v2655_v50, 4  ;;  %v2675_v3 = vrot.slane %v2673_v59, 4  ;;  %v2678_v4 = vrot.slane %v2676_v60, 5  ;;  %v8257_v10 = vld [vmem:[%s9670_s1 + $0x48] sm:$0xff]   ;;  %v8260_v36 = vld [vmem:[%s8473_s26 + $0x30] sm:$0xff]  }
  0x1d   : > { %7708 = vmatpush3.bf16.msra.mxu0 %v8245_v11  ;;  %7517 = vmatprep.subr.bf16.mxu1 %v8246_v18  ;;  %v2666_v1 = vrot.slane %v2665_v56, 4  ;;  %v2684_v7 = vrot.slane %v2682_v62, 5  ;;  %v2688_v8 = vrot.slane %v2686_v63, 4  ;;  %v2694_v9 = vrot.slane %v2692_v0, 5  ;;  %v6602_v40 = vld [vmem:[%s8473_s26 + $0x40] sm:$0xf] }
  0x1e   : > { %7709 = vmatprep.subr.bf16.mxu0 %v8247_v24  ;;  %7713 = vmatprep.mubr.bf16.mxu0 %v6653_v54  ;;  %v2661_v5 = vsel %vm8496_vm2, %v2656_v61, %v2660_v45  ;;  %v2679_v12 = vor.u32 %v2678_v4, %v2675_v3  ;;  %v2700_v19 = vshll.u32 %v6598_v13, 16  ;;  %v2706_v21 = vshll.u32 %v6599_v14, 16  ;;  %v6603_v41 = vld [vmem:[%s8473_s26 + $0x44] sm:$0x1]  ;;  %v8262_v54 = vld [vmem:[%s9670_s1 + $0x50] sm:$0xff]  }
  0x1f   : > { %v2671_v11 = vsel %vm8496_vm2, %v2666_v1, %v2670_v51  ;;  %v2689_v16 = vor.u32 %v2688_v8, %v2684_v7  ;;  %v2710_v22 = vshrl.u32 %v6599_v14, 16  ;;  %v2716_v23 = vshll.u32 %v6600_v17, 16  ;;  %v6604_v58 = vld [vmem:[%s8473_s26 + $0x48] sm:$0xf]  ;;  %v6605_v61 = vld [vmem:[%s8473_s26 + $0x4c] sm:$0xf] }
  0x20   : > { %7518 = vmatpush3.bf16.msra.mxu1 %v8246_v18  ;;  %v6654_v15 = vcombine.low %v2661_v5, %v2671_v11  ;;  %v2697_v18 = vshrl.u32 %v6598_v13, 16  ;;  %v2680_v20 = vrot.slane %v2679_v12, 4  ;;  %v2702_v26 = vrot.slane %v2700_v19, 5  ;;  %v6606_v62 = vld [vmem:[%s8473_s26 + $0x50] sm:$0x1]  ;;  %v8263_v8 = vld [vmem:[%s9670_s1 + $0x160] sm:$0xff]  }
  0x21   : > { %7710 = vmatpush3.bf16.msra.mxu0 %v8247_v24  ;;  %7519 = vmatprep.subr.bf16.mxu1 %v8248_v32  ;;  %v2690_v24 = vrot.slane %v2689_v16, 4  ;;  %v2708_v29 = vrot.slane %v2706_v21, 5  ;;  %v2712_v30 = vrot.slane %v2710_v22, 4  ;;  %v2718_v35 = vrot.slane %v2716_v23, 5  ;;  %v6607_v19 = vld [vmem:[%s8473_s26 + $0x54] sm:$0xf] }
  0x22   : > { %7711 = vmatprep.subr.bf16.mxu0 %v8249_v38  ;;  %v2699_v25 = vrot.slane %v2697_v18, 4  ;;  %v2685_v27 = vsel %vm8496_vm2, %v2680_v20, %v2684_v7  ;;  %v2721_v43 = vshrl.u32 %v6601_v39, 16  ;;  %v2724_v44 = vshll.u32 %v6601_v39, 16  ;;  %v8265_v18 = vld [vmem:[%s8473_s26 + $0x48] sm:$0xff]   ;;  %v6608_v20 = vld [vmem:[%s8473_s26 + $0x58] sm:$0xf] }
  0x23   : > { %v2730_v45 = vshll.u32 %v6602_v40, 16  ;;  %v2734_v48 = vshrl.u32 %v6602_v40, 16  ;;  %v2740_v49 = vshll.u32 %v6603_v41, 16  ;;  %v2745_v63 = vshrl.u32 %v6604_v58, 16  ;;  %v8264_v23 = vld [vmem:[%s9670_s1 + $0x168] sm:$0xff]   ;;  %v8266_v39 = vld [vmem:[%s8473_s26 + $0x54] sm:$0xff]  }
  0x24   : > { %7520 = vmatpush3.bf16.msra.mxu1 %v8248_v32  ;;  %v2695_v32 = vsel %vm8496_vm2, %v2690_v24, %v2694_v9  ;;  %v2703_v34 = vor.u32 %v2702_v26, %v2699_v25  ;;  %v2723_v51 = vrot.slane %v2721_v43, 4  ;;  %v2748_v0 = vshll.u32 %v6604_v58, 16  ;;  %v6609_v24 = vld [vmem:[%s8473_s26 + $0x5c] sm:$0x1]  ;;  %v6610_v43 = vld [vmem:[%s8473_s26 + $0x60] sm:$0xf] }
  0x25   : > { %7712 = vmatpush3.bf16.msra.mxu0 %v8249_v38  ;;  %7553 = vmatprep.subr.bf16.mxu1 %v8252_v47  ;;  %v6655_v37 = vcombine.low %v2685_v27, %v2695_v32  ;;  %v2713_v38 = vor.u32 %v2712_v30, %v2708_v29  ;;  %v2732_v53 = vrot.slane %v2730_v45, 5  ;;  %v2736_v56 = vrot.slane %v2734_v48, 4  ;;  %v8267_v40 = vld [vmem:[%s9670_s1 + $0x58] sm:$0xff]   ;;  %v6612_v45 = vld [vmem:[%s8473_s26 + $0x68] sm:$0x1] }
  0x26   : > { %7745 = vmatprep.subr.bf16.mxu0 %v8253_v52  ;;  %v2704_v42 = vrot.slane %v2703_v34, 4  ;;  %v2742_v57 = vrot.slane %v2740_v49, 5  ;;  %v2758_v3 = vshrl.u32 %v6605_v61, 16  ;;  %v2764_v4 = vshll.u32 %v6606_v62, 16 }
  0x27   : > { %7522 = vmatmul.mubr.bf16.vlgmr.msra.gmra.mrb[0].mxu1 %v8251_v55  ;;  %v2714_v46 = vrot.slane %v2713_v38, 4  ;;  %v2737_v1 = vor.u32 %v2736_v56, %v2732_v53  ;;  %v2750_v7 = vrot.slane %v2748_v0, 5  ;;  %v2769_v25 = vshrl.u32 %v6607_v19, 16  ;;  %v6677_v0 = vld [vmem:[%s8473_s26 + $0xc] sm:$0xe] }
  0x28   : > { %7714 = vmatmul.mubr.bf16.vlgmr.msra.gmra.mrb[0].mxu0 %v6654_v15  ;;  %7554 = vmatpush3.bf16.msra.mxu1 %v8252_v47  ;;  %v8259_v47 = vld [vmem:[%s9670_s1 + $0x158] sm:$0xff]   ;;  %v2709_v50 = vsel %vm8496_vm2, %v2704_v42, %v2708_v29  ;;  %v2760_v12 = vrot.slane %v2758_v3, 4  ;;  %v2766_v17 = vrot.slane %v2764_v4, 5  ;;  %v2772_v26 = vshll.u32 %v6607_v19, 16 }
  0x29   : > { %7746 = vmatpush3.bf16.msra.mxu0 %v8253_v52  ;;  %7525 = vmatprep.mubr.bf16.mxu1 %v8255_v2  ;;  %v2726_v52 = vrot.slane %v2724_v44, 5  ;;  %v2719_v55 = vsel %vm8496_vm2, %v2714_v46, %v2718_v35  ;;  %v2754_v2 = vshll.u32 %v6605_v61, 16  ;;  %v2738_v9 = vrot.slane %v2737_v1, 4  ;;  %v6611_v44 = vld [vmem:[%s8473_s26 + $0x64] sm:$0xf] }
  0x2a   : > { %7747 = vmatprep.subr.bf16.mxu0 %v8254_v6  ;;  %7555 = vmatprep.subr.bf16.mxu1 %v8257_v10  ;;  %v6656_v59 = vcombine.low %v2709_v50, %v2719_v55  ;;  %v2782_v29 = vshrl.u32 %v6608_v20, 16  ;;  %v2788_v30 = vshll.u32 %v6609_v24, 16  ;;  %v2771_v32 = vrot.slane %v2769_v25, 4  ;;  %v8268_v50 = vld [vmem:[%s9670_s1 + $0x170] sm:$0xff]  }
  0x2b   : > { %7717 = vmatprep.mubr.bf16.mxu0 %v6655_v37  ;;  %v2727_v60 = vor.u32 %v2726_v52, %v2723_v51  ;;  %v2756_v11 = vrot.slane %v2754_v2, 5  ;;  %v2743_v15 = vsel %vm8496_vm2, %v2738_v9, %v2742_v57  ;;  %v2774_v34 = vrot.slane %v2772_v26, 5 }
  0x2c   : > { %7556 = vmatpush3.bf16.msra.mxu1 %v8257_v10  ;;  %v8261_v10 = vld [vmem:[%s8473_s26 + $0x3c] sm:$0xff]   ;;  %v2784_v37 = vrot.slane %v2782_v29, 4  ;;  %v2790_v38 = vrot.slane %v2788_v30, 5  ;;  %v2796_v48 = vshll.u32 %v6610_v43, 16  ;;  %v2802_v49 = vshll.u32 %v6611_v44, 16 }
  0x2d   : > { %7748 = vmatpush3.bf16.msra.mxu0 %v8254_v6  ;;  %7557 = vmatprep.subr.bf16.mxu1 %v8262_v54  ;;  %v2728_v5 = vrot.slane %v2727_v60, 4  ;;  %v2747_v6 = vrot.slane %v2745_v63, 4  ;;  %v2761_v16 = vor.u32 %v2760_v12, %v2756_v11  ;;  %v2775_v42 = vor.u32 %v2774_v34, %v2771_v32  ;;  %v8269_v60 = vld [vmem:[%s9670_s1 + $0x178] sm:$0xff]   ;;  %v8270_v63 = vld [vmem:[%s8473_s26 + $0x60] sm:$0xff]   ;;  %v6685_v32 = vld [vmem:[%s8473_s26 + $0x2c] sm:$0x1] }
  0x2e   : > { %7749 = vmatprep.subr.bf16.mxu0 %v8258_v31  ;;  %v2806_v52 = vshrl.u32 %v6611_v44, 16  ;;  %v2798_v56 = vrot.slane %v2796_v48, 5  ;;  %v2804_v57 = vrot.slane %v2802_v49, 5  ;;  %v6683_v29 = vld [vmem:[%s8473_s26 + $0x24] sm:$0xe]  ;;  %v8277_v48 = vld [vmem:[%s9670_s1 + $0x188] sm:$0xff]  }
  0x2f   : > { %7526 = vmatmul.mubr.bf16.gmra.mrb[4].mxu1 %v8256_v28  ;;  %v2733_v13 = vsel %vm8496_vm2, %v2728_v5, %v2732_v53  ;;  %v2751_v14 = vor.u32 %v2750_v7, %v2747_v6  ;;  %v2762_v27 = vrot.slane %v2761_v16, 4  ;;  %v2778_v28 = vshll.u32 %v6608_v20, 16  ;;  %v6678_v5 = vld [vmem:[%s8473_s26 + $0x10] sm:$0xf]  ;;  %v6679_v6 = vld [vmem:[%s8473_s26 + $0x14] sm:$0x1] }
  0x30   : > { %7529 = vmatprep.mubr.bf16.mxu1 %v8260_v36  ;;  %7558 = vmatpush3.bf16.msra.mxu1 %v8262_v54  ;;  %v6657_v21 = vcombine.low %v2733_v13, %v2743_v15  ;;  %v2776_v51 = vrot.slane %v2775_v42, 4  ;;  %v2812_v53 = vshll.u32 %v6612_v45, 16  ;;  %v6725_v7 = vrot.slane %v6677_v0, 9  ;;  %v8273_v13 = vld [vmem:[%s9670_s1 + $0x180] sm:$0xff]   ;;  %v6681_v20 = vld [vmem:[%s8473_s26 + $0x1c] sm:$0xf] }
  0x31   : > { %7750 = vmatpush3.bf16.msra.mxu0 %v8258_v31  ;;  %v2752_v22 = vrot.slane %v2751_v14, 4  ;;  %v2767_v35 = vsel %vm8496_vm2, %v2762_v27, %v2766_v17  ;;  %v2780_v36 = vrot.slane %v2778_v28, 5  ;;  %7559 = vmatprep.subr.bf16.mxu1 %v8267_v40  ;;  %v3492_v9 = vrot.slane %v6678_v5, 5  ;;  %v8271_v17 = vld [vmem:[%s8473_s26 + $0x6c] sm:$0xff]   ;;  %v8275_v42 = vld [vmem:[%s8473_s26 + $0x84] sm:$0xff]  }
  0x32   : > { %7718 = vmatmul.mubr.bf16.gmra.mrb[4].mxu0 %v6656_v59  ;;  %7751 = vmatprep.subr.bf16.mxu0 %v8259_v47  ;;  %v2808_v59 = vrot.slane %v2806_v52, 4  ;;  %v2814_v3 = vrot.slane %v2812_v53, 5  ;;  %v3499_v26 = vrot.slane %v6681_v20, 5  ;;  %v6727_v34 = vrot.slane %v6683_v29, 9  ;;  %v6687_v44 = vld [vmem:[%s8473_s26 + $0x34] sm:$0xf] }
  0x33   : > { %7721 = vmatprep.mubr.bf16.mxu0 %v6657_v21  ;;  %v2757_v31 = vsel %vm8496_vm2, %v2752_v22, %v2756_v11  ;;  %v2785_v46 = vor.u32 %v2784_v37, %v2780_v36  ;;  %v2781_v58 = vsel %vm8496_vm2, %v2776_v51, %v2780_v36  ;;  %v8272_v11 = vld [vmem:[%s9670_s1 + $0x60] sm:$0xff]   ;;  %v3493_v15 = vsel %vm8596_vm5, %v6725_v7, %v3492_v9  ;;  %v6692_v0 = vld [vmem:[%s8473_s26 + $0x48] sm:$0xe]  ;;  %v6693_v5 = vld [vmem:[%s8473_s26 + $0x4c] sm:$0xf] }
  0x34   : > { %v6658_v41 = vcombine.low %v2757_v31, %v2767_v35  ;;  %7560 = vmatpush3.bf16.msra.mxu1 %v8267_v40  ;;  %v2809_v2 = vor.u32 %v2808_v59, %v2804_v57  ;;  %v3494_v16 = vrot.slane %v3492_v9, 4  ;;  %v6682_v21 = vld [vmem:[%s8473_s26 + $0x20] sm:$0x1]  ;;  %v3501_v30 = vrot.slane %v3499_v26, 4  ;;  %v6684_v31 = vld [vmem:[%s8473_s26 + $0x28] sm:$0xf] }
  0x35   : > { %7752 = vmatpush3.bf16.msra.mxu0 %v8259_v47  ;;  %v2793_v47 = vshrl.u32 %v6610_v43, 16  ;;  %v2786_v54 = vrot.slane %v2785_v46, 4  ;;  %7561 = vmatprep.subr.bf16.mxu1 %v8272_v11  ;;  %v3502_v27 = vrot.slane %v6682_v21, 5  ;;  %v3506_v36 = vrot.slane %v6684_v31, 5  ;;  %v6686_v43 = vld [vmem:[%s8473_s26 + $0x30] sm:$0xe] }
  0x36   : > { %7753 = vmatprep.subr.bf16.mxu0 %v8263_v8  ;;  %v2810_v12 = vrot.slane %v2809_v2, 4  ;;  %v3509_v37 = vrot.slane %v6685_v32, 5  ;;  %v6688_v46 = vld [vmem:[%s8473_s26 + $0x38] sm:$0x1]  ;;  %v8280_v59 = vld [vmem:[%s9670_s1 + $0x70] sm:$0xff]   ;;  %v6730_v7 = vrot.slane %v6692_v0, 9 }
  0x37   : > { %7530 = vmatmul.mubr.bf16.gmra.mrb[8].mxu1 %v8261_v10  ;;  %v2795_v55 = vrot.slane %v2793_v47, 4  ;;  %v2791_v61 = vsel %vm8496_vm2, %v2786_v54, %v2790_v38  ;;  %v3495_v10 = vrot.slane %v6679_v6, 5  ;;  %v3503_v38 = vsel %vm8596_vm5, %v3501_v30, %v3502_v27  ;;  %v8278_v54 = vld [vmem:[%s8473_s26 + $0x90] sm:$0xff]   ;;  %v6698_v27 = vld [vmem:[%s8473_s26 + $0x60] sm:$0xe]  ;;  %v8285_v31 = vld [vmem:[%s9670_s1 + $0x198] sm:$0xff]  }
  0x38   : > { %7533 = vmatprep.mubr.bf16.mxu1 %v8265_v18  ;;  %v6659_v1 = vcombine.low %v2781_v58, %v2791_v61  ;;  %v6680_v18 = vld [vmem:[%s8473_s26 + $0x18] sm:$0xe]  ;;  %v2815_v19 = vsel %vm8496_vm2, %v2810_v12, %v2814_v3  ;;  %7562 = vmatpush3.bf16.msra.mxu1 %v8272_v11  ;;  %v3507_v40 = vsel %vm8596_vm5, %v6727_v34, %v3506_v36  ;;  %v3513_v47 = vrot.slane %v6687_v44, 5  ;;  %v8279_v3 = vld [vmem:[%s8473_s26 + $0x9c] sm:$0xff]   ;;  %v6694_v6 = vld [vmem:[%s8473_s26 + $0x50] sm:$0x1] }
  0x39   : > { %7754 = vmatpush3.bf16.msra.mxu0 %v8263_v8  ;;  %v2799_v62 = vor.u32 %v2798_v56, %v2795_v55  ;;  %v6726_v22 = vrot.slane %v6680_v18, 9  ;;  %v3496_v25 = vsel %vm8596_vm5, %v3494_v16, %v3495_v10  ;;  %v3516_v51 = vrot.slane %v6688_v46, 5  ;;  %v6689_v55 = vld [vmem:[%s8473_s26 + $0x3c] sm:$0xe]  ;;  %v6690_v56 = vld [vmem:[%s8473_s26 + $0x40] sm:$0xf] }
  0x3a   : > { %7755 = vmatprep.subr.bf16.mxu0 %v8264_v23  ;;  %7722 = vmatmul.mubr.bf16.gmra.mrb[8].mxu0 %v6658_v41  ;;  %v6757_v28 = vcombine.low %v3493_v15, %v3496_v25  ;;  %v3508_v41 = vrot.slane %v3506_v36, 4  ;;  %v3515_v53 = vrot.slane %v3513_v47, 4  ;;  %v6729_v58 = vrot.slane %v6689_v55, 9  ;;  %v8281_v12 = vld [vmem:[%s9670_s1 + $0x190] sm:$0xff]   ;;  %v8282_v15 = vld [vmem:[%s8473_s26 + $0xa8] sm:$0xff]  }
  0x3b   : > { %v2800_v8 = vrot.slane %v2799_v62, 4  ;;  %7725 = vmatprep.mubr.bf16.mxu0 %v6659_v1  ;;  %v3500_v35 = vsel %vm8596_vm5, %v6726_v22, %v3499_v26  ;;  %v3530_v11 = vrot.slane %v6694_v6, 5  ;;  %v6695_v16 = vld [vmem:[%s8473_s26 + $0x54] sm:$0xe]  ;;  %v6697_v18 = vld [vmem:[%s8473_s26 + $0x5c] sm:$0x1] }
  0x3c   : > { %v6758_v45 = vcombine.low %v3500_v35, %v3503_v38  ;;  %v3510_v49 = vsel %vm8596_vm5, %v3508_v41, %v3509_v37  ;;  %v3537_v21 = vrot.slane %v6697_v18, 5  ;;  %v8284_v26 = vld [vmem:[%s9670_s1 + $0x78] sm:$0xff]   ;;  %v6700_v29 = vld [vmem:[%s8473_s26 + $0x68] sm:$0x1]  ;;  %v6732_v30 = vrot.slane %v6698_v27, 9 }
  0x3d   : > { %7756 = vmatpush3.bf16.msra.mxu0 %v8264_v23  ;;  %v2805_v14 = vsel %vm8496_vm2, %v2800_v8, %v2804_v57  ;;  %v8274_v23 = vld [vmem:[%s8473_s26 + $0x78] sm:$0xff]   ;;  %v6759_v52 = vcombine.low %v3507_v40, %v3510_v49  ;;  %v6691_v57 = vld [vmem:[%s8473_s26 + $0x44] sm:$0x1]  ;;  %v3527_v8 = vrot.slane %v6693_v5, 5  ;;  %v3544_v36 = vrot.slane %v6700_v29, 5 }
  0x3e   : > { %7757 = vmatprep.subr.bf16.mxu0 %v8268_v50  ;;  %v6660_v24 = vcombine.low %v2805_v14, %v2815_v19  ;;  %v3523_v61 = vrot.slane %v6691_v57, 5  ;;  %v6731_v19 = vrot.slane %v6695_v16, 9  ;;  %v8283_v34 = vld [vmem:[%s8473_s26 + $0xb4] sm:$0xff]   ;;  %v708_v40 = vld [vmem:[%s8473_s26 + $0x4] sm:$0xf] }
  0x3f   : > { %7534 = vmatmul.mubr.bf16.gmra.mrb[12].mxu1 %v8266_v39  ;;  %v8276_v39 = vld [vmem:[%s9670_s1 + $0x68] sm:$0xff]   ;;  %v3529_v14 = vrot.slane %v3527_v8, 4  ;;  %v3528_v22 = vsel %vm8596_vm5, %v6730_v7, %v3527_v8  ;;  %v772_v49 = vshrl.u32 %v708_v40, 16  ;;  %v711_v5 = vld [vmem:[%s8473_s26 + $0x10] sm:$0xf] }
  0x40   : > { %7537 = vmatprep.mubr.bf16.mxu1 %v8270_v63  ;;  %7563 = vmatprep.subr.bf16.mxu1 %v8276_v39  ;;  %v3517_v63 = vsel %vm8596_vm5, %v3515_v53, %v3516_v51  ;;  %v709_v41 = vld [vmem:[%s8473_s26 + $0x8] sm:$0x1]  ;;  %v6701_v46 = vld [vmem:[%s8473_s26 + $0x6c] sm:$0xe]  ;;  %v6702_v51 = vld [vmem:[%s8473_s26 + $0x70] sm:$0xf] }
  0x41   : > { %7758 = vmatpush3.bf16.msra.mxu0 %v8268_v50  ;;  %v6728_v50 = vrot.slane %v6686_v43, 9  ;;  %7564 = vmatpush3.bf16.msra.mxu1 %v8276_v39  ;;  %v707_v39 = vld [vmem:[%s8473_s26] sm:$0xf]  ;;  %v3548_v57 = vrot.slane %v6702_v51, 5  ;;  %v712_v6 = vld [vmem:[%s8473_s26 + $0x14] sm:$0x1] }
  0x42   : > { %7759 = vmatprep.subr.bf16.mxu0 %v8269_v60  ;;  %7726 = vmatmul.mubr.bf16.gmra.mrb[12].mxu0 %v6660_v24  ;;  %v759_v44 = vshrl.u32 %v707_v39, 16  ;;  %v6706_v29 = vld [vmem:[%s8473_s26 + $0x80] sm:$0x1] }
  0x43   : > { %7761 = vmatprep.mubr.bf16.mxu0 %v6757_v28  ;;  %v3514_v62 = vsel %vm8596_vm5, %v6728_v50, %v3513_v47  ;;  %7565 = vmatprep.subr.bf16.mxu1 %v8280_v59  ;;  %v6699_v28 = vld [vmem:[%s8473_s26 + $0x64] sm:$0xf]  ;;  %v778_v50 = vshll.u32 %v709_v41, 16  ;;  %v714_v41 = vld [vmem:[%s8473_s26 + $0x1c] sm:$0xf] }
  0x44   : > { %v6760_v9 = vcombine.low %v3514_v62, %v3517_v63  ;;  %v3541_v35 = vrot.slane %v6699_v28, 5  ;;  %v8697_v47 = vld [vmem:[%s9670_s1 + $0x80] sm:$0xff]   ;;  %v710_v63 = vld [vmem:[%s8473_s26 + $0xc] sm:$0xf]  ;;  %v820_v51 = vshrl.u32 %v714_v41, 16 }
  0x45   : > { %7760 = vmatpush3.bf16.msra.mxu0 %v8269_v60  ;;  %v3520_v60 = vrot.slane %v6690_v56, 5  ;;  %7566 = vmatpush3.bf16.msra.mxu1 %v8280_v59  ;;  %v6703_v56 = vld [vmem:[%s8473_s26 + $0x74] sm:$0x1]  ;;  %v780_v62 = vrot.slane %v778_v50, 5  ;;  %v783_v8 = vshrl.u32 %v710_v63, 16 }
  0x46   : > { %7793 = vmatprep.subr.bf16.mxu0 %v8273_v13  ;;  %7567 = vmatprep.subr.bf16.mxu1 %v8284_v26  ;;  %v3543_v43 = vrot.slane %v3541_v35, 4 }
  0x47   : > { %7538 = vmatmul.mubr.bf16.gmra.mrb[16].mxu1 %v8271_v17  ;;  %v3521_v1 = vsel %vm8596_vm5, %v6729_v58, %v3520_v60  ;;  %v3522_v2 = vrot.slane %v3520_v60, 4  ;;  %v6696_v17 = vld [vmem:[%s8473_s26 + $0x58] sm:$0xf]  ;;  %v8287_v58 = vld [vmem:[%s9670_s1 + $0x1a0] sm:$0xff]   ;;  %v785_v18 = vrot.slane %v783_v8, 4 }
  0x48   : > { %7541 = vmatprep.mubr.bf16.mxu1 %v8274_v23  ;;  %v3534_v20 = vrot.slane %v6696_v17, 5  ;;  %v3531_v23 = vsel %vm8596_vm5, %v3529_v14, %v3530_v11  ;;  %v3545_v53 = vsel %vm8596_vm5, %v3543_v43, %v3544_v36  ;;  %v8289_v11 = vld [vmem:[%s9670_s1 + $0x1a8] sm:$0xff]   ;;  %v796_v14 = vshrl.u32 %v711_v5, 16  ;;  %v713_v36 = vld [vmem:[%s8473_s26 + $0x18] sm:$0xf] }
  0x49   : > { %v3524_v10 = vsel %vm8596_vm5, %v3522_v2, %v3523_v61  ;;  %v6762_v37 = vcombine.low %v3528_v22, %v3531_v23  ;;  %7568 = vmatpush3.bf16.msra.mxu1 %v8284_v26  ;;  %v774_v61 = vrot.slane %v772_v49, 4  ;;  %v3550_v2 = vrot.slane %v3548_v57, 4  ;;  %v6705_v26 = vld [vmem:[%s8473_s26 + $0x7c] sm:$0xf] }
  0x4a   : > { %7762 = vmatmul.mubr.bf16.vlgmr.msra.gmra.mrb[0].mxu0 %v6758_v45  ;;  %v3535_v24 = vsel %vm8596_vm5, %v6731_v19, %v3534_v20  ;;  %v3536_v25 = vrot.slane %v3534_v20, 4  ;;  %v762_v45 = vshll.u32 %v707_v39, 16  ;;  %7601 = vmatprep.subr.bf16.mxu1 %v8697_v47  ;;  %v6704_v20 = vld [vmem:[%s8473_s26 + $0x78] sm:$0xe] }
  0x4b   : > { %7794 = vmatpush3.bf16.msra.mxu0 %v8273_v13  ;;  %7765 = vmatprep.mubr.bf16.mxu0 %v6759_v52  ;;  %v6761_v13 = vcombine.low %v3521_v1, %v3524_v10  ;;  %v6733_v52 = vrot.slane %v6701_v46, 9  ;;  %v792_v10 = vshll.u32 %v711_v5, 16  ;;  %v816_v46 = vshll.u32 %v714_v41, 16 }
  0x4c   : > { %7795 = vmatprep.subr.bf16.mxu0 %v8277_v48  ;;  %v3538_v32 = vsel %vm8596_vm5, %v3536_v25, %v3537_v21  ;;  %v764_v55 = vrot.slane %v762_v45, 5  ;;  %v8291_v21 = vld [vmem:[%s9670_s1 + $0x1b0] sm:$0xff]   ;;  %v810_v45 = vshll.u32 %v713_v36, 16 }
  0x4d   : > { %v6763_v38 = vcombine.low %v3535_v24, %v3538_v32  ;;  %v3549_v1 = vsel %vm8596_vm5, %v6733_v52, %v3548_v57  ;;  %v794_v23 = vrot.slane %v792_v10, 5  ;;  %v798_v24 = vrot.slane %v796_v14, 4 }
  0x4f   : > { %7542 = vmatmul.mubr.bf16.gmra.mrb[20].mxu1 %v8275_v42  ;;  %7796 = vmatpush3.bf16.msra.mxu0 %v8277_v48  ;;  %v8691_v42 = vsel %vm8596_vm5, %v6732_v30, %v3541_v35  ;;  %v768_v48 = vshll.u32 %v708_v40, 16  ;;  %v6734_v30 = vrot.slane %v6704_v20, 9  ;;  %v3558_v35 = vrot.slane %v6706_v29, 5 }
  0x50   : > { %7545 = vmatprep.mubr.bf16.mxu1 %v8278_v54  ;;  %7797 = vmatprep.subr.bf16.mxu0 %v8281_v12  ;;  %v761_v54 = vrot.slane %v759_v44, 4  ;;  %v6764_v59 = vcombine.low %v8691_v42, %v3545_v53  ;;  %v715_v42 = vld [vmem:[%s8473_s26 + $0x20] sm:$0x1]  ;;  %v807_v44 = vshrl.u32 %v713_v36, 16  ;;  %v6708_v53 = vld [vmem:[%s8473_s26 + $0x88] sm:$0xf] }
  0x51   : > { %v770_v60 = vrot.slane %v768_v48, 5  ;;  %v6707_v48 = vld [vmem:[%s8473_s26 + $0x84] sm:$0xe]  ;;  %v826_v52 = vshll.u32 %v715_v42, 16 }
  0x52   : > { %7766 = vmatmul.mubr.bf16.gmra.mrb[4].mxu0 %v6760_v9  ;;  %v765_v0 = vor.u32 %v764_v55, %v761_v54  ;;  %v786_v9 = vshll.u32 %v710_v63, 16  ;;  %v6709_v54 = vld [vmem:[%s8473_s26 + $0x8c] sm:$0x1]  ;;  %v809_v57 = vrot.slane %v807_v44, 4  ;;  %v822_v63 = vrot.slane %v820_v51, 4 }
  0x53   : > { %7769 = vmatprep.mubr.bf16.mxu0 %v6761_v13  ;;  %7798 = vmatpush3.bf16.msra.mxu0 %v8281_v12  ;;  %v775_v7 = vor.u32 %v774_v61, %v770_v60  ;;  %v6735_v5 = vrot.slane %v6707_v48, 9  ;;  %v6714_v51 = vld [vmem:[%s8473_s26 + $0xa0] sm:$0xf] }
  0x54   : > { %7799 = vmatprep.subr.bf16.mxu0 %v8285_v31  ;;  %v766_v12 = vrot.slane %v765_v0, 4  ;;  %v788_v19 = vrot.slane %v786_v9, 5  ;;  %v828_v0 = vrot.slane %v826_v52, 5 }
  0x55   : > { %v776_v16 = vrot.slane %v775_v7, 4  ;;  %v3565_v7 = vrot.slane %v6709_v54, 5 }
  0x56   : > { %v771_v22 = vsel %vm8496_vm2, %v766_v12, %v770_v60  ;;  %v789_v28 = vor.u32 %v788_v19, %v785_v18  ;;  %v717_v60 = vld [vmem:[%s8473_s26 + $0x28] sm:$0xf]  ;;  %v8290_v12 = vld [vmem:[%s9670_s1 + $0x90] sm:$0xff]   ;;  %v8761_v18 = vld [vmem:[%s9670_s1 + $0x1c0] sm:$0xff]  }
  0x57   : > { %7546 = vmatmul.mubr.bf16.gmra.mrb[24].mxu1 %v8279_v3  ;;  %7800 = vmatpush3.bf16.msra.mxu0 %v8285_v31  ;;  %v3551_v3 = vrot.slane %v6703_v56, 5  ;;  %v781_v27 = vsel %vm8496_vm2, %v776_v16, %v780_v62  ;;  %v3555_v31 = vrot.slane %v6705_v26, 5  ;;  %v818_v62 = vrot.slane %v816_v46, 5 }
  0x58   : > { %7549 = vmatprep.mubr.bf16.mxu1 %v8282_v15  ;;  %7801 = vmatprep.subr.bf16.mxu0 %v8287_v58  ;;  %v802_v15 = vshll.u32 %v712_v6, 16  ;;  %v6437_v32 = vcombine.low %v771_v22, %v781_v27  ;;  %v3562_v6 = vrot.slane %v6708_v53, 5  ;;  %v844_v16 = vshrl.u32 %v717_v60, 16  ;;  %v6712_v27 = vld [vmem:[%s8473_s26 + $0x98] sm:$0x1] }
  0x59   : > { %v3552_v13 = vsel %vm8596_vm5, %v3550_v2, %v3551_v3  ;;  %v3556_v39 = vsel %vm8596_vm5, %v6734_v30, %v3555_v31  ;;  %v3557_v40 = vrot.slane %v3555_v31, 4  ;;  %v8288_v2 = vld [vmem:[%s9670_s1 + $0x88] sm:$0xff]   ;;  %v823_v8 = vor.u32 %v822_v63, %v818_v62 }
  0x5a   : > { %7770 = vmatmul.mubr.bf16.gmra.mrb[8].mxu0 %v6762_v37  ;;  %v6765_v17 = vcombine.low %v3549_v1, %v3552_v13  ;;  %v804_v25 = vrot.slane %v802_v15, 5  ;;  %v8293_v37 = vld [vmem:[%s9670_s1 + $0x1b8] sm:$0xff]   ;;  %v718_v1 = vld [vmem:[%s8473_s26 + $0x2c] sm:$0x1]  ;;  %v3563_v14 = vsel %vm8596_vm5, %v6735_v5, %v3562_v6  ;;  %v3564_v15 = vrot.slane %v3562_v6, 4  ;;  %v8295_v5 = vld [vmem:[%s9670_s1 + $0xa0] sm:$0xff]  }
  0x5b   : > { %7773 = vmatprep.mubr.bf16.mxu0 %v6763_v38  ;;  %7802 = vmatpush3.bf16.msra.mxu0 %v8287_v58  ;;  %v790_v38 = vrot.slane %v789_v28, 4  ;;  %v3559_v50 = vsel %vm8596_vm5, %v3557_v40, %v3558_v35  ;;  %v812_v58 = vrot.slane %v810_v45, 5  ;;  %v824_v19 = vrot.slane %v823_v8, 4  ;;  %v721_v40 = vld [vmem:[%s8473_s26 + $0x38] sm:$0x1] }
  0x5c   : > { %7803 = vmatprep.subr.bf16.mxu0 %v8289_v11  ;;  %v6766_v56 = vcombine.low %v3556_v39, %v3559_v50  ;;  %v850_v26 = vshll.u32 %v718_v1, 16  ;;  %v720_v39 = vld [vmem:[%s8473_s26 + $0x34] sm:$0xf]  ;;  %v3572_v42 = vrot.slane %v6712_v27, 5  ;;  %v6713_v45 = vld [vmem:[%s8473_s26 + $0x9c] sm:$0xe] }
  0x5d   : > { %v795_v49 = vsel %vm8496_vm2, %v790_v38, %v794_v23  ;;  %v813_v3 = vor.u32 %v812_v58, %v809_v57  ;;  %v829_v28 = vsel %vm8496_vm2, %v824_v19, %v828_v0  ;;  %v864_v50 = vshll.u32 %v720_v39, 16 }
  0x5e   : > { %v3576_v8 = vrot.slane %v6714_v51, 5 }
  0x5f   : > { %7550 = vmatmul.mubr.bf16.gmra.mrb[28].mxu1 %v8283_v34  ;;  %v799_v34 = vor.u32 %v798_v24, %v794_v23  ;;  %7804 = vmatpush3.bf16.msra.mxu0 %v8289_v11  ;;  %v840_v11 = vshll.u32 %v717_v60, 16  ;;  %v814_v13 = vrot.slane %v813_v3, 4  ;;  %v3566_v24 = vsel %vm8596_vm5, %v3564_v15, %v3565_v7  ;;  %v724_v3 = vld [vmem:[%s8473_s26 + $0x44] sm:$0x1] }
  0x60   : > { %7805 = vmatprep.subr.bf16.mxu0 %v8291_v21  ;;  %7569 = vmatprep.mubr.bf16.mxu1 %v6437_v32  ;;  %v6767_v29 = vcombine.low %v3563_v14, %v3566_v24  ;;  %v719_v32 = vld [vmem:[%s8473_s26 + $0x30] sm:$0xf]  ;;  %v874_v60 = vshll.u32 %v721_v40, 16  ;;  %v6737_v7 = vrot.slane %v6713_v45, 9  ;;  %v6716_v14 = vld [vmem:[%s8473_s26 + $0xa8] sm:$0xe] }
  0x61   : > { %v800_v43 = vrot.slane %v799_v34, 4  ;;  %v842_v22 = vrot.slane %v840_v11, 5  ;;  %v819_v23 = vsel %vm8496_vm2, %v814_v13, %v818_v62  ;;  %v8292_v34 = vld [vmem:[%s9670_s1 + $0x98] sm:$0xff]   ;;  %v858_v44 = vshll.u32 %v719_v32, 16  ;;  %v723_v62 = vld [vmem:[%s8473_s26 + $0x40] sm:$0xf] }
  0x62   : > { %7774 = vmatmul.mubr.bf16.gmra.mrb[12].mxu0 %v6764_v59  ;;  %v716_v59 = vld [vmem:[%s8473_s26 + $0x24] sm:$0xf]  ;;  %v6439_v35 = vcombine.low %v819_v23, %v829_v28  ;;  %v876_v6 = vrot.slane %v874_v60, 5  ;;  %v3577_v15 = vsel %vm8596_vm5, %v6737_v7, %v3576_v8  ;;  %v892_v19 = vshrl.u32 %v723_v62, 16  ;;  %v6718_v24 = vld [vmem:[%s8473_s26 + $0xb0] sm:$0x1] }
  0x63   : > { %7777 = vmatprep.mubr.bf16.mxu0 %v6765_v17  ;;  %v805_v55 = vsel %vm8496_vm2, %v800_v43, %v804_v25  ;;  %7806 = vmatpush3.bf16.msra.mxu0 %v8291_v21  ;;  %v831_v9 = vshrl.u32 %v716_v59, 16  ;;  %v834_v10 = vshll.u32 %v716_v59, 16  ;;  %v6710_v17 = vld [vmem:[%s8473_s26 + $0x90] sm:$0xe]  ;;  %v846_v25 = vrot.slane %v844_v16, 4  ;;  %v8307_v7 = vld [vmem:[%s9670_s1 + $0xb8] sm:$0xff]  }
  0x64   : > { %v6438_v61 = vcombine.low %v795_v49, %v805_v55  ;;  %7807 = vmatprep.subr.bf16.mxu0 %v8293_v37  ;;  %v6736_v31 = vrot.slane %v6710_v17, 9  ;;  %v855_v43 = vshrl.u32 %v719_v32, 16  ;;  %v860_v54 = vrot.slane %v858_v44, 5 }
  0x65   : > { %v833_v20 = vrot.slane %v831_v9, 4  ;;  %v836_v21 = vrot.slane %v834_v10, 5  ;;  %v847_v36 = vor.u32 %v846_v25, %v842_v22  ;;  %v868_v55 = vshrl.u32 %v720_v39, 16  ;;  %v8299_v25 = vld [vmem:[%s9670_s1 + $0xa8] sm:$0xff]  }
  0x66   : > { %v857_v53 = vrot.slane %v855_v43, 4  ;;  %v866_v59 = vrot.slane %v864_v50, 5  ;;  %v3578_v16 = vrot.slane %v3576_v8, 4  ;;  %v888_v17 = vshll.u32 %v723_v62, 16 }
  0x67   : > { %7570 = vmatmul.mubr.bf16.vlgmr.msra.gmra.mrb[0].mxu1 %v6438_v61  ;;  %7808 = vmatpush3.bf16.msra.mxu0 %v8293_v37  ;;  %v837_v30 = vor.u32 %v836_v21, %v833_v20  ;;  %v852_v37 = vrot.slane %v850_v26, 5  ;;  %v848_v46 = vrot.slane %v847_v36, 4  ;;  %v722_v61 = vld [vmem:[%s8473_s26 + $0x3c] sm:$0xf]  ;;  %v6717_v20 = vld [vmem:[%s8473_s26 + $0xac] sm:$0xf] }
  0x68   : > { %7602 = vmatpush3.bf16.msra.mxu1 %v8697_v47  ;;  %v6711_v47 = vld [vmem:[%s8473_s26 + $0x94] sm:$0xf]  ;;  %7841 = vmatprep.subr.bf16.mxu0 %v8761_v18  ;;  %v861_v1 = vor.u32 %v860_v54, %v857_v53  ;;  %v882_v13 = vshll.u32 %v722_v61, 16  ;;  %v890_v27 = vrot.slane %v888_v17, 5  ;;  %v894_v28 = vrot.slane %v892_v19, 4 }
  0x69   : > { %7603 = vmatprep.subr.bf16.mxu1 %v8288_v2  ;;  %v3569_v38 = vrot.slane %v6711_v47, 5  ;;  %v838_v41 = vrot.slane %v837_v30, 4  ;;  %7573 = vmatprep.mubr.bf16.mxu1 %v6439_v35  ;;  %v853_v57 = vsel %vm8496_vm2, %v848_v46, %v852_v37  ;;  %v725_v35 = vld [vmem:[%s8473_s26 + $0x48] sm:$0xf]  ;;  %v8303_v36 = vld [vmem:[%s9670_s1 + $0xb0] sm:$0xff]   ;;  %v3583_v40 = vrot.slane %v6717_v20, 5 }
  0x6a   : > { %7778 = vmatmul.mubr.bf16.gmra.mrb[16].mxu0 %v6766_v56  ;;  %v6715_v56 = vld [vmem:[%s8473_s26 + $0xa4] sm:$0x1]  ;;  %v862_v10 = vrot.slane %v861_v1, 4  ;;  %v884_v23 = vrot.slane %v882_v13, 5  ;;  %v3586_v44 = vrot.slane %v6718_v24, 5  ;;  %v903_v45 = vshrl.u32 %v725_v35, 16 }
  0x6b   : > { %7781 = vmatprep.mubr.bf16.mxu0 %v6767_v29  ;;  %v3570_v48 = vsel %vm8596_vm5, %v6736_v31, %v3569_v38  ;;  %v3571_v49 = vrot.slane %v3569_v38, 4  ;;  %v843_v52 = vsel %vm8496_vm2, %v838_v41, %v842_v22  ;;  %v3579_v9 = vrot.slane %v6715_v56, 5  ;;  %v726_v41 = vld [vmem:[%s8473_s26 + $0x4c] sm:$0xf]  ;;  %v6720_v53 = vld [vmem:[%s8473_s26 + $0xb8] sm:$0xf] }
  0x6c   : > { %7604 = vmatpush3.bf16.msra.mxu1 %v8288_v2  ;;  %v6440_v63 = vcombine.low %v843_v52, %v853_v57  ;;  %v870_v2 = vrot.slane %v868_v55, 4  ;;  %v867_v21 = vsel %vm8496_vm2, %v862_v10, %v866_v59  ;;  %v898_v29 = vshll.u32 %v724_v3, 16 }
  0x6d   : > { %7605 = vmatprep.subr.bf16.mxu1 %v8290_v12  ;;  %v3573_v58 = vsel %vm8596_vm5, %v3571_v49, %v3572_v42  ;;  %v3580_v26 = vsel %vm8596_vm5, %v3578_v16, %v3579_v9  ;;  %v895_v38 = vor.u32 %v894_v28, %v890_v27  ;;  %v727_v42 = vld [vmem:[%s8473_s26 + $0x50] sm:$0x1]  ;;  %v906_v46 = vshll.u32 %v725_v35, 16  ;;  %v6722_v16 = vld [vmem:[%s8473_s26 + $0xc0] sm:$0xe] }
  0x6e   : > { %v6768_v0 = vcombine.low %v3570_v48, %v3573_v58  ;;  %v871_v11 = vor.u32 %v870_v2, %v866_v59  ;;  %v6769_v31 = vcombine.low %v3577_v15, %v3580_v26  ;;  %v900_v39 = vrot.slane %v898_v29, 5  ;;  %v6719_v48 = vld [vmem:[%s8473_s26 + $0xb4] sm:$0xe]  ;;  %v6721_v58 = vld [vmem:[%s8473_s26 + $0xbc] sm:$0x1] }
  0x6f   : > { %7574 = vmatmul.mubr.bf16.gmra.mrb[4].mxu1 %v6440_v63  ;;  %v896_v49 = vrot.slane %v895_v38, 4  ;;  %v3585_v51 = vrot.slane %v3583_v40, 4  ;;  %v912_v52 = vshll.u32 %v726_v41, 16  ;;  %v905_v55 = vrot.slane %v903_v45, 4  ;;  %v728_v63 = vld [vmem:[%s8473_s26 + $0x54] sm:$0xf] }
  0x70   : > { %7606 = vmatpush3.bf16.msra.mxu1 %v8290_v12  ;;  %v879_v12 = vshrl.u32 %v722_v61, 16  ;;  %v872_v22 = vrot.slane %v871_v11, 4  ;;  %v908_v56 = vrot.slane %v906_v46, 5  ;;  %v916_v57 = vshrl.u32 %v726_v41, 16  ;;  %v6724_v26 = vld [vmem:[%s8473_s26 + $0xc8] sm:$0x1] }
  0x71   : > { %7607 = vmatprep.subr.bf16.mxu1 %v8292_v34  ;;  %v901_v59 = vsel %vm8496_vm2, %v896_v49, %v900_v39  ;;  %v3587_v60 = vsel %vm8596_vm5, %v3585_v51, %v3586_v44  ;;  %v914_v61 = vrot.slane %v912_v52, 5  ;;  %v922_v62 = vshll.u32 %v727_v42, 16  ;;  %v732_v42 = vld [vmem:[%s8473_s26 + $0x64] sm:$0xf] }
  0x72   : > { %7782 = vmatmul.mubr.bf16.gmra.mrb[20].mxu0 %v6768_v0  ;;  %v881_v47 = vrot.slane %v879_v12, 4  ;;  %v877_v30 = vsel %vm8496_vm2, %v872_v22, %v876_v6  ;;  %v729_v0 = vld [vmem:[%s8473_s26 + $0x58] sm:$0xf]  ;;  %v909_v3 = vor.u32 %v908_v56, %v905_v55  ;;  %v730_v6 = vld [vmem:[%s8473_s26 + $0x5c] sm:$0x1]  ;;  %v6739_v9 = vrot.slane %v6719_v48, 9 }
  0x73   : > { %v6441_v37 = vcombine.low %v867_v21, %v877_v30  ;;  %7785 = vmatprep.mubr.bf16.mxu0 %v6769_v31  ;;  %v924_v8 = vrot.slane %v922_v62, 5  ;;  %v3590_v10 = vrot.slane %v6720_v53, 5  ;;  %v3593_v11 = vrot.slane %v6721_v58, 5  ;;  %v6723_v22 = vld [vmem:[%s8473_s26 + $0xc4] sm:$0xf] }
  0x74   : > { %7608 = vmatpush3.bf16.msra.mxu1 %v8292_v34  ;;  %v885_v32 = vor.u32 %v884_v23, %v881_v47  ;;  %v6738_v34 = vrot.slane %v6716_v14, 9  ;;  %v910_v12 = vrot.slane %v909_v3, 4  ;;  %v927_v14 = vshrl.u32 %v728_v63, 16  ;;  %v734_v58 = vld [vmem:[%s8473_s26 + $0x6c] sm:$0xf] }
  0x75   : > { %7609 = vmatprep.subr.bf16.mxu1 %v8295_v5  ;;  %7577 = vmatprep.mubr.bf16.mxu1 %v6441_v37  ;;  %v930_v15 = vshll.u32 %v728_v63, 16  ;;  %v3591_v17 = vsel %vm8596_vm5, %v6739_v9, %v3590_v10  ;;  %v3592_v19 = vrot.slane %v3590_v10, 4  ;;  %v936_v20 = vshll.u32 %v729_v0, 16  ;;  %v731_v37 = vld [vmem:[%s8473_s26 + $0x60] sm:$0xf] }
  0x76   : > { %v886_v43 = vrot.slane %v885_v32, 4  ;;  %v3584_v50 = vsel %vm8596_vm5, %v6738_v34, %v3583_v40  ;;  %v940_v21 = vshrl.u32 %v729_v0, 16  ;;  %v915_v47 = vsel %vm8496_vm2, %v910_v12, %v914_v61  ;;  %v735_v63 = vld [vmem:[%s8473_s26 + $0x70] sm:$0xf]  ;;  %v736_v0 = vld [vmem:[%s8473_s26 + $0x74] sm:$0x1] }
  0x77   : > { %v6770_v2 = vcombine.low %v3584_v50, %v3587_v60  ;;  %v929_v24 = vrot.slane %v927_v14, 4  ;;  %v3594_v28 = vsel %vm8596_vm5, %v3592_v19, %v3593_v11  ;;  %v938_v29 = vrot.slane %v936_v20, 5 }
  0x78   : > { %7610 = vmatpush3.bf16.msra.mxu1 %v8295_v5  ;;  %v891_v54 = vsel %vm8496_vm2, %v886_v43, %v890_v27  ;;  %v918_v5 = vrot.slane %v916_v57, 4  ;;  %v8842_v27 = vld [vmem:[%s9670_s1 + $0xc0] sm:$0xff]   ;;  %v942_v30 = vrot.slane %v940_v21, 4  ;;  %v946_v31 = vshll.u32 %v730_v6, 16  ;;  %v733_v43 = vld [vmem:[%s8473_s26 + $0x68] sm:$0x1] }
  0x79   : > { %7611 = vmatprep.subr.bf16.mxu1 %v8299_v25  ;;  %v6442_v1 = vcombine.low %v891_v54, %v901_v59  ;;  %v6771_v34 = vcombine.low %v3591_v17, %v3594_v28  ;;  %v3597_v41 = vrot.slane %v6723_v22, 5  ;;  %v3600_v45 = vrot.slane %v6724_v26, 5  ;;  %v8294_v57 = vld [vmem:[%s8473_s26 + $0x18] sm:$0xff]   ;;  %v8296_v22 = vld [vmem:[%s8473_s26 + $0x24] sm:$0xff]   ;;  %v8298_v26 = vld [vmem:[%s8473_s26 + $0x30] sm:$0xff]  }
  0x7a   : > { %7786 = vmatmul.mubr.bf16.gmra.mrb[24].mxu0 %v6770_v2  ;;  %v919_v13 = vor.u32 %v918_v5, %v914_v61  ;;  %v943_v39 = vor.u32 %v942_v30, %v938_v29  ;;  %v948_v40 = vrot.slane %v946_v31, 5  ;;  %v951_v46 = vshrl.u32 %v731_v37, 16 }
  0x7b   : > { %7578 = vmatmul.mubr.bf16.gmra.mrb[8].mxu1 %v6442_v1  ;;  %7789 = vmatprep.mubr.bf16.mxu0 %v6771_v34  ;;  %v954_v48 = vshll.u32 %v731_v37, 16  ;;  %v3599_v51 = vrot.slane %v3597_v41, 4  ;;  %v960_v52 = vshll.u32 %v732_v42, 16  ;;  %v964_v56 = vshrl.u32 %v732_v42, 16  ;;  %v740_v37 = vld [vmem:[%s8473_s26 + $0x84] sm:$0xf] }
  0x7c   : > { %7612 = vmatpush3.bf16.msra.mxu1 %v8299_v25  ;;  %v920_v23 = vrot.slane %v919_v13, 4  ;;  %v932_v25 = vrot.slane %v930_v15, 5  ;;  %v944_v49 = vrot.slane %v943_v39, 4  ;;  %v953_v54 = vrot.slane %v951_v46, 4 }
  0x7d   : > { %7613 = vmatprep.subr.bf16.mxu1 %v8303_v36  ;;  %v956_v55 = vrot.slane %v954_v48, 5  ;;  %v3601_v60 = vsel %vm8596_vm5, %v3599_v51, %v3600_v45  ;;  %v962_v61 = vrot.slane %v960_v52, 5  ;;  %v970_v62 = vshll.u32 %v733_v43, 16  ;;  %v741_v43 = vld [vmem:[%s8473_s26 + $0x88] sm:$0xf] }
  0x7e   : > { %v925_v32 = vsel %vm8496_vm2, %v920_v23, %v924_v8  ;;  %v933_v35 = vor.u32 %v932_v25, %v929_v24  ;;  %v949_v59 = vsel %vm8496_vm2, %v944_v49, %v948_v40  ;;  %v966_v5 = vrot.slane %v964_v56, 4  ;;  %v737_v23 = vld [vmem:[%s8473_s26 + $0x78] sm:$0xf]  ;;  %v738_v24 = vld [vmem:[%s8473_s26 + $0x7c] sm:$0xf] }
  0x7f   : > { %v6443_v38 = vcombine.low %v915_v47, %v925_v32  ;;  %v957_v3 = vor.u32 %v956_v55, %v953_v54  ;;  %v972_v6 = vrot.slane %v970_v62, 5  ;;  %v978_v8 = vshll.u32 %v734_v58, 16  ;;  %v739_v25 = vld [vmem:[%s8473_s26 + $0x80] sm:$0x1]  ;;  %v742_v48 = vld [vmem:[%s8473_s26 + $0x8c] sm:$0x1] }
  0x80   : > { %7614 = vmatpush3.bf16.msra.mxu1 %v8303_v36  ;;  %v6740_v36 = vrot.slane %v6722_v16, 9  ;;  %v934_v44 = vrot.slane %v933_v35, 4  ;;  %v984_v9 = vshll.u32 %v735_v63, 16  ;;  %v967_v11 = vor.u32 %v966_v5, %v962_v61  ;;  %v8305_v54 = vld [vmem:[%s9670_s1 + $0x1d0] sm:$0xff]  }
  0x81   : > { %7615 = vmatprep.subr.bf16.mxu1 %v8307_v7  ;;  %7581 = vmatprep.mubr.bf16.mxu1 %v6443_v38  ;;  %v958_v10 = vrot.slane %v957_v3, 4  ;;  %v988_v12 = vshrl.u32 %v735_v63, 16  ;;  %v994_v13 = vshll.u32 %v736_v0, 16  ;;  %v980_v15 = vrot.slane %v978_v8, 5  ;;  %v8301_v38 = vld [vmem:[%s9670_s1 + $0x1c8] sm:$0xff]   ;;  %v8300_v63 = vld [vmem:[%s8473_s26 + $0x3c] sm:$0xff]  }
  0x82   : > { %v3598_v50 = vsel %vm8596_vm5, %v6740_v36, %v3597_v41  ;;  %v939_v53 = vsel %vm8496_vm2, %v934_v44, %v938_v29  ;;  %v986_v16 = vrot.slane %v984_v9, 5  ;;  %v968_v19 = vrot.slane %v967_v11, 4  ;;  %v8302_v3 = vld [vmem:[%s8473_s26 + $0x48] sm:$0xff]   ;;  %v744_v8 = vld [vmem:[%s8473_s26 + $0x94] sm:$0xf] }
  0x83   : > { %v6444_v1 = vcombine.low %v939_v53, %v949_v59  ;;  %v6772_v2 = vcombine.low %v3598_v50, %v3601_v60  ;;  %v963_v17 = vsel %vm8496_vm2, %v958_v10, %v962_v61  ;;  %v990_v20 = vrot.slane %v988_v12, 4  ;;  %v745_v9 = vld [vmem:[%s8473_s26 + $0x98] sm:$0x1] }
  0x84   : > { %7616 = vmatpush3.bf16.msra.mxu1 %v8307_v7  ;;  %v975_v7 = vshrl.u32 %v734_v58, 16  ;;  %v996_v21 = vrot.slane %v994_v13, 5  ;;  %v973_v28 = vsel %vm8496_vm2, %v968_v19, %v972_v6  ;;  %v999_v30 = vshrl.u32 %v737_v23, 16 }
  0x85   : > { %7649 = vmatprep.subr.bf16.mxu1 %v8842_v27  ;;  %7582 = vmatmul.mubr.bf16.gmra.mrb[12].mxu1 %v6444_v1  ;;  %v991_v29 = vor.u32 %v990_v20, %v986_v16  ;;  %v1002_v31 = vshll.u32 %v737_v23, 16  ;;  %v6445_v32 = vcombine.low %v963_v17, %v973_v28  ;;  %v1008_v35 = vshll.u32 %v738_v24, 16  ;;  %v746_v20 = vld [vmem:[%s8473_s26 + $0x9c] sm:$0xf] }
  0x86   : > { %7790 = vmatmul.mubr.bf16.gmra.mrb[28].mxu0 %v6772_v2  ;;  %v977_v14 = vrot.slane %v975_v7, 4  ;;  %v1012_v36 = vshrl.u32 %v738_v24, 16  ;;  %v1001_v40 = vrot.slane %v999_v30, 4  ;;  %v1018_v42 = vshll.u32 %v739_v25, 16  ;;  %v743_v2 = vld [vmem:[%s8473_s26 + $0x90] sm:$0xf] }
  0x87   : > { %7809 = vmatprep.mubr.bf16.mxu0 %v8294_v57  ;;  %v992_v39 = vrot.slane %v991_v29, 4  ;;  %v1004_v41 = vrot.slane %v1002_v31, 5  ;;  %7585 = vmatprep.mubr.bf16.mxu1 %v6445_v32  ;;  %v1010_v45 = vrot.slane %v1008_v35, 5  ;;  %v1023_v49 = vshrl.u32 %v740_v37, 16  ;;  %v747_v24 = vld [vmem:[%s8473_s26 + $0xa0] sm:$0xf] }
  0x88   : > { %v981_v47 = vor.u32 %v980_v15, %v977_v14  ;;  %v1014_v46 = vrot.slane %v1012_v36, 4  ;;  %v1020_v52 = vrot.slane %v1018_v42, 5  ;;  %v1026_v53 = vshll.u32 %v740_v37, 16  ;;  %v8309_v14 = vld [vmem:[%s9670_s1 + $0x1d8] sm:$0xff]   ;;  %v748_v29 = vld [vmem:[%s8473_s26 + $0xa4] sm:$0x1] }
  0x89   : > { %v997_v50 = vsel %vm8496_vm2, %v992_v39, %v996_v21  ;;  %v1005_v51 = vor.u32 %v1004_v41, %v1001_v40  ;;  %v1025_v57 = vrot.slane %v1023_v49, 4  ;;  %v1032_v58 = vshll.u32 %v741_v43, 16  ;;  %v8313_v36 = vld [vmem:[%s9670_s1 + $0x1e0] sm:$0xff]  }
  0x8a   : > { %v982_v34 = vrot.slane %v981_v47, 4  ;;  %v1015_v56 = vor.u32 %v1014_v46, %v1010_v45  ;;  %v1028_v60 = vrot.slane %v1026_v53, 5  ;;  %v1036_v61 = vshrl.u32 %v741_v43, 16  ;;  %v749_v53 = vld [vmem:[%s8473_s26 + $0xa8] sm:$0xf] }
  0x8b   : > { %v1006_v59 = vrot.slane %v1005_v51, 4  ;;  %v1042_v62 = vshll.u32 %v742_v48, 16  ;;  %v1034_v1 = vrot.slane %v1032_v58, 5  ;;  %v1047_v11 = vshrl.u32 %v743_v2, 16  ;;  %v751_v58 = vld [vmem:[%s8473_s26 + $0xb0] sm:$0x1] }
  0x8c   : > { %v987_v44 = vsel %vm8496_vm2, %v982_v34, %v986_v16  ;;  %v1016_v0 = vrot.slane %v1015_v56, 4  ;;  %v1029_v5 = vor.u32 %v1028_v60, %v1025_v57  ;;  %v1038_v6 = vrot.slane %v1036_v61, 4 }
  0x8d   : > { %v6446_v55 = vcombine.low %v987_v44, %v997_v50  ;;  %v1044_v7 = vrot.slane %v1042_v62, 5  ;;  %v1050_v12 = vshll.u32 %v743_v2, 16  ;;  %v1056_v13 = vshll.u32 %v744_v8, 16  ;;  %v8306_v50 = vld [vmem:[%s8473_s26 + $0x60] sm:$0xff]  }
  0x8e   : > { %7810 = vmatmul.mubr.bf16.vlgmr.msra.gmra.mrb[0].mxu0 %v8296_v22  ;;  %v1021_v10 = vsel %vm8496_vm2, %v1016_v0, %v1020_v52  ;;  %v1030_v16 = vrot.slane %v1029_v5, 4  ;;  %v1039_v17 = vor.u32 %v1038_v6, %v1034_v1  ;;  %v1060_v19 = vshrl.u32 %v744_v8, 16  ;;  %v8317_v0 = vld [vmem:[%s9670_s1 + $0x1e8] sm:$0xff]   ;;  %v752_v5 = vld [vmem:[%s8473_s26 + $0xb4] sm:$0xf] }
  0x8f   : > { %7842 = vmatpush3.bf16.msra.mxu0 %v8761_v18  ;;  %7813 = vmatprep.mubr.bf16.mxu0 %v8298_v26  ;;  %v1011_v18 = vsel %vm8496_vm2, %v1006_v59, %v1010_v45  ;;  %v1049_v21 = vrot.slane %v1047_v11, 4  ;;  %v1052_v22 = vrot.slane %v1050_v12, 5  ;;  %v1058_v47 = vrot.slane %v1056_v13, 5  ;;  %v8304_v45 = vld [vmem:[%s8473_s26 + $0x54] sm:$0xff]  }
  0x90   : > { %7843 = vmatprep.subr.bf16.mxu0 %v8301_v38  ;;  %7586 = vmatmul.mubr.bf16.gmra.mrb[16].mxu1 %v6446_v55  ;;  %v6447_v15 = vcombine.low %v1011_v18, %v1021_v10  ;;  %v1066_v23 = vshll.u32 %v745_v9, 16  ;;  %v1035_v25 = vsel %vm8496_vm2, %v1030_v16, %v1034_v1  ;;  %v1040_v26 = vrot.slane %v1039_v17, 4  ;;  %v753_v9 = vld [vmem:[%s8473_s26 + $0xb8] sm:$0xf]  ;;  %v754_v10 = vld [vmem:[%s8473_s26 + $0xbc] sm:$0x1] }
  0x91   : > { %v1062_v28 = vrot.slane %v1060_v19, 4  ;;  %v1071_v30 = vshrl.u32 %v746_v20, 16  ;;  %v1053_v31 = vor.u32 %v1052_v22, %v1049_v21  ;;  %v1074_v34 = vshll.u32 %v746_v20, 16 }
  0x92   : > { %7589 = vmatprep.mubr.bf16.mxu1 %v6447_v15  ;;  %v1068_v32 = vrot.slane %v1066_v23, 5  ;;  %v1080_v35 = vshll.u32 %v747_v24, 16  ;;  %v1045_v37 = vsel %vm8496_vm2, %v1040_v26, %v1044_v7  ;;  %v1084_v40 = vshrl.u32 %v747_v24, 16  ;;  %v8321_v15 = vld [vmem:[%s9670_s1 + $0x1f0] sm:$0xff]  }
  0x93   : > { %7844 = vmatpush3.bf16.msra.mxu0 %v8301_v38  ;;  %v1063_v38 = vor.u32 %v1062_v28, %v1058_v47  ;;  %v1073_v39 = vrot.slane %v1071_v30, 4  ;;  %v6448_v41 = vcombine.low %v1035_v25, %v1045_v37  ;;  %v1054_v42 = vrot.slane %v1053_v31, 4  ;;  %v8308_v24 = vld [vmem:[%s8473_s26 + $0x6c] sm:$0xff]   ;;  %v1528_v37 = vld [vmem:[%s8473_s26] sm:$0xe] }
  0x94   : > { %7845 = vmatprep.subr.bf16.mxu0 %v8305_v54  ;;  %v1076_v43 = vrot.slane %v1074_v34, 5  ;;  %v1082_v44 = vrot.slane %v1080_v35, 5  ;;  %v1086_v48 = vrot.slane %v1084_v40, 4  ;;  %v1090_v49 = vshll.u32 %v748_v29, 16  ;;  %v8310_v29 = vld [vmem:[%s8473_s26 + $0x78] sm:$0xff]  }
  0x95   : > { %v1064_v46 = vrot.slane %v1063_v38, 4  ;;  %v1059_v51 = vsel %vm8496_vm2, %v1054_v42, %v1058_v47  ;;  %v1095_v59 = vshrl.u32 %v749_v53, 16  ;;  %v1098_v62 = vshll.u32 %v749_v53, 16  ;;  %v8325_v34 = vld [vmem:[%s9670_s1 + $0x1f8] sm:$0xff]   ;;  %v1529_v38 = vld [vmem:[%s8473_s26 + $0x4] sm:$0xf] }
  0x96   : > { %7814 = vmatmul.mubr.bf16.gmra.mrb[4].mxu0 %v8300_v63  ;;  %v1077_v52 = vor.u32 %v1076_v43, %v1073_v39  ;;  %v1087_v56 = vor.u32 %v1086_v48, %v1082_v44  ;;  %v1092_v57 = vrot.slane %v1090_v49, 5  ;;  %v1114_v18 = vshll.u32 %v751_v58, 16  ;;  %v1530_v39 = vld [vmem:[%s8473_s26 + $0x8] sm:$0x1]  ;;  %v1531_v48 = vld [vmem:[%s8473_s26 + $0xc] sm:$0xe] }
  0x97   : > { %7817 = vmatprep.mubr.bf16.mxu0 %v8302_v3  ;;  %7846 = vmatpush3.bf16.msra.mxu0 %v8305_v54  ;;  %v750_v54 = vld [vmem:[%s8473_s26 + $0xac] sm:$0xf]  ;;  %v1069_v55 = vsel %vm8496_vm2, %v1064_v46, %v1068_v32  ;;  %v1097_v2 = vrot.slane %v1095_v59, 4  ;;  %v1100_v7 = vrot.slane %v1098_v62, 5  ;;  %v1122_v19 = vshll.u32 %v752_v5, 16 }
  0x98   : > { %7847 = vmatprep.subr.bf16.mxu0 %v8309_v14  ;;  %7590 = vmatmul.mubr.bf16.gmra.mrb[20].mxu1 %v6448_v41  ;;  %v6449_v60 = vcombine.low %v1059_v51, %v1069_v55  ;;  %v1078_v61 = vrot.slane %v1077_v52, 4  ;;  %v1104_v63 = vshll.u32 %v750_v54, 16  ;;  %v1088_v1 = vrot.slane %v1087_v56, 4  ;;  %v1532_v49 = vld [vmem:[%s8473_s26 + $0x10] sm:$0xf]  ;;  %v8312_v55 = vld [vmem:[%s8473_s26 + $0x84] sm:$0xff]  }
  0x99   : > { %v1108_v3 = vshrl.u32 %v750_v54, 16  ;;  %v1116_v13 = vrot.slane %v1114_v18, 5  ;;  %v1101_v17 = vor.u32 %v1100_v7, %v1097_v2  ;;  %v1128_v20 = vshll.u32 %v753_v9, 16  ;;  %v1533_v53 = vld [vmem:[%s8473_s26 + $0x14] sm:$0x1]  ;;  %v8952_v56 = vld [vmem:[%s9670_s1 + $0x200] sm:$0xff]  }
  0x9a   : > { %7593 = vmatprep.mubr.bf16.mxu1 %v6449_v60  ;;  %v1083_v6 = vsel %vm8496_vm2, %v1078_v61, %v1082_v44  ;;  %v1106_v8 = vrot.slane %v1104_v63, 5  ;;  %v1093_v11 = vsel %vm8496_vm2, %v1088_v1, %v1092_v57  ;;  %v1132_v47 = vshrl.u32 %v753_v9, 16  ;;  %v1534_v1 = vld [vmem:[%s8473_s26 + $0x18] sm:$0xe]  ;;  %v8314_v2 = vld [vmem:[%s8473_s26 + $0x90] sm:$0xff]  }
  0x9b   : > { %7848 = vmatpush3.bf16.msra.mxu0 %v8309_v14  ;;  %v1110_v12 = vrot.slane %v1108_v3, 4  ;;  %v1119_v14 = vshrl.u32 %v752_v5, 16  ;;  %v6450_v16 = vcombine.low %v1083_v6, %v1093_v11  ;;  %v1138_v23 = vshll.u32 %v754_v10, 16  ;;  %v1535_v3 = vld [vmem:[%s8473_s26 + $0x1c] sm:$0xf] }
  0x9c   : > { %7849 = vmatprep.subr.bf16.mxu0 %v8313_v36  ;;  %v1102_v25 = vrot.slane %v1101_v17, 4  ;;  %v1124_v26 = vrot.slane %v1122_v19, 5  ;;  %v1130_v28 = vrot.slane %v1128_v20, 5  ;;  %v1134_v31 = vrot.slane %v1132_v47, 4  ;;  %v1536_v18 = vld [vmem:[%s8473_s26 + $0x20] sm:$0x1] }
  0x9d   : > { %v1111_v21 = vor.u32 %v1110_v12, %v1106_v8  ;;  %v1121_v22 = vrot.slane %v1119_v14, 4  ;;  %v1140_v32 = vrot.slane %v1138_v23, 5  ;;  %v6461_v42 = vrot.slane %v1528_v37, 9  ;;  %v1537_v10 = vld [vmem:[%s8473_s26 + $0x24] sm:$0xe]  ;;  %v8316_v47 = vld [vmem:[%s8473_s26 + $0x9c] sm:$0xff]  }
  0x9e   : > { %7818 = vmatmul.mubr.bf16.gmra.mrb[8].mxu0 %v8304_v45  ;;  %v1107_v35 = vsel %vm8496_vm2, %v1102_v25, %v1106_v8  ;;  %v1135_v41 = vor.u32 %v1134_v31, %v1130_v28  ;;  %v1629_v43 = vrot.slane %v1529_v38, 5  ;;  %v1632_v46 = vrot.slane %v1530_v39, 5  ;;  %v1538_v11 = vld [vmem:[%s8473_s26 + $0x28] sm:$0xf]  ;;  %v1539_v12 = vld [vmem:[%s8473_s26 + $0x2c] sm:$0x1] }
  0x9f   : > { %7821 = vmatprep.mubr.bf16.mxu0 %v8306_v50  ;;  %7850 = vmatpush3.bf16.msra.mxu0 %v8313_v36  ;;  %v1112_v30 = vrot.slane %v1111_v21, 4  ;;  %v1125_v36 = vor.u32 %v1124_v26, %v1121_v22  ;;  %v6462_v54 = vrot.slane %v1531_v48, 9  ;;  %v1636_v58 = vrot.slane %v1532_v49, 5  ;;  %v8315_v22 = vld [vmem:[%s9670_s1 + $0xc8] sm:$0xff]   ;;  %v1541_v25 = vld [vmem:[%s8473_s26 + $0x34] sm:$0xf] }
  0xa0   : > { %7851 = vmatprep.subr.bf16.mxu0 %v8317_v0  ;;  %7594 = vmatmul.mubr.bf16.gmra.mrb[24].mxu1 %v6450_v16  ;;  %v1136_v50 = vrot.slane %v1135_v41, 4  ;;  %v1630_v51 = vsel %vm8596_vm5, %v6461_v42, %v1629_v43  ;;  %v1631_v52 = vrot.slane %v1629_v43, 4  ;;  %v1639_v59 = vrot.slane %v1533_v53, 5  ;;  %v1542_v26 = vld [vmem:[%s8473_s26 + $0x38] sm:$0x1]  ;;  %v8318_v31 = vld [vmem:[%s8473_s26 + $0xa8] sm:$0xff]  }
  0xa1   : > { %v1117_v40 = vsel %vm8496_vm2, %v1112_v30, %v1116_v13  ;;  %v1126_v45 = vrot.slane %v1125_v36, 4  ;;  %v6463_v5 = vrot.slane %v1534_v1, 9  ;;  %v1643_v6 = vrot.slane %v1535_v3, 5  ;;  %v1545_v36 = vld [vmem:[%s8473_s26 + $0x44] sm:$0x1]  ;;  %v8320_v48 = vld [vmem:[%s8473_s26 + $0xb4] sm:$0xff]  }
  0xa2   : > { %v6451_v44 = vcombine.low %v1107_v35, %v1117_v40  ;;  %v1141_v60 = vsel %vm8496_vm2, %v1136_v50, %v1140_v32  ;;  %v1633_v61 = vsel %vm8596_vm5, %v1631_v52, %v1632_v46  ;;  %v1646_v7 = vrot.slane %v1536_v18, 5  ;;  %v1543_v32 = vld [vmem:[%s8473_s26 + $0x3c] sm:$0xe]  ;;  %v1544_v35 = vld [vmem:[%s8473_s26 + $0x40] sm:$0xf]  ;;  %v8319_v40 = vld [vmem:[%s9670_s1 + $0xd0] sm:$0xff]  }
  0xa3   : > { %7852 = vmatpush3.bf16.msra.mxu0 %v8317_v0  ;;  %v1131_v57 = vsel %vm8496_vm2, %v1126_v45, %v1130_v28  ;;  %v6493_v63 = vcombine.low %v1630_v51, %v1633_v61  ;;  %v1638_v0 = vrot.slane %v1636_v58, 4  ;;  %v1637_v8 = vsel %vm8596_vm5, %v6462_v54, %v1636_v58  ;;  %v1547_v49 = vld [vmem:[%s8473_s26 + $0x4c] sm:$0xf]  ;;  %v1548_v50 = vld [vmem:[%s8473_s26 + $0x50] sm:$0x1]  ;;  %v8323_v52 = vld [vmem:[%s9670_s1 + $0xd8] sm:$0xff]  }
  0xa4   : > { %7853 = vmatprep.subr.bf16.mxu0 %v8321_v15  ;;  %7597 = vmatprep.mubr.bf16.mxu1 %v6451_v44  ;;  %v6452_v62 = vcombine.low %v1131_v57, %v1141_v60  ;;  %v1644_v13 = vsel %vm8596_vm5, %v6463_v5, %v1643_v6  ;;  %v1645_v14 = vrot.slane %v1643_v6, 4  ;;  %v6464_v16 = vrot.slane %v1537_v10, 9  ;;  %v1546_v44 = vld [vmem:[%s8473_s26 + $0x48] sm:$0xe]  ;;  %v1549_v57 = vld [vmem:[%s8473_s26 + $0x54] sm:$0xe] }
  0xa5   : > { %v1640_v9 = vsel %vm8596_vm5, %v1638_v0, %v1639_v59  ;;  %v1653_v21 = vrot.slane %v1539_v12, 5  ;;  %v1660_v30 = vrot.slane %v1542_v26, 5  ;;  %v1664_v39 = vrot.slane %v1544_v35, 5  ;;  %v1550_v58 = vld [vmem:[%s8473_s26 + $0x58] sm:$0xf]  ;;  %v8322_v61 = vld [vmem:[%s8473_s26 + $0xc0] sm:$0xff]  }
  0xa6   : > { %7822 = vmatmul.mubr.bf16.gmra.mrb[12].mxu0 %v8308_v24  ;;  %v6494_v17 = vcombine.low %v1637_v8, %v1640_v9  ;;  %v1647_v19 = vsel %vm8596_vm5, %v1645_v14, %v1646_v7  ;;  %v1540_v24 = vld [vmem:[%s8473_s26 + $0x30] sm:$0xe]  ;;  %v6466_v42 = vrot.slane %v1543_v32, 9  ;;  %v1667_v43 = vrot.slane %v1545_v36, 5  ;;  %v1551_v59 = vld [vmem:[%s8473_s26 + $0x5c] sm:$0x1] }
  0xa7   : > { %7825 = vmatprep.mubr.bf16.mxu0 %v8310_v29  ;;  %7854 = vmatpush3.bf16.msra.mxu0 %v8321_v15  ;;  %v1650_v15 = vrot.slane %v1538_v11, 5  ;;  %v6495_v23 = vcombine.low %v1644_v13, %v1647_v19  ;;  %v6465_v28 = vrot.slane %v1540_v24, 9  ;;  %v1657_v29 = vrot.slane %v1541_v25, 5  ;;  %v8326_v6 = vld [vmem:[%s9670_s1 + $0xe0] sm:$0xff]   ;;  %v1554_v11 = vld [vmem:[%s8473_s26 + $0x68] sm:$0x1] }
  0xa8   : > { %7855 = vmatprep.subr.bf16.mxu0 %v8325_v34  ;;  %7598 = vmatmul.mubr.bf16.gmra.mrb[28].mxu1 %v6452_v62  ;;  %v1666_v46 = vrot.slane %v1664_v39, 4  ;;  %v6467_v51 = vrot.slane %v1546_v44, 9  ;;  %v1671_v54 = vrot.slane %v1547_v49, 5  ;;  %v6468_v62 = vrot.slane %v1549_v57, 9  ;;  %v1552_v7 = vld [vmem:[%s8473_s26 + $0x60] sm:$0xe] }
  0xa9   : > { %7617 = vmatprep.mubr.bf16.mxu1 %v6493_v63  ;;  %v1652_v20 = vrot.slane %v1650_v15, 4  ;;  %v1651_v37 = vsel %vm8596_vm5, %v6464_v16, %v1650_v15  ;;  %v1678_v63 = vrot.slane %v1550_v58, 5  ;;  %v1665_v0 = vsel %vm8596_vm5, %v6466_v42, %v1664_v39  ;;  %v1553_v8 = vld [vmem:[%s8473_s26 + $0x64] sm:$0xf]  ;;  %v6853_v13 = vld [vmem:[%s8473_s26 + $0x18] sm:$0xf] }
  0xaa   : > { %v1673_v60 = vrot.slane %v1671_v54, 4  ;;  %v1668_v1 = vsel %vm8596_vm5, %v1666_v46, %v1667_v43  ;;  %v1672_v3 = vsel %vm8596_vm5, %v6467_v51, %v1671_v54  ;;  %v1685_v12 = vrot.slane %v1553_v8, 5  ;;  %v8324_v16 = vld [vmem:[%s8473_s26 + $0xcc] sm:$0xff]   ;;  %v6854_v19 = vld [vmem:[%s8473_s26 + $0x1c] sm:$0xf] }
  0xab   : > { %7856 = vmatpush3.bf16.msra.mxu0 %v8325_v34  ;;  %v1659_v34 = vrot.slane %v1657_v29, 4  ;;  %v1654_v38 = vsel %vm8596_vm5, %v1652_v20, %v1653_v21  ;;  %v1680_v5 = vrot.slane %v1678_v63, 4  ;;  %v6498_v9 = vcombine.low %v1665_v0, %v1668_v1  ;;  %v6855_v20 = vld [vmem:[%s8473_s26 + $0x20] sm:$0x1]  ;;  %v1555_v26 = vld [vmem:[%s8473_s26 + $0x6c] sm:$0xe] }
  0xac   : > { %7889 = vmatprep.subr.bf16.mxu0 %v8952_v56  ;;  %v6496_v45 = vcombine.low %v1651_v37, %v1654_v38  ;;  %v9025_v10 = vsel %vm8596_vm5, %v6468_v62, %v1678_v63  ;;  %v4488_v21 = vshrl.u32 %v6853_v13, 16  ;;  %v4491_v24 = vshll.u32 %v6853_v13, 16  ;;  %v1557_v36 = vld [vmem:[%s8473_s26 + $0x74] sm:$0x1]  ;;  %v6856_v46 = vld [vmem:[%s8473_s26 + $0x24] sm:$0xf] }
  0xad   : > { %v1661_v41 = vsel %vm8596_vm5, %v1659_v34, %v1660_v30  ;;  %v4497_v25 = vshll.u32 %v6854_v19, 16  ;;  %v4507_v30 = vshll.u32 %v6855_v20, 16  ;;  %v6470_v32 = vrot.slane %v1555_v26, 9  ;;  %v6858_v51 = vld [vmem:[%s8473_s26 + $0x2c] sm:$0x1] }
  0xae   : > { %7826 = vmatmul.mubr.bf16.gmra.mrb[16].mxu0 %v8312_v55  ;;  %v1674_v55 = vrot.slane %v1548_v50, 5  ;;  %v4493_v34 = vrot.slane %v4491_v24, 5  ;;  %v6857_v50 = vld [vmem:[%s8473_s26 + $0x28] sm:$0xf]  ;;  %v1560_v8 = vld [vmem:[%s8473_s26 + $0x80] sm:$0x1] }
  0xaf   : > { %7829 = vmatprep.mubr.bf16.mxu0 %v8314_v2  ;;  %v1681_v2 = vrot.slane %v1551_v59, 5  ;;  %v4499_v35 = vrot.slane %v4497_v25, 5  ;;  %v4509_v44 = vrot.slane %v4507_v30, 5  ;;  %v4521_v57 = vshll.u32 %v6857_v50, 16  ;;  %v6861_v20 = vld [vmem:[%s8473_s26 + $0x38] sm:$0x1] }
  0xb0   : > { %7618 = vmatmul.mubr.bf16.vlgmr.msra.gmra.mrb[0].mxu1 %v6494_v17  ;;  %v1675_v18 = vsel %vm8596_vm5, %v1673_v60, %v1674_v55  ;;  %v6469_v17 = vrot.slane %v1552_v7, 9  ;;  %v4525_v58 = vshrl.u32 %v6857_v50, 16  ;;  %v1559_v7 = vld [vmem:[%s8473_s26 + $0x7c] sm:$0xf]  ;;  %v1561_v26 = vld [vmem:[%s8473_s26 + $0x84] sm:$0xe] }
  0xb1   : > { %7650 = vmatpush3.bf16.msra.mxu1 %v8842_v27  ;;  %7621 = vmatprep.mubr.bf16.mxu1 %v6495_v23  ;;  %v1658_v27 = vsel %vm8596_vm5, %v6465_v28, %v1657_v29  ;;  %v6499_v14 = vcombine.low %v1672_v3, %v1675_v18  ;;  %v9031_v15 = vsel %vm8596_vm5, %v1680_v5, %v1681_v2  ;;  %v1688_v23 = vrot.slane %v1554_v11, 5  ;;  %v1558_v3 = vld [vmem:[%s8473_s26 + $0x78] sm:$0xe] }
  0xb2   : > { %7651 = vmatprep.subr.bf16.mxu1 %v8315_v22  ;;  %v6497_v53 = vcombine.low %v1658_v27, %v1661_v41  ;;  %v4490_v28 = vrot.slane %v4488_v21, 4  ;;  %v4501_v29 = vshrl.u32 %v6854_v19, 16  ;;  %v6500_v38 = vcombine.low %v9025_v10, %v9031_v15  ;;  %v8330_v41 = vld [vmem:[%s9670_s1 + $0xf0] sm:$0xff]   ;;  %v8332_v10 = vld [vmem:[%s9670_s1 + $0xf8] sm:$0xff]  }
  0xb3   : > { %v1686_v39 = vsel %vm8596_vm5, %v6469_v17, %v1685_v12  ;;  %v1695_v27 = vrot.slane %v1557_v36, 5  ;;  %v4523_v0 = vrot.slane %v4521_v57, 5  ;;  %v4527_v1 = vrot.slane %v4525_v58, 4  ;;  %v6859_v15 = vld [vmem:[%s8473_s26 + $0x30] sm:$0xf] }
  0xb4   : > { %v4494_v43 = vor.u32 %v4493_v34, %v4490_v28  ;;  %v4531_v2 = vshll.u32 %v6858_v51, 16  ;;  %v1702_v19 = vrot.slane %v1560_v8, 5  ;;  %v4536_v21 = vshrl.u32 %v6859_v15, 16 }
  0xb5   : > { %7652 = vmatpush3.bf16.msra.mxu1 %v8315_v22  ;;  %v8328_v22 = vld [vmem:[%s9670_s1 + $0xe8] sm:$0xff]  }
  0xb6   : > { %7830 = vmatmul.mubr.bf16.gmra.mrb[20].mxu0 %v8316_v47  ;;  %7653 = vmatprep.subr.bf16.mxu1 %v8319_v40  ;;  %v1687_v47 = vrot.slane %v1685_v12, 4  ;;  %v4495_v54 = vrot.slane %v4494_v43, 4  ;;  %v4528_v12 = vor.u32 %v4527_v1, %v4523_v0  ;;  %v4533_v13 = vrot.slane %v4531_v2, 5  ;;  %v6862_v43 = vld [vmem:[%s8473_s26 + $0x3c] sm:$0xf] }
  0xb7   : > { %7833 = vmatprep.mubr.bf16.mxu0 %v8318_v31  ;;  %v1556_v31 = vld [vmem:[%s8473_s26 + $0x70] sm:$0xf] }
  0xb8   : > { %7622 = vmatmul.mubr.bf16.gmra.mrb[4].mxu1 %v6496_v45  ;;  %v1692_v37 = vrot.slane %v1556_v31, 5  ;;  %v1689_v42 = vsel %vm8596_vm5, %v1687_v47, %v1688_v23  ;;  %v4500_v63 = vsel %vm8496_vm2, %v4495_v54, %v4499_v35  ;;  %v4529_v47 = vrot.slane %v4528_v12, 4  ;;  %v8333_v12 = vld [vmem:[%s9670_s1 + $0x218] sm:$0xff]  }
  0xb9   : > { %7625 = vmatprep.mubr.bf16.mxu1 %v6497_v53  ;;  %7654 = vmatpush3.bf16.msra.mxu1 %v8319_v40  ;;  %v4503_v40 = vrot.slane %v4501_v29, 4  ;;  %v4515_v53 = vshll.u32 %v6856_v46, 16  ;;  %v6501_v59 = vcombine.low %v1686_v39, %v1689_v42  ;;  %v4538_v29 = vrot.slane %v4536_v21, 4 }
  0xba   : > { %7655 = vmatprep.subr.bf16.mxu1 %v8323_v52  ;;  %v1694_v45 = vrot.slane %v1692_v37, 4  ;;  %v9054_v49 = vsel %vm8596_vm5, %v6470_v32, %v1692_v37  ;;  %v1562_v32 = vld [vmem:[%s8473_s26 + $0x88] sm:$0xf]  ;;  %v4534_v34 = vsel %vm8496_vm2, %v4529_v47, %v4533_v13  ;;  %v4555_v37 = vshll.u32 %v6861_v20, 16 }
  0xbb   : > { %v4517_v62 = vrot.slane %v4515_v53, 5  ;;  %v4560_v53 = vshrl.u32 %v6862_v43, 16  ;;  %v4563_v54 = vshll.u32 %v6862_v43, 16 }
  0xbc   : > { %v9060_v55 = vsel %vm8596_vm5, %v1694_v45, %v1695_v27  ;;  %v6472_v45 = vrot.slane %v1561_v26, 9 }
  0xbd   : > { %7656 = vmatpush3.bf16.msra.mxu1 %v8323_v52  ;;  %v4512_v52 = vshrl.u32 %v6856_v46, 16  ;;  %v6502_v5 = vcombine.low %v9054_v49, %v9060_v55  ;;  %v1706_v46 = vrot.slane %v1562_v32, 5  ;;  %v6863_v49 = vld [vmem:[%s8473_s26 + $0x40] sm:$0xf] }
  0xbe   : > { %7834 = vmatmul.mubr.bf16.gmra.mrb[24].mxu0 %v8320_v48  ;;  %7657 = vmatprep.subr.bf16.mxu1 %v8326_v6  ;;  %v4504_v48 = vor.u32 %v4503_v40, %v4499_v35  ;;  %v4569_v58 = vshll.u32 %v6863_v49, 16 }
  0xbf   : > { %7837 = vmatprep.mubr.bf16.mxu0 %v8322_v61  ;;  %v4514_v61 = vrot.slane %v4512_v52, 4  ;;  %v6864_v52 = vld [vmem:[%s8473_s26 + $0x44] sm:$0x1]  ;;  %v1707_v55 = vsel %vm8596_vm5, %v6472_v45, %v1706_v46  ;;  %v1708_v57 = vrot.slane %v1706_v46, 4 }
  0xc0   : > { %7626 = vmatmul.mubr.bf16.gmra.mrb[8].mxu1 %v6498_v9  ;;  %v4505_v60 = vrot.slane %v4504_v48, 4  ;;  %v6471_v9 = vrot.slane %v1558_v3, 9  ;;  %v4571_v2 = vrot.slane %v4569_v58, 5  ;;  %v8336_v45 = vld [vmem:[%s9670_s1 + $0x220] sm:$0xff]  }
  0xc1   : > { %7629 = vmatprep.mubr.bf16.mxu1 %v6499_v14  ;;  %7658 = vmatpush3.bf16.msra.mxu1 %v8326_v6  ;;  %v4518_v6 = vor.u32 %v4517_v62, %v4514_v61  ;;  %v1699_v14 = vrot.slane %v1559_v7, 5  ;;  %v4562_v62 = vrot.slane %v4560_v53, 4 }
  0xc2   : > { %7659 = vmatprep.subr.bf16.mxu1 %v8328_v22  ;;  %v4510_v18 = vsel %vm8496_vm2, %v4505_v60, %v4509_v44  ;;  %v4557_v44 = vrot.slane %v4555_v37, 5  ;;  %v9100_v60 = vld [vmem:[%s9670_s1 + $0x100] sm:$0xff]  }
  0xc3   : > { %v6917_v11 = vcombine.low %v4500_v63, %v4510_v18  ;;  %v4519_v17 = vrot.slane %v4518_v6, 4  ;;  %v1700_v23 = vsel %vm8596_vm5, %v6471_v9, %v1699_v14  ;;  %v1701_v24 = vrot.slane %v1699_v14, 4  ;;  %v1565_v9 = vld [vmem:[%s8473_s26 + $0x94] sm:$0xf] }
  0xc4   : > { %v4565_v63 = vrot.slane %v4563_v54, 5  ;;  %v4579_v18 = vshll.u32 %v6864_v52, 16  ;;  %v6870_v54 = vld [vmem:[%s8473_s26 + $0x5c] sm:$0x1] }
  0xc5   : > { %7660 = vmatpush3.bf16.msra.mxu1 %v8328_v22  ;;  %v4539_v22 = vshll.u32 %v6859_v15, 16  ;;  %v4524_v28 = vsel %vm8496_vm2, %v4519_v17, %v4523_v0  ;;  %v1703_v35 = vsel %vm8596_vm5, %v1701_v24, %v1702_v19  ;;  %v8331_v0 = vld [vmem:[%s9670_s1 + $0x210] sm:$0xff]   ;;  %v6865_v17 = vld [vmem:[%s8473_s26 + $0x48] sm:$0xf]  ;;  %v6866_v19 = vld [vmem:[%s8473_s26 + $0x4c] sm:$0xf] }
  0xc6   : > { %7838 = vmatmul.mubr.bf16.gmra.mrb[28].mxu0 %v8324_v16  ;;  %7661 = vmatprep.subr.bf16.mxu1 %v8330_v41  ;;  %v6860_v16 = vld [vmem:[%s8473_s26 + $0x34] sm:$0xf]  ;;  %v6918_v39 = vcombine.low %v4524_v28, %v4534_v34  ;;  %v6503_v40 = vcombine.low %v1700_v23, %v1703_v35  ;;  %v4566_v8 = vor.u32 %v4565_v63, %v4562_v62  ;;  %v4581_v15 = vrot.slane %v4579_v18, 5  ;;  %v1568_v35 = vld [vmem:[%s8473_s26 + $0xa0] sm:$0xf] }
  0xc7   : > { %7857 = vmatprep.mubr.bf16.mxu0 %v6917_v11  ;;  %v4545_v25 = vshll.u32 %v6860_v16, 16  ;;  %v4541_v30 = vrot.slane %v4539_v22, 5  ;;  %v4549_v31 = vshrl.u32 %v6860_v16, 16  ;;  %v1713_v16 = vrot.slane %v1565_v9, 5  ;;  %v6867_v22 = vld [vmem:[%s8473_s26 + $0x50] sm:$0x1] }
  0xc8   : > { %7630 = vmatmul.mubr.bf16.gmra.mrb[12].mxu1 %v6500_v38  ;;  %v1563_v38 = vld [vmem:[%s8473_s26 + $0x8c] sm:$0x1]  ;;  %v4567_v20 = vrot.slane %v4566_v8, 4  ;;  %v4584_v47 = vshrl.u32 %v6865_v17, 16  ;;  %v4587_v23 = vshll.u32 %v6865_v17, 16  ;;  %v4593_v28 = vshll.u32 %v6866_v19, 16 }
  0xc9   : > { %7633 = vmatprep.mubr.bf16.mxu1 %v6501_v59  ;;  %7662 = vmatpush3.bf16.msra.mxu1 %v8330_v41  ;;  %v4547_v36 = vrot.slane %v4545_v25, 5  ;;  %v4542_v27 = vor.u32 %v4541_v30, %v4538_v29  ;;  %v4551_v42 = vrot.slane %v4549_v31, 4  ;;  %v8329_v41 = vld [vmem:[%s9670_s1 + $0x208] sm:$0xff]   ;;  %v1709_v48 = vrot.slane %v1563_v38, 5  ;;  %v1567_v29 = vld [vmem:[%s8473_s26 + $0x9c] sm:$0xe] }
  0xca   : > { %7663 = vmatprep.subr.bf16.mxu1 %v8332_v10  ;;  %v4573_v59 = vshrl.u32 %v6863_v49, 16  ;;  %v1715_v26 = vrot.slane %v1713_v16, 4  ;;  %v4572_v30 = vsel %vm8496_vm2, %v4567_v20, %v4571_v2  ;;  %v4586_v31 = vrot.slane %v4584_v47, 4  ;;  %v6871_v20 = vld [vmem:[%s8473_s26 + $0x60] sm:$0xf] }
  0xcb   : > { %v4543_v50 = vrot.slane %v4542_v27, 4  ;;  %v4552_v51 = vor.u32 %v4551_v42, %v4547_v36  ;;  %v1710_v1 = vsel %vm8596_vm5, %v1708_v57, %v1709_v48  ;;  %v4589_v32 = vrot.slane %v4587_v23, 5  ;;  %v6873_v23 = vld [vmem:[%s8473_s26 + $0x68] sm:$0x1] }
  0xcc   : > { %v4575_v3 = vrot.slane %v4573_v59, 4  ;;  %v6504_v7 = vcombine.low %v1707_v55, %v1710_v1  ;;  %v4597_v34 = vshrl.u32 %v6866_v19, 16  ;;  %v4595_v38 = vrot.slane %v4593_v28, 5 }
  0xcd   : > { %7664 = vmatpush3.bf16.msra.mxu1 %v8332_v10  ;;  %v4548_v61 = vsel %vm8496_vm2, %v4543_v50, %v4547_v36  ;;  %v1566_v10 = vld [vmem:[%s8473_s26 + $0x98] sm:$0x1]  ;;  %v4590_v43 = vor.u32 %v4589_v32, %v4586_v31  ;;  %v6474_v48 = vrot.slane %v1567_v29, 9  ;;  %v1720_v49 = vrot.slane %v1568_v35, 5  ;;  %v1573_v31 = vld [vmem:[%s8473_s26 + $0xb4] sm:$0xe] }
  0xce   : > { %7858 = vmatmul.mubr.bf16.vlgmr.msra.gmra.mrb[0].mxu0 %v6918_v39  ;;  %7937 = vmatprep.subr.bf16.mxu1 %v9100_v60  ;;  %v4576_v14 = vor.u32 %v4575_v3, %v4571_v2  ;;  %v1716_v21 = vrot.slane %v1566_v10, 5  ;;  %v4603_v39 = vshll.u32 %v6867_v22, 16  ;;  %v8339_v2 = vld [vmem:[%s9670_s1 + $0x228] sm:$0xff]  }
  0xcf   : > { %7890 = vmatpush3.bf16.msra.mxu0 %v8952_v56  ;;  %v4553_v56 = vrot.slane %v4552_v51, 4  ;;  %v6869_v51 = vld [vmem:[%s8473_s26 + $0x58] sm:$0xf]  ;;  %v4591_v52 = vrot.slane %v4590_v43, 4  ;;  %v1721_v58 = vsel %vm8596_vm5, %v6474_v48, %v1720_v49  ;;  %v1722_v59 = vrot.slane %v1720_v49, 4 }
  0xd0   : > { %7634 = vmatmul.mubr.bf16.gmra.mrb[16].mxu1 %v6502_v5  ;;  %7891 = vmatprep.subr.bf16.mxu0 %v8329_v41  ;;  %v1564_v5 = vld [vmem:[%s8473_s26 + $0x90] sm:$0xe]  ;;  %v4577_v24 = vrot.slane %v4576_v14, 4  ;;  %v1717_v37 = vsel %vm8596_vm5, %v1715_v26, %v1716_v21  ;;  %v4605_v46 = vrot.slane %v4603_v39, 5  ;;  %v6872_v21 = vld [vmem:[%s8473_s26 + $0x64] sm:$0xf] }
  0xd1   : > { %7637 = vmatprep.mubr.bf16.mxu1 %v6503_v40  ;;  %v4558_v6 = vsel %vm8496_vm2, %v4553_v56, %v4557_v44  ;;  %v6473_v11 = vrot.slane %v1564_v5, 9  ;;  %v1569_v40 = vld [vmem:[%s8473_s26 + $0xa4] sm:$0x1]  ;;  %v6868_v44 = vld [vmem:[%s8473_s26 + $0x54] sm:$0xf]  ;;  %v4621_v56 = vshrl.u32 %v6869_v51, 16  ;;  %v4596_v62 = vsel %vm8496_vm2, %v4591_v52, %v4595_v38 }
  0xd2   : > { %v6919_v13 = vcombine.low %v4548_v61, %v4558_v6  ;;  %v4582_v36 = vsel %vm8496_vm2, %v4577_v24, %v4581_v15  ;;  %v1723_v50 = vrot.slane %v1569_v40, 5  ;;  %v4608_v55 = vshrl.u32 %v6868_v44, 16  ;;  %v8342_v14 = vld [vmem:[%s9670_s1 + $0x230] sm:$0xff]   ;;  %v8345_v48 = vld [vmem:[%s9670_s1 + $0x238] sm:$0xff]  }
  0xd3   : > { %7892 = vmatpush3.bf16.msra.mxu0 %v8329_v41  ;;  %v1714_v25 = vsel %vm8596_vm5, %v6473_v11, %v1713_v16  ;;  %v6920_v27 = vcombine.low %v4572_v30, %v4582_v36  ;;  %v4599_v41 = vrot.slane %v4597_v34, 4  ;;  %v4611_v57 = vshll.u32 %v6868_v44, 16  ;;  %v1571_v11 = vld [vmem:[%s8473_s26 + $0xac] sm:$0xf] }
  0xd4   : > { %7893 = vmatprep.subr.bf16.mxu0 %v8331_v0  ;;  %7861 = vmatprep.mubr.bf16.mxu0 %v6919_v13  ;;  %v6505_v42 = vcombine.low %v1714_v25, %v1717_v37  ;;  %v4617_v61 = vshll.u32 %v6869_v51, 16  ;;  %v1724_v3 = vsel %vm8596_vm5, %v1722_v59, %v1723_v50  ;;  %v4623_v5 = vrot.slane %v4621_v56, 4  ;;  %v1574_v37 = vld [vmem:[%s8473_s26 + $0xb8] sm:$0xf] }
  0xd5   : > { %v4600_v53 = vor.u32 %v4599_v41, %v4595_v38  ;;  %v4613_v1 = vrot.slane %v4611_v57, 5  ;;  %v4627_v6 = vshll.u32 %v6870_v54, 16  ;;  %v6506_v9 = vcombine.low %v1721_v58, %v1724_v3  ;;  %v6876_v57 = vld [vmem:[%s8473_s26 + $0x74] sm:$0x1] }
  0xd6   : > { %7862 = vmatmul.mubr.bf16.gmra.mrb[4].mxu0 %v6920_v27  ;;  %v4619_v18 = vrot.slane %v4617_v61, 5  ;;  %v1727_v19 = vrot.slane %v1571_v11, 5  ;;  %v4632_v24 = vshrl.u32 %v6871_v20, 16  ;;  %v4635_v25 = vshll.u32 %v6871_v20, 16 }
  0xd7   : > { %7894 = vmatpush3.bf16.msra.mxu0 %v8331_v0  ;;  %v4601_v63 = vrot.slane %v4600_v53, 4  ;;  %v4610_v0 = vrot.slane %v4608_v55, 4  ;;  %v4629_v17 = vrot.slane %v4627_v6, 5  ;;  %v4641_v30 = vshll.u32 %v6872_v21, 16  ;;  %v6875_v53 = vld [vmem:[%s8473_s26 + $0x70] sm:$0xf] }
  0xd8   : > { %7638 = vmatmul.mubr.bf16.gmra.mrb[20].mxu1 %v6504_v7  ;;  %7895 = vmatprep.subr.bf16.mxu0 %v8333_v12  ;;  %v1570_v7 = vld [vmem:[%s8473_s26 + $0xa8] sm:$0xe]  ;;  %v4624_v16 = vor.u32 %v4623_v5, %v4619_v18  ;;  %v1729_v29 = vrot.slane %v1727_v19, 4  ;;  %v4634_v34 = vrot.slane %v4632_v24, 4  ;;  %v4637_v35 = vrot.slane %v4635_v25, 5 }
  0xd9   : > { %7641 = vmatprep.mubr.bf16.mxu1 %v6505_v42  ;;  %v4606_v8 = vsel %vm8496_vm2, %v4601_v63, %v4605_v46  ;;  %v4614_v10 = vor.u32 %v4613_v1, %v4610_v0  ;;  %v6475_v13 = vrot.slane %v1570_v7, 9  ;;  %v4645_v36 = vshrl.u32 %v6872_v21, 16  ;;  %v1575_v42 = vld [vmem:[%s8473_s26 + $0xbc] sm:$0x1]  ;;  %v6874_v46 = vld [vmem:[%s8473_s26 + $0x6c] sm:$0xf] }
  0xda   : > { %v6921_v15 = vcombine.low %v4596_v62, %v4606_v8  ;;  %v4625_v26 = vrot.slane %v4624_v16, 4  ;;  %v4643_v40 = vrot.slane %v4641_v30, 5  ;;  %v4651_v27 = vshll.u32 %v6873_v23, 16  ;;  %v8334_v8 = vld [vmem:[%s8473_s26 + $0xc] sm:$0xff]  }
  0xdb   : > { %7896 = vmatpush3.bf16.msra.mxu0 %v8333_v12  ;;  %v1572_v12 = vld [vmem:[%s8473_s26 + $0xb0] sm:$0x1]  ;;  %v4615_v22 = vrot.slane %v4614_v10, 4  ;;  %v1728_v28 = vsel %vm8596_vm5, %v6475_v13, %v1727_v19  ;;  %v4638_v44 = vor.u32 %v4637_v35, %v4634_v34  ;;  %v6476_v50 = vrot.slane %v1573_v31, 9  ;;  %v6878_v13 = vld [vmem:[%s8473_s26 + $0x7c] sm:$0xf] }
  0xdc   : > { %7897 = vmatprep.subr.bf16.mxu0 %v8336_v45  ;;  %v1730_v47 = vrot.slane %v1572_v12, 5  ;;  %7865 = vmatprep.mubr.bf16.mxu0 %v6921_v15  ;;  %v4630_v38 = vsel %vm8496_vm2, %v4625_v26, %v4629_v17  ;;  %v4653_v49 = vrot.slane %v4651_v27, 5  ;;  %v1734_v51 = vrot.slane %v1574_v37, 5  ;;  %v6877_v12 = vld [vmem:[%s8473_s26 + $0x78] sm:$0xf] }
  0xdd   : > { %v4620_v32 = vsel %vm8496_vm2, %v4615_v22, %v4619_v18  ;;  %v1737_v52 = vrot.slane %v1575_v42, 5  ;;  %v4639_v54 = vrot.slane %v4638_v44, 4  ;;  %v4656_v58 = vshrl.u32 %v6874_v46, 16  ;;  %v6879_v17 = vld [vmem:[%s8473_s26 + $0x80] sm:$0x1] }
  0xde   : > { %v1731_v39 = vsel %vm8596_vm5, %v1729_v29, %v1730_v47  ;;  %v6922_v43 = vcombine.low %v4620_v32, %v4630_v38  ;;  %v4659_v59 = vshll.u32 %v6874_v46, 16  ;;  %v1735_v61 = vsel %vm8596_vm5, %v6476_v50, %v1734_v51  ;;  %v6880_v26 = vld [vmem:[%s8473_s26 + $0x84] sm:$0xf]  ;;  %v6881_v32 = vld [vmem:[%s8473_s26 + $0x88] sm:$0xf] }
  0xdf   : > { %7898 = vmatpush3.bf16.msra.mxu0 %v8336_v45  ;;  %v6507_v41 = vcombine.low %v1728_v28, %v1731_v39  ;;  %v4647_v45 = vrot.slane %v4645_v36, 4  ;;  %v1736_v56 = vrot.slane %v1734_v51, 4  ;;  %v4665_v62 = vshll.u32 %v6875_v53, 16  ;;  %v8335_v36 = vld [vmem:[%s8473_s26 + $0x18] sm:$0xff]   ;;  %v6882_v37 = vld [vmem:[%s8473_s26 + $0x8c] sm:$0x1] }
  0xe0   : > { %7642 = vmatmul.mubr.bf16.gmra.mrb[24].mxu1 %v6506_v9  ;;  %7899 = vmatprep.subr.bf16.mxu0 %v8339_v2  ;;  %v4669_v63 = vshrl.u32 %v6875_v53, 16  ;;  %v4644_v0 = vsel %vm8496_vm2, %v4639_v54, %v4643_v40  ;;  %v4661_v3 = vrot.slane %v4659_v59, 5  ;;  %v4675_v7 = vshll.u32 %v6876_v57, 16  ;;  %v6884_v57 = vld [vmem:[%s8473_s26 + $0x94] sm:$0xf] }
  0xe1   : > { %7866 = vmatmul.mubr.bf16.gmra.mrb[8].mxu0 %v6922_v43  ;;  %7645 = vmatprep.mubr.bf16.mxu1 %v6507_v41  ;;  %v4648_v55 = vor.u32 %v4647_v45, %v4643_v40  ;;  %v1738_v18 = vsel %vm8596_vm5, %v1736_v56, %v1737_v52  ;;  %v4667_v5 = vrot.slane %v4665_v62, 5  ;;  %v4680_v19 = vshrl.u32 %v6877_v12, 16  ;;  %v8337_v41 = vld [vmem:[%s8473_s26 + $0x24] sm:$0xff]  }
  0xe2   : > { %v4671_v6 = vrot.slane %v4669_v63, 4  ;;  %v6508_v10 = vcombine.low %v1735_v61, %v1738_v18  ;;  %v4677_v16 = vrot.slane %v4675_v7, 5  ;;  %v4683_v21 = vshll.u32 %v6877_v12, 16  ;;  %v6885_v61 = vld [vmem:[%s8473_s26 + $0x98] sm:$0x1] }
  0xe3   : > { %7900 = vmatpush3.bf16.msra.mxu0 %v8339_v2  ;;  %v4649_v1 = vrot.slane %v4648_v55, 4  ;;  %v4658_v2 = vrot.slane %v4656_v58, 4  ;;  %v4689_v22 = vshll.u32 %v6878_v13, 16  ;;  %v4693_v47 = vshrl.u32 %v6878_v13, 16  ;;  %v6883_v55 = vld [vmem:[%s8473_s26 + $0x90] sm:$0xf] }
  0xe4   : > { %7901 = vmatprep.subr.bf16.mxu0 %v8342_v14  ;;  %v4672_v15 = vor.u32 %v4671_v6, %v4667_v5  ;;  %v4682_v24 = vrot.slane %v4680_v19, 4  ;;  %v4699_v25 = vshll.u32 %v6879_v17, 16  ;;  %v4685_v29 = vrot.slane %v4683_v21, 5  ;;  %v6888_v12 = vld [vmem:[%s8473_s26 + $0xa4] sm:$0x1]  ;;  %v8338_v17 = vld [vmem:[%s8473_s26 + $0x30] sm:$0xff]  }
  0xe5   : > { %v4654_v9 = vsel %vm8496_vm2, %v4649_v1, %v4653_v49  ;;  %v4662_v11 = vor.u32 %v4661_v3, %v4658_v2  ;;  %v4691_v30 = vrot.slane %v4689_v22, 5  ;;  %v4695_v31 = vrot.slane %v4693_v47, 4  ;;  %v6886_v3 = vld [vmem:[%s8473_s26 + $0x9c] sm:$0xf] }
  0xe6   : > { %v4673_v23 = vrot.slane %v4672_v15, 4  ;;  %v4701_v35 = vrot.slane %v4699_v25, 5  ;;  %v4704_v38 = vshrl.u32 %v6880_v26, 16  ;;  %v4707_v39 = vshll.u32 %v6880_v26, 16 }
  0xe7   : > { %7902 = vmatpush3.bf16.msra.mxu0 %v8342_v14  ;;  %v6923_v14 = vcombine.low %v4644_v0, %v4654_v9  ;;  %v4663_v20 = vrot.slane %v4662_v11, 4  ;;  %v4686_v27 = vor.u32 %v4685_v29, %v4682_v24  ;;  %v4696_v42 = vor.u32 %v4695_v31, %v4691_v30  ;;  %v6887_v9 = vld [vmem:[%s8473_s26 + $0xa0] sm:$0xf]  ;;  %v8356_v29 = vld [vmem:[%s9670_s1 + $0x110] sm:$0xff]  }
  0xe8   : > { %7903 = vmatprep.subr.bf16.mxu0 %v8345_v48  ;;  %7646 = vmatmul.mubr.bf16.gmra.mrb[28].mxu1 %v6508_v10  ;;  %v4678_v34 = vsel %vm8496_vm2, %v4673_v23, %v4677_v16  ;;  %v4713_v43 = vshll.u32 %v6881_v32, 16  ;;  %v4706_v44 = vrot.slane %v4704_v38, 4  ;;  %v4709_v45 = vrot.slane %v4707_v39, 5  ;;  %v8340_v23 = vld [vmem:[%s8473_s26 + $0x3c] sm:$0xff]   ;;  %v6890_v38 = vld [vmem:[%s8473_s26 + $0xac] sm:$0xf] }
  0xe9   : > { %7869 = vmatprep.mubr.bf16.mxu0 %v6923_v14  ;;  %7665 = vmatprep.mubr.bf16.mxu1 %v8334_v8  ;;  %v4668_v28 = vsel %vm8496_vm2, %v4663_v20, %v4667_v5  ;;  %v4717_v46 = vshrl.u32 %v6881_v32, 16  ;;  %v4687_v49 = vrot.slane %v4686_v27, 4  ;;  %v4697_v50 = vrot.slane %v4696_v42, 4  ;;  %v8355_v8 = vld [vmem:[%s9670_s1 + $0x108] sm:$0xff]   ;;  %v6891_v39 = vld [vmem:[%s8473_s26 + $0xb0] sm:$0x1] }
  0xea   : > { %v6924_v40 = vcombine.low %v4668_v28, %v4678_v34  ;;  %v4715_v51 = vrot.slane %v4713_v43, 5  ;;  %v4710_v52 = vor.u32 %v4709_v45, %v4706_v44  ;;  %v4728_v56 = vshrl.u32 %v6883_v55, 16  ;;  %v6889_v34 = vld [vmem:[%s8473_s26 + $0xa8] sm:$0xf] }
  0xeb   : > { %7904 = vmatpush3.bf16.msra.mxu0 %v8345_v48  ;;  %v4723_v48 = vshll.u32 %v6882_v37, 16  ;;  %v4719_v53 = vrot.slane %v4717_v46, 4  ;;  %v4692_v58 = vsel %vm8496_vm2, %v4687_v49, %v4691_v30  ;;  %v4702_v59 = vsel %vm8496_vm2, %v4697_v50, %v4701_v35  ;;  %v8341_v49 = vld [vmem:[%s8473_s26 + $0x48] sm:$0xff]   ;;  %v8357_v50 = vld [vmem:[%s9670_s1 + $0x118] sm:$0xff]  }
  0xec   : > { %7870 = vmatmul.mubr.bf16.gmra.mrb[12].mxu0 %v6924_v40  ;;  %v4731_v62 = vshll.u32 %v6883_v55, 16  ;;  %v6925_v63 = vcombine.low %v4692_v58, %v4702_v59  ;;  %v4711_v0 = vrot.slane %v4710_v52, 4  ;;  %v4737_v2 = vshll.u32 %v6884_v57, 16  ;;  %v6892_v55 = vld [vmem:[%s8473_s26 + $0xb4] sm:$0xf] }
  0xed   : > { %v4725_v54 = vrot.slane %v4723_v48, 5  ;;  %v4720_v1 = vor.u32 %v4719_v53, %v4715_v51  ;;  %v4730_v18 = vrot.slane %v4728_v56, 4  ;;  %v4741_v6 = vshrl.u32 %v6884_v57, 16  ;;  %v8343_v57 = vld [vmem:[%s8473_s26 + $0x54] sm:$0xff]  }
  0xee   : > { %v4733_v5 = vrot.slane %v4731_v62, 5  ;;  %v4747_v7 = vshll.u32 %v6885_v61, 16  ;;  %7873 = vmatprep.mubr.bf16.mxu0 %v6925_v63  ;;  %v4716_v10 = vsel %vm8496_vm2, %v4711_v0, %v4715_v51  ;;  %v4739_v11 = vrot.slane %v4737_v2, 5  ;;  %v6893_v56 = vld [vmem:[%s8473_s26 + $0xb8] sm:$0xf] }
  0xef   : > { %v4752_v13 = vshrl.u32 %v6886_v3, 16  ;;  %v4743_v15 = vrot.slane %v4741_v6, 4  ;;  %v4755_v19 = vshll.u32 %v6886_v3, 16  ;;  %v4761_v22 = vshll.u32 %v6887_v9, 16  ;;  %v6894_v62 = vld [vmem:[%s8473_s26 + $0xbc] sm:$0x1] }
  0xf0   : > { %7666 = vmatmul.mubr.bf16.vlgmr.msra.gmra.mrb[0].mxu1 %v8335_v36  ;;  %v4734_v14 = vor.u32 %v4733_v5, %v4730_v18  ;;  %v4749_v16 = vrot.slane %v4747_v7, 5  ;;  %v4765_v47 = vshrl.u32 %v6887_v9, 16  ;;  %v4771_v32 = vshll.u32 %v6888_v12, 16  ;;  %v8358_v7 = vld [vmem:[%s9670_s1 + $0x120] sm:$0xff]  }
  0xf1   : > { %7945 = vmatpush3.bf16.msra.mxu1 %v9100_v60  ;;  %7669 = vmatprep.mubr.bf16.mxu1 %v8337_v41  ;;  %v4721_v60 = vrot.slane %v4720_v1, 4  ;;  %v4754_v21 = vrot.slane %v4752_v13, 4  ;;  %v4744_v26 = vor.u32 %v4743_v15, %v4739_v11  ;;  %v4757_v28 = vrot.slane %v4755_v19, 5  ;;  %v6896_v15 = vld [vmem:[%s8473_s26 + $0xc4] sm:$0xf] }
  0xf2   : > { %7938 = vmatprep.subr.bf16.mxu1 %v8355_v8  ;;  %v4735_v25 = vrot.slane %v4734_v14, 4  ;;  %v4763_v30 = vrot.slane %v4761_v22, 5  ;;  %v4767_v31 = vrot.slane %v4765_v47, 4  ;;  %v4776_v40 = vshrl.u32 %v6889_v34, 16 }
  0xf3   : > { %v4726_v20 = vsel %vm8496_vm2, %v4721_v60, %v4725_v54  ;;  %v4745_v36 = vrot.slane %v4744_v26, 4  ;;  %v4758_v37 = vor.u32 %v4757_v28, %v4754_v21  ;;  %v4773_v42 = vrot.slane %v4771_v32, 5  ;;  %v6897_v21 = vld [vmem:[%s8473_s26 + $0xc8] sm:$0x1]  ;;  %v8344_v26 = vld [vmem:[%s8473_s26 + $0x60] sm:$0xff]  }
  0xf4   : > { %v6926_v24 = vcombine.low %v4716_v10, %v4726_v20  ;;  %v4740_v35 = vsel %vm8496_vm2, %v4735_v25, %v4739_v11  ;;  %v4768_v27 = vor.u32 %v4767_v31, %v4763_v30  ;;  %v4779_v43 = vshll.u32 %v6889_v34, 16  ;;  %v6895_v11 = vld [vmem:[%s8473_s26 + $0xc0] sm:$0xf]  ;;  %v8359_v28 = vld [vmem:[%s9670_s1 + $0x128] sm:$0xff]  }
  0xf5   : > { %7946 = vmatpush3.bf16.msra.mxu1 %v8355_v8  ;;  %v4785_v41 = vshll.u32 %v6890_v38, 16  ;;  %v4750_v44 = vsel %vm8496_vm2, %v4745_v36, %v4749_v16  ;;  %v4759_v45 = vrot.slane %v4758_v37, 4  ;;  %v4778_v46 = vrot.slane %v4776_v40, 4  ;;  %v6898_v34 = vld [vmem:[%s8473_s26 + $0xcc] sm:$0xf] }
  0xf6   : > { %7939 = vmatprep.subr.bf16.mxu1 %v8356_v29  ;;  %7874 = vmatmul.mubr.bf16.gmra.mrb[16].mxu0 %v6926_v24  ;;  %v4789_v48 = vshrl.u32 %v6890_v38, 16  ;;  %v6927_v51 = vcombine.low %v4740_v35, %v4750_v44  ;;  %v4769_v52 = vrot.slane %v4768_v27, 4  ;;  %v4781_v53 = vrot.slane %v4779_v43, 5  ;;  %v6899_v35 = vld [vmem:[%s8473_s26 + $0xd0] sm:$0xf] }
  0xf7   : > { %v4787_v54 = vrot.slane %v4785_v41, 5  ;;  %v4764_v58 = vsel %vm8496_vm2, %v4759_v45, %v4763_v30  ;;  %v4795_v61 = vshll.u32 %v6891_v39, 16  ;;  %v4800_v1 = vshrl.u32 %v6892_v55, 16  ;;  %v8346_v36 = vld [vmem:[%s8473_s26 + $0x6c] sm:$0xff]   ;;  %v6900_v40 = vld [vmem:[%s8473_s26 + $0xd4] sm:$0x1] }
  0xf8   : > { %7670 = vmatmul.mubr.bf16.gmra.mrb[4].mxu1 %v8338_v17  ;;  %v4791_v59 = vrot.slane %v4789_v48, 4  ;;  %7877 = vmatprep.mubr.bf16.mxu0 %v6927_v51  ;;  %v4774_v63 = vsel %vm8496_vm2, %v4769_v52, %v4773_v42  ;;  %v4782_v0 = vor.u32 %v4781_v53, %v4778_v46  ;;  %v4803_v2 = vshll.u32 %v6892_v55, 16 }
  0xf9   : > { %7673 = vmatprep.mubr.bf16.mxu1 %v8340_v23  ;;  %7947 = vmatpush3.bf16.msra.mxu1 %v8356_v29  ;;  %v6928_v3 = vcombine.low %v4764_v58, %v4774_v63  ;;  %v4797_v5 = vrot.slane %v4795_v61, 5  ;;  %v4809_v6 = vshll.u32 %v6893_v56, 16  ;;  %v4802_v9 = vrot.slane %v4800_v1, 4  ;;  %v6941_v61 = vld [vmem:[%s8473_s26 + $0x18] sm:$0xe] }
  0xfa   : > { %7940 = vmatprep.subr.bf16.mxu1 %v8357_v50  ;;  %v4792_v18 = vor.u32 %v4791_v59, %v4787_v54  ;;  %v4783_v8 = vrot.slane %v4782_v0, 4  ;;  %v4805_v10 = vrot.slane %v4803_v2, 5  ;;  %v4813_v60 = vshrl.u32 %v6893_v56, 16  ;;  %v6942_v56 = vld [vmem:[%s8473_s26 + $0x1c] sm:$0xf] }
  0xfb   : > { %v4811_v13 = vrot.slane %v4809_v6, 5  ;;  %v4819_v14 = vshll.u32 %v6894_v62, 16  ;;  %v4824_v16 = vshrl.u32 %v6895_v11, 16  ;;  %v4827_v22 = vshll.u32 %v6895_v11, 16  ;;  %v6943_v0 = vld [vmem:[%s8473_s26 + $0x20] sm:$0x1] }
  0xfc   : > { %v4793_v12 = vrot.slane %v4792_v18, 4  ;;  %v4788_v17 = vsel %vm8496_vm2, %v4783_v8, %v4787_v54  ;;  %v4806_v19 = vor.u32 %v4805_v10, %v4802_v9  ;;  %v4815_v20 = vrot.slane %v4813_v60, 4  ;;  %v8347_v6 = vld [vmem:[%s8473_s26 + $0x78] sm:$0xff]   ;;  %v6944_v60 = vld [vmem:[%s8473_s26 + $0x24] sm:$0xe] }
  0xfd   : > { %7948 = vmatpush3.bf16.msra.mxu1 %v8357_v50  ;;  %v4821_v23 = vrot.slane %v4819_v14, 5  ;;  %v4826_v24 = vrot.slane %v4824_v16, 4  ;;  %v4833_v25 = vshll.u32 %v6896_v15, 16  ;;  %v4829_v32 = vrot.slane %v4827_v22, 5  ;;  %v8360_v50 = vld [vmem:[%s9670_s1 + $0x130] sm:$0xff]   ;;  %v8348_v16 = vld [vmem:[%s8473_s26 + $0x84] sm:$0xff]  }
  0xfe   : > { %7941 = vmatprep.subr.bf16.mxu1 %v8358_v7  ;;  %7878 = vmatmul.mubr.bf16.gmra.mrb[20].mxu0 %v6928_v3  ;;  %v4798_v47 = vsel %vm8496_vm2, %v4793_v12, %v4797_v5  ;;  %v4807_v30 = vrot.slane %v4806_v19, 4  ;;  %v4816_v31 = vor.u32 %v4815_v20, %v4811_v13  ;;  %v4837_v38 = vshrl.u32 %v6896_v15, 16  ;;  %v6945_v11 = vld [vmem:[%s8473_s26 + $0x28] sm:$0xf]  ;;  %v6946_v15 = vld [vmem:[%s8473_s26 + $0x2c] sm:$0x1] }
  0xff   : > { %v6929_v29 = vcombine.low %v4788_v17, %v4798_v47  ;;  %v4835_v37 = vrot.slane %v4833_v25, 5  ;;  %v4843_v39 = vshll.u32 %v6897_v21, 16  ;;  %v4848_v27 = vshrl.u32 %v6898_v34, 16  ;;  %v6947_v22 = vld [vmem:[%s8473_s26 + $0x30] sm:$0xe] }
 0x100   : > { %7674 = vmatmul.mubr.bf16.gmra.mrb[8].mxu1 %v8341_v49  ;;  %v4812_v42 = vsel %vm8496_vm2, %v4807_v30, %v4811_v13  ;;  %v4817_v43 = vrot.slane %v4816_v31, 4  ;;  %v4830_v41 = vor.u32 %v4829_v32, %v4826_v24  ;;  %v4851_v44 = vshll.u32 %v6898_v34, 16  ;;  %v6948_v25 = vld [vmem:[%s8473_s26 + $0x34] sm:$0xf] }
 0x101   : > { %7677 = vmatprep.mubr.bf16.mxu1 %v8343_v57  ;;  %7949 = vmatpush3.bf16.msra.mxu1 %v8358_v7  ;;  %v4839_v45 = vrot.slane %v4837_v38, 4  ;;  %v4845_v46 = vrot.slane %v4843_v39, 5  ;;  %v4850_v48 = vrot.slane %v4848_v27, 4  ;;  %v4857_v49 = vshll.u32 %v6899_v35, 16  ;;  %v8361_v7 = vld [vmem:[%s9670_s1 + $0x138] sm:$0xff]  }
 0x102   : > { %7942 = vmatprep.subr.bf16.mxu1 %v8359_v28  ;;  %7881 = vmatprep.mubr.bf16.mxu0 %v6929_v29  ;;  %v4822_v51 = vsel %vm8496_vm2, %v4817_v43, %v4821_v23  ;;  %v4831_v52 = vrot.slane %v4830_v41, 4  ;;  %v4853_v53 = vrot.slane %v4851_v44, 5  ;;  %v4861_v54 = vshrl.u32 %v6899_v35, 16  ;;  %v6952_v38 = vld [vmem:[%s8473_s26 + $0x44] sm:$0x1] }
 0x103   : > { %v6930_v55 = vcombine.low %v4812_v42, %v4822_v51  ;;  %v4840_v57 = vor.u32 %v4839_v45, %v4835_v37  ;;  %v4859_v58 = vrot.slane %v4857_v49, 5  ;;  %v4867_v59 = vshll.u32 %v6900_v40, 16  ;;  %v8349_v42 = vld [vmem:[%s8473_s26 + $0x90] sm:$0xff]   ;;  %v6953_v41 = vld [vmem:[%s8473_s26 + $0x48] sm:$0xe] }
 0x104   : > { %v4854_v62 = vor.u32 %v4853_v53, %v4850_v48  ;;  %v4863_v63 = vrot.slane %v4861_v54, 4  ;;  %v6989_v1 = vrot.slane %v6941_v61, 9  ;;  %v4836_v2 = vsel %vm8496_vm2, %v4831_v52, %v4835_v37  ;;  %v6951_v37 = vld [vmem:[%s8473_s26 + $0x40] sm:$0xf]  ;;  %v6954_v49 = vld [vmem:[%s8473_s26 + $0x4c] sm:$0xf] }
 0x105   : > { %7950 = vmatpush3.bf16.msra.mxu1 %v8359_v28  ;;  %v4841_v3 = vrot.slane %v4840_v57, 4  ;;  %v5355_v18 = vrot.slane %v6942_v56, 5  ;;  %v5358_v5 = vrot.slane %v6943_v0, 5  ;;  %v4869_v10 = vrot.slane %v4867_v59, 5  ;;  %v8350_v48 = vld [vmem:[%s8473_s26 + $0x9c] sm:$0xff]  }
 0x106   : > { %7943 = vmatprep.subr.bf16.mxu1 %v8360_v50  ;;  %7882 = vmatmul.mubr.bf16.gmra.mrb[24].mxu0 %v6930_v55  ;;  %v4855_v8 = vrot.slane %v4854_v62, 4  ;;  %v4864_v9 = vor.u32 %v4863_v63, %v4859_v58  ;;  %v5362_v21 = vrot.slane %v6945_v11, 5  ;;  %v6990_v23 = vrot.slane %v6944_v60, 9  ;;  %v6956_v57 = vld [vmem:[%s8473_s26 + $0x54] sm:$0xe] }
 0x107   : > { %v4846_v12 = vsel %vm8496_vm2, %v4841_v3, %v4845_v46  ;;  %v5356_v13 = vsel %vm8596_vm5, %v6989_v1, %v5355_v18  ;;  %v5357_v14 = vrot.slane %v5355_v18, 4  ;;  %v5365_v24 = vrot.slane %v6946_v15, 5  ;;  %v6958_v59 = vld [vmem:[%s8473_s26 + $0x5c] sm:$0x1]  ;;  %v6959_v18 = vld [vmem:[%s8473_s26 + $0x60] sm:$0xe] }
 0x108   : > { %7678 = vmatmul.mubr.bf16.gmra.mrb[12].mxu1 %v8344_v26  ;;  %v6931_v17 = vcombine.low %v4836_v2, %v4846_v12  ;;  %v4860_v19 = vsel %vm8496_vm2, %v4855_v8, %v4859_v58  ;;  %v4865_v20 = vrot.slane %v4864_v9, 4  ;;  %v6949_v26 = vld [vmem:[%s8473_s26 + $0x38] sm:$0x1]  ;;  %v5364_v30 = vrot.slane %v5362_v21, 4  ;;  %v6961_v8 = vld [vmem:[%s8473_s26 + $0x68] sm:$0x1] }
 0x109   : > { %7681 = vmatprep.mubr.bf16.mxu1 %v8346_v36  ;;  %7951 = vmatpush3.bf16.msra.mxu1 %v8360_v50  ;;  %v5359_v47 = vsel %vm8596_vm5, %v5357_v14, %v5358_v5  ;;  %v6991_v31 = vrot.slane %v6947_v22, 9  ;;  %v5369_v34 = vrot.slane %v6948_v25, 5  ;;  %v5372_v35 = vrot.slane %v6949_v26, 5  ;;  %v6950_v36 = vld [vmem:[%s8473_s26 + $0x3c] sm:$0xe]  ;;  %v8351_v15 = vld [vmem:[%s8473_s26 + $0xa8] sm:$0xff]  }
 0x10a   : > { %7944 = vmatprep.subr.bf16.mxu1 %v8361_v7  ;;  %7885 = vmatprep.mubr.bf16.mxu0 %v6931_v17  ;;  %v4870_v28 = vsel %vm8496_vm2, %v4865_v20, %v4869_v10  ;;  %v7021_v29 = vcombine.low %v5356_v13, %v5359_v47  ;;  %v6992_v39 = vrot.slane %v6950_v36, 9  ;;  %v5376_v40 = vrot.slane %v6951_v37, 5  ;;  %v6955_v50 = vld [vmem:[%s8473_s26 + $0x50] sm:$0x1]  ;;  %v6957_v58 = vld [vmem:[%s8473_s26 + $0x58] sm:$0xf] }
 0x10b   : > { %v6932_v32 = vcombine.low %v4860_v19, %v4870_v28  ;;  %v5371_v27 = vrot.slane %v5369_v34, 4  ;;  %v5379_v43 = vrot.slane %v6952_v38, 5  ;;  %v5363_v44 = vsel %vm8596_vm5, %v6990_v23, %v5362_v21  ;;  %v6960_v5 = vld [vmem:[%s8473_s26 + $0x64] sm:$0xf]  ;;  %v6962_v13 = vld [vmem:[%s8473_s26 + $0x6c] sm:$0xe] }
 0x10c   : > { %v5366_v45 = vsel %vm8596_vm5, %v5364_v30, %v5365_v24  ;;  %v5378_v46 = vrot.slane %v5376_v40, 4  ;;  %v6993_v51 = vrot.slane %v6953_v41, 9  ;;  %v5370_v52 = vsel %vm8596_vm5, %v6991_v31, %v5369_v34  ;;  %v6963_v19 = vld [vmem:[%s8473_s26 + $0x70] sm:$0xf]  ;;  %v6964_v20 = vld [vmem:[%s8473_s26 + $0x74] sm:$0x1] }
 0x10d   : > { %7952 = vmatpush3.bf16.msra.mxu1 %v8361_v7  ;;  %v5373_v53 = vsel %vm8596_vm5, %v5371_v27, %v5372_v35  ;;  %v5383_v54 = vrot.slane %v6954_v49, 5  ;;  %v5386_v55 = vrot.slane %v6955_v50, 5  ;;  %v7022_v61 = vcombine.low %v5363_v44, %v5366_v45  ;;  %v8352_v23 = vld [vmem:[%s8473_s26 + $0xb4] sm:$0xff]   ;;  %v6613_v26 = vld [vmem:[%s8473_s26 + $0x6c] sm:$0xf] }
 0x10e   : > { %7886 = vmatmul.mubr.bf16.gmra.mrb[28].mxu0 %v6932_v32  ;;  %v9310_v56 = vsel %vm8596_vm5, %v6992_v39, %v5376_v40  ;;  %v6994_v63 = vrot.slane %v6956_v57, 9  ;;  %v7023_v0 = vcombine.low %v5370_v52, %v5373_v53  ;;  %v9314_v1 = vsel %vm8596_vm5, %v5378_v46, %v5379_v43  ;;  %v6614_v28 = vld [vmem:[%s8473_s26 + $0x70] sm:$0xf]  ;;  %v6615_v31 = vld [vmem:[%s8473_s26 + $0x74] sm:$0x1] }
 0x10f   : > { %7905 = vmatprep.mubr.bf16.mxu0 %v7021_v29  ;;  %v5385_v62 = vrot.slane %v5383_v54, 4  ;;  %v5390_v2 = vrot.slane %v6957_v58, 5  ;;  %v5393_v3 = vrot.slane %v6958_v59, 5  ;;  %v6995_v9 = vrot.slane %v6959_v18, 9  ;;  %v6965_v35 = vld [vmem:[%s8473_s26 + $0x78] sm:$0xe] }
 0x110   : > { %7682 = vmatmul.mubr.bf16.gmra.mrb[16].mxu1 %v8347_v6  ;;  %v9320_v6 = vsel %vm8596_vm5, %v6993_v51, %v5383_v54  ;;  %v5397_v10 = vrot.slane %v6960_v5, 5  ;;  %v5400_v12 = vrot.slane %v6961_v8, 5  ;;  %v7024_v14 = vcombine.low %v9310_v56, %v9314_v1  ;;  %v6966_v40 = vld [vmem:[%s8473_s26 + $0x7c] sm:$0xf]  ;;  %v6967_v27 = vld [vmem:[%s8473_s26 + $0x80] sm:$0x1] }
 0x111   : > { %7685 = vmatprep.mubr.bf16.mxu1 %v8348_v16  ;;  %v9324_v7 = vsel %vm8596_vm5, %v5385_v62, %v5386_v55  ;;  %v9329_v60 = vsel %vm8596_vm5, %v6994_v63, %v5390_v2  ;;  %v5392_v11 = vrot.slane %v5390_v2, 4  ;;  %v6996_v21 = vrot.slane %v6962_v13, 9  ;;  %v6616_v45 = vld [vmem:[%s8473_s26 + $0x78] sm:$0xf]  ;;  %v6617_v51 = vld [vmem:[%s8473_s26 + $0x7c] sm:$0xf] }
 0x112   : > { %v9337_v16 = vsel %vm8596_vm5, %v6995_v9, %v5397_v10  ;;  %v5399_v17 = vrot.slane %v5397_v10, 4  ;;  %v7025_v22 = vcombine.low %v9320_v6, %v9324_v7  ;;  %v5404_v24 = vrot.slane %v6963_v19, 5  ;;  %v6618_v57 = vld [vmem:[%s8473_s26 + $0x80] sm:$0x1]  ;;  %v6968_v62 = vld [vmem:[%s8473_s26 + $0x84] sm:$0xe] }
 0x113   : > { %v9345_v47 = vsel %vm8596_vm5, %v5392_v11, %v5393_v3  ;;  %v5407_v25 = vrot.slane %v6964_v20, 5  ;;  %v2817_v32 = vshrl.u32 %v6613_v26, 16  ;;  %v2820_v34 = vshll.u32 %v6613_v26, 16  ;;  %v6969_v3 = vld [vmem:[%s8473_s26 + $0x88] sm:$0xf]  ;;  %v8353_v9 = vld [vmem:[%s8473_s26 + $0xc0] sm:$0xff]  }
 0x114   : > { %v7026_v29 = vcombine.low %v9329_v60, %v9345_v47  ;;  %v9354_v30 = vsel %vm8596_vm5, %v5399_v17, %v5400_v12  ;;  %v9362_v37 = vsel %vm8596_vm5, %v6996_v21, %v5404_v24  ;;  %v5406_v38 = vrot.slane %v5404_v24, 4  ;;  %v6970_v8 = vld [vmem:[%s8473_s26 + $0x8c] sm:$0x1]  ;;  %v6620_v21 = vld [vmem:[%s8473_s26 + $0x88] sm:$0xf] }
 0x115   : > { %v7027_v36 = vcombine.low %v9337_v16, %v9354_v30  ;;  %v2826_v39 = vshll.u32 %v6614_v28, 16  ;;  %v2822_v43 = vrot.slane %v2820_v34, 5  ;;  %v2830_v41 = vshrl.u32 %v6614_v28, 16 }
 0x116   : > { %7906 = vmatmul.mubr.bf16.vlgmr.msra.gmra.mrb[0].mxu0 %v7022_v61  ;;  %v2836_v44 = vshll.u32 %v6615_v31, 16  ;;  %v9369_v46 = vsel %vm8596_vm5, %v5406_v38, %v5407_v25  ;;  %v6997_v49 = vrot.slane %v6965_v35, 9  ;;  %v5411_v50 = vrot.slane %v6966_v40, 5  ;;  %v6621_v31 = vld [vmem:[%s8473_s26 + $0x8c] sm:$0x1] }
 0x117   : > { %7909 = vmatprep.mubr.bf16.mxu0 %v7023_v0  ;;  %v7028_v52 = vcombine.low %v9362_v37, %v9369_v46  ;;  %v2832_v54 = vrot.slane %v2830_v41, 4  ;;  %v5414_v61 = vrot.slane %v6967_v27, 5  ;;  %v2841_v56 = vshrl.u32 %v6616_v45, 16  ;;  %v6971_v27 = vld [vmem:[%s8473_s26 + $0x90] sm:$0xe] }
 0x118   : > { %7686 = vmatmul.mubr.bf16.gmra.mrb[20].mxu1 %v8349_v42  ;;  %v2819_v42 = vrot.slane %v2817_v32, 4  ;;  %v2838_v55 = vrot.slane %v2836_v44, 5  ;;  %v9377_v58 = vsel %vm8596_vm5, %v6997_v49, %v5411_v50  ;;  %v5413_v59 = vrot.slane %v5411_v50, 4 }
 0x119   : > { %7689 = vmatprep.mubr.bf16.mxu1 %v8350_v48  ;;  %v2828_v48 = vrot.slane %v2826_v39, 5  ;;  %v2844_v1 = vshll.u32 %v6616_v45, 16  ;;  %v2850_v2 = vshll.u32 %v6617_v51, 16  ;;  %v2843_v5 = vrot.slane %v2841_v56, 4  ;;  %v6972_v45 = vld [vmem:[%s8473_s26 + $0x94] sm:$0xf] }
 0x11a   : > { %v2823_v53 = vor.u32 %v2822_v43, %v2819_v42  ;;  %v9383_v18 = vsel %vm8596_vm5, %v5413_v59, %v5414_v61  ;;  %v2854_v6 = vshrl.u32 %v6617_v51, 16  ;;  %v2860_v7 = vshll.u32 %v6618_v57, 16  ;;  %v6623_v57 = vld [vmem:[%s8473_s26 + $0x94] sm:$0xf] }
 0x11b   : > { %v2833_v0 = vor.u32 %v2832_v54, %v2828_v48  ;;  %v7029_v12 = vcombine.low %v9377_v58, %v9383_v18  ;;  %v2846_v13 = vrot.slane %v2844_v1, 5  ;;  %v6998_v20 = vrot.slane %v6968_v62, 9  ;;  %v6622_v54 = vld [vmem:[%s8473_s26 + $0x90] sm:$0xf]  ;;  %v6974_v1 = vld [vmem:[%s8473_s26 + $0x9c] sm:$0xe] }
 0x11c   : > { %v2824_v63 = vrot.slane %v2823_v53, 4  ;;  %v2856_v17 = vrot.slane %v2854_v6, 4  ;;  %v2862_v19 = vrot.slane %v2860_v7, 5  ;;  %v5418_v24 = vrot.slane %v6969_v3, 5  ;;  %v6973_v53 = vld [vmem:[%s8473_s26 + $0x98] sm:$0x1] }
 0x11d   : > { %v2834_v11 = vrot.slane %v2833_v0, 4  ;;  %v5421_v25 = vrot.slane %v6970_v8, 5  ;;  %v2874_v40 = vshll.u32 %v6620_v21, 16  ;;  %v2878_v44 = vshrl.u32 %v6620_v21, 16  ;;  %v6975_v7 = vld [vmem:[%s8473_s26 + $0xa0] sm:$0xf] }
 0x11e   : > { %7910 = vmatmul.mubr.bf16.gmra.mrb[4].mxu0 %v7024_v14  ;;  %v2829_v10 = vsel %vm8496_vm2, %v2824_v63, %v2828_v48  ;;  %v6619_v14 = vld [vmem:[%s8473_s26 + $0x84] sm:$0xf]  ;;  %v9398_v38 = vsel %vm8596_vm5, %v6998_v20, %v5418_v24  ;;  %v5420_v39 = vrot.slane %v5418_v24, 4  ;;  %v2884_v51 = vshll.u32 %v6621_v31, 16  ;;  %v6624_v63 = vld [vmem:[%s8473_s26 + $0x98] sm:$0x1] }
 0x11f   : > { %7913 = vmatprep.mubr.bf16.mxu0 %v7025_v22  ;;  %v2839_v22 = vsel %vm8496_vm2, %v2834_v11, %v2838_v55  ;;  %v2865_v32 = vshrl.u32 %v6619_v14, 16  ;;  %v2868_v34 = vshll.u32 %v6619_v14, 16  ;;  %v2876_v50 = vrot.slane %v2874_v40, 5  ;;  %v6625_v20 = vld [vmem:[%s8473_s26 + $0x9c] sm:$0xf] }
 0x120   : > { %7690 = vmatmul.mubr.bf16.gmra.mrb[24].mxu1 %v8351_v15  ;;  %v2852_v15 = vrot.slane %v2850_v2, 5  ;;  %v6661_v26 = vcombine.low %v2829_v10, %v2839_v22  ;;  %v9409_v49 = vsel %vm8596_vm5, %v5420_v39, %v5421_v25  ;;  %v2880_v55 = vrot.slane %v2878_v44, 4  ;;  %v6626_v25 = vld [vmem:[%s8473_s26 + $0xa0] sm:$0xf]  ;;  %v6627_v39 = vld [vmem:[%s8473_s26 + $0xa4] sm:$0x1] }
 0x121   : > { %7693 = vmatprep.mubr.bf16.mxu1 %v8352_v23  ;;  %v2847_v23 = vor.u32 %v2846_v13, %v2843_v5  ;;  %v2867_v43 = vrot.slane %v2865_v32, 4  ;;  %v2870_v41 = vrot.slane %v2868_v34, 5  ;;  %v7030_v47 = vcombine.low %v9398_v38, %v9409_v49  ;;  %v6976_v13 = vld [vmem:[%s8473_s26 + $0xa4] sm:$0x1]  ;;  %v6978_v44 = vld [vmem:[%s8473_s26 + $0xac] sm:$0xf] }
 0x122   : > { %v2857_v28 = vor.u32 %v2856_v17, %v2852_v15  ;;  %v2886_v61 = vrot.slane %v2884_v51, 5  ;;  %v6999_v56 = vrot.slane %v6971_v27, 9  ;;  %v5425_v62 = vrot.slane %v6972_v45, 5 }
 0x123   : > { %v2848_v35 = vrot.slane %v2847_v23, 4  ;;  %v2881_v16 = vor.u32 %v2880_v55, %v2876_v50  ;;  %v5428_v30 = vrot.slane %v6973_v53, 5  ;;  %v2892_v5 = vshll.u32 %v6622_v54, 16  ;;  %v6979_v53 = vld [vmem:[%s8473_s26 + $0xb0] sm:$0x1] }
 0x124   : > { %v2858_v42 = vrot.slane %v2857_v28, 4  ;;  %v9425_v2 = vsel %vm8596_vm5, %v6999_v56, %v5425_v62  ;;  %v5427_v3 = vrot.slane %v5425_v62, 4  ;;  %v2898_v6 = vshll.u32 %v6623_v57, 16 }
 0x125   : > { %v2853_v48 = vsel %vm8496_vm2, %v2848_v35, %v2852_v15  ;;  %v2902_v11 = vshrl.u32 %v6623_v57, 16  ;;  %v2894_v15 = vrot.slane %v2892_v5, 5  ;;  %v7000_v24 = vrot.slane %v6974_v1, 9 }
 0x126   : > { %7914 = vmatmul.mubr.bf16.gmra.mrb[8].mxu0 %v7026_v29  ;;  %v2863_v60 = vsel %vm8496_vm2, %v2858_v42, %v2862_v19  ;;  %v2871_v29 = vor.u32 %v2870_v41, %v2867_v43  ;;  %v5429_v14 = vsel %vm8596_vm5, %v5427_v3, %v5428_v30  ;;  %v2900_v17 = vrot.slane %v2898_v6, 5  ;;  %v6977_v43 = vld [vmem:[%s8473_s26 + $0xa8] sm:$0xe] }
 0x127   : > { %7917 = vmatprep.mubr.bf16.mxu0 %v7027_v36  ;;  %v6662_v59 = vcombine.low %v2853_v48, %v2863_v60  ;;  %v2889_v36 = vshrl.u32 %v6622_v54, 16  ;;  %v2908_v19 = vshll.u32 %v6624_v63, 16  ;;  %v7031_v22 = vcombine.low %v9425_v2, %v5429_v14  ;;  %v6628_v54 = vld [vmem:[%s8473_s26 + $0xa8] sm:$0xf]  ;;  %v6980_v2 = vld [vmem:[%s8473_s26 + $0xb4] sm:$0xe] }
 0x128   : > { %7694 = vmatmul.mubr.bf16.gmra.mrb[28].mxu1 %v8353_v9  ;;  %v2872_v0 = vrot.slane %v2871_v29, 4  ;;  %v2882_v9 = vrot.slane %v2881_v16, 4  ;;  %v2904_v23 = vrot.slane %v2902_v11, 4  ;;  %v5432_v32 = vrot.slane %v6975_v7, 5  ;;  %v6982_v14 = vld [vmem:[%s8473_s26 + $0xbc] sm:$0x1] }
 0x129   : > { %7729 = vmatprep.mubr.bf16.mxu1 %v6661_v26  ;;  %v2891_v10 = vrot.slane %v2889_v36, 4  ;;  %v2910_v31 = vrot.slane %v2908_v19, 5  ;;  %v5435_v35 = vrot.slane %v6976_v13, 5  ;;  %v2913_v40 = vshrl.u32 %v6625_v20, 16 }
 0x12a   : > { %v2877_v8 = vsel %vm8496_vm2, %v2872_v0, %v2876_v50  ;;  %v2887_v21 = vsel %vm8496_vm2, %v2882_v9, %v2886_v61  ;;  %v2905_v34 = vor.u32 %v2904_v23, %v2900_v17  ;;  %v2916_v27 = vshll.u32 %v6625_v20, 16  ;;  %v6630_v0 = vld [vmem:[%s8473_s26 + $0xb0] sm:$0x1]  ;;  %v6632_v23 = vld [vmem:[%s8473_s26 + $0xb8] sm:$0xf] }
 0x12b   : > { %v6663_v26 = vcombine.low %v2877_v8, %v2887_v21  ;;  %v2895_v28 = vor.u32 %v2894_v15, %v2891_v10  ;;  %v9447_v46 = vsel %vm8596_vm5, %v7000_v24, %v5432_v32  ;;  %v2922_v42 = vshll.u32 %v6626_v25, 16  ;;  %v6981_v8 = vld [vmem:[%s8473_s26 + $0xb8] sm:$0xf] }
 0x12c   : > { %v2906_v58 = vrot.slane %v2905_v34, 4  ;;  %v2915_v18 = vrot.slane %v2913_v40, 4  ;;  %v2926_v41 = vshrl.u32 %v6626_v25, 16  ;;  %v2932_v51 = vshll.u32 %v6627_v39, 16  ;;  %v6633_v34 = vld [vmem:[%s8473_s26 + $0xbc] sm:$0x1] }
 0x12d   : > { %v2896_v37 = vrot.slane %v2895_v28, 4  ;;  %v2924_v50 = vrot.slane %v2922_v42, 5  ;;  %v7001_v62 = vrot.slane %v6977_v43, 9  ;;  %v5439_v63 = vrot.slane %v6978_v44, 5 }
 0x12e   : > { %7918 = vmatmul.mubr.bf16.gmra.mrb[12].mxu0 %v7028_v52  ;;  %v5434_v52 = vrot.slane %v5432_v32, 4  ;;  %v2911_v60 = vsel %vm8496_vm2, %v2906_v58, %v2910_v31  ;;  %v2928_v57 = vrot.slane %v2926_v41, 4  ;;  %v2934_v56 = vrot.slane %v2932_v51, 5  ;;  %v6634_v51 = vld [vmem:[%s8473_s26 + $0xc0] sm:$0xf] }
 0x12f   : > { %7921 = vmatprep.mubr.bf16.mxu0 %v7029_v12  ;;  %v2918_v12 = vrot.slane %v2916_v27, 5  ;;  %v2901_v45 = vsel %vm8496_vm2, %v2896_v37, %v2900_v17  ;;  %v5442_v36 = vrot.slane %v6979_v53, 5  ;;  %v2937_v1 = vshrl.u32 %v6628_v54, 16  ;;  %v6631_v17 = vld [vmem:[%s8473_s26 + $0xb4] sm:$0xf] }
 0x130   : > { %7730 = vmatmul.mubr.bf16.vlgmr.msra.gmra.mrb[16].mxu1 %v6662_v59  ;;  %v9455_v48 = vsel %vm8596_vm5, %v5434_v52, %v5435_v35  ;;  %v6629_v59 = vld [vmem:[%s8473_s26 + $0xac] sm:$0xf]  ;;  %v6664_v61 = vcombine.low %v2901_v45, %v2911_v60  ;;  %v2929_v30 = vor.u32 %v2928_v57, %v2924_v50  ;;  %v5440_v3 = vsel %vm8596_vm5, %v7001_v62, %v5439_v63  ;;  %v6983_v52 = vld [vmem:[%s8473_s26 + $0xc0] sm:$0xe] }
 0x131   : > { %7733 = vmatprep.mubr.bf16.mxu1 %v6663_v26  ;;  %v7032_v29 = vcombine.low %v9447_v46, %v9455_v48  ;;  %v2919_v55 = vor.u32 %v2918_v12, %v2915_v18  ;;  %v5441_v5 = vrot.slane %v5439_v63, 4  ;;  %v2940_v6 = vshll.u32 %v6628_v54, 16  ;;  %v6984_v12 = vld [vmem:[%s8473_s26 + $0xc4] sm:$0xf] }
 0x132   : > { %v2946_v7 = vshll.u32 %v6629_v59, 16  ;;  %v2930_v10 = vrot.slane %v2929_v30, 4  ;;  %v2939_v11 = vrot.slane %v2937_v1, 4  ;;  %v2950_v13 = vshrl.u32 %v6629_v59, 16 }
 0x133   : > { %v2920_v16 = vrot.slane %v2919_v55, 4  ;;  %v5443_v38 = vsel %vm8596_vm5, %v5441_v5, %v5442_v36  ;;  %v2942_v49 = vrot.slane %v2940_v6, 5  ;;  %v2956_v15 = vshll.u32 %v6630_v0, 16  ;;  %v6986_v5 = vld [vmem:[%s8473_s26 + $0xcc] sm:$0xe] }
 0x134   : > { %v2935_v19 = vsel %vm8496_vm2, %v2930_v10, %v2934_v56  ;;  %v7033_v20 = vcombine.low %v5440_v3, %v5443_v38  ;;  %v2952_v21 = vrot.slane %v2950_v13, 4  ;;  %v5446_v28 = vrot.slane %v6981_v8, 5  ;;  %v6987_v10 = vld [vmem:[%s8473_s26 + $0xd0] sm:$0xf] }
 0x135   : > { %v2925_v9 = vsel %vm8496_vm2, %v2920_v16, %v2924_v50  ;;  %v2943_v25 = vor.u32 %v2942_v49, %v2939_v11  ;;  %v2958_v26 = vrot.slane %v2956_v15, 5  ;;  %v5449_v32 = vrot.slane %v6982_v14, 5  ;;  %v6985_v50 = vld [vmem:[%s8473_s26 + $0xc8] sm:$0x1]  ;;  %v6988_v49 = vld [vmem:[%s8473_s26 + $0xd4] sm:$0x1] }
 0x136   : > { %7922 = vmatmul.mubr.bf16.gmra.mrb[16].mxu0 %v7030_v47  ;;  %v2948_v47 = vrot.slane %v2946_v7, 5  ;;  %v6665_v24 = vcombine.low %v2925_v9, %v2935_v19  ;;  %v2961_v35 = vshrl.u32 %v6631_v17, 16  ;;  %v2964_v39 = vshll.u32 %v6631_v17, 16  ;;  %v6636_v16 = vld [vmem:[%s8473_s26 + $0xc8] sm:$0x1] }
 0x137   : > { %7925 = vmatprep.mubr.bf16.mxu0 %v7031_v22  ;;  %v7002_v22 = vrot.slane %v6980_v2, 9  ;;  %v2944_v40 = vrot.slane %v2943_v25, 4  ;;  %v5448_v37 = vrot.slane %v5446_v28, 4  ;;  %v2970_v46 = vshll.u32 %v6632_v23, 16 }
 0x138   : > { %7734 = vmatmul.mubr.bf16.gmra.mrb[20].mxu1 %v6664_v61  ;;  %v2953_v31 = vor.u32 %v2952_v21, %v2948_v47  ;;  %v2963_v43 = vrot.slane %v2961_v35, 4  ;;  %v2966_v58 = vrot.slane %v2964_v39, 5  ;;  %v2974_v18 = vshrl.u32 %v6632_v23, 16 }
 0x139   : > { %7737 = vmatprep.mubr.bf16.mxu1 %v6665_v24  ;;  %v5447_v27 = vsel %vm8596_vm5, %v7002_v22, %v5446_v28  ;;  %v2949_v41 = vsel %vm8496_vm2, %v2944_v40, %v2948_v47  ;;  %v5450_v44 = vsel %vm8596_vm5, %v5448_v37, %v5449_v32  ;;  %v2972_v45 = vrot.slane %v2970_v46, 5 }
 0x13a   : > { %v2954_v42 = vrot.slane %v2953_v31, 4  ;;  %v2980_v48 = vshll.u32 %v6633_v34, 16  ;;  %v7034_v54 = vcombine.low %v5447_v27, %v5450_v44  ;;  %v2967_v60 = vor.u32 %v2966_v58, %v2963_v43 }
 0x13b   : > { %v2976_v55 = vrot.slane %v2974_v18, 4  ;;  %v7003_v61 = vrot.slane %v6983_v52, 9  ;;  %v5453_v56 = vrot.slane %v6984_v12, 5  ;;  %v5456_v0 = vrot.slane %v6985_v50, 5 }
 0x13c   : > { %v2959_v53 = vsel %vm8496_vm2, %v2954_v42, %v2958_v26  ;;  %v2982_v59 = vrot.slane %v2980_v48, 5  ;;  %v2968_v62 = vrot.slane %v2967_v60, 4  ;;  %v2985_v30 = vshrl.u32 %v6634_v51, 16 }
 0x13d   : > { %v6666_v57 = vcombine.low %v2949_v41, %v2959_v53  ;;  %v2977_v63 = vor.u32 %v2976_v55, %v2972_v45  ;;  %v5454_v36 = vsel %vm8596_vm5, %v7003_v61, %v5453_v56  ;;  %v5455_v1 = vrot.slane %v5453_v56, 4 }
 0x13e   : > { %7926 = vmatmul.mubr.bf16.gmra.mrb[20].mxu0 %v7032_v29  ;;  %v6635_v29 = vld [vmem:[%s8473_s26 + $0xc4] sm:$0xf]  ;;  %v2988_v2 = vshll.u32 %v6634_v51, 16  ;;  %v2973_v6 = vsel %vm8496_vm2, %v2968_v62, %v2972_v45  ;;  %v2987_v8 = vrot.slane %v2985_v30, 4  ;;  %v3004_v38 = vshll.u32 %v6636_v16, 16  ;;  %s7081_s26 = sshll.u32 %s9684_s18, 7 }
 0x13f   : > { %7929 = vmatprep.mubr.bf16.mxu0 %v7033_v20  ;;  %v2994_v3 = vshll.u32 %v6635_v29, 16  ;;  %v2978_v7 = vrot.slane %v2977_v63, 4  ;;  %v2998_v9 = vshrl.u32 %v6635_v29, 16  ;;  %v5457_v11 = vsel %vm8596_vm5, %v5455_v1, %v5456_v0  ;;  %s9537_s27 = scalar_lea.vmem %s9673_s4, %s7081_s26  ;;  %s9567_s9 = scalar_lea.vmem %s9674_s5, %s7081_s26 }
 0x140   : > { %7738 = vmatmul.mubr.bf16.gmra.mrb[24].mxu1 %v6666_v57  ;;  %v2990_v13 = vrot.slane %v2988_v2, 5  ;;  %v7035_v15 = vcombine.low %v5454_v36, %v5457_v11  ;;  %v7004_v19 = vrot.slane %v6986_v5, 9  ;;  %v5460_v22 = vrot.slane %v6987_v10, 5  ;;  %v7259_v60 = vld [vmem:[%s9537_s27 + $0x8] sm:$0xff]   ;;  %v7116_v57 = vld [vmem:[%s9537_s27] sm:$0xff]   ;;  %v7261_v11 = vld [vmem:[%s9537_s27 + $0x18] sm:$0xff]  }
 0x141   : > { %v2996_v14 = vrot.slane %v2994_v3, 5  ;;  %v2983_v47 = vsel %vm8496_vm2, %v2978_v7, %v2982_v59  ;;  %v3000_v17 = vrot.slane %v2998_v9, 4  ;;  %v3006_v24 = vrot.slane %v3004_v38, 5  ;;  %v9549_v59 = vld [vmem:[%s9672_s3] ss:$0 sm:$0xff] }
 0x142   : > { %v6667_v20 = vcombine.low %v2973_v6, %v2983_v47  ;;  %v2991_v21 = vor.u32 %v2990_v13, %v2987_v8  ;;  %v5463_v25 = vrot.slane %v6988_v49, 5  ;;  %v5461_v28 = vsel %vm8596_vm5, %v7004_v19, %v5460_v22  ;;  %v7260_v13 = vld [vmem:[%s9537_s27 + $0x10] sm:$0xff]  }
 0x143   : > { %v3001_v23 = vor.u32 %v3000_v17, %v2996_v14  ;;  %v5462_v31 = vrot.slane %v5460_v22, 4  ;;  %v7121_v63 = vunpack.c.l.bf16 %v7259_v60  ;;  %v7117_v36 = vunpack.c.l.bf16 %v7116_v57 }
 0x144   : > { %7741 = vmatprep.mubr.bf16.mxu1 %v6667_v20  ;;  %v2992_v26 = vrot.slane %v2991_v21, 4  ;;  %v7122_v5 = vunpack.c.h.bf16 %v7259_v60  ;;  %v7118_v8 = vunpack.c.h.bf16 %v7116_v57  ;;  %v7129_v20 = vunpack.c.l.bf16 %v7261_v11  ;;  %v7263_v60 = vld [vmem:[%s9537_s27 + $0x28] sm:$0xff]  }
 0x145   : > { %v3002_v32 = vrot.slane %v3001_v23, 4  ;;  %v5464_v35 = vsel %vm8596_vm5, %v5462_v31, %v5463_v25  ;;  %v7125_v22 = vunpack.c.l.bf16 %v7260_v13 }
 0x146   : > { %7930 = vmatmul.mubr.bf16.gmra.mrb[24].mxu0 %v7034_v54  ;;  %v2997_v34 = vsel %vm8496_vm2, %v2992_v26, %v2996_v14  ;;  %v7036_v40 = vcombine.low %v5461_v28, %v5464_v35  ;;  %v9542_v54 = vld [vmem:[%s9671_s2] ss:$0 sm:$0xff] }
 0x147   : > { %7933 = vmatprep.mubr.bf16.mxu0 %v7035_v15  ;;  %v3007_v39 = vsel %vm8496_vm2, %v3002_v32, %v3006_v24 }
 0x148   : > { %v6668_v27 = vcombine.low %v2997_v34, %v3007_v39 }
 0x14a   : > { %7742 = vmatmul.mubr.bf16.gmra.mrb[28].mxu1 %v6668_v27 }
 0x14e   : > { %7934 = vmatmul.mubr.bf16.gmra.mrb[28].mxu0 %v7036_v40 }
 0x1c3   : > { %v7667_v37 = vpop.f32.mrb[0].mxu1 }
 0x1c4   : > { %v2353_v46 = vpop.f32.mrb[1].mxu1 }
 0x1c5   : > { %v7668_v52 = vpop.f32.mrb[2].mxu1 }
 0x1c6   : > { %v2356_v42 = vpop.f32.mrb[3].mxu1 }
 0x1cb   : > { %v7671_v43 = vpop.f32.mrb[4].mxu1 }
 0x1cc   : > { %v2369_v58 = vpop.f32.mrb[5].mxu1 }
 0x1cd   : > { %v7672_v18 = vpop.f32.mrb[6].mxu1 }
 0x1ce   : > { %v2372_v12 = vpop.f32.mrb[7].mxu1 }
 0x1d3   : > { %v9515_v41 = vpop.f32.mrb[8].mxu1 }
 0x1d4   : > { %v9517_v4 = vpop.f32.mrb[9].mxu1 }
 0x1d5   : > { %v9519_v33 = vpop.f32.mrb[10].mxu1 }
 0x1d6   : > { %v9521_v44 = vpop.f32.mrb[11].mxu1 }
 0x1db   : > { %v9523_v45 = vpop.f32.mrb[12].mxu1 }
 0x1dc   : > { %v9525_v48 = vpop.f32.mrb[13].mxu1 }
 0x1dd   : > { %v9527_v50 = vpop.f32.mrb[14].mxu1 }
 0x1de   : > { %v9529_v51 = vpop.f32.mrb[15].mxu1 }
 0x1e9   : > { %v7907_v53 = vpop.f32.mrb[0].mxu0 }
 0x1ea   : > { %v7953_v55 = vadd.f32 %v7907_v53, %v7667_v37  ;;  %v5628_v29 = vpop.f32.mrb[1].mxu0 }
 0x1eb   : > { %v7954_v61 = vadd.f32 %v5628_v29, %v2353_v46  ;;  %v7908_v56 = vpop.f32.mrb[2].mxu0  ;;  %v7130_v46 = vunpack.c.h.bf16 %v7261_v11 }
 0x1ec   : > { %v5892_v62 = vmul.f32 %v7953_v55, %v9542_v54  ;;  %v7955_v0 = vadd.f32 %v7908_v56, %v7668_v52  ;;  %v5631_v16 = vpop.f32.mrb[3].mxu0  ;;  %v7262_v55 = vld [vmem:[%s9537_s27 + $0x20] sm:$0xff]  }
 0x1ed   : > { %v5890_v30 = vmul.f32 %v7954_v61, %v9542_v54  ;;  %v7956_v1 = vadd.f32 %v5631_v16, %v2356_v42 }
 0x1ee   : > { %v5931_v2 = vadd.f32 %v9549_v59, %v5892_v62  ;;  %v5893_v3 = vmul.f32 %v7955_v0, %v9542_v54  ;;  %v7137_v0 = vunpack.c.l.bf16 %v7263_v60 }
 0x1ef   : > { %v5929_v6 = vadd.f32 %v9549_v59, %v5890_v30  ;;  %v5891_v7 = vmul.f32 %v7956_v1, %v9542_v54  ;;  %v7133_v30 = vunpack.c.l.bf16 %v7262_v55 }
 0x1f0   : > { %v6027_v9 = vadd.f32 %v7121_v63, %v5931_v2  ;;  %v5932_v10 = vadd.f32 %v9549_v59, %v5893_v3 }
 0x1f1   : > { %v6025_v14 = vadd.f32 %v7117_v36, %v5929_v6  ;;  %v5930_v38 = vadd.f32 %v9549_v59, %v5891_v7  ;;  %v7911_v49 = vpop.f32.mrb[4].mxu0 }
 0x1f2   : > { %v6028_v47 = vadd.f32 %v7122_v5, %v5932_v10  ;;  %v7957_v15 = vadd.f32 %v7911_v49, %v7671_v43  ;;  %v5644_v17 = vpop.f32.mrb[5].mxu0  ;;  %v6059_v24 = vmax.f32 %v6027_v9, 0.0  ;;  %v7134_v49 = vunpack.c.h.bf16 %v7262_v55 }
 0x1f3   : > { %v6026_v19 = vadd.f32 %v7118_v8, %v5930_v38  ;;  %v7958_v21 = vadd.f32 %v5644_v17, %v2369_v58  ;;  %v7912_v23 = vpop.f32.mrb[6].mxu0  ;;  %v6057_v32 = vmax.f32 %v6025_v14, 0.0  ;;  %v7126_v58 = vunpack.c.h.bf16 %v7260_v13 }
 0x1f4   : > { %v6060_v25 = vmax.f32 %v6028_v47, 0.0  ;;  %v5896_v26 = vmul.f32 %v7957_v15, %v9542_v54  ;;  %v7959_v28 = vadd.f32 %v7912_v23, %v7672_v18  ;;  %v5647_v31 = vpop.f32.mrb[7].mxu0  ;;  %v7138_v13 = vunpack.c.h.bf16 %v7263_v60 }
 0x1f5   : > { %v6058_v34 = vmax.f32 %v6026_v19, 0.0  ;;  %v5894_v35 = vmul.f32 %v7958_v21, %v9542_v54  ;;  %v7960_v39 = vadd.f32 %v5647_v31, %v2372_v12  ;;  %v7265_v19 = vld [vmem:[%s9537_s27 + $0x38] sm:$0xff]  }
 0x1f6   : > { %v7187_v40 = vpack.c.bf16 %v6060_v25, %v6059_v24  ;;  %v5935_v27 = vadd.f32 %v9549_v59, %v5896_v26  ;;  %v5897_v37 = vmul.f32 %v7959_v28, %v9542_v54  ;;  %v7146_v55 = vunpack.c.h.bf16 %v7265_v19 }
 0x1f7   : > { %v7182_v52 = vpack.c.bf16 %v6058_v34, %v6057_v32  ;;  %v5933_v42 = vadd.f32 %v9549_v59, %v5894_v35  ;;  %v5895_v43 = vmul.f32 %v7960_v39, %v9542_v54  ;;  %v7145_v34 = vunpack.c.l.bf16 %v7265_v19 }
 0x1f8   : > { %7274 = vst [vmem:[%s9567_s9 + $0x8] sm:$0xff] %v7187_v40   ;;  %v6031_v18 = vadd.f32 %v7129_v20, %v5935_v27  ;;  %v5936_v53 = vadd.f32 %v9549_v59, %v5897_v37 }
 0x1f9   : > { %7183 = vst [vmem:[%s9567_s9] sm:$0xff] %v7182_v52   ;;  %v6029_v12 = vadd.f32 %v7125_v22, %v5933_v42  ;;  %v5934_v29 = vadd.f32 %v9549_v59, %v5895_v43  ;;  %v7915_v57 = vpop.f32.mrb[8].mxu0 }
 0x1fa   : > { %v6032_v61 = vadd.f32 %v7130_v46, %v5936_v53  ;;  %v7961_v56 = vadd.f32 %v7915_v57, %v9515_v41  ;;  %v5660_v62 = vpop.f32.mrb[9].mxu0  ;;  %v6063_v1 = vmax.f32 %v6031_v18, 0.0 }
 0x1fb   : > { %v6030_v63 = vadd.f32 %v7126_v58, %v5934_v29  ;;  %v7962_v16 = vadd.f32 %v5660_v62, %v9517_v4  ;;  %v7916_v36 = vpop.f32.mrb[10].mxu0  ;;  %v6061_v7 = vmax.f32 %v6029_v12, 0.0  ;;  %v7267_v62 = vld [vmem:[%s9537_s27 + $0x48] sm:$0xff]  }
 0x1fc   : > { %v6064_v2 = vmax.f32 %v6032_v61, 0.0  ;;  %v5900_v3 = vmul.f32 %v7961_v56, %v9542_v54  ;;  %v7963_v5 = vadd.f32 %v7916_v36, %v9519_v33  ;;  %v5663_v6 = vpop.f32.mrb[11].mxu0 }
 0x1fd   : > { %v6062_v8 = vmax.f32 %v6030_v63, 0.0  ;;  %v5898_v41 = vmul.f32 %v7962_v16, %v9542_v54  ;;  %v7964_v9 = vadd.f32 %v5663_v6, %v9521_v44  ;;  %v7264_v44 = vld [vmem:[%s9537_s27 + $0x30] sm:$0xff]   ;;  %v7266_v63 = vld [vmem:[%s9537_s27 + $0x40] sm:$0xff]   ;;  %v7153_v6 = vunpack.c.l.bf16 %v7267_v62 }
 0x1fe   : > { %v7197_v4 = vpack.c.bf16 %v6064_v2, %v6063_v1  ;;  %v5939_v10 = vadd.f32 %v9549_v59, %v5900_v3  ;;  %v5901_v11 = vmul.f32 %v7963_v5, %v9542_v54  ;;  %v7141_v39 = vunpack.c.l.bf16 %v7264_v44 }
 0x1ff   : > { %v7192_v14 = vpack.c.bf16 %v6062_v8, %v6061_v7  ;;  %v5937_v38 = vadd.f32 %v9549_v59, %v5898_v41  ;;  %v5899_v33 = vmul.f32 %v7964_v9, %v9542_v54  ;;  %v7142_v57 = vunpack.c.h.bf16 %v7264_v44 }
 0x200   : > { %7276 = vst [vmem:[%s9567_s9 + $0x18] sm:$0xff] %v7197_v4   ;;  %v6035_v15 = vadd.f32 %v7137_v0, %v5939_v10  ;;  %v5940_v17 = vadd.f32 %v9549_v59, %v5901_v11  ;;  %v7149_v8 = vunpack.c.l.bf16 %v7266_v63 }
 0x201   : > { %7275 = vst [vmem:[%s9567_s9 + $0x10] sm:$0xff] %v7192_v14   ;;  %v6033_v21 = vadd.f32 %v7133_v30, %v5937_v38  ;;  %v5938_v22 = vadd.f32 %v9549_v59, %v5899_v33  ;;  %v7919_v23 = vpop.f32.mrb[12].mxu0 }
 0x202   : > { %v6036_v25 = vadd.f32 %v7138_v13, %v5940_v17  ;;  %v7965_v26 = vadd.f32 %v7919_v23, %v9523_v45  ;;  %v5676_v28 = vpop.f32.mrb[13].mxu0  ;;  %v6067_v27 = vmax.f32 %v6035_v15, 0.0 }
 0x203   : > { %v7731_v47 = vpop.f32.mrb[16].mxu1  ;;  %v6034_v32 = vadd.f32 %v7134_v49, %v5938_v22  ;;  %v7966_v35 = vadd.f32 %v5676_v28, %v9525_v48  ;;  %v7920_v40 = vpop.f32.mrb[14].mxu0  ;;  %v6065_v43 = vmax.f32 %v6033_v21, 0.0  ;;  %v7269_v28 = vld [vmem:[%s9537_s27 + $0x58] sm:$0xff]  }
 0x204   : > { %v3235_v20 = vpop.f32.mrb[17].mxu1  ;;  %v6068_v37 = vmax.f32 %v6036_v25, 0.0  ;;  %v5904_v46 = vmul.f32 %v7965_v26, %v9542_v54  ;;  %v7967_v52 = vadd.f32 %v7920_v40, %v9527_v50  ;;  %v5679_v42 = vpop.f32.mrb[15].mxu0 }
 0x205   : > { %v7732_v24 = vpop.f32.mrb[18].mxu1  ;;  %v6066_v45 = vmax.f32 %v6034_v32, 0.0  ;;  %v5902_v58 = vmul.f32 %v7966_v35, %v9542_v54  ;;  %v7968_v18 = vadd.f32 %v5679_v42, %v9529_v51  ;;  %v7268_v32 = vld [vmem:[%s9537_s27 + $0x50] sm:$0xff]  }
 0x206   : > { %v3238_v31 = vpop.f32.mrb[19].mxu1  ;;  %v7207_v48 = vpack.c.bf16 %v6068_v37, %v6067_v27  ;;  %v5943_v53 = vadd.f32 %v9549_v59, %v5904_v46  ;;  %v5905_v60 = vmul.f32 %v7967_v52, %v9542_v54  ;;  %v7161_v46 = vunpack.c.l.bf16 %v7269_v28 }
 0x207   : > { %v7202_v12 = vpack.c.bf16 %v6066_v45, %v6065_v43  ;;  %v5941_v29 = vadd.f32 %v9549_v59, %v5902_v58  ;;  %v5903_v50 = vmul.f32 %v7968_v18, %v9542_v54  ;;  %v7157_v42 = vunpack.c.l.bf16 %v7268_v32 }
 0x208   : > { %7278 = vst [vmem:[%s9567_s9 + $0x28] sm:$0xff] %v7207_v48   ;;  %v6039_v61 = vadd.f32 %v7145_v34, %v5943_v53  ;;  %v5944_v56 = vadd.f32 %v9549_v59, %v5905_v60 }
 0x209   : > { %7277 = vst [vmem:[%s9567_s9 + $0x20] sm:$0xff] %v7202_v12   ;;  %v6037_v51 = vadd.f32 %v7141_v39, %v5941_v29  ;;  %v5942_v0 = vadd.f32 %v9549_v59, %v5903_v50  ;;  %v7923_v16 = vpop.f32.mrb[16].mxu0 }
 0x20a   : > { %v6040_v36 = vadd.f32 %v7146_v55, %v5944_v56  ;;  %v7969_v1 = vadd.f32 %v7923_v16, %v7731_v47  ;;  %v5692_v2 = vpop.f32.mrb[17].mxu0  ;;  %v6071_v4 = vmax.f32 %v6039_v61, 0.0 }
 0x20b   : > { %v7735_v30 = vpop.f32.mrb[20].mxu1  ;;  %v6038_v5 = vadd.f32 %v7142_v57, %v5942_v0  ;;  %v7970_v7 = vadd.f32 %v5692_v2, %v3235_v20  ;;  %v7924_v41 = vpop.f32.mrb[18].mxu0  ;;  %v6069_v33 = vmax.f32 %v6037_v51, 0.0  ;;  %v7154_v20 = vunpack.c.h.bf16 %v7267_v62 }
 0x20c   : > { %v3251_v3 = vpop.f32.mrb[21].mxu1  ;;  %v6072_v10 = vmax.f32 %v6040_v36, 0.0  ;;  %v5908_v11 = vmul.f32 %v7969_v1, %v9542_v54  ;;  %v7971_v13 = vadd.f32 %v7924_v41, %v7732_v24  ;;  %v5695_v14 = vpop.f32.mrb[19].mxu0  ;;  %v7150_v24 = vunpack.c.h.bf16 %v7266_v63 }
 0x20d   : > { %v7736_v9 = vpop.f32.mrb[22].mxu1  ;;  %v6070_v49 = vmax.f32 %v6038_v5, 0.0  ;;  %v5906_v47 = vmul.f32 %v7970_v7, %v9542_v54  ;;  %v7972_v15 = vadd.f32 %v5695_v14, %v3238_v31  ;;  %v7162_v62 = vunpack.c.h.bf16 %v7269_v28  ;;  %v7270_v5 = vld [vmem:[%s9537_s27 + $0x60] sm:$0xff]  }
 0x20e   : > { %v3254_v38 = vpop.f32.mrb[23].mxu1  ;;  %v7217_v17 = vpack.c.bf16 %v6072_v10, %v6071_v4  ;;  %v5947_v19 = vadd.f32 %v9549_v59, %v5908_v11  ;;  %v5909_v44 = vmul.f32 %v7971_v13, %v9542_v54 }
 0x20f   : > { %v7212_v21 = vpack.c.bf16 %v6070_v49, %v6069_v33  ;;  %v5945_v22 = vadd.f32 %v9549_v59, %v5906_v47  ;;  %v5907_v23 = vmul.f32 %v7972_v15, %v9542_v54 }
 0x210   : > { %7280 = vst [vmem:[%s9567_s9 + $0x38] sm:$0xff] %v7217_v17   ;;  %v6043_v25 = vadd.f32 %v7153_v6, %v5947_v19  ;;  %v5948_v26 = vadd.f32 %v9549_v59, %v5909_v44 }
 0x211   : > { %7279 = vst [vmem:[%s9567_s9 + $0x30] sm:$0xff] %v7212_v21   ;;  %v6041_v31 = vadd.f32 %v7149_v8, %v5945_v22  ;;  %v5946_v34 = vadd.f32 %v9549_v59, %v5907_v23  ;;  %v7927_v35 = vpop.f32.mrb[20].mxu0 }
 0x212   : > { %v6044_v39 = vadd.f32 %v7154_v20, %v5948_v26  ;;  %v7973_v40 = vadd.f32 %v7927_v35, %v7735_v30  ;;  %v5708_v27 = vpop.f32.mrb[21].mxu0  ;;  %v6075_v45 = vmax.f32 %v6043_v25, 0.0  ;;  %v7158_v30 = vunpack.c.h.bf16 %v7268_v32 }
 0x213   : > { %v6042_v37 = vadd.f32 %v7150_v24, %v5946_v34  ;;  %v7974_v52 = vadd.f32 %v5708_v27, %v3251_v3  ;;  %v7928_v43 = vpop.f32.mrb[22].mxu0  ;;  %v6073_v60 = vmax.f32 %v6041_v31, 0.0  ;;  %v7739_v50 = vpop.f32.mrb[24].mxu1  ;;  %v7271_v3 = vld [vmem:[%s9537_s27 + $0x68] sm:$0xff]   ;;  %v7166_v34 = vunpack.c.h.bf16 %v7270_v5  ;;  %v7272_v27 = vld [vmem:[%s9537_s27 + $0x70] sm:$0xff]  }
 0x214   : > { %v6076_v58 = vmax.f32 %v6044_v39, 0.0  ;;  %v5912_v18 = vmul.f32 %v7973_v40, %v9542_v54  ;;  %v7975_v48 = vadd.f32 %v7928_v43, %v7736_v9  ;;  %v5711_v53 = vpop.f32.mrb[23].mxu0  ;;  %v3267_v63 = vpop.f32.mrb[25].mxu1  ;;  %v7169_v13 = vunpack.c.l.bf16 %v7271_v3  ;;  %v7273_v40 = vld [vmem:[%s9537_s27 + $0x78] sm:$0xff]  }
 0x215   : > { %v6074_v55 = vmax.f32 %v6042_v37, 0.0  ;;  %v5910_v12 = vmul.f32 %v7974_v52, %v9542_v54  ;;  %v7976_v29 = vadd.f32 %v5711_v53, %v3254_v38  ;;  %v7740_v36 = vpop.f32.mrb[26].mxu1  ;;  %v7165_v38 = vunpack.c.l.bf16 %v7270_v5 }
 0x216   : > { %v7227_v57 = vpack.c.bf16 %v6076_v58, %v6075_v45  ;;  %v5951_v61 = vadd.f32 %v9549_v59, %v5912_v18  ;;  %v5913_v56 = vmul.f32 %v7975_v48, %v9542_v54  ;;  %v3270_v6 = vpop.f32.mrb[27].mxu1  ;;  %v7170_v26 = vunpack.c.h.bf16 %v7271_v3 }
 0x217   : > { %v7222_v51 = vpack.c.bf16 %v6074_v55, %v6073_v60  ;;  %v5949_v0 = vadd.f32 %v9549_v59, %v5910_v12  ;;  %v5911_v16 = vmul.f32 %v7976_v29, %v9542_v54  ;;  %v7177_v53 = vunpack.c.l.bf16 %v7273_v40 }
 0x218   : > { %7282 = vst [vmem:[%s9567_s9 + $0x48] sm:$0xff] %v7227_v57   ;;  %v6047_v1 = vadd.f32 %v7161_v46, %v5951_v61  ;;  %v5952_v2 = vadd.f32 %v9549_v59, %v5913_v56  ;;  %v7173_v55 = vunpack.c.l.bf16 %v7272_v27  ;;  %v7178_v3 = vunpack.c.h.bf16 %v7273_v40 }
 0x219   : > { %7281 = vst [vmem:[%s9567_s9 + $0x40] sm:$0xff] %v7222_v51   ;;  %v6045_v7 = vadd.f32 %v7157_v42, %v5949_v0  ;;  %v5950_v8 = vadd.f32 %v9549_v59, %v5911_v16  ;;  %v7931_v41 = vpop.f32.mrb[24].mxu0 }
 0x21a   : > { %v6048_v9 = vadd.f32 %v7162_v62, %v5952_v2  ;;  %v7977_v4 = vadd.f32 %v7931_v41, %v7739_v50  ;;  %v5724_v10 = vpop.f32.mrb[25].mxu0  ;;  %v6079_v49 = vmax.f32 %v6047_v1, 0.0 }
 0x21b   : > { %v6046_v11 = vadd.f32 %v7158_v30, %v5950_v8  ;;  %v7978_v14 = vadd.f32 %v5724_v10, %v3267_v63  ;;  %v7932_v33 = vpop.f32.mrb[26].mxu0  ;;  %v6077_v44 = vmax.f32 %v6045_v7, 0.0  ;;  %v7174_v8 = vunpack.c.h.bf16 %v7272_v27 }
 0x21c   : > { %v6080_v47 = vmax.f32 %v6048_v9, 0.0  ;;  %v5916_v15 = vmul.f32 %v7977_v4, %v9542_v54  ;;  %v7979_v17 = vadd.f32 %v7932_v33, %v7740_v36  ;;  %v5727_v19 = vpop.f32.mrb[27].mxu0 }
 0x21d   : > { %v6078_v20 = vmax.f32 %v6046_v11, 0.0  ;;  %v5914_v21 = vmul.f32 %v7978_v14, %v9542_v54  ;;  %v7980_v22 = vadd.f32 %v5727_v19, %v3270_v6  ;;  %v7743_v52 = vpop.f32.mrb[28].mxu1 }
 0x21e   : > { %v7237_v23 = vpack.c.bf16 %v6080_v47, %v6079_v49  ;;  %v5955_v24 = vadd.f32 %v9549_v59, %v5916_v15  ;;  %v5917_v25 = vmul.f32 %v7979_v17, %v9542_v54  ;;  %v3283_v58 = vpop.f32.mrb[29].mxu1 }
 0x21f   : > { %v7232_v28 = vpack.c.bf16 %v6078_v20, %v6077_v44  ;;  %v5953_v32 = vadd.f32 %v9549_v59, %v5914_v21  ;;  %v5915_v31 = vmul.f32 %v7980_v22, %v9542_v54  ;;  %v7744_v12 = vpop.f32.mrb[30].mxu1 }
 0x220   : > { %7284 = vst [vmem:[%s9567_s9 + $0x58] sm:$0xff] %v7237_v23   ;;  %v6051_v35 = vadd.f32 %v7169_v13, %v5955_v24  ;;  %v5956_v39 = vadd.f32 %v9549_v59, %v5917_v25  ;;  %v3286_v62 = vpop.f32.mrb[31].mxu1 }
 0x221   : > { %7283 = vst [vmem:[%s9567_s9 + $0x50] sm:$0xff] %v7232_v28   ;;  %v6049_v37 = vadd.f32 %v7165_v38, %v5953_v32  ;;  %v5954_v46 = vadd.f32 %v9549_v59, %v5915_v31  ;;  %v7935_v42 = vpop.f32.mrb[28].mxu0 }
 0x222   : > { %v6052_v43 = vadd.f32 %v7170_v26, %v5956_v39  ;;  %v7981_v45 = vadd.f32 %v7935_v42, %v7743_v52  ;;  %v5740_v18 = vpop.f32.mrb[29].mxu0  ;;  %v6083_v50 = vmax.f32 %v6051_v35, 0.0 }
 0x223   : > { %v6050_v48 = vadd.f32 %v7166_v34, %v5954_v46  ;;  %v7982_v60 = vadd.f32 %v5740_v18, %v3283_v58  ;;  %v7936_v29 = vpop.f32.mrb[30].mxu0  ;;  %v6081_v51 = vmax.f32 %v6049_v37, 0.0 }
 0x224   : > { %v6084_v57 = vmax.f32 %v6052_v43, 0.0  ;;  %v5920_v61 = vmul.f32 %v7981_v45, %v9542_v54  ;;  %v7983_v56 = vadd.f32 %v7936_v29, %v7744_v12  ;;  %v5743_v63 = vpop.f32.mrb[31].mxu0 }
 0x225   : > { %v6082_v0 = vmax.f32 %v6050_v48, 0.0  ;;  %v5918_v16 = vmul.f32 %v7982_v60, %v9542_v54  ;;  %v7984_v30 = vadd.f32 %v5743_v63, %v3286_v62 }
 0x226   : > { %v7247_v36 = vpack.c.bf16 %v6084_v57, %v6083_v50  ;;  %v5959_v1 = vadd.f32 %v9549_v59, %v5920_v61  ;;  %v5921_v2 = vmul.f32 %v7983_v56, %v9542_v54 }
 0x227   : > { %v7242_v5 = vpack.c.bf16 %v6082_v0, %v6081_v51  ;;  %v5957_v6 = vadd.f32 %v9549_v59, %v5918_v16  ;;  %v5919_v7 = vmul.f32 %v7984_v30, %v9542_v54 }
 0x228   : > { %7286 = vst [vmem:[%s9567_s9 + $0x68] sm:$0xff] %v7247_v36   ;;  %v6055_v41 = vadd.f32 %v7177_v53, %v5959_v1  ;;  %v5960_v9 = vadd.f32 %v9549_v59, %v5921_v2 }
 0x229   : > { %7285 = vst [vmem:[%s9567_s9 + $0x60] sm:$0xff] %v7242_v5   ;;  %v6053_v4 = vadd.f32 %v7173_v55, %v5957_v6  ;;  %v5958_v10 = vadd.f32 %v9549_v59, %v5919_v7 }
 0x22a   : > { %v6056_v11 = vadd.f32 %v7178_v3, %v5960_v9  ;;  %v6087_v14 = vmax.f32 %v6055_v41, 0.0 }
 0x22b   : > { %v6054_v13 = vadd.f32 %v7174_v8, %v5958_v10  ;;  %v6085_v33 = vmax.f32 %v6053_v4, 0.0 }
 0x22c   : > { %v6088_v38 = vmax.f32 %v6056_v11, 0.0 }
 0x22d   : > { %v6086_v49 = vmax.f32 %v6054_v13, 0.0 }
 0x22e   : > { %v7257_v47 = vpack.c.bf16 %v6088_v38, %v6087_v14 }
 0x22f   : > { %v7252_v15 = vpack.c.bf16 %v6086_v49, %v6085_v33 }
 0x230   : > { %7288 = vst [vmem:[%s9567_s9 + $0x78] sm:$0xff] %v7257_v47  }
 0x231   : > { %7287 = vst [vmem:[%s9567_s9 + $0x70] sm:$0xff] %v7252_v15  }
 0x232 PF: > { %s15_s20 = sadd.s32 1, %s8384_s20   ;;  %s9679_s18 = smov %s8380_s19 }
 0x233   : > { %p12_p5 = scmp.ge.s32.totalorder %s15_s20, 4   ;;  %s9680_s19 = smov %s9682_s21 }
 0x235   :  { %14 = sbr.rel (!%p12_p5) target bundleno = 2 (0x2), region = 92 }

// kernel: forward.5
= control target key start
LH: loop header
LB: loop body
LE: loop exit
PB: predicated region body
PF: predicated region fallthrough
CT: control target
= control target key end

     0   :  { %s8157_s15 = smov 0   ;;  %s8159_s16 = smov 0   ;;  %s9376_s0 = inlined_call_operand.vmem [shape: bf16[2,18,18,128], index: 0, kind: input, shape index: {}]   ;;  %s9377_s1 = inlined_call_operand.vmem [shape: bf16[3,3,128,128], index: 1, kind: input, shape index: {}]   ;;  %s9378_s2 = inlined_call_operand.vmem [shape: f32[1,128], index: 2, kind: input, shape index: {}]   ;;  %s9379_s3 = inlined_call_operand.vmem [shape: f32[1,128], index: 3, kind: input, shape index: {}]   ;;  %s9380_s4 = inlined_call_operand.vmem [shape: bf16[2,16,16,128], index: 4, kind: output, shape index: {}]  }
   0x1   :  { %s8161_s17 = smov 0  }
   0x2 LB: > { %s26_s18 = sadd.s32 1, %s8126_s16  ;;  %p6219_p0 = scmp.ge.s32.totalorder %s8130_s17, 1  ;;  %s8130_s17 = sphi %s8161_s17, %s14_s17   ;;  %s8126_s16 = sphi %s8159_s16, %s9386_s16   ;;  %s8122_s15 = sphi %s8157_s15, %s9385_s15  }
   0x3   : > { %p28_p1 = scmp.ge.s32.totalorder %s26_s18, 2  ;;  %p201_p2 = scmp.lt.s32.totalorder %s8130_s17, 3 }
   0x5   : > { %s9388_s18 = smov (%p28_p1, %s26_s18), 0  ;;  %p202_p3 = pnand %p6219_p0, %p201_p2 }
   0x6   : > { %v7980_v0 = vld [vmem:[%s9377_s1] sm:$0xff] (!%p202_p3)   ;;  %v7982_v2 = vld [vmem:[%s9377_s1 + $0x8] sm:$0xff] (!%p202_p3)   ;;  %p240_p4 = scmp.lt.s32.totalorder (!%p202_p3), %s8122_s15, 1  ;;  %v7984_v4 = vld [vmem:[%s9377_s1 + $0x10] sm:$0xff] (!%p202_p3)   ;;  %vm697_vm0 = vsmask.f32 (!%p202_p3), 3328 }
   0x7   : > { %205 = sbr.rel (%p202_p3) target bundleno = 560 (0x230), region = 36  ;;  %v7981_v1 = vld [vmem:[%s9377_s1 + $0x100] sm:$0xff] (!%p202_p3)   ;;  %7251 = vmatprep.subr.bf16.mxu1 (!%p202_p3), %v7980_v0  ;;  %v7983_v3 = vld [vmem:[%s9377_s1 + $0x108] sm:$0xff] (!%p202_p3)   ;;  %v7985_v5 = vld [vmem:[%s9377_s1 + $0x110] sm:$0xff] (!%p202_p3)   ;;  %vm698_vm1 = vsmask.f32 (!%p202_p3), 7440 }
   0x8   : > { %7443 = vmatprep.subr.bf16.mxu0 (!%p202_p3), %v7981_v1  ;;  %7252 = vmatpush3.bf16.msra.mxu1 (!%p202_p3), %v7980_v0  ;;  %v7986_v6 = vld [vmem:[%s9377_s1 + $0x18] sm:$0xff] (!%p202_p3)   ;;  %v7988_v8 = vld [vmem:[%s9377_s1 + $0x20] sm:$0xff] (!%p202_p3)   ;;  %v7990_v10 = vld [vmem:[%s9377_s1 + $0x28] sm:$0xff] (!%p202_p3)   ;;  %vm1566_vm3 = vcmask (!%p202_p3), 1042432   ;;  %vm1567_vm4 = vcmask (!%p202_p3), 1046532  }
   0x9   : > { %7444 = vmatpush3.bf16.msra.mxu0 (!%p202_p3), %v7981_v1  ;;  %7253 = vmatprep.subr.bf16.mxu1 (!%p202_p3), %v7982_v2  ;;  %v7987_v7 = vld [vmem:[%s9377_s1 + $0x118] sm:$0xff] (!%p202_p3)   ;;  %v7989_v9 = vld [vmem:[%s9377_s1 + $0x120] sm:$0xff] (!%p202_p3)   ;;  %v7991_v11 = vld [vmem:[%s9377_s1 + $0x128] sm:$0xff] (!%p202_p3)  }
   0xa   : > { %7445 = vmatprep.subr.bf16.mxu0 (!%p202_p3), %v7983_v3  ;;  %v7992_v18 = vld [vmem:[%s9377_s1 + $0x30] sm:$0xff] (!%p202_p3)   ;;  %v7994_v32 = vld [vmem:[%s9377_s1 + $0x38] sm:$0xff] (!%p202_p3)   ;;  %vm8237_vm2 = vmor (!%p202_p3), %vm697_vm0, %vm698_vm1 }
   0xb   : > { %v7993_v24 = vld [vmem:[%s9377_s1 + $0x130] sm:$0xff] (!%p202_p3)   ;;  %v7995_v38 = vld [vmem:[%s9377_s1 + $0x138] sm:$0xff] (!%p202_p3)   ;;  %v7998_v47 = vld [vmem:[%s9377_s1 + $0x40] sm:$0xff] (!%p202_p3)  }
   0xc   : > { %7254 = vmatpush3.bf16.msra.mxu1 (!%p202_p3), %v7982_v2  ;;  %v7999_v52 = vld [vmem:[%s9377_s1 + $0x140] sm:$0xff] (!%p202_p3)   ;;  %vm8337_vm5 = vmor (!%p202_p3), %vm1566_vm3, %vm1567_vm4 }
   0xd   : > { %7446 = vmatpush3.bf16.msra.mxu0 (!%p202_p3), %v7983_v3  ;;  %7255 = vmatprep.subr.bf16.mxu1 (!%p202_p3), %v7984_v4 }
   0xe   : > { %s9390_s15 = smov (!%p240_p4, %s8122_s15), 1  ;;  %7447 = vmatprep.subr.bf16.mxu0 %v7985_v5 }
   0xf   : > { %s7955_s9 = smul.u32 216, %s9390_s15  ;;  %s6907_s12 = sshll.u32 %s9390_s15, 7 }
  0x10   : > { %7256 = vmatpush3.bf16.msra.mxu1 %v7984_v4  ;;  %s9288_s19 = scalar_lea.vmem %s9380_s4, %s6907_s12 }
  0x11   : > { %7448 = vmatpush3.bf16.msra.mxu0 %v7985_v5  ;;  %7257 = vmatprep.subr.bf16.mxu1 %v7986_v6  ;;  %s8214_s22 = scalar_lea.vmem %s9376_s0, %s7955_s9 }
  0x12   : > { %7449 = vmatprep.subr.bf16.mxu0 %v7987_v7  ;;  %v7996_v12 = vld [vmem:[%s8214_s22] sm:$0xff]   ;;  %v6415_v13 = vld [vmem:[%s8214_s22 + $0xc] sm:$0xf]  ;;  %v6416_v14 = vld [vmem:[%s8214_s22 + $0x10] sm:$0xf] }
  0x13   : > { %7267 = vmatprep.mubr.bf16.mxu1 %v7996_v12  ;;  %v6417_v15 = vld [vmem:[%s8214_s22 + $0x14] sm:$0x1]  ;;  %v2567_v16 = vshrl.u32 %v6415_v13, 16  ;;  %v2570_v17 = vshll.u32 %v6415_v13, 16  ;;  %v2576_v19 = vshll.u32 %v6416_v14, 16  ;;  %v2580_v20 = vshrl.u32 %v6416_v14, 16 }
  0x14   : > { %7258 = vmatpush3.bf16.msra.mxu1 %v7986_v6  ;;  %v2586_v21 = vshll.u32 %v6417_v15, 16  ;;  %v6418_v29 = vld [vmem:[%s8214_s22 + $0x18] sm:$0xf]  ;;  %v6419_v30 = vld [vmem:[%s8214_s22 + $0x1c] sm:$0xf]  ;;  %v7997_v55 = vld [vmem:[%s8214_s22 + $0xc] sm:$0xff]  }
  0x15   : > { %7450 = vmatpush3.bf16.msra.mxu0 %v7987_v7  ;;  %7259 = vmatprep.subr.bf16.mxu1 %v7988_v8  ;;  %v2569_v22 = vrot.slane %v2567_v16, 4  ;;  %v2572_v23 = vrot.slane %v2570_v17, 5  ;;  %v2578_v25 = vrot.slane %v2576_v19, 5  ;;  %v2582_v26 = vrot.slane %v2580_v20, 4  ;;  %v6420_v31 = vld [vmem:[%s8214_s22 + $0x20] sm:$0x1] }
  0x16   : > { %7451 = vmatprep.subr.bf16.mxu0 %v7989_v9  ;;  %v2588_v27 = vrot.slane %v2586_v21, 5  ;;  %v2591_v35 = vshrl.u32 %v6418_v29, 16  ;;  %v2594_v36 = vshll.u32 %v6418_v29, 16  ;;  %v2600_v37 = vshll.u32 %v6419_v30, 16  ;;  %v6421_v53 = vld [vmem:[%s8214_s22 + $0x24] sm:$0xf] }
  0x17   : > { %v2573_v28 = vor.u32 %v2572_v23, %v2569_v22  ;;  %v2583_v34 = vor.u32 %v2582_v26, %v2578_v25  ;;  %v2604_v40 = vshrl.u32 %v6419_v30, 16  ;;  %v2610_v41 = vshll.u32 %v6420_v31, 16  ;;  %v6422_v57 = vld [vmem:[%s8214_s22 + $0x28] sm:$0xf]  ;;  %v6423_v58 = vld [vmem:[%s8214_s22 + $0x2c] sm:$0x1] }
  0x18   : > { %7260 = vmatpush3.bf16.msra.mxu1 %v7988_v8  ;;  %v2593_v43 = vrot.slane %v2591_v35, 4  ;;  %v2596_v44 = vrot.slane %v2594_v36, 5  ;;  %v2602_v45 = vrot.slane %v2600_v37, 5  ;;  %v2615_v59 = vshrl.u32 %v6421_v53, 16  ;;  %v8001_v2 = vld [vmem:[%s8214_s22 + $0x18] sm:$0xff]   ;;  %v8000_v6 = vld [vmem:[%s9377_s1 + $0x148] sm:$0xff]  }
  0x19   : > { %7452 = vmatpush3.bf16.msra.mxu0 %v7989_v9  ;;  %7261 = vmatprep.subr.bf16.mxu1 %v7990_v10  ;;  %v2574_v39 = vrot.slane %v2573_v28, 4  ;;  %v2584_v42 = vrot.slane %v2583_v34, 4  ;;  %v2606_v48 = vrot.slane %v2604_v40, 4  ;;  %v2612_v51 = vrot.slane %v2610_v41, 5  ;;  %v6424_v13 = vld [vmem:[%s8214_s22 + $0x30] sm:$0xf] }
  0x1a   : > { %7453 = vmatprep.subr.bf16.mxu0 %v7991_v11  ;;  %v2597_v50 = vor.u32 %v2596_v44, %v2593_v43  ;;  %v2618_v60 = vshll.u32 %v6421_v53, 16  ;;  %v2624_v62 = vshll.u32 %v6422_v57, 16  ;;  %v2628_v63 = vshrl.u32 %v6422_v57, 16  ;;  %v6425_v14 = vld [vmem:[%s8214_s22 + $0x34] sm:$0xf]  ;;  %v8002_v28 = vld [vmem:[%s8214_s22 + $0x24] sm:$0xff]  }
  0x1b   : > { %v2579_v46 = vsel %vm8237_vm2, %v2574_v39, %v2578_v25  ;;  %v2589_v49 = vsel %vm8237_vm2, %v2584_v42, %v2588_v27  ;;  %v2607_v56 = vor.u32 %v2606_v48, %v2602_v45  ;;  %v2634_v0 = vshll.u32 %v6423_v58, 16  ;;  %v6426_v17 = vld [vmem:[%s8214_s22 + $0x38] sm:$0x1]  ;;  %v8004_v31 = vld [vmem:[%s9377_s1 + $0x150] sm:$0xff]   ;;  %v6427_v39 = vld [vmem:[%s8214_s22 + $0x3c] sm:$0xf] }
  0x1c   : > { %7262 = vmatpush3.bf16.msra.mxu1 %v7990_v10  ;;  %v6479_v54 = vcombine.low %v2579_v46, %v2589_v49  ;;  %v2598_v61 = vrot.slane %v2597_v50, 4  ;;  %v2617_v3 = vrot.slane %v2615_v59, 4  ;;  %v2620_v4 = vrot.slane %v2618_v60, 5  ;;  %v8003_v10 = vld [vmem:[%s9377_s1 + $0x48] sm:$0xff]   ;;  %v8006_v36 = vld [vmem:[%s8214_s22 + $0x30] sm:$0xff]  }
  0x1d   : > { %7454 = vmatpush3.bf16.msra.mxu0 %v7991_v11  ;;  %7263 = vmatprep.subr.bf16.mxu1 %v7992_v18  ;;  %v2608_v1 = vrot.slane %v2607_v56, 4  ;;  %v2626_v7 = vrot.slane %v2624_v62, 5  ;;  %v2630_v8 = vrot.slane %v2628_v63, 4  ;;  %v2636_v9 = vrot.slane %v2634_v0, 5  ;;  %v6428_v40 = vld [vmem:[%s8214_s22 + $0x40] sm:$0xf] }
  0x1e   : > { %7455 = vmatprep.subr.bf16.mxu0 %v7993_v24  ;;  %7459 = vmatprep.mubr.bf16.mxu0 %v6479_v54  ;;  %v2603_v5 = vsel %vm8237_vm2, %v2598_v61, %v2602_v45  ;;  %v2621_v12 = vor.u32 %v2620_v4, %v2617_v3  ;;  %v2642_v19 = vshll.u32 %v6424_v13, 16  ;;  %v2648_v21 = vshll.u32 %v6425_v14, 16  ;;  %v6429_v41 = vld [vmem:[%s8214_s22 + $0x44] sm:$0x1]  ;;  %v8008_v54 = vld [vmem:[%s9377_s1 + $0x50] sm:$0xff]  }
  0x1f   : > { %v2613_v11 = vsel %vm8237_vm2, %v2608_v1, %v2612_v51  ;;  %v2631_v16 = vor.u32 %v2630_v8, %v2626_v7  ;;  %v2652_v22 = vshrl.u32 %v6425_v14, 16  ;;  %v2658_v23 = vshll.u32 %v6426_v17, 16  ;;  %v6430_v58 = vld [vmem:[%s8214_s22 + $0x48] sm:$0xf]  ;;  %v6431_v61 = vld [vmem:[%s8214_s22 + $0x4c] sm:$0xf] }
  0x20   : > { %7264 = vmatpush3.bf16.msra.mxu1 %v7992_v18  ;;  %v6480_v15 = vcombine.low %v2603_v5, %v2613_v11  ;;  %v2639_v18 = vshrl.u32 %v6424_v13, 16  ;;  %v2622_v20 = vrot.slane %v2621_v12, 4  ;;  %v2644_v26 = vrot.slane %v2642_v19, 5  ;;  %v6432_v62 = vld [vmem:[%s8214_s22 + $0x50] sm:$0x1]  ;;  %v8009_v8 = vld [vmem:[%s9377_s1 + $0x160] sm:$0xff]  }
  0x21   : > { %7456 = vmatpush3.bf16.msra.mxu0 %v7993_v24  ;;  %7265 = vmatprep.subr.bf16.mxu1 %v7994_v32  ;;  %v2632_v24 = vrot.slane %v2631_v16, 4  ;;  %v2650_v29 = vrot.slane %v2648_v21, 5  ;;  %v2654_v30 = vrot.slane %v2652_v22, 4  ;;  %v2660_v35 = vrot.slane %v2658_v23, 5  ;;  %v6433_v19 = vld [vmem:[%s8214_s22 + $0x54] sm:$0xf] }
  0x22   : > { %7457 = vmatprep.subr.bf16.mxu0 %v7995_v38  ;;  %v2641_v25 = vrot.slane %v2639_v18, 4  ;;  %v2627_v27 = vsel %vm8237_vm2, %v2622_v20, %v2626_v7  ;;  %v2663_v43 = vshrl.u32 %v6427_v39, 16  ;;  %v2666_v44 = vshll.u32 %v6427_v39, 16  ;;  %v8011_v18 = vld [vmem:[%s8214_s22 + $0x48] sm:$0xff]   ;;  %v6434_v20 = vld [vmem:[%s8214_s22 + $0x58] sm:$0xf] }
  0x23   : > { %v2672_v45 = vshll.u32 %v6428_v40, 16  ;;  %v2676_v48 = vshrl.u32 %v6428_v40, 16  ;;  %v2682_v49 = vshll.u32 %v6429_v41, 16  ;;  %v2687_v63 = vshrl.u32 %v6430_v58, 16  ;;  %v8010_v23 = vld [vmem:[%s9377_s1 + $0x168] sm:$0xff]   ;;  %v8012_v39 = vld [vmem:[%s8214_s22 + $0x54] sm:$0xff]  }
  0x24   : > { %7266 = vmatpush3.bf16.msra.mxu1 %v7994_v32  ;;  %v2637_v32 = vsel %vm8237_vm2, %v2632_v24, %v2636_v9  ;;  %v2645_v34 = vor.u32 %v2644_v26, %v2641_v25  ;;  %v2665_v51 = vrot.slane %v2663_v43, 4  ;;  %v2690_v0 = vshll.u32 %v6430_v58, 16  ;;  %v6435_v24 = vld [vmem:[%s8214_s22 + $0x5c] sm:$0x1]  ;;  %v6436_v43 = vld [vmem:[%s8214_s22 + $0x60] sm:$0xf] }
  0x25   : > { %7458 = vmatpush3.bf16.msra.mxu0 %v7995_v38  ;;  %7299 = vmatprep.subr.bf16.mxu1 %v7998_v47  ;;  %v6481_v37 = vcombine.low %v2627_v27, %v2637_v32  ;;  %v2655_v38 = vor.u32 %v2654_v30, %v2650_v29  ;;  %v2674_v53 = vrot.slane %v2672_v45, 5  ;;  %v2678_v56 = vrot.slane %v2676_v48, 4  ;;  %v8013_v40 = vld [vmem:[%s9377_s1 + $0x58] sm:$0xff]   ;;  %v6438_v45 = vld [vmem:[%s8214_s22 + $0x68] sm:$0x1] }
  0x26   : > { %7491 = vmatprep.subr.bf16.mxu0 %v7999_v52  ;;  %v2646_v42 = vrot.slane %v2645_v34, 4  ;;  %v2684_v57 = vrot.slane %v2682_v49, 5  ;;  %v2700_v3 = vshrl.u32 %v6431_v61, 16  ;;  %v2706_v4 = vshll.u32 %v6432_v62, 16 }
  0x27   : > { %7268 = vmatmul.mubr.bf16.vlgmr.msra.gmra.mrb[0].mxu1 %v7997_v55  ;;  %v2656_v46 = vrot.slane %v2655_v38, 4  ;;  %v2679_v1 = vor.u32 %v2678_v56, %v2674_v53  ;;  %v2692_v7 = vrot.slane %v2690_v0, 5  ;;  %v2711_v25 = vshrl.u32 %v6433_v19, 16  ;;  %v6503_v0 = vld [vmem:[%s8214_s22 + $0xc] sm:$0xe] }
  0x28   : > { %7460 = vmatmul.mubr.bf16.vlgmr.msra.gmra.mrb[0].mxu0 %v6480_v15  ;;  %7300 = vmatpush3.bf16.msra.mxu1 %v7998_v47  ;;  %v8005_v47 = vld [vmem:[%s9377_s1 + $0x158] sm:$0xff]   ;;  %v2651_v50 = vsel %vm8237_vm2, %v2646_v42, %v2650_v29  ;;  %v2702_v12 = vrot.slane %v2700_v3, 4  ;;  %v2708_v17 = vrot.slane %v2706_v4, 5  ;;  %v2714_v26 = vshll.u32 %v6433_v19, 16 }
  0x29   : > { %7492 = vmatpush3.bf16.msra.mxu0 %v7999_v52  ;;  %7271 = vmatprep.mubr.bf16.mxu1 %v8001_v2  ;;  %v2668_v52 = vrot.slane %v2666_v44, 5  ;;  %v2661_v55 = vsel %vm8237_vm2, %v2656_v46, %v2660_v35  ;;  %v2696_v2 = vshll.u32 %v6431_v61, 16  ;;  %v2680_v9 = vrot.slane %v2679_v1, 4  ;;  %v6437_v44 = vld [vmem:[%s8214_s22 + $0x64] sm:$0xf] }
  0x2a   : > { %7493 = vmatprep.subr.bf16.mxu0 %v8000_v6  ;;  %7301 = vmatprep.subr.bf16.mxu1 %v8003_v10  ;;  %v6482_v59 = vcombine.low %v2651_v50, %v2661_v55  ;;  %v2724_v29 = vshrl.u32 %v6434_v20, 16  ;;  %v2730_v30 = vshll.u32 %v6435_v24, 16  ;;  %v2713_v32 = vrot.slane %v2711_v25, 4  ;;  %v8014_v50 = vld [vmem:[%s9377_s1 + $0x170] sm:$0xff]  }
  0x2b   : > { %7463 = vmatprep.mubr.bf16.mxu0 %v6481_v37  ;;  %v2669_v60 = vor.u32 %v2668_v52, %v2665_v51  ;;  %v2698_v11 = vrot.slane %v2696_v2, 5  ;;  %v2685_v15 = vsel %vm8237_vm2, %v2680_v9, %v2684_v57  ;;  %v2716_v34 = vrot.slane %v2714_v26, 5 }
  0x2c   : > { %7302 = vmatpush3.bf16.msra.mxu1 %v8003_v10  ;;  %v8007_v10 = vld [vmem:[%s8214_s22 + $0x3c] sm:$0xff]   ;;  %v2726_v37 = vrot.slane %v2724_v29, 4  ;;  %v2732_v38 = vrot.slane %v2730_v30, 5  ;;  %v2738_v48 = vshll.u32 %v6436_v43, 16  ;;  %v2744_v49 = vshll.u32 %v6437_v44, 16 }
  0x2d   : > { %7494 = vmatpush3.bf16.msra.mxu0 %v8000_v6  ;;  %7303 = vmatprep.subr.bf16.mxu1 %v8008_v54  ;;  %v2670_v5 = vrot.slane %v2669_v60, 4  ;;  %v2689_v6 = vrot.slane %v2687_v63, 4  ;;  %v2703_v16 = vor.u32 %v2702_v12, %v2698_v11  ;;  %v2717_v42 = vor.u32 %v2716_v34, %v2713_v32  ;;  %v8015_v60 = vld [vmem:[%s9377_s1 + $0x178] sm:$0xff]   ;;  %v8016_v63 = vld [vmem:[%s8214_s22 + $0x60] sm:$0xff]   ;;  %v6511_v32 = vld [vmem:[%s8214_s22 + $0x2c] sm:$0x1] }
  0x2e   : > { %7495 = vmatprep.subr.bf16.mxu0 %v8004_v31  ;;  %v2748_v52 = vshrl.u32 %v6437_v44, 16  ;;  %v2740_v56 = vrot.slane %v2738_v48, 5  ;;  %v2746_v57 = vrot.slane %v2744_v49, 5  ;;  %v6509_v29 = vld [vmem:[%s8214_s22 + $0x24] sm:$0xe]  ;;  %v8023_v48 = vld [vmem:[%s9377_s1 + $0x188] sm:$0xff]  }
  0x2f   : > { %7272 = vmatmul.mubr.bf16.gmra.mrb[4].mxu1 %v8002_v28  ;;  %v2675_v13 = vsel %vm8237_vm2, %v2670_v5, %v2674_v53  ;;  %v2693_v14 = vor.u32 %v2692_v7, %v2689_v6  ;;  %v2704_v27 = vrot.slane %v2703_v16, 4  ;;  %v2720_v28 = vshll.u32 %v6434_v20, 16  ;;  %v6504_v5 = vld [vmem:[%s8214_s22 + $0x10] sm:$0xf]  ;;  %v6505_v6 = vld [vmem:[%s8214_s22 + $0x14] sm:$0x1] }
  0x30   : > { %7275 = vmatprep.mubr.bf16.mxu1 %v8006_v36  ;;  %7304 = vmatpush3.bf16.msra.mxu1 %v8008_v54  ;;  %v6483_v21 = vcombine.low %v2675_v13, %v2685_v15  ;;  %v2718_v51 = vrot.slane %v2717_v42, 4  ;;  %v2754_v53 = vshll.u32 %v6438_v45, 16  ;;  %v6551_v7 = vrot.slane %v6503_v0, 9  ;;  %v8019_v13 = vld [vmem:[%s9377_s1 + $0x180] sm:$0xff]   ;;  %v6507_v20 = vld [vmem:[%s8214_s22 + $0x1c] sm:$0xf] }
  0x31   : > { %7496 = vmatpush3.bf16.msra.mxu0 %v8004_v31  ;;  %v2694_v22 = vrot.slane %v2693_v14, 4  ;;  %v2709_v35 = vsel %vm8237_vm2, %v2704_v27, %v2708_v17  ;;  %v2722_v36 = vrot.slane %v2720_v28, 5  ;;  %7305 = vmatprep.subr.bf16.mxu1 %v8013_v40  ;;  %v3434_v9 = vrot.slane %v6504_v5, 5  ;;  %v8017_v17 = vld [vmem:[%s8214_s22 + $0x6c] sm:$0xff]   ;;  %v8021_v42 = vld [vmem:[%s8214_s22 + $0x84] sm:$0xff]  }
  0x32   : > { %7464 = vmatmul.mubr.bf16.gmra.mrb[4].mxu0 %v6482_v59  ;;  %7497 = vmatprep.subr.bf16.mxu0 %v8005_v47  ;;  %v2750_v59 = vrot.slane %v2748_v52, 4  ;;  %v2756_v3 = vrot.slane %v2754_v53, 5  ;;  %v3441_v26 = vrot.slane %v6507_v20, 5  ;;  %v6553_v34 = vrot.slane %v6509_v29, 9  ;;  %v6513_v44 = vld [vmem:[%s8214_s22 + $0x34] sm:$0xf] }
  0x33   : > { %7467 = vmatprep.mubr.bf16.mxu0 %v6483_v21  ;;  %v2699_v31 = vsel %vm8237_vm2, %v2694_v22, %v2698_v11  ;;  %v2727_v46 = vor.u32 %v2726_v37, %v2722_v36  ;;  %v2723_v58 = vsel %vm8237_vm2, %v2718_v51, %v2722_v36  ;;  %v8018_v11 = vld [vmem:[%s9377_s1 + $0x60] sm:$0xff]   ;;  %v3435_v15 = vsel %vm8337_vm5, %v6551_v7, %v3434_v9  ;;  %v6518_v0 = vld [vmem:[%s8214_s22 + $0x48] sm:$0xe]  ;;  %v6519_v5 = vld [vmem:[%s8214_s22 + $0x4c] sm:$0xf] }
  0x34   : > { %v6484_v41 = vcombine.low %v2699_v31, %v2709_v35  ;;  %7306 = vmatpush3.bf16.msra.mxu1 %v8013_v40  ;;  %v2751_v2 = vor.u32 %v2750_v59, %v2746_v57  ;;  %v3436_v16 = vrot.slane %v3434_v9, 4  ;;  %v6508_v21 = vld [vmem:[%s8214_s22 + $0x20] sm:$0x1]  ;;  %v3443_v30 = vrot.slane %v3441_v26, 4  ;;  %v6510_v31 = vld [vmem:[%s8214_s22 + $0x28] sm:$0xf] }
  0x35   : > { %7498 = vmatpush3.bf16.msra.mxu0 %v8005_v47  ;;  %v2735_v47 = vshrl.u32 %v6436_v43, 16  ;;  %v2728_v54 = vrot.slane %v2727_v46, 4  ;;  %7307 = vmatprep.subr.bf16.mxu1 %v8018_v11  ;;  %v3444_v27 = vrot.slane %v6508_v21, 5  ;;  %v3448_v36 = vrot.slane %v6510_v31, 5  ;;  %v6512_v43 = vld [vmem:[%s8214_s22 + $0x30] sm:$0xe] }
  0x36   : > { %7499 = vmatprep.subr.bf16.mxu0 %v8009_v8  ;;  %v2752_v12 = vrot.slane %v2751_v2, 4  ;;  %v3451_v37 = vrot.slane %v6511_v32, 5  ;;  %v6514_v46 = vld [vmem:[%s8214_s22 + $0x38] sm:$0x1]  ;;  %v8026_v59 = vld [vmem:[%s9377_s1 + $0x70] sm:$0xff]   ;;  %v6556_v7 = vrot.slane %v6518_v0, 9 }
  0x37   : > { %7276 = vmatmul.mubr.bf16.gmra.mrb[8].mxu1 %v8007_v10  ;;  %v2737_v55 = vrot.slane %v2735_v47, 4  ;;  %v2733_v61 = vsel %vm8237_vm2, %v2728_v54, %v2732_v38  ;;  %v3437_v10 = vrot.slane %v6505_v6, 5  ;;  %v3445_v38 = vsel %vm8337_vm5, %v3443_v30, %v3444_v27  ;;  %v8024_v54 = vld [vmem:[%s8214_s22 + $0x90] sm:$0xff]   ;;  %v6524_v27 = vld [vmem:[%s8214_s22 + $0x60] sm:$0xe]  ;;  %v8031_v31 = vld [vmem:[%s9377_s1 + $0x198] sm:$0xff]  }
  0x38   : > { %7279 = vmatprep.mubr.bf16.mxu1 %v8011_v18  ;;  %v6485_v1 = vcombine.low %v2723_v58, %v2733_v61  ;;  %v6506_v18 = vld [vmem:[%s8214_s22 + $0x18] sm:$0xe]  ;;  %v2757_v19 = vsel %vm8237_vm2, %v2752_v12, %v2756_v3  ;;  %7308 = vmatpush3.bf16.msra.mxu1 %v8018_v11  ;;  %v3449_v40 = vsel %vm8337_vm5, %v6553_v34, %v3448_v36  ;;  %v3455_v47 = vrot.slane %v6513_v44, 5  ;;  %v8025_v3 = vld [vmem:[%s8214_s22 + $0x9c] sm:$0xff]   ;;  %v6520_v6 = vld [vmem:[%s8214_s22 + $0x50] sm:$0x1] }
  0x39   : > { %7500 = vmatpush3.bf16.msra.mxu0 %v8009_v8  ;;  %v2741_v62 = vor.u32 %v2740_v56, %v2737_v55  ;;  %v6552_v22 = vrot.slane %v6506_v18, 9  ;;  %v3438_v25 = vsel %vm8337_vm5, %v3436_v16, %v3437_v10  ;;  %v3458_v51 = vrot.slane %v6514_v46, 5  ;;  %v6515_v55 = vld [vmem:[%s8214_s22 + $0x3c] sm:$0xe]  ;;  %v6516_v56 = vld [vmem:[%s8214_s22 + $0x40] sm:$0xf] }
  0x3a   : > { %7501 = vmatprep.subr.bf16.mxu0 %v8010_v23  ;;  %7468 = vmatmul.mubr.bf16.gmra.mrb[8].mxu0 %v6484_v41  ;;  %v6583_v28 = vcombine.low %v3435_v15, %v3438_v25  ;;  %v3450_v41 = vrot.slane %v3448_v36, 4  ;;  %v3457_v53 = vrot.slane %v3455_v47, 4  ;;  %v6555_v58 = vrot.slane %v6515_v55, 9  ;;  %v8027_v12 = vld [vmem:[%s9377_s1 + $0x190] sm:$0xff]   ;;  %v8028_v15 = vld [vmem:[%s8214_s22 + $0xa8] sm:$0xff]  }
  0x3b   : > { %v2742_v8 = vrot.slane %v2741_v62, 4  ;;  %7471 = vmatprep.mubr.bf16.mxu0 %v6485_v1  ;;  %v3442_v35 = vsel %vm8337_vm5, %v6552_v22, %v3441_v26  ;;  %v3472_v11 = vrot.slane %v6520_v6, 5  ;;  %v6521_v16 = vld [vmem:[%s8214_s22 + $0x54] sm:$0xe]  ;;  %v6523_v18 = vld [vmem:[%s8214_s22 + $0x5c] sm:$0x1] }
  0x3c   : > { %v6584_v45 = vcombine.low %v3442_v35, %v3445_v38  ;;  %v3452_v49 = vsel %vm8337_vm5, %v3450_v41, %v3451_v37  ;;  %v3479_v21 = vrot.slane %v6523_v18, 5  ;;  %v8030_v26 = vld [vmem:[%s9377_s1 + $0x78] sm:$0xff]   ;;  %v6526_v29 = vld [vmem:[%s8214_s22 + $0x68] sm:$0x1]  ;;  %v6558_v30 = vrot.slane %v6524_v27, 9 }
  0x3d   : > { %7502 = vmatpush3.bf16.msra.mxu0 %v8010_v23  ;;  %v2747_v14 = vsel %vm8237_vm2, %v2742_v8, %v2746_v57  ;;  %v8020_v23 = vld [vmem:[%s8214_s22 + $0x78] sm:$0xff]   ;;  %v6585_v52 = vcombine.low %v3449_v40, %v3452_v49  ;;  %v6517_v57 = vld [vmem:[%s8214_s22 + $0x44] sm:$0x1]  ;;  %v3469_v8 = vrot.slane %v6519_v5, 5  ;;  %v3486_v36 = vrot.slane %v6526_v29, 5 }
  0x3e   : > { %7503 = vmatprep.subr.bf16.mxu0 %v8014_v50  ;;  %v6486_v24 = vcombine.low %v2747_v14, %v2757_v19  ;;  %v3465_v61 = vrot.slane %v6517_v57, 5  ;;  %v6557_v19 = vrot.slane %v6521_v16, 9  ;;  %v8029_v34 = vld [vmem:[%s8214_s22 + $0xb4] sm:$0xff]   ;;  %v650_v40 = vld [vmem:[%s8214_s22 + $0x4] sm:$0xf] }
  0x3f   : > { %7280 = vmatmul.mubr.bf16.gmra.mrb[12].mxu1 %v8012_v39  ;;  %v8022_v39 = vld [vmem:[%s9377_s1 + $0x68] sm:$0xff]   ;;  %v3471_v14 = vrot.slane %v3469_v8, 4  ;;  %v3470_v22 = vsel %vm8337_vm5, %v6556_v7, %v3469_v8  ;;  %v714_v49 = vshrl.u32 %v650_v40, 16  ;;  %v653_v5 = vld [vmem:[%s8214_s22 + $0x10] sm:$0xf] }
  0x40   : > { %7283 = vmatprep.mubr.bf16.mxu1 %v8016_v63  ;;  %7309 = vmatprep.subr.bf16.mxu1 %v8022_v39  ;;  %v3459_v63 = vsel %vm8337_vm5, %v3457_v53, %v3458_v51  ;;  %v651_v41 = vld [vmem:[%s8214_s22 + $0x8] sm:$0x1]  ;;  %v6527_v46 = vld [vmem:[%s8214_s22 + $0x6c] sm:$0xe]  ;;  %v6528_v51 = vld [vmem:[%s8214_s22 + $0x70] sm:$0xf] }
  0x41   : > { %7504 = vmatpush3.bf16.msra.mxu0 %v8014_v50  ;;  %v6554_v50 = vrot.slane %v6512_v43, 9  ;;  %7310 = vmatpush3.bf16.msra.mxu1 %v8022_v39  ;;  %v649_v39 = vld [vmem:[%s8214_s22] sm:$0xf]  ;;  %v3490_v57 = vrot.slane %v6528_v51, 5  ;;  %v654_v6 = vld [vmem:[%s8214_s22 + $0x14] sm:$0x1] }
  0x42   : > { %7505 = vmatprep.subr.bf16.mxu0 %v8015_v60  ;;  %7472 = vmatmul.mubr.bf16.gmra.mrb[12].mxu0 %v6486_v24  ;;  %v701_v44 = vshrl.u32 %v649_v39, 16  ;;  %v6532_v29 = vld [vmem:[%s8214_s22 + $0x80] sm:$0x1] }
  0x43   : > { %7507 = vmatprep.mubr.bf16.mxu0 %v6583_v28  ;;  %v3456_v62 = vsel %vm8337_vm5, %v6554_v50, %v3455_v47  ;;  %7311 = vmatprep.subr.bf16.mxu1 %v8026_v59  ;;  %v6525_v28 = vld [vmem:[%s8214_s22 + $0x64] sm:$0xf]  ;;  %v720_v50 = vshll.u32 %v651_v41, 16  ;;  %v656_v41 = vld [vmem:[%s8214_s22 + $0x1c] sm:$0xf] }
  0x44   : > { %v6586_v9 = vcombine.low %v3456_v62, %v3459_v63  ;;  %v3483_v35 = vrot.slane %v6525_v28, 5  ;;  %v8438_v47 = vld [vmem:[%s9377_s1 + $0x80] sm:$0xff]   ;;  %v652_v63 = vld [vmem:[%s8214_s22 + $0xc] sm:$0xf]  ;;  %v762_v51 = vshrl.u32 %v656_v41, 16 }
  0x45   : > { %7506 = vmatpush3.bf16.msra.mxu0 %v8015_v60  ;;  %v3462_v60 = vrot.slane %v6516_v56, 5  ;;  %7312 = vmatpush3.bf16.msra.mxu1 %v8026_v59  ;;  %v6529_v56 = vld [vmem:[%s8214_s22 + $0x74] sm:$0x1]  ;;  %v722_v62 = vrot.slane %v720_v50, 5  ;;  %v725_v8 = vshrl.u32 %v652_v63, 16 }
  0x46   : > { %7539 = vmatprep.subr.bf16.mxu0 %v8019_v13  ;;  %7313 = vmatprep.subr.bf16.mxu1 %v8030_v26  ;;  %v3485_v43 = vrot.slane %v3483_v35, 4 }
  0x47   : > { %7284 = vmatmul.mubr.bf16.gmra.mrb[16].mxu1 %v8017_v17  ;;  %v3463_v1 = vsel %vm8337_vm5, %v6555_v58, %v3462_v60  ;;  %v3464_v2 = vrot.slane %v3462_v60, 4  ;;  %v6522_v17 = vld [vmem:[%s8214_s22 + $0x58] sm:$0xf]  ;;  %v8033_v58 = vld [vmem:[%s9377_s1 + $0x1a0] sm:$0xff]   ;;  %v727_v18 = vrot.slane %v725_v8, 4 }
  0x48   : > { %7287 = vmatprep.mubr.bf16.mxu1 %v8020_v23  ;;  %v3476_v20 = vrot.slane %v6522_v17, 5  ;;  %v3473_v23 = vsel %vm8337_vm5, %v3471_v14, %v3472_v11  ;;  %v3487_v53 = vsel %vm8337_vm5, %v3485_v43, %v3486_v36  ;;  %v8035_v11 = vld [vmem:[%s9377_s1 + $0x1a8] sm:$0xff]   ;;  %v738_v14 = vshrl.u32 %v653_v5, 16  ;;  %v655_v36 = vld [vmem:[%s8214_s22 + $0x18] sm:$0xf] }
  0x49   : > { %v3466_v10 = vsel %vm8337_vm5, %v3464_v2, %v3465_v61  ;;  %v6588_v37 = vcombine.low %v3470_v22, %v3473_v23  ;;  %7314 = vmatpush3.bf16.msra.mxu1 %v8030_v26  ;;  %v716_v61 = vrot.slane %v714_v49, 4  ;;  %v3492_v2 = vrot.slane %v3490_v57, 4  ;;  %v6531_v26 = vld [vmem:[%s8214_s22 + $0x7c] sm:$0xf] }
  0x4a   : > { %7508 = vmatmul.mubr.bf16.vlgmr.msra.gmra.mrb[0].mxu0 %v6584_v45  ;;  %v3477_v24 = vsel %vm8337_vm5, %v6557_v19, %v3476_v20  ;;  %v3478_v25 = vrot.slane %v3476_v20, 4  ;;  %v704_v45 = vshll.u32 %v649_v39, 16  ;;  %7347 = vmatprep.subr.bf16.mxu1 %v8438_v47  ;;  %v6530_v20 = vld [vmem:[%s8214_s22 + $0x78] sm:$0xe] }
  0x4b   : > { %7540 = vmatpush3.bf16.msra.mxu0 %v8019_v13  ;;  %7511 = vmatprep.mubr.bf16.mxu0 %v6585_v52  ;;  %v6587_v13 = vcombine.low %v3463_v1, %v3466_v10  ;;  %v6559_v52 = vrot.slane %v6527_v46, 9  ;;  %v734_v10 = vshll.u32 %v653_v5, 16  ;;  %v758_v46 = vshll.u32 %v656_v41, 16 }
  0x4c   : > { %7541 = vmatprep.subr.bf16.mxu0 %v8023_v48  ;;  %v3480_v32 = vsel %vm8337_vm5, %v3478_v25, %v3479_v21  ;;  %v706_v55 = vrot.slane %v704_v45, 5  ;;  %v8037_v21 = vld [vmem:[%s9377_s1 + $0x1b0] sm:$0xff]   ;;  %v752_v45 = vshll.u32 %v655_v36, 16 }
  0x4d   : > { %v6589_v38 = vcombine.low %v3477_v24, %v3480_v32  ;;  %v3491_v1 = vsel %vm8337_vm5, %v6559_v52, %v3490_v57  ;;  %v736_v23 = vrot.slane %v734_v10, 5  ;;  %v740_v24 = vrot.slane %v738_v14, 4 }
  0x4f   : > { %7288 = vmatmul.mubr.bf16.gmra.mrb[20].mxu1 %v8021_v42  ;;  %7542 = vmatpush3.bf16.msra.mxu0 %v8023_v48  ;;  %v8432_v42 = vsel %vm8337_vm5, %v6558_v30, %v3483_v35  ;;  %v710_v48 = vshll.u32 %v650_v40, 16  ;;  %v6560_v30 = vrot.slane %v6530_v20, 9  ;;  %v3500_v35 = vrot.slane %v6532_v29, 5 }
  0x50   : > { %7291 = vmatprep.mubr.bf16.mxu1 %v8024_v54  ;;  %7543 = vmatprep.subr.bf16.mxu0 %v8027_v12  ;;  %v703_v54 = vrot.slane %v701_v44, 4  ;;  %v6590_v59 = vcombine.low %v8432_v42, %v3487_v53  ;;  %v657_v42 = vld [vmem:[%s8214_s22 + $0x20] sm:$0x1]  ;;  %v749_v44 = vshrl.u32 %v655_v36, 16  ;;  %v6534_v53 = vld [vmem:[%s8214_s22 + $0x88] sm:$0xf] }
  0x51   : > { %v712_v60 = vrot.slane %v710_v48, 5  ;;  %v6533_v48 = vld [vmem:[%s8214_s22 + $0x84] sm:$0xe]  ;;  %v768_v52 = vshll.u32 %v657_v42, 16 }
  0x52   : > { %7512 = vmatmul.mubr.bf16.gmra.mrb[4].mxu0 %v6586_v9  ;;  %v707_v0 = vor.u32 %v706_v55, %v703_v54  ;;  %v728_v9 = vshll.u32 %v652_v63, 16  ;;  %v6535_v54 = vld [vmem:[%s8214_s22 + $0x8c] sm:$0x1]  ;;  %v751_v57 = vrot.slane %v749_v44, 4  ;;  %v764_v63 = vrot.slane %v762_v51, 4 }
  0x53   : > { %7515 = vmatprep.mubr.bf16.mxu0 %v6587_v13  ;;  %7544 = vmatpush3.bf16.msra.mxu0 %v8027_v12  ;;  %v717_v7 = vor.u32 %v716_v61, %v712_v60  ;;  %v6561_v5 = vrot.slane %v6533_v48, 9  ;;  %v6540_v51 = vld [vmem:[%s8214_s22 + $0xa0] sm:$0xf] }
  0x54   : > { %7545 = vmatprep.subr.bf16.mxu0 %v8031_v31  ;;  %v708_v12 = vrot.slane %v707_v0, 4  ;;  %v730_v19 = vrot.slane %v728_v9, 5  ;;  %v770_v0 = vrot.slane %v768_v52, 5 }
  0x55   : > { %v718_v16 = vrot.slane %v717_v7, 4  ;;  %v3507_v7 = vrot.slane %v6535_v54, 5 }
  0x56   : > { %v713_v22 = vsel %vm8237_vm2, %v708_v12, %v712_v60  ;;  %v731_v28 = vor.u32 %v730_v19, %v727_v18  ;;  %v659_v60 = vld [vmem:[%s8214_s22 + $0x28] sm:$0xf]  ;;  %v8036_v12 = vld [vmem:[%s9377_s1 + $0x90] sm:$0xff]   ;;  %v8502_v18 = vld [vmem:[%s9377_s1 + $0x1c0] sm:$0xff]  }
  0x57   : > { %7292 = vmatmul.mubr.bf16.gmra.mrb[24].mxu1 %v8025_v3  ;;  %7546 = vmatpush3.bf16.msra.mxu0 %v8031_v31  ;;  %v3493_v3 = vrot.slane %v6529_v56, 5  ;;  %v723_v27 = vsel %vm8237_vm2, %v718_v16, %v722_v62  ;;  %v3497_v31 = vrot.slane %v6531_v26, 5  ;;  %v760_v62 = vrot.slane %v758_v46, 5 }
  0x58   : > { %7295 = vmatprep.mubr.bf16.mxu1 %v8028_v15  ;;  %7547 = vmatprep.subr.bf16.mxu0 %v8033_v58  ;;  %v744_v15 = vshll.u32 %v654_v6, 16  ;;  %v6263_v32 = vcombine.low %v713_v22, %v723_v27  ;;  %v3504_v6 = vrot.slane %v6534_v53, 5  ;;  %v786_v16 = vshrl.u32 %v659_v60, 16  ;;  %v6538_v27 = vld [vmem:[%s8214_s22 + $0x98] sm:$0x1] }
  0x59   : > { %v3494_v13 = vsel %vm8337_vm5, %v3492_v2, %v3493_v3  ;;  %v3498_v39 = vsel %vm8337_vm5, %v6560_v30, %v3497_v31  ;;  %v3499_v40 = vrot.slane %v3497_v31, 4  ;;  %v8034_v2 = vld [vmem:[%s9377_s1 + $0x88] sm:$0xff]   ;;  %v765_v8 = vor.u32 %v764_v63, %v760_v62 }
  0x5a   : > { %7516 = vmatmul.mubr.bf16.gmra.mrb[8].mxu0 %v6588_v37  ;;  %v6591_v17 = vcombine.low %v3491_v1, %v3494_v13  ;;  %v746_v25 = vrot.slane %v744_v15, 5  ;;  %v8039_v37 = vld [vmem:[%s9377_s1 + $0x1b8] sm:$0xff]   ;;  %v660_v1 = vld [vmem:[%s8214_s22 + $0x2c] sm:$0x1]  ;;  %v3505_v14 = vsel %vm8337_vm5, %v6561_v5, %v3504_v6  ;;  %v3506_v15 = vrot.slane %v3504_v6, 4  ;;  %v8041_v5 = vld [vmem:[%s9377_s1 + $0xa0] sm:$0xff]  }
  0x5b   : > { %7519 = vmatprep.mubr.bf16.mxu0 %v6589_v38  ;;  %7548 = vmatpush3.bf16.msra.mxu0 %v8033_v58  ;;  %v732_v38 = vrot.slane %v731_v28, 4  ;;  %v3501_v50 = vsel %vm8337_vm5, %v3499_v40, %v3500_v35  ;;  %v754_v58 = vrot.slane %v752_v45, 5  ;;  %v766_v19 = vrot.slane %v765_v8, 4  ;;  %v663_v40 = vld [vmem:[%s8214_s22 + $0x38] sm:$0x1] }
  0x5c   : > { %7549 = vmatprep.subr.bf16.mxu0 %v8035_v11  ;;  %v6592_v56 = vcombine.low %v3498_v39, %v3501_v50  ;;  %v792_v26 = vshll.u32 %v660_v1, 16  ;;  %v662_v39 = vld [vmem:[%s8214_s22 + $0x34] sm:$0xf]  ;;  %v3514_v42 = vrot.slane %v6538_v27, 5  ;;  %v6539_v45 = vld [vmem:[%s8214_s22 + $0x9c] sm:$0xe] }
  0x5d   : > { %v737_v49 = vsel %vm8237_vm2, %v732_v38, %v736_v23  ;;  %v755_v3 = vor.u32 %v754_v58, %v751_v57  ;;  %v771_v28 = vsel %vm8237_vm2, %v766_v19, %v770_v0  ;;  %v806_v50 = vshll.u32 %v662_v39, 16 }
  0x5e   : > { %v3518_v8 = vrot.slane %v6540_v51, 5 }
  0x5f   : > { %7296 = vmatmul.mubr.bf16.gmra.mrb[28].mxu1 %v8029_v34  ;;  %v741_v34 = vor.u32 %v740_v24, %v736_v23  ;;  %7550 = vmatpush3.bf16.msra.mxu0 %v8035_v11  ;;  %v782_v11 = vshll.u32 %v659_v60, 16  ;;  %v756_v13 = vrot.slane %v755_v3, 4  ;;  %v3508_v24 = vsel %vm8337_vm5, %v3506_v15, %v3507_v7  ;;  %v666_v3 = vld [vmem:[%s8214_s22 + $0x44] sm:$0x1] }
  0x60   : > { %7551 = vmatprep.subr.bf16.mxu0 %v8037_v21  ;;  %7315 = vmatprep.mubr.bf16.mxu1 %v6263_v32  ;;  %v6593_v29 = vcombine.low %v3505_v14, %v3508_v24  ;;  %v661_v32 = vld [vmem:[%s8214_s22 + $0x30] sm:$0xf]  ;;  %v816_v60 = vshll.u32 %v663_v40, 16  ;;  %v6563_v7 = vrot.slane %v6539_v45, 9  ;;  %v6542_v14 = vld [vmem:[%s8214_s22 + $0xa8] sm:$0xe] }
  0x61   : > { %v742_v43 = vrot.slane %v741_v34, 4  ;;  %v784_v22 = vrot.slane %v782_v11, 5  ;;  %v761_v23 = vsel %vm8237_vm2, %v756_v13, %v760_v62  ;;  %v8038_v34 = vld [vmem:[%s9377_s1 + $0x98] sm:$0xff]   ;;  %v800_v44 = vshll.u32 %v661_v32, 16  ;;  %v665_v62 = vld [vmem:[%s8214_s22 + $0x40] sm:$0xf] }
  0x62   : > { %7520 = vmatmul.mubr.bf16.gmra.mrb[12].mxu0 %v6590_v59  ;;  %v658_v59 = vld [vmem:[%s8214_s22 + $0x24] sm:$0xf]  ;;  %v6265_v35 = vcombine.low %v761_v23, %v771_v28  ;;  %v818_v6 = vrot.slane %v816_v60, 5  ;;  %v3519_v15 = vsel %vm8337_vm5, %v6563_v7, %v3518_v8  ;;  %v834_v19 = vshrl.u32 %v665_v62, 16  ;;  %v6544_v24 = vld [vmem:[%s8214_s22 + $0xb0] sm:$0x1] }
  0x63   : > { %7523 = vmatprep.mubr.bf16.mxu0 %v6591_v17  ;;  %v747_v55 = vsel %vm8237_vm2, %v742_v43, %v746_v25  ;;  %7552 = vmatpush3.bf16.msra.mxu0 %v8037_v21  ;;  %v773_v9 = vshrl.u32 %v658_v59, 16  ;;  %v776_v10 = vshll.u32 %v658_v59, 16  ;;  %v6536_v17 = vld [vmem:[%s8214_s22 + $0x90] sm:$0xe]  ;;  %v788_v25 = vrot.slane %v786_v16, 4  ;;  %v8053_v7 = vld [vmem:[%s9377_s1 + $0xb8] sm:$0xff]  }
  0x64   : > { %v6264_v61 = vcombine.low %v737_v49, %v747_v55  ;;  %7553 = vmatprep.subr.bf16.mxu0 %v8039_v37  ;;  %v6562_v31 = vrot.slane %v6536_v17, 9  ;;  %v797_v43 = vshrl.u32 %v661_v32, 16  ;;  %v802_v54 = vrot.slane %v800_v44, 5 }
  0x65   : > { %v775_v20 = vrot.slane %v773_v9, 4  ;;  %v778_v21 = vrot.slane %v776_v10, 5  ;;  %v789_v36 = vor.u32 %v788_v25, %v784_v22  ;;  %v810_v55 = vshrl.u32 %v662_v39, 16  ;;  %v8045_v25 = vld [vmem:[%s9377_s1 + $0xa8] sm:$0xff]  }
  0x66   : > { %v799_v53 = vrot.slane %v797_v43, 4  ;;  %v808_v59 = vrot.slane %v806_v50, 5  ;;  %v3520_v16 = vrot.slane %v3518_v8, 4  ;;  %v830_v17 = vshll.u32 %v665_v62, 16 }
  0x67   : > { %7316 = vmatmul.mubr.bf16.vlgmr.msra.gmra.mrb[0].mxu1 %v6264_v61  ;;  %7554 = vmatpush3.bf16.msra.mxu0 %v8039_v37  ;;  %v779_v30 = vor.u32 %v778_v21, %v775_v20  ;;  %v794_v37 = vrot.slane %v792_v26, 5  ;;  %v790_v46 = vrot.slane %v789_v36, 4  ;;  %v664_v61 = vld [vmem:[%s8214_s22 + $0x3c] sm:$0xf]  ;;  %v6543_v20 = vld [vmem:[%s8214_s22 + $0xac] sm:$0xf] }
  0x68   : > { %7348 = vmatpush3.bf16.msra.mxu1 %v8438_v47  ;;  %v6537_v47 = vld [vmem:[%s8214_s22 + $0x94] sm:$0xf]  ;;  %7587 = vmatprep.subr.bf16.mxu0 %v8502_v18  ;;  %v803_v1 = vor.u32 %v802_v54, %v799_v53  ;;  %v824_v13 = vshll.u32 %v664_v61, 16  ;;  %v832_v27 = vrot.slane %v830_v17, 5  ;;  %v836_v28 = vrot.slane %v834_v19, 4 }
  0x69   : > { %7349 = vmatprep.subr.bf16.mxu1 %v8034_v2  ;;  %v3511_v38 = vrot.slane %v6537_v47, 5  ;;  %v780_v41 = vrot.slane %v779_v30, 4  ;;  %7319 = vmatprep.mubr.bf16.mxu1 %v6265_v35  ;;  %v795_v57 = vsel %vm8237_vm2, %v790_v46, %v794_v37  ;;  %v667_v35 = vld [vmem:[%s8214_s22 + $0x48] sm:$0xf]  ;;  %v8049_v36 = vld [vmem:[%s9377_s1 + $0xb0] sm:$0xff]   ;;  %v3525_v40 = vrot.slane %v6543_v20, 5 }
  0x6a   : > { %7524 = vmatmul.mubr.bf16.gmra.mrb[16].mxu0 %v6592_v56  ;;  %v6541_v56 = vld [vmem:[%s8214_s22 + $0xa4] sm:$0x1]  ;;  %v804_v10 = vrot.slane %v803_v1, 4  ;;  %v826_v23 = vrot.slane %v824_v13, 5  ;;  %v3528_v44 = vrot.slane %v6544_v24, 5  ;;  %v845_v45 = vshrl.u32 %v667_v35, 16 }
  0x6b   : > { %7527 = vmatprep.mubr.bf16.mxu0 %v6593_v29  ;;  %v3512_v48 = vsel %vm8337_vm5, %v6562_v31, %v3511_v38  ;;  %v3513_v49 = vrot.slane %v3511_v38, 4  ;;  %v785_v52 = vsel %vm8237_vm2, %v780_v41, %v784_v22  ;;  %v3521_v9 = vrot.slane %v6541_v56, 5  ;;  %v668_v41 = vld [vmem:[%s8214_s22 + $0x4c] sm:$0xf]  ;;  %v6546_v53 = vld [vmem:[%s8214_s22 + $0xb8] sm:$0xf] }
  0x6c   : > { %7350 = vmatpush3.bf16.msra.mxu1 %v8034_v2  ;;  %v6266_v63 = vcombine.low %v785_v52, %v795_v57  ;;  %v812_v2 = vrot.slane %v810_v55, 4  ;;  %v809_v21 = vsel %vm8237_vm2, %v804_v10, %v808_v59  ;;  %v840_v29 = vshll.u32 %v666_v3, 16 }
  0x6d   : > { %7351 = vmatprep.subr.bf16.mxu1 %v8036_v12  ;;  %v3515_v58 = vsel %vm8337_vm5, %v3513_v49, %v3514_v42  ;;  %v3522_v26 = vsel %vm8337_vm5, %v3520_v16, %v3521_v9  ;;  %v837_v38 = vor.u32 %v836_v28, %v832_v27  ;;  %v669_v42 = vld [vmem:[%s8214_s22 + $0x50] sm:$0x1]  ;;  %v848_v46 = vshll.u32 %v667_v35, 16  ;;  %v6548_v16 = vld [vmem:[%s8214_s22 + $0xc0] sm:$0xe] }
  0x6e   : > { %v6594_v0 = vcombine.low %v3512_v48, %v3515_v58  ;;  %v813_v11 = vor.u32 %v812_v2, %v808_v59  ;;  %v6595_v31 = vcombine.low %v3519_v15, %v3522_v26  ;;  %v842_v39 = vrot.slane %v840_v29, 5  ;;  %v6545_v48 = vld [vmem:[%s8214_s22 + $0xb4] sm:$0xe]  ;;  %v6547_v58 = vld [vmem:[%s8214_s22 + $0xbc] sm:$0x1] }
  0x6f   : > { %7320 = vmatmul.mubr.bf16.gmra.mrb[4].mxu1 %v6266_v63  ;;  %v838_v49 = vrot.slane %v837_v38, 4  ;;  %v3527_v51 = vrot.slane %v3525_v40, 4  ;;  %v854_v52 = vshll.u32 %v668_v41, 16  ;;  %v847_v55 = vrot.slane %v845_v45, 4  ;;  %v670_v63 = vld [vmem:[%s8214_s22 + $0x54] sm:$0xf] }
  0x70   : > { %7352 = vmatpush3.bf16.msra.mxu1 %v8036_v12  ;;  %v821_v12 = vshrl.u32 %v664_v61, 16  ;;  %v814_v22 = vrot.slane %v813_v11, 4  ;;  %v850_v56 = vrot.slane %v848_v46, 5  ;;  %v858_v57 = vshrl.u32 %v668_v41, 16  ;;  %v6550_v26 = vld [vmem:[%s8214_s22 + $0xc8] sm:$0x1] }
  0x71   : > { %7353 = vmatprep.subr.bf16.mxu1 %v8038_v34  ;;  %v843_v59 = vsel %vm8237_vm2, %v838_v49, %v842_v39  ;;  %v3529_v60 = vsel %vm8337_vm5, %v3527_v51, %v3528_v44  ;;  %v856_v61 = vrot.slane %v854_v52, 5  ;;  %v864_v62 = vshll.u32 %v669_v42, 16  ;;  %v674_v42 = vld [vmem:[%s8214_s22 + $0x64] sm:$0xf] }
  0x72   : > { %7528 = vmatmul.mubr.bf16.gmra.mrb[20].mxu0 %v6594_v0  ;;  %v823_v47 = vrot.slane %v821_v12, 4  ;;  %v819_v30 = vsel %vm8237_vm2, %v814_v22, %v818_v6  ;;  %v671_v0 = vld [vmem:[%s8214_s22 + $0x58] sm:$0xf]  ;;  %v851_v3 = vor.u32 %v850_v56, %v847_v55  ;;  %v672_v6 = vld [vmem:[%s8214_s22 + $0x5c] sm:$0x1]  ;;  %v6565_v9 = vrot.slane %v6545_v48, 9 }
  0x73   : > { %v6267_v37 = vcombine.low %v809_v21, %v819_v30  ;;  %7531 = vmatprep.mubr.bf16.mxu0 %v6595_v31  ;;  %v866_v8 = vrot.slane %v864_v62, 5  ;;  %v3532_v10 = vrot.slane %v6546_v53, 5  ;;  %v3535_v11 = vrot.slane %v6547_v58, 5  ;;  %v6549_v22 = vld [vmem:[%s8214_s22 + $0xc4] sm:$0xf] }
  0x74   : > { %7354 = vmatpush3.bf16.msra.mxu1 %v8038_v34  ;;  %v827_v32 = vor.u32 %v826_v23, %v823_v47  ;;  %v6564_v34 = vrot.slane %v6542_v14, 9  ;;  %v852_v12 = vrot.slane %v851_v3, 4  ;;  %v869_v14 = vshrl.u32 %v670_v63, 16  ;;  %v676_v58 = vld [vmem:[%s8214_s22 + $0x6c] sm:$0xf] }
  0x75   : > { %7355 = vmatprep.subr.bf16.mxu1 %v8041_v5  ;;  %7323 = vmatprep.mubr.bf16.mxu1 %v6267_v37  ;;  %v872_v15 = vshll.u32 %v670_v63, 16  ;;  %v3533_v17 = vsel %vm8337_vm5, %v6565_v9, %v3532_v10  ;;  %v3534_v19 = vrot.slane %v3532_v10, 4  ;;  %v878_v20 = vshll.u32 %v671_v0, 16  ;;  %v673_v37 = vld [vmem:[%s8214_s22 + $0x60] sm:$0xf] }
  0x76   : > { %v828_v43 = vrot.slane %v827_v32, 4  ;;  %v3526_v50 = vsel %vm8337_vm5, %v6564_v34, %v3525_v40  ;;  %v882_v21 = vshrl.u32 %v671_v0, 16  ;;  %v857_v47 = vsel %vm8237_vm2, %v852_v12, %v856_v61  ;;  %v677_v63 = vld [vmem:[%s8214_s22 + $0x70] sm:$0xf]  ;;  %v678_v0 = vld [vmem:[%s8214_s22 + $0x74] sm:$0x1] }
  0x77   : > { %v6596_v2 = vcombine.low %v3526_v50, %v3529_v60  ;;  %v871_v24 = vrot.slane %v869_v14, 4  ;;  %v3536_v28 = vsel %vm8337_vm5, %v3534_v19, %v3535_v11  ;;  %v880_v29 = vrot.slane %v878_v20, 5 }
  0x78   : > { %7356 = vmatpush3.bf16.msra.mxu1 %v8041_v5  ;;  %v833_v54 = vsel %vm8237_vm2, %v828_v43, %v832_v27  ;;  %v860_v5 = vrot.slane %v858_v57, 4  ;;  %v8583_v27 = vld [vmem:[%s9377_s1 + $0xc0] sm:$0xff]   ;;  %v884_v30 = vrot.slane %v882_v21, 4  ;;  %v888_v31 = vshll.u32 %v672_v6, 16  ;;  %v675_v43 = vld [vmem:[%s8214_s22 + $0x68] sm:$0x1] }
  0x79   : > { %7357 = vmatprep.subr.bf16.mxu1 %v8045_v25  ;;  %v6268_v1 = vcombine.low %v833_v54, %v843_v59  ;;  %v6597_v34 = vcombine.low %v3533_v17, %v3536_v28  ;;  %v3539_v41 = vrot.slane %v6549_v22, 5  ;;  %v3542_v45 = vrot.slane %v6550_v26, 5  ;;  %v8040_v57 = vld [vmem:[%s8214_s22 + $0x18] sm:$0xff]   ;;  %v8042_v22 = vld [vmem:[%s8214_s22 + $0x24] sm:$0xff]   ;;  %v8044_v26 = vld [vmem:[%s8214_s22 + $0x30] sm:$0xff]  }
  0x7a   : > { %7532 = vmatmul.mubr.bf16.gmra.mrb[24].mxu0 %v6596_v2  ;;  %v861_v13 = vor.u32 %v860_v5, %v856_v61  ;;  %v885_v39 = vor.u32 %v884_v30, %v880_v29  ;;  %v890_v40 = vrot.slane %v888_v31, 5  ;;  %v893_v46 = vshrl.u32 %v673_v37, 16 }
  0x7b   : > { %7324 = vmatmul.mubr.bf16.gmra.mrb[8].mxu1 %v6268_v1  ;;  %7535 = vmatprep.mubr.bf16.mxu0 %v6597_v34  ;;  %v896_v48 = vshll.u32 %v673_v37, 16  ;;  %v3541_v51 = vrot.slane %v3539_v41, 4  ;;  %v902_v52 = vshll.u32 %v674_v42, 16  ;;  %v906_v56 = vshrl.u32 %v674_v42, 16  ;;  %v682_v37 = vld [vmem:[%s8214_s22 + $0x84] sm:$0xf] }
  0x7c   : > { %7358 = vmatpush3.bf16.msra.mxu1 %v8045_v25  ;;  %v862_v23 = vrot.slane %v861_v13, 4  ;;  %v874_v25 = vrot.slane %v872_v15, 5  ;;  %v886_v49 = vrot.slane %v885_v39, 4  ;;  %v895_v54 = vrot.slane %v893_v46, 4 }
  0x7d   : > { %7359 = vmatprep.subr.bf16.mxu1 %v8049_v36  ;;  %v898_v55 = vrot.slane %v896_v48, 5  ;;  %v3543_v60 = vsel %vm8337_vm5, %v3541_v51, %v3542_v45  ;;  %v904_v61 = vrot.slane %v902_v52, 5  ;;  %v912_v62 = vshll.u32 %v675_v43, 16  ;;  %v683_v43 = vld [vmem:[%s8214_s22 + $0x88] sm:$0xf] }
  0x7e   : > { %v867_v32 = vsel %vm8237_vm2, %v862_v23, %v866_v8  ;;  %v875_v35 = vor.u32 %v874_v25, %v871_v24  ;;  %v891_v59 = vsel %vm8237_vm2, %v886_v49, %v890_v40  ;;  %v908_v5 = vrot.slane %v906_v56, 4  ;;  %v679_v23 = vld [vmem:[%s8214_s22 + $0x78] sm:$0xf]  ;;  %v680_v24 = vld [vmem:[%s8214_s22 + $0x7c] sm:$0xf] }
  0x7f   : > { %v6269_v38 = vcombine.low %v857_v47, %v867_v32  ;;  %v899_v3 = vor.u32 %v898_v55, %v895_v54  ;;  %v914_v6 = vrot.slane %v912_v62, 5  ;;  %v920_v8 = vshll.u32 %v676_v58, 16  ;;  %v681_v25 = vld [vmem:[%s8214_s22 + $0x80] sm:$0x1]  ;;  %v684_v48 = vld [vmem:[%s8214_s22 + $0x8c] sm:$0x1] }
  0x80   : > { %7360 = vmatpush3.bf16.msra.mxu1 %v8049_v36  ;;  %v6566_v36 = vrot.slane %v6548_v16, 9  ;;  %v876_v44 = vrot.slane %v875_v35, 4  ;;  %v926_v9 = vshll.u32 %v677_v63, 16  ;;  %v909_v11 = vor.u32 %v908_v5, %v904_v61  ;;  %v8051_v54 = vld [vmem:[%s9377_s1 + $0x1d0] sm:$0xff]  }
  0x81   : > { %7361 = vmatprep.subr.bf16.mxu1 %v8053_v7  ;;  %7327 = vmatprep.mubr.bf16.mxu1 %v6269_v38  ;;  %v900_v10 = vrot.slane %v899_v3, 4  ;;  %v930_v12 = vshrl.u32 %v677_v63, 16  ;;  %v936_v13 = vshll.u32 %v678_v0, 16  ;;  %v922_v15 = vrot.slane %v920_v8, 5  ;;  %v8047_v38 = vld [vmem:[%s9377_s1 + $0x1c8] sm:$0xff]   ;;  %v8046_v63 = vld [vmem:[%s8214_s22 + $0x3c] sm:$0xff]  }
  0x82   : > { %v3540_v50 = vsel %vm8337_vm5, %v6566_v36, %v3539_v41  ;;  %v881_v53 = vsel %vm8237_vm2, %v876_v44, %v880_v29  ;;  %v928_v16 = vrot.slane %v926_v9, 5  ;;  %v910_v19 = vrot.slane %v909_v11, 4  ;;  %v8048_v3 = vld [vmem:[%s8214_s22 + $0x48] sm:$0xff]   ;;  %v686_v8 = vld [vmem:[%s8214_s22 + $0x94] sm:$0xf] }
  0x83   : > { %v6270_v1 = vcombine.low %v881_v53, %v891_v59  ;;  %v6598_v2 = vcombine.low %v3540_v50, %v3543_v60  ;;  %v905_v17 = vsel %vm8237_vm2, %v900_v10, %v904_v61  ;;  %v932_v20 = vrot.slane %v930_v12, 4  ;;  %v687_v9 = vld [vmem:[%s8214_s22 + $0x98] sm:$0x1] }
  0x84   : > { %7362 = vmatpush3.bf16.msra.mxu1 %v8053_v7  ;;  %v917_v7 = vshrl.u32 %v676_v58, 16  ;;  %v938_v21 = vrot.slane %v936_v13, 5  ;;  %v915_v28 = vsel %vm8237_vm2, %v910_v19, %v914_v6  ;;  %v941_v30 = vshrl.u32 %v679_v23, 16 }
  0x85   : > { %7395 = vmatprep.subr.bf16.mxu1 %v8583_v27  ;;  %7328 = vmatmul.mubr.bf16.gmra.mrb[12].mxu1 %v6270_v1  ;;  %v933_v29 = vor.u32 %v932_v20, %v928_v16  ;;  %v944_v31 = vshll.u32 %v679_v23, 16  ;;  %v6271_v32 = vcombine.low %v905_v17, %v915_v28  ;;  %v950_v35 = vshll.u32 %v680_v24, 16  ;;  %v688_v20 = vld [vmem:[%s8214_s22 + $0x9c] sm:$0xf] }
  0x86   : > { %7536 = vmatmul.mubr.bf16.gmra.mrb[28].mxu0 %v6598_v2  ;;  %v919_v14 = vrot.slane %v917_v7, 4  ;;  %v954_v36 = vshrl.u32 %v680_v24, 16  ;;  %v943_v40 = vrot.slane %v941_v30, 4  ;;  %v960_v42 = vshll.u32 %v681_v25, 16  ;;  %v685_v2 = vld [vmem:[%s8214_s22 + $0x90] sm:$0xf] }
  0x87   : > { %7555 = vmatprep.mubr.bf16.mxu0 %v8040_v57  ;;  %v934_v39 = vrot.slane %v933_v29, 4  ;;  %v946_v41 = vrot.slane %v944_v31, 5  ;;  %7331 = vmatprep.mubr.bf16.mxu1 %v6271_v32  ;;  %v952_v45 = vrot.slane %v950_v35, 5  ;;  %v965_v49 = vshrl.u32 %v682_v37, 16  ;;  %v689_v24 = vld [vmem:[%s8214_s22 + $0xa0] sm:$0xf] }
  0x88   : > { %v923_v47 = vor.u32 %v922_v15, %v919_v14  ;;  %v956_v46 = vrot.slane %v954_v36, 4  ;;  %v962_v52 = vrot.slane %v960_v42, 5  ;;  %v968_v53 = vshll.u32 %v682_v37, 16  ;;  %v8055_v14 = vld [vmem:[%s9377_s1 + $0x1d8] sm:$0xff]   ;;  %v690_v29 = vld [vmem:[%s8214_s22 + $0xa4] sm:$0x1] }
  0x89   : > { %v939_v50 = vsel %vm8237_vm2, %v934_v39, %v938_v21  ;;  %v947_v51 = vor.u32 %v946_v41, %v943_v40  ;;  %v967_v57 = vrot.slane %v965_v49, 4  ;;  %v974_v58 = vshll.u32 %v683_v43, 16  ;;  %v8059_v36 = vld [vmem:[%s9377_s1 + $0x1e0] sm:$0xff]  }
  0x8a   : > { %v924_v34 = vrot.slane %v923_v47, 4  ;;  %v957_v56 = vor.u32 %v956_v46, %v952_v45  ;;  %v970_v60 = vrot.slane %v968_v53, 5  ;;  %v978_v61 = vshrl.u32 %v683_v43, 16  ;;  %v691_v53 = vld [vmem:[%s8214_s22 + $0xa8] sm:$0xf] }
  0x8b   : > { %v948_v59 = vrot.slane %v947_v51, 4  ;;  %v984_v62 = vshll.u32 %v684_v48, 16  ;;  %v976_v1 = vrot.slane %v974_v58, 5  ;;  %v989_v11 = vshrl.u32 %v685_v2, 16  ;;  %v693_v58 = vld [vmem:[%s8214_s22 + $0xb0] sm:$0x1] }
  0x8c   : > { %v929_v44 = vsel %vm8237_vm2, %v924_v34, %v928_v16  ;;  %v958_v0 = vrot.slane %v957_v56, 4  ;;  %v971_v5 = vor.u32 %v970_v60, %v967_v57  ;;  %v980_v6 = vrot.slane %v978_v61, 4 }
  0x8d   : > { %v6272_v55 = vcombine.low %v929_v44, %v939_v50  ;;  %v986_v7 = vrot.slane %v984_v62, 5  ;;  %v992_v12 = vshll.u32 %v685_v2, 16  ;;  %v998_v13 = vshll.u32 %v686_v8, 16  ;;  %v8052_v50 = vld [vmem:[%s8214_s22 + $0x60] sm:$0xff]  }
  0x8e   : > { %7556 = vmatmul.mubr.bf16.vlgmr.msra.gmra.mrb[0].mxu0 %v8042_v22  ;;  %v963_v10 = vsel %vm8237_vm2, %v958_v0, %v962_v52  ;;  %v972_v16 = vrot.slane %v971_v5, 4  ;;  %v981_v17 = vor.u32 %v980_v6, %v976_v1  ;;  %v1002_v19 = vshrl.u32 %v686_v8, 16  ;;  %v8063_v0 = vld [vmem:[%s9377_s1 + $0x1e8] sm:$0xff]   ;;  %v694_v5 = vld [vmem:[%s8214_s22 + $0xb4] sm:$0xf] }
  0x8f   : > { %7588 = vmatpush3.bf16.msra.mxu0 %v8502_v18  ;;  %7559 = vmatprep.mubr.bf16.mxu0 %v8044_v26  ;;  %v953_v18 = vsel %vm8237_vm2, %v948_v59, %v952_v45  ;;  %v991_v21 = vrot.slane %v989_v11, 4  ;;  %v994_v22 = vrot.slane %v992_v12, 5  ;;  %v1000_v47 = vrot.slane %v998_v13, 5  ;;  %v8050_v45 = vld [vmem:[%s8214_s22 + $0x54] sm:$0xff]  }
  0x90   : > { %7589 = vmatprep.subr.bf16.mxu0 %v8047_v38  ;;  %7332 = vmatmul.mubr.bf16.gmra.mrb[16].mxu1 %v6272_v55  ;;  %v6273_v15 = vcombine.low %v953_v18, %v963_v10  ;;  %v1008_v23 = vshll.u32 %v687_v9, 16  ;;  %v977_v25 = vsel %vm8237_vm2, %v972_v16, %v976_v1  ;;  %v982_v26 = vrot.slane %v981_v17, 4  ;;  %v695_v9 = vld [vmem:[%s8214_s22 + $0xb8] sm:$0xf]  ;;  %v696_v10 = vld [vmem:[%s8214_s22 + $0xbc] sm:$0x1] }
  0x91   : > { %v1004_v28 = vrot.slane %v1002_v19, 4  ;;  %v1013_v30 = vshrl.u32 %v688_v20, 16  ;;  %v995_v31 = vor.u32 %v994_v22, %v991_v21  ;;  %v1016_v34 = vshll.u32 %v688_v20, 16 }
  0x92   : > { %7335 = vmatprep.mubr.bf16.mxu1 %v6273_v15  ;;  %v1010_v32 = vrot.slane %v1008_v23, 5  ;;  %v1022_v35 = vshll.u32 %v689_v24, 16  ;;  %v987_v37 = vsel %vm8237_vm2, %v982_v26, %v986_v7  ;;  %v1026_v40 = vshrl.u32 %v689_v24, 16  ;;  %v8067_v15 = vld [vmem:[%s9377_s1 + $0x1f0] sm:$0xff]  }
  0x93   : > { %7590 = vmatpush3.bf16.msra.mxu0 %v8047_v38  ;;  %v1005_v38 = vor.u32 %v1004_v28, %v1000_v47  ;;  %v1015_v39 = vrot.slane %v1013_v30, 4  ;;  %v6274_v41 = vcombine.low %v977_v25, %v987_v37  ;;  %v996_v42 = vrot.slane %v995_v31, 4  ;;  %v8054_v24 = vld [vmem:[%s8214_s22 + $0x6c] sm:$0xff]   ;;  %v1470_v37 = vld [vmem:[%s8214_s22] sm:$0xe] }
  0x94   : > { %7591 = vmatprep.subr.bf16.mxu0 %v8051_v54  ;;  %v1018_v43 = vrot.slane %v1016_v34, 5  ;;  %v1024_v44 = vrot.slane %v1022_v35, 5  ;;  %v1028_v48 = vrot.slane %v1026_v40, 4  ;;  %v1032_v49 = vshll.u32 %v690_v29, 16  ;;  %v8056_v29 = vld [vmem:[%s8214_s22 + $0x78] sm:$0xff]  }
  0x95   : > { %v1006_v46 = vrot.slane %v1005_v38, 4  ;;  %v1001_v51 = vsel %vm8237_vm2, %v996_v42, %v1000_v47  ;;  %v1037_v59 = vshrl.u32 %v691_v53, 16  ;;  %v1040_v62 = vshll.u32 %v691_v53, 16  ;;  %v8071_v34 = vld [vmem:[%s9377_s1 + $0x1f8] sm:$0xff]   ;;  %v1471_v38 = vld [vmem:[%s8214_s22 + $0x4] sm:$0xf] }
  0x96   : > { %7560 = vmatmul.mubr.bf16.gmra.mrb[4].mxu0 %v8046_v63  ;;  %v1019_v52 = vor.u32 %v1018_v43, %v1015_v39  ;;  %v1029_v56 = vor.u32 %v1028_v48, %v1024_v44  ;;  %v1034_v57 = vrot.slane %v1032_v49, 5  ;;  %v1056_v18 = vshll.u32 %v693_v58, 16  ;;  %v1472_v39 = vld [vmem:[%s8214_s22 + $0x8] sm:$0x1]  ;;  %v1473_v48 = vld [vmem:[%s8214_s22 + $0xc] sm:$0xe] }
  0x97   : > { %7563 = vmatprep.mubr.bf16.mxu0 %v8048_v3  ;;  %7592 = vmatpush3.bf16.msra.mxu0 %v8051_v54  ;;  %v692_v54 = vld [vmem:[%s8214_s22 + $0xac] sm:$0xf]  ;;  %v1011_v55 = vsel %vm8237_vm2, %v1006_v46, %v1010_v32  ;;  %v1039_v2 = vrot.slane %v1037_v59, 4  ;;  %v1042_v7 = vrot.slane %v1040_v62, 5  ;;  %v1064_v19 = vshll.u32 %v694_v5, 16 }
  0x98   : > { %7593 = vmatprep.subr.bf16.mxu0 %v8055_v14  ;;  %7336 = vmatmul.mubr.bf16.gmra.mrb[20].mxu1 %v6274_v41  ;;  %v6275_v60 = vcombine.low %v1001_v51, %v1011_v55  ;;  %v1020_v61 = vrot.slane %v1019_v52, 4  ;;  %v1046_v63 = vshll.u32 %v692_v54, 16  ;;  %v1030_v1 = vrot.slane %v1029_v56, 4  ;;  %v1474_v49 = vld [vmem:[%s8214_s22 + $0x10] sm:$0xf]  ;;  %v8058_v55 = vld [vmem:[%s8214_s22 + $0x84] sm:$0xff]  }
  0x99   : > { %v1050_v3 = vshrl.u32 %v692_v54, 16  ;;  %v1058_v13 = vrot.slane %v1056_v18, 5  ;;  %v1043_v17 = vor.u32 %v1042_v7, %v1039_v2  ;;  %v1070_v20 = vshll.u32 %v695_v9, 16  ;;  %v1475_v53 = vld [vmem:[%s8214_s22 + $0x14] sm:$0x1]  ;;  %v8693_v56 = vld [vmem:[%s9377_s1 + $0x200] sm:$0xff]  }
  0x9a   : > { %7339 = vmatprep.mubr.bf16.mxu1 %v6275_v60  ;;  %v1025_v6 = vsel %vm8237_vm2, %v1020_v61, %v1024_v44  ;;  %v1048_v8 = vrot.slane %v1046_v63, 5  ;;  %v1035_v11 = vsel %vm8237_vm2, %v1030_v1, %v1034_v57  ;;  %v1074_v47 = vshrl.u32 %v695_v9, 16  ;;  %v1476_v1 = vld [vmem:[%s8214_s22 + $0x18] sm:$0xe]  ;;  %v8060_v2 = vld [vmem:[%s8214_s22 + $0x90] sm:$0xff]  }
  0x9b   : > { %7594 = vmatpush3.bf16.msra.mxu0 %v8055_v14  ;;  %v1052_v12 = vrot.slane %v1050_v3, 4  ;;  %v1061_v14 = vshrl.u32 %v694_v5, 16  ;;  %v6276_v16 = vcombine.low %v1025_v6, %v1035_v11  ;;  %v1080_v23 = vshll.u32 %v696_v10, 16  ;;  %v1477_v3 = vld [vmem:[%s8214_s22 + $0x1c] sm:$0xf] }
  0x9c   : > { %7595 = vmatprep.subr.bf16.mxu0 %v8059_v36  ;;  %v1044_v25 = vrot.slane %v1043_v17, 4  ;;  %v1066_v26 = vrot.slane %v1064_v19, 5  ;;  %v1072_v28 = vrot.slane %v1070_v20, 5  ;;  %v1076_v31 = vrot.slane %v1074_v47, 4  ;;  %v1478_v18 = vld [vmem:[%s8214_s22 + $0x20] sm:$0x1] }
  0x9d   : > { %v1053_v21 = vor.u32 %v1052_v12, %v1048_v8  ;;  %v1063_v22 = vrot.slane %v1061_v14, 4  ;;  %v1082_v32 = vrot.slane %v1080_v23, 5  ;;  %v6287_v42 = vrot.slane %v1470_v37, 9  ;;  %v1479_v10 = vld [vmem:[%s8214_s22 + $0x24] sm:$0xe]  ;;  %v8062_v47 = vld [vmem:[%s8214_s22 + $0x9c] sm:$0xff]  }
  0x9e   : > { %7564 = vmatmul.mubr.bf16.gmra.mrb[8].mxu0 %v8050_v45  ;;  %v1049_v35 = vsel %vm8237_vm2, %v1044_v25, %v1048_v8  ;;  %v1077_v41 = vor.u32 %v1076_v31, %v1072_v28  ;;  %v1571_v43 = vrot.slane %v1471_v38, 5  ;;  %v1574_v46 = vrot.slane %v1472_v39, 5  ;;  %v1480_v11 = vld [vmem:[%s8214_s22 + $0x28] sm:$0xf]  ;;  %v1481_v12 = vld [vmem:[%s8214_s22 + $0x2c] sm:$0x1] }
  0x9f   : > { %7567 = vmatprep.mubr.bf16.mxu0 %v8052_v50  ;;  %7596 = vmatpush3.bf16.msra.mxu0 %v8059_v36  ;;  %v1054_v30 = vrot.slane %v1053_v21, 4  ;;  %v1067_v36 = vor.u32 %v1066_v26, %v1063_v22  ;;  %v6288_v54 = vrot.slane %v1473_v48, 9  ;;  %v1578_v58 = vrot.slane %v1474_v49, 5  ;;  %v8061_v22 = vld [vmem:[%s9377_s1 + $0xc8] sm:$0xff]   ;;  %v1483_v25 = vld [vmem:[%s8214_s22 + $0x34] sm:$0xf] }
  0xa0   : > { %7597 = vmatprep.subr.bf16.mxu0 %v8063_v0  ;;  %7340 = vmatmul.mubr.bf16.gmra.mrb[24].mxu1 %v6276_v16  ;;  %v1078_v50 = vrot.slane %v1077_v41, 4  ;;  %v1572_v51 = vsel %vm8337_vm5, %v6287_v42, %v1571_v43  ;;  %v1573_v52 = vrot.slane %v1571_v43, 4  ;;  %v1581_v59 = vrot.slane %v1475_v53, 5  ;;  %v1484_v26 = vld [vmem:[%s8214_s22 + $0x38] sm:$0x1]  ;;  %v8064_v31 = vld [vmem:[%s8214_s22 + $0xa8] sm:$0xff]  }
  0xa1   : > { %v1059_v40 = vsel %vm8237_vm2, %v1054_v30, %v1058_v13  ;;  %v1068_v45 = vrot.slane %v1067_v36, 4  ;;  %v6289_v5 = vrot.slane %v1476_v1, 9  ;;  %v1585_v6 = vrot.slane %v1477_v3, 5  ;;  %v1487_v36 = vld [vmem:[%s8214_s22 + $0x44] sm:$0x1]  ;;  %v8066_v48 = vld [vmem:[%s8214_s22 + $0xb4] sm:$0xff]  }
  0xa2   : > { %v6277_v44 = vcombine.low %v1049_v35, %v1059_v40  ;;  %v1083_v60 = vsel %vm8237_vm2, %v1078_v50, %v1082_v32  ;;  %v1575_v61 = vsel %vm8337_vm5, %v1573_v52, %v1574_v46  ;;  %v1588_v7 = vrot.slane %v1478_v18, 5  ;;  %v1485_v32 = vld [vmem:[%s8214_s22 + $0x3c] sm:$0xe]  ;;  %v1486_v35 = vld [vmem:[%s8214_s22 + $0x40] sm:$0xf]  ;;  %v8065_v40 = vld [vmem:[%s9377_s1 + $0xd0] sm:$0xff]  }
  0xa3   : > { %7598 = vmatpush3.bf16.msra.mxu0 %v8063_v0  ;;  %v1073_v57 = vsel %vm8237_vm2, %v1068_v45, %v1072_v28  ;;  %v6319_v63 = vcombine.low %v1572_v51, %v1575_v61  ;;  %v1580_v0 = vrot.slane %v1578_v58, 4  ;;  %v1579_v8 = vsel %vm8337_vm5, %v6288_v54, %v1578_v58  ;;  %v1489_v49 = vld [vmem:[%s8214_s22 + $0x4c] sm:$0xf]  ;;  %v1490_v50 = vld [vmem:[%s8214_s22 + $0x50] sm:$0x1]  ;;  %v8069_v52 = vld [vmem:[%s9377_s1 + $0xd8] sm:$0xff]  }
  0xa4   : > { %7599 = vmatprep.subr.bf16.mxu0 %v8067_v15  ;;  %7343 = vmatprep.mubr.bf16.mxu1 %v6277_v44  ;;  %v6278_v62 = vcombine.low %v1073_v57, %v1083_v60  ;;  %v1586_v13 = vsel %vm8337_vm5, %v6289_v5, %v1585_v6  ;;  %v1587_v14 = vrot.slane %v1585_v6, 4  ;;  %v6290_v16 = vrot.slane %v1479_v10, 9  ;;  %v1488_v44 = vld [vmem:[%s8214_s22 + $0x48] sm:$0xe]  ;;  %v1491_v57 = vld [vmem:[%s8214_s22 + $0x54] sm:$0xe] }
  0xa5   : > { %v1582_v9 = vsel %vm8337_vm5, %v1580_v0, %v1581_v59  ;;  %v1595_v21 = vrot.slane %v1481_v12, 5  ;;  %v1602_v30 = vrot.slane %v1484_v26, 5  ;;  %v1606_v39 = vrot.slane %v1486_v35, 5  ;;  %v1492_v58 = vld [vmem:[%s8214_s22 + $0x58] sm:$0xf]  ;;  %v8068_v61 = vld [vmem:[%s8214_s22 + $0xc0] sm:$0xff]  }
  0xa6   : > { %7568 = vmatmul.mubr.bf16.gmra.mrb[12].mxu0 %v8054_v24  ;;  %v6320_v17 = vcombine.low %v1579_v8, %v1582_v9  ;;  %v1589_v19 = vsel %vm8337_vm5, %v1587_v14, %v1588_v7  ;;  %v1482_v24 = vld [vmem:[%s8214_s22 + $0x30] sm:$0xe]  ;;  %v6292_v42 = vrot.slane %v1485_v32, 9  ;;  %v1609_v43 = vrot.slane %v1487_v36, 5  ;;  %v1493_v59 = vld [vmem:[%s8214_s22 + $0x5c] sm:$0x1] }
  0xa7   : > { %7571 = vmatprep.mubr.bf16.mxu0 %v8056_v29  ;;  %7600 = vmatpush3.bf16.msra.mxu0 %v8067_v15  ;;  %v1592_v15 = vrot.slane %v1480_v11, 5  ;;  %v6321_v23 = vcombine.low %v1586_v13, %v1589_v19  ;;  %v6291_v28 = vrot.slane %v1482_v24, 9  ;;  %v1599_v29 = vrot.slane %v1483_v25, 5  ;;  %v8072_v6 = vld [vmem:[%s9377_s1 + $0xe0] sm:$0xff]   ;;  %v1496_v11 = vld [vmem:[%s8214_s22 + $0x68] sm:$0x1] }
  0xa8   : > { %7601 = vmatprep.subr.bf16.mxu0 %v8071_v34  ;;  %7344 = vmatmul.mubr.bf16.gmra.mrb[28].mxu1 %v6278_v62  ;;  %v1608_v46 = vrot.slane %v1606_v39, 4  ;;  %v6293_v51 = vrot.slane %v1488_v44, 9  ;;  %v1613_v54 = vrot.slane %v1489_v49, 5  ;;  %v6294_v62 = vrot.slane %v1491_v57, 9  ;;  %v1494_v7 = vld [vmem:[%s8214_s22 + $0x60] sm:$0xe] }
  0xa9   : > { %7363 = vmatprep.mubr.bf16.mxu1 %v6319_v63  ;;  %v1594_v20 = vrot.slane %v1592_v15, 4  ;;  %v1593_v37 = vsel %vm8337_vm5, %v6290_v16, %v1592_v15  ;;  %v1620_v63 = vrot.slane %v1492_v58, 5  ;;  %v1607_v0 = vsel %vm8337_vm5, %v6292_v42, %v1606_v39  ;;  %v1495_v8 = vld [vmem:[%s8214_s22 + $0x64] sm:$0xf]  ;;  %v6679_v13 = vld [vmem:[%s8214_s22 + $0x18] sm:$0xf] }
  0xaa   : > { %v1615_v60 = vrot.slane %v1613_v54, 4  ;;  %v1610_v1 = vsel %vm8337_vm5, %v1608_v46, %v1609_v43  ;;  %v1614_v3 = vsel %vm8337_vm5, %v6293_v51, %v1613_v54  ;;  %v1627_v12 = vrot.slane %v1495_v8, 5  ;;  %v8070_v16 = vld [vmem:[%s8214_s22 + $0xcc] sm:$0xff]   ;;  %v6680_v19 = vld [vmem:[%s8214_s22 + $0x1c] sm:$0xf] }
  0xab   : > { %7602 = vmatpush3.bf16.msra.mxu0 %v8071_v34  ;;  %v1601_v34 = vrot.slane %v1599_v29, 4  ;;  %v1596_v38 = vsel %vm8337_vm5, %v1594_v20, %v1595_v21  ;;  %v1622_v5 = vrot.slane %v1620_v63, 4  ;;  %v6324_v9 = vcombine.low %v1607_v0, %v1610_v1  ;;  %v6681_v20 = vld [vmem:[%s8214_s22 + $0x20] sm:$0x1]  ;;  %v1497_v26 = vld [vmem:[%s8214_s22 + $0x6c] sm:$0xe] }
  0xac   : > { %7635 = vmatprep.subr.bf16.mxu0 %v8693_v56  ;;  %v6322_v45 = vcombine.low %v1593_v37, %v1596_v38  ;;  %v8766_v10 = vsel %vm8337_vm5, %v6294_v62, %v1620_v63  ;;  %v4430_v21 = vshrl.u32 %v6679_v13, 16  ;;  %v4433_v24 = vshll.u32 %v6679_v13, 16  ;;  %v1499_v36 = vld [vmem:[%s8214_s22 + $0x74] sm:$0x1]  ;;  %v6682_v46 = vld [vmem:[%s8214_s22 + $0x24] sm:$0xf] }
  0xad   : > { %v1603_v41 = vsel %vm8337_vm5, %v1601_v34, %v1602_v30  ;;  %v4439_v25 = vshll.u32 %v6680_v19, 16  ;;  %v4449_v30 = vshll.u32 %v6681_v20, 16  ;;  %v6296_v32 = vrot.slane %v1497_v26, 9  ;;  %v6684_v51 = vld [vmem:[%s8214_s22 + $0x2c] sm:$0x1] }
  0xae   : > { %7572 = vmatmul.mubr.bf16.gmra.mrb[16].mxu0 %v8058_v55  ;;  %v1616_v55 = vrot.slane %v1490_v50, 5  ;;  %v4435_v34 = vrot.slane %v4433_v24, 5  ;;  %v6683_v50 = vld [vmem:[%s8214_s22 + $0x28] sm:$0xf]  ;;  %v1502_v8 = vld [vmem:[%s8214_s22 + $0x80] sm:$0x1] }
  0xaf   : > { %7575 = vmatprep.mubr.bf16.mxu0 %v8060_v2  ;;  %v1623_v2 = vrot.slane %v1493_v59, 5  ;;  %v4441_v35 = vrot.slane %v4439_v25, 5  ;;  %v4451_v44 = vrot.slane %v4449_v30, 5  ;;  %v4463_v57 = vshll.u32 %v6683_v50, 16  ;;  %v6687_v20 = vld [vmem:[%s8214_s22 + $0x38] sm:$0x1] }
  0xb0   : > { %7364 = vmatmul.mubr.bf16.vlgmr.msra.gmra.mrb[0].mxu1 %v6320_v17  ;;  %v1617_v18 = vsel %vm8337_vm5, %v1615_v60, %v1616_v55  ;;  %v6295_v17 = vrot.slane %v1494_v7, 9  ;;  %v4467_v58 = vshrl.u32 %v6683_v50, 16  ;;  %v1501_v7 = vld [vmem:[%s8214_s22 + $0x7c] sm:$0xf]  ;;  %v1503_v26 = vld [vmem:[%s8214_s22 + $0x84] sm:$0xe] }
  0xb1   : > { %7396 = vmatpush3.bf16.msra.mxu1 %v8583_v27  ;;  %7367 = vmatprep.mubr.bf16.mxu1 %v6321_v23  ;;  %v1600_v27 = vsel %vm8337_vm5, %v6291_v28, %v1599_v29  ;;  %v6325_v14 = vcombine.low %v1614_v3, %v1617_v18  ;;  %v8772_v15 = vsel %vm8337_vm5, %v1622_v5, %v1623_v2  ;;  %v1630_v23 = vrot.slane %v1496_v11, 5  ;;  %v1500_v3 = vld [vmem:[%s8214_s22 + $0x78] sm:$0xe] }
  0xb2   : > { %7397 = vmatprep.subr.bf16.mxu1 %v8061_v22  ;;  %v6323_v53 = vcombine.low %v1600_v27, %v1603_v41  ;;  %v4432_v28 = vrot.slane %v4430_v21, 4  ;;  %v4443_v29 = vshrl.u32 %v6680_v19, 16  ;;  %v6326_v38 = vcombine.low %v8766_v10, %v8772_v15  ;;  %v8076_v41 = vld [vmem:[%s9377_s1 + $0xf0] sm:$0xff]   ;;  %v8078_v10 = vld [vmem:[%s9377_s1 + $0xf8] sm:$0xff]  }
  0xb3   : > { %v1628_v39 = vsel %vm8337_vm5, %v6295_v17, %v1627_v12  ;;  %v1637_v27 = vrot.slane %v1499_v36, 5  ;;  %v4465_v0 = vrot.slane %v4463_v57, 5  ;;  %v4469_v1 = vrot.slane %v4467_v58, 4  ;;  %v6685_v15 = vld [vmem:[%s8214_s22 + $0x30] sm:$0xf] }
  0xb4   : > { %v4436_v43 = vor.u32 %v4435_v34, %v4432_v28  ;;  %v4473_v2 = vshll.u32 %v6684_v51, 16  ;;  %v1644_v19 = vrot.slane %v1502_v8, 5  ;;  %v4478_v21 = vshrl.u32 %v6685_v15, 16 }
  0xb5   : > { %7398 = vmatpush3.bf16.msra.mxu1 %v8061_v22  ;;  %v8074_v22 = vld [vmem:[%s9377_s1 + $0xe8] sm:$0xff]  }
  0xb6   : > { %7576 = vmatmul.mubr.bf16.gmra.mrb[20].mxu0 %v8062_v47  ;;  %7399 = vmatprep.subr.bf16.mxu1 %v8065_v40  ;;  %v1629_v47 = vrot.slane %v1627_v12, 4  ;;  %v4437_v54 = vrot.slane %v4436_v43, 4  ;;  %v4470_v12 = vor.u32 %v4469_v1, %v4465_v0  ;;  %v4475_v13 = vrot.slane %v4473_v2, 5  ;;  %v6688_v43 = vld [vmem:[%s8214_s22 + $0x3c] sm:$0xf] }
  0xb7   : > { %7579 = vmatprep.mubr.bf16.mxu0 %v8064_v31  ;;  %v1498_v31 = vld [vmem:[%s8214_s22 + $0x70] sm:$0xf] }
  0xb8   : > { %7368 = vmatmul.mubr.bf16.gmra.mrb[4].mxu1 %v6322_v45  ;;  %v1634_v37 = vrot.slane %v1498_v31, 5  ;;  %v1631_v42 = vsel %vm8337_vm5, %v1629_v47, %v1630_v23  ;;  %v4442_v63 = vsel %vm8237_vm2, %v4437_v54, %v4441_v35  ;;  %v4471_v47 = vrot.slane %v4470_v12, 4  ;;  %v8079_v12 = vld [vmem:[%s9377_s1 + $0x218] sm:$0xff]  }
  0xb9   : > { %7371 = vmatprep.mubr.bf16.mxu1 %v6323_v53  ;;  %7400 = vmatpush3.bf16.msra.mxu1 %v8065_v40  ;;  %v4445_v40 = vrot.slane %v4443_v29, 4  ;;  %v4457_v53 = vshll.u32 %v6682_v46, 16  ;;  %v6327_v59 = vcombine.low %v1628_v39, %v1631_v42  ;;  %v4480_v29 = vrot.slane %v4478_v21, 4 }
  0xba   : > { %7401 = vmatprep.subr.bf16.mxu1 %v8069_v52  ;;  %v1636_v45 = vrot.slane %v1634_v37, 4  ;;  %v8795_v49 = vsel %vm8337_vm5, %v6296_v32, %v1634_v37  ;;  %v1504_v32 = vld [vmem:[%s8214_s22 + $0x88] sm:$0xf]  ;;  %v4476_v34 = vsel %vm8237_vm2, %v4471_v47, %v4475_v13  ;;  %v4497_v37 = vshll.u32 %v6687_v20, 16 }
  0xbb   : > { %v4459_v62 = vrot.slane %v4457_v53, 5  ;;  %v4502_v53 = vshrl.u32 %v6688_v43, 16  ;;  %v4505_v54 = vshll.u32 %v6688_v43, 16 }
  0xbc   : > { %v8801_v55 = vsel %vm8337_vm5, %v1636_v45, %v1637_v27  ;;  %v6298_v45 = vrot.slane %v1503_v26, 9 }
  0xbd   : > { %7402 = vmatpush3.bf16.msra.mxu1 %v8069_v52  ;;  %v4454_v52 = vshrl.u32 %v6682_v46, 16  ;;  %v6328_v5 = vcombine.low %v8795_v49, %v8801_v55  ;;  %v1648_v46 = vrot.slane %v1504_v32, 5  ;;  %v6689_v49 = vld [vmem:[%s8214_s22 + $0x40] sm:$0xf] }
  0xbe   : > { %7580 = vmatmul.mubr.bf16.gmra.mrb[24].mxu0 %v8066_v48  ;;  %7403 = vmatprep.subr.bf16.mxu1 %v8072_v6  ;;  %v4446_v48 = vor.u32 %v4445_v40, %v4441_v35  ;;  %v4511_v58 = vshll.u32 %v6689_v49, 16 }
  0xbf   : > { %7583 = vmatprep.mubr.bf16.mxu0 %v8068_v61  ;;  %v4456_v61 = vrot.slane %v4454_v52, 4  ;;  %v6690_v52 = vld [vmem:[%s8214_s22 + $0x44] sm:$0x1]  ;;  %v1649_v55 = vsel %vm8337_vm5, %v6298_v45, %v1648_v46  ;;  %v1650_v57 = vrot.slane %v1648_v46, 4 }
  0xc0   : > { %7372 = vmatmul.mubr.bf16.gmra.mrb[8].mxu1 %v6324_v9  ;;  %v4447_v60 = vrot.slane %v4446_v48, 4  ;;  %v6297_v9 = vrot.slane %v1500_v3, 9  ;;  %v4513_v2 = vrot.slane %v4511_v58, 5  ;;  %v8082_v45 = vld [vmem:[%s9377_s1 + $0x220] sm:$0xff]  }
  0xc1   : > { %7375 = vmatprep.mubr.bf16.mxu1 %v6325_v14  ;;  %7404 = vmatpush3.bf16.msra.mxu1 %v8072_v6  ;;  %v4460_v6 = vor.u32 %v4459_v62, %v4456_v61  ;;  %v1641_v14 = vrot.slane %v1501_v7, 5  ;;  %v4504_v62 = vrot.slane %v4502_v53, 4 }
  0xc2   : > { %7405 = vmatprep.subr.bf16.mxu1 %v8074_v22  ;;  %v4452_v18 = vsel %vm8237_vm2, %v4447_v60, %v4451_v44  ;;  %v4499_v44 = vrot.slane %v4497_v37, 5  ;;  %v8841_v60 = vld [vmem:[%s9377_s1 + $0x100] sm:$0xff]  }
  0xc3   : > { %v6743_v11 = vcombine.low %v4442_v63, %v4452_v18  ;;  %v4461_v17 = vrot.slane %v4460_v6, 4  ;;  %v1642_v23 = vsel %vm8337_vm5, %v6297_v9, %v1641_v14  ;;  %v1643_v24 = vrot.slane %v1641_v14, 4  ;;  %v1507_v9 = vld [vmem:[%s8214_s22 + $0x94] sm:$0xf] }
  0xc4   : > { %v4507_v63 = vrot.slane %v4505_v54, 5  ;;  %v4521_v18 = vshll.u32 %v6690_v52, 16  ;;  %v6696_v54 = vld [vmem:[%s8214_s22 + $0x5c] sm:$0x1] }
  0xc5   : > { %7406 = vmatpush3.bf16.msra.mxu1 %v8074_v22  ;;  %v4481_v22 = vshll.u32 %v6685_v15, 16  ;;  %v4466_v28 = vsel %vm8237_vm2, %v4461_v17, %v4465_v0  ;;  %v1645_v35 = vsel %vm8337_vm5, %v1643_v24, %v1644_v19  ;;  %v8077_v0 = vld [vmem:[%s9377_s1 + $0x210] sm:$0xff]   ;;  %v6691_v17 = vld [vmem:[%s8214_s22 + $0x48] sm:$0xf]  ;;  %v6692_v19 = vld [vmem:[%s8214_s22 + $0x4c] sm:$0xf] }
  0xc6   : > { %7584 = vmatmul.mubr.bf16.gmra.mrb[28].mxu0 %v8070_v16  ;;  %7407 = vmatprep.subr.bf16.mxu1 %v8076_v41  ;;  %v6686_v16 = vld [vmem:[%s8214_s22 + $0x34] sm:$0xf]  ;;  %v6744_v39 = vcombine.low %v4466_v28, %v4476_v34  ;;  %v6329_v40 = vcombine.low %v1642_v23, %v1645_v35  ;;  %v4508_v8 = vor.u32 %v4507_v63, %v4504_v62  ;;  %v4523_v15 = vrot.slane %v4521_v18, 5  ;;  %v1510_v35 = vld [vmem:[%s8214_s22 + $0xa0] sm:$0xf] }
  0xc7   : > { %7603 = vmatprep.mubr.bf16.mxu0 %v6743_v11  ;;  %v4487_v25 = vshll.u32 %v6686_v16, 16  ;;  %v4483_v30 = vrot.slane %v4481_v22, 5  ;;  %v4491_v31 = vshrl.u32 %v6686_v16, 16  ;;  %v1655_v16 = vrot.slane %v1507_v9, 5  ;;  %v6693_v22 = vld [vmem:[%s8214_s22 + $0x50] sm:$0x1] }
  0xc8   : > { %7376 = vmatmul.mubr.bf16.gmra.mrb[12].mxu1 %v6326_v38  ;;  %v1505_v38 = vld [vmem:[%s8214_s22 + $0x8c] sm:$0x1]  ;;  %v4509_v20 = vrot.slane %v4508_v8, 4  ;;  %v4526_v47 = vshrl.u32 %v6691_v17, 16  ;;  %v4529_v23 = vshll.u32 %v6691_v17, 16  ;;  %v4535_v28 = vshll.u32 %v6692_v19, 16 }
  0xc9   : > { %7379 = vmatprep.mubr.bf16.mxu1 %v6327_v59  ;;  %7408 = vmatpush3.bf16.msra.mxu1 %v8076_v41  ;;  %v4489_v36 = vrot.slane %v4487_v25, 5  ;;  %v4484_v27 = vor.u32 %v4483_v30, %v4480_v29  ;;  %v4493_v42 = vrot.slane %v4491_v31, 4  ;;  %v8075_v41 = vld [vmem:[%s9377_s1 + $0x208] sm:$0xff]   ;;  %v1651_v48 = vrot.slane %v1505_v38, 5  ;;  %v1509_v29 = vld [vmem:[%s8214_s22 + $0x9c] sm:$0xe] }
  0xca   : > { %7409 = vmatprep.subr.bf16.mxu1 %v8078_v10  ;;  %v4515_v59 = vshrl.u32 %v6689_v49, 16  ;;  %v1657_v26 = vrot.slane %v1655_v16, 4  ;;  %v4514_v30 = vsel %vm8237_vm2, %v4509_v20, %v4513_v2  ;;  %v4528_v31 = vrot.slane %v4526_v47, 4  ;;  %v6697_v20 = vld [vmem:[%s8214_s22 + $0x60] sm:$0xf] }
  0xcb   : > { %v4485_v50 = vrot.slane %v4484_v27, 4  ;;  %v4494_v51 = vor.u32 %v4493_v42, %v4489_v36  ;;  %v1652_v1 = vsel %vm8337_vm5, %v1650_v57, %v1651_v48  ;;  %v4531_v32 = vrot.slane %v4529_v23, 5  ;;  %v6699_v23 = vld [vmem:[%s8214_s22 + $0x68] sm:$0x1] }
  0xcc   : > { %v4517_v3 = vrot.slane %v4515_v59, 4  ;;  %v6330_v7 = vcombine.low %v1649_v55, %v1652_v1  ;;  %v4539_v34 = vshrl.u32 %v6692_v19, 16  ;;  %v4537_v38 = vrot.slane %v4535_v28, 5 }
  0xcd   : > { %7410 = vmatpush3.bf16.msra.mxu1 %v8078_v10  ;;  %v4490_v61 = vsel %vm8237_vm2, %v4485_v50, %v4489_v36  ;;  %v1508_v10 = vld [vmem:[%s8214_s22 + $0x98] sm:$0x1]  ;;  %v4532_v43 = vor.u32 %v4531_v32, %v4528_v31  ;;  %v6300_v48 = vrot.slane %v1509_v29, 9  ;;  %v1662_v49 = vrot.slane %v1510_v35, 5  ;;  %v1515_v31 = vld [vmem:[%s8214_s22 + $0xb4] sm:$0xe] }
  0xce   : > { %7604 = vmatmul.mubr.bf16.vlgmr.msra.gmra.mrb[0].mxu0 %v6744_v39  ;;  %7683 = vmatprep.subr.bf16.mxu1 %v8841_v60  ;;  %v4518_v14 = vor.u32 %v4517_v3, %v4513_v2  ;;  %v1658_v21 = vrot.slane %v1508_v10, 5  ;;  %v4545_v39 = vshll.u32 %v6693_v22, 16  ;;  %v8085_v2 = vld [vmem:[%s9377_s1 + $0x228] sm:$0xff]  }
  0xcf   : > { %7636 = vmatpush3.bf16.msra.mxu0 %v8693_v56  ;;  %v4495_v56 = vrot.slane %v4494_v51, 4  ;;  %v6695_v51 = vld [vmem:[%s8214_s22 + $0x58] sm:$0xf]  ;;  %v4533_v52 = vrot.slane %v4532_v43, 4  ;;  %v1663_v58 = vsel %vm8337_vm5, %v6300_v48, %v1662_v49  ;;  %v1664_v59 = vrot.slane %v1662_v49, 4 }
  0xd0   : > { %7380 = vmatmul.mubr.bf16.gmra.mrb[16].mxu1 %v6328_v5  ;;  %7637 = vmatprep.subr.bf16.mxu0 %v8075_v41  ;;  %v1506_v5 = vld [vmem:[%s8214_s22 + $0x90] sm:$0xe]  ;;  %v4519_v24 = vrot.slane %v4518_v14, 4  ;;  %v1659_v37 = vsel %vm8337_vm5, %v1657_v26, %v1658_v21  ;;  %v4547_v46 = vrot.slane %v4545_v39, 5  ;;  %v6698_v21 = vld [vmem:[%s8214_s22 + $0x64] sm:$0xf] }
  0xd1   : > { %7383 = vmatprep.mubr.bf16.mxu1 %v6329_v40  ;;  %v4500_v6 = vsel %vm8237_vm2, %v4495_v56, %v4499_v44  ;;  %v6299_v11 = vrot.slane %v1506_v5, 9  ;;  %v1511_v40 = vld [vmem:[%s8214_s22 + $0xa4] sm:$0x1]  ;;  %v6694_v44 = vld [vmem:[%s8214_s22 + $0x54] sm:$0xf]  ;;  %v4563_v56 = vshrl.u32 %v6695_v51, 16  ;;  %v4538_v62 = vsel %vm8237_vm2, %v4533_v52, %v4537_v38 }
  0xd2   : > { %v6745_v13 = vcombine.low %v4490_v61, %v4500_v6  ;;  %v4524_v36 = vsel %vm8237_vm2, %v4519_v24, %v4523_v15  ;;  %v1665_v50 = vrot.slane %v1511_v40, 5  ;;  %v4550_v55 = vshrl.u32 %v6694_v44, 16  ;;  %v8088_v14 = vld [vmem:[%s9377_s1 + $0x230] sm:$0xff]   ;;  %v8091_v48 = vld [vmem:[%s9377_s1 + $0x238] sm:$0xff]  }
  0xd3   : > { %7638 = vmatpush3.bf16.msra.mxu0 %v8075_v41  ;;  %v1656_v25 = vsel %vm8337_vm5, %v6299_v11, %v1655_v16  ;;  %v6746_v27 = vcombine.low %v4514_v30, %v4524_v36  ;;  %v4541_v41 = vrot.slane %v4539_v34, 4  ;;  %v4553_v57 = vshll.u32 %v6694_v44, 16  ;;  %v1513_v11 = vld [vmem:[%s8214_s22 + $0xac] sm:$0xf] }
  0xd4   : > { %7639 = vmatprep.subr.bf16.mxu0 %v8077_v0  ;;  %7607 = vmatprep.mubr.bf16.mxu0 %v6745_v13  ;;  %v6331_v42 = vcombine.low %v1656_v25, %v1659_v37  ;;  %v4559_v61 = vshll.u32 %v6695_v51, 16  ;;  %v1666_v3 = vsel %vm8337_vm5, %v1664_v59, %v1665_v50  ;;  %v4565_v5 = vrot.slane %v4563_v56, 4  ;;  %v1516_v37 = vld [vmem:[%s8214_s22 + $0xb8] sm:$0xf] }
  0xd5   : > { %v4542_v53 = vor.u32 %v4541_v41, %v4537_v38  ;;  %v4555_v1 = vrot.slane %v4553_v57, 5  ;;  %v4569_v6 = vshll.u32 %v6696_v54, 16  ;;  %v6332_v9 = vcombine.low %v1663_v58, %v1666_v3  ;;  %v6702_v57 = vld [vmem:[%s8214_s22 + $0x74] sm:$0x1] }
  0xd6   : > { %7608 = vmatmul.mubr.bf16.gmra.mrb[4].mxu0 %v6746_v27  ;;  %v4561_v18 = vrot.slane %v4559_v61, 5  ;;  %v1669_v19 = vrot.slane %v1513_v11, 5  ;;  %v4574_v24 = vshrl.u32 %v6697_v20, 16  ;;  %v4577_v25 = vshll.u32 %v6697_v20, 16 }
  0xd7   : > { %7640 = vmatpush3.bf16.msra.mxu0 %v8077_v0  ;;  %v4543_v63 = vrot.slane %v4542_v53, 4  ;;  %v4552_v0 = vrot.slane %v4550_v55, 4  ;;  %v4571_v17 = vrot.slane %v4569_v6, 5  ;;  %v4583_v30 = vshll.u32 %v6698_v21, 16  ;;  %v6701_v53 = vld [vmem:[%s8214_s22 + $0x70] sm:$0xf] }
  0xd8   : > { %7384 = vmatmul.mubr.bf16.gmra.mrb[20].mxu1 %v6330_v7  ;;  %7641 = vmatprep.subr.bf16.mxu0 %v8079_v12  ;;  %v1512_v7 = vld [vmem:[%s8214_s22 + $0xa8] sm:$0xe]  ;;  %v4566_v16 = vor.u32 %v4565_v5, %v4561_v18  ;;  %v1671_v29 = vrot.slane %v1669_v19, 4  ;;  %v4576_v34 = vrot.slane %v4574_v24, 4  ;;  %v4579_v35 = vrot.slane %v4577_v25, 5 }
  0xd9   : > { %7387 = vmatprep.mubr.bf16.mxu1 %v6331_v42  ;;  %v4548_v8 = vsel %vm8237_vm2, %v4543_v63, %v4547_v46  ;;  %v4556_v10 = vor.u32 %v4555_v1, %v4552_v0  ;;  %v6301_v13 = vrot.slane %v1512_v7, 9  ;;  %v4587_v36 = vshrl.u32 %v6698_v21, 16  ;;  %v1517_v42 = vld [vmem:[%s8214_s22 + $0xbc] sm:$0x1]  ;;  %v6700_v46 = vld [vmem:[%s8214_s22 + $0x6c] sm:$0xf] }
  0xda   : > { %v6747_v15 = vcombine.low %v4538_v62, %v4548_v8  ;;  %v4567_v26 = vrot.slane %v4566_v16, 4  ;;  %v4585_v40 = vrot.slane %v4583_v30, 5  ;;  %v4593_v27 = vshll.u32 %v6699_v23, 16  ;;  %v8080_v8 = vld [vmem:[%s8214_s22 + $0xc] sm:$0xff]  }
  0xdb   : > { %7642 = vmatpush3.bf16.msra.mxu0 %v8079_v12  ;;  %v1514_v12 = vld [vmem:[%s8214_s22 + $0xb0] sm:$0x1]  ;;  %v4557_v22 = vrot.slane %v4556_v10, 4  ;;  %v1670_v28 = vsel %vm8337_vm5, %v6301_v13, %v1669_v19  ;;  %v4580_v44 = vor.u32 %v4579_v35, %v4576_v34  ;;  %v6302_v50 = vrot.slane %v1515_v31, 9  ;;  %v6704_v13 = vld [vmem:[%s8214_s22 + $0x7c] sm:$0xf] }
  0xdc   : > { %7643 = vmatprep.subr.bf16.mxu0 %v8082_v45  ;;  %v1672_v47 = vrot.slane %v1514_v12, 5  ;;  %7611 = vmatprep.mubr.bf16.mxu0 %v6747_v15  ;;  %v4572_v38 = vsel %vm8237_vm2, %v4567_v26, %v4571_v17  ;;  %v4595_v49 = vrot.slane %v4593_v27, 5  ;;  %v1676_v51 = vrot.slane %v1516_v37, 5  ;;  %v6703_v12 = vld [vmem:[%s8214_s22 + $0x78] sm:$0xf] }
  0xdd   : > { %v4562_v32 = vsel %vm8237_vm2, %v4557_v22, %v4561_v18  ;;  %v1679_v52 = vrot.slane %v1517_v42, 5  ;;  %v4581_v54 = vrot.slane %v4580_v44, 4  ;;  %v4598_v58 = vshrl.u32 %v6700_v46, 16  ;;  %v6705_v17 = vld [vmem:[%s8214_s22 + $0x80] sm:$0x1] }
  0xde   : > { %v1673_v39 = vsel %vm8337_vm5, %v1671_v29, %v1672_v47  ;;  %v6748_v43 = vcombine.low %v4562_v32, %v4572_v38  ;;  %v4601_v59 = vshll.u32 %v6700_v46, 16  ;;  %v1677_v61 = vsel %vm8337_vm5, %v6302_v50, %v1676_v51  ;;  %v6706_v26 = vld [vmem:[%s8214_s22 + $0x84] sm:$0xf]  ;;  %v6707_v32 = vld [vmem:[%s8214_s22 + $0x88] sm:$0xf] }
  0xdf   : > { %7644 = vmatpush3.bf16.msra.mxu0 %v8082_v45  ;;  %v6333_v41 = vcombine.low %v1670_v28, %v1673_v39  ;;  %v4589_v45 = vrot.slane %v4587_v36, 4  ;;  %v1678_v56 = vrot.slane %v1676_v51, 4  ;;  %v4607_v62 = vshll.u32 %v6701_v53, 16  ;;  %v8081_v36 = vld [vmem:[%s8214_s22 + $0x18] sm:$0xff]   ;;  %v6708_v37 = vld [vmem:[%s8214_s22 + $0x8c] sm:$0x1] }
  0xe0   : > { %7388 = vmatmul.mubr.bf16.gmra.mrb[24].mxu1 %v6332_v9  ;;  %7645 = vmatprep.subr.bf16.mxu0 %v8085_v2  ;;  %v4611_v63 = vshrl.u32 %v6701_v53, 16  ;;  %v4586_v0 = vsel %vm8237_vm2, %v4581_v54, %v4585_v40  ;;  %v4603_v3 = vrot.slane %v4601_v59, 5  ;;  %v4617_v7 = vshll.u32 %v6702_v57, 16  ;;  %v6710_v57 = vld [vmem:[%s8214_s22 + $0x94] sm:$0xf] }
  0xe1   : > { %7612 = vmatmul.mubr.bf16.gmra.mrb[8].mxu0 %v6748_v43  ;;  %7391 = vmatprep.mubr.bf16.mxu1 %v6333_v41  ;;  %v4590_v55 = vor.u32 %v4589_v45, %v4585_v40  ;;  %v1680_v18 = vsel %vm8337_vm5, %v1678_v56, %v1679_v52  ;;  %v4609_v5 = vrot.slane %v4607_v62, 5  ;;  %v4622_v19 = vshrl.u32 %v6703_v12, 16  ;;  %v8083_v41 = vld [vmem:[%s8214_s22 + $0x24] sm:$0xff]  }
  0xe2   : > { %v4613_v6 = vrot.slane %v4611_v63, 4  ;;  %v6334_v10 = vcombine.low %v1677_v61, %v1680_v18  ;;  %v4619_v16 = vrot.slane %v4617_v7, 5  ;;  %v4625_v21 = vshll.u32 %v6703_v12, 16  ;;  %v6711_v61 = vld [vmem:[%s8214_s22 + $0x98] sm:$0x1] }
  0xe3   : > { %7646 = vmatpush3.bf16.msra.mxu0 %v8085_v2  ;;  %v4591_v1 = vrot.slane %v4590_v55, 4  ;;  %v4600_v2 = vrot.slane %v4598_v58, 4  ;;  %v4631_v22 = vshll.u32 %v6704_v13, 16  ;;  %v4635_v47 = vshrl.u32 %v6704_v13, 16  ;;  %v6709_v55 = vld [vmem:[%s8214_s22 + $0x90] sm:$0xf] }
  0xe4   : > { %7647 = vmatprep.subr.bf16.mxu0 %v8088_v14  ;;  %v4614_v15 = vor.u32 %v4613_v6, %v4609_v5  ;;  %v4624_v24 = vrot.slane %v4622_v19, 4  ;;  %v4641_v25 = vshll.u32 %v6705_v17, 16  ;;  %v4627_v29 = vrot.slane %v4625_v21, 5  ;;  %v6714_v12 = vld [vmem:[%s8214_s22 + $0xa4] sm:$0x1]  ;;  %v8084_v17 = vld [vmem:[%s8214_s22 + $0x30] sm:$0xff]  }
  0xe5   : > { %v4596_v9 = vsel %vm8237_vm2, %v4591_v1, %v4595_v49  ;;  %v4604_v11 = vor.u32 %v4603_v3, %v4600_v2  ;;  %v4633_v30 = vrot.slane %v4631_v22, 5  ;;  %v4637_v31 = vrot.slane %v4635_v47, 4  ;;  %v6712_v3 = vld [vmem:[%s8214_s22 + $0x9c] sm:$0xf] }
  0xe6   : > { %v4615_v23 = vrot.slane %v4614_v15, 4  ;;  %v4643_v35 = vrot.slane %v4641_v25, 5  ;;  %v4646_v38 = vshrl.u32 %v6706_v26, 16  ;;  %v4649_v39 = vshll.u32 %v6706_v26, 16 }
  0xe7   : > { %7648 = vmatpush3.bf16.msra.mxu0 %v8088_v14  ;;  %v6749_v14 = vcombine.low %v4586_v0, %v4596_v9  ;;  %v4605_v20 = vrot.slane %v4604_v11, 4  ;;  %v4628_v27 = vor.u32 %v4627_v29, %v4624_v24  ;;  %v4638_v42 = vor.u32 %v4637_v31, %v4633_v30  ;;  %v6713_v9 = vld [vmem:[%s8214_s22 + $0xa0] sm:$0xf]  ;;  %v8102_v29 = vld [vmem:[%s9377_s1 + $0x110] sm:$0xff]  }
  0xe8   : > { %7649 = vmatprep.subr.bf16.mxu0 %v8091_v48  ;;  %7392 = vmatmul.mubr.bf16.gmra.mrb[28].mxu1 %v6334_v10  ;;  %v4620_v34 = vsel %vm8237_vm2, %v4615_v23, %v4619_v16  ;;  %v4655_v43 = vshll.u32 %v6707_v32, 16  ;;  %v4648_v44 = vrot.slane %v4646_v38, 4  ;;  %v4651_v45 = vrot.slane %v4649_v39, 5  ;;  %v8086_v23 = vld [vmem:[%s8214_s22 + $0x3c] sm:$0xff]   ;;  %v6716_v38 = vld [vmem:[%s8214_s22 + $0xac] sm:$0xf] }
  0xe9   : > { %7615 = vmatprep.mubr.bf16.mxu0 %v6749_v14  ;;  %7411 = vmatprep.mubr.bf16.mxu1 %v8080_v8  ;;  %v4610_v28 = vsel %vm8237_vm2, %v4605_v20, %v4609_v5  ;;  %v4659_v46 = vshrl.u32 %v6707_v32, 16  ;;  %v4629_v49 = vrot.slane %v4628_v27, 4  ;;  %v4639_v50 = vrot.slane %v4638_v42, 4  ;;  %v8101_v8 = vld [vmem:[%s9377_s1 + $0x108] sm:$0xff]   ;;  %v6717_v39 = vld [vmem:[%s8214_s22 + $0xb0] sm:$0x1] }
  0xea   : > { %v6750_v40 = vcombine.low %v4610_v28, %v4620_v34  ;;  %v4657_v51 = vrot.slane %v4655_v43, 5  ;;  %v4652_v52 = vor.u32 %v4651_v45, %v4648_v44  ;;  %v4670_v56 = vshrl.u32 %v6709_v55, 16  ;;  %v6715_v34 = vld [vmem:[%s8214_s22 + $0xa8] sm:$0xf] }
  0xeb   : > { %7650 = vmatpush3.bf16.msra.mxu0 %v8091_v48  ;;  %v4665_v48 = vshll.u32 %v6708_v37, 16  ;;  %v4661_v53 = vrot.slane %v4659_v46, 4  ;;  %v4634_v58 = vsel %vm8237_vm2, %v4629_v49, %v4633_v30  ;;  %v4644_v59 = vsel %vm8237_vm2, %v4639_v50, %v4643_v35  ;;  %v8087_v49 = vld [vmem:[%s8214_s22 + $0x48] sm:$0xff]   ;;  %v8103_v50 = vld [vmem:[%s9377_s1 + $0x118] sm:$0xff]  }
  0xec   : > { %7616 = vmatmul.mubr.bf16.gmra.mrb[12].mxu0 %v6750_v40  ;;  %v4673_v62 = vshll.u32 %v6709_v55, 16  ;;  %v6751_v63 = vcombine.low %v4634_v58, %v4644_v59  ;;  %v4653_v0 = vrot.slane %v4652_v52, 4  ;;  %v4679_v2 = vshll.u32 %v6710_v57, 16  ;;  %v6718_v55 = vld [vmem:[%s8214_s22 + $0xb4] sm:$0xf] }
  0xed   : > { %v4667_v54 = vrot.slane %v4665_v48, 5  ;;  %v4662_v1 = vor.u32 %v4661_v53, %v4657_v51  ;;  %v4672_v18 = vrot.slane %v4670_v56, 4  ;;  %v4683_v6 = vshrl.u32 %v6710_v57, 16  ;;  %v8089_v57 = vld [vmem:[%s8214_s22 + $0x54] sm:$0xff]  }
  0xee   : > { %v4675_v5 = vrot.slane %v4673_v62, 5  ;;  %v4689_v7 = vshll.u32 %v6711_v61, 16  ;;  %7619 = vmatprep.mubr.bf16.mxu0 %v6751_v63  ;;  %v4658_v10 = vsel %vm8237_vm2, %v4653_v0, %v4657_v51  ;;  %v4681_v11 = vrot.slane %v4679_v2, 5  ;;  %v6719_v56 = vld [vmem:[%s8214_s22 + $0xb8] sm:$0xf] }
  0xef   : > { %v4694_v13 = vshrl.u32 %v6712_v3, 16  ;;  %v4685_v15 = vrot.slane %v4683_v6, 4  ;;  %v4697_v19 = vshll.u32 %v6712_v3, 16  ;;  %v4703_v22 = vshll.u32 %v6713_v9, 16  ;;  %v6720_v62 = vld [vmem:[%s8214_s22 + $0xbc] sm:$0x1] }
  0xf0   : > { %7412 = vmatmul.mubr.bf16.vlgmr.msra.gmra.mrb[0].mxu1 %v8081_v36  ;;  %v4676_v14 = vor.u32 %v4675_v5, %v4672_v18  ;;  %v4691_v16 = vrot.slane %v4689_v7, 5  ;;  %v4707_v47 = vshrl.u32 %v6713_v9, 16  ;;  %v4713_v32 = vshll.u32 %v6714_v12, 16  ;;  %v8104_v7 = vld [vmem:[%s9377_s1 + $0x120] sm:$0xff]  }
  0xf1   : > { %7691 = vmatpush3.bf16.msra.mxu1 %v8841_v60  ;;  %7415 = vmatprep.mubr.bf16.mxu1 %v8083_v41  ;;  %v4663_v60 = vrot.slane %v4662_v1, 4  ;;  %v4696_v21 = vrot.slane %v4694_v13, 4  ;;  %v4686_v26 = vor.u32 %v4685_v15, %v4681_v11  ;;  %v4699_v28 = vrot.slane %v4697_v19, 5  ;;  %v6722_v15 = vld [vmem:[%s8214_s22 + $0xc4] sm:$0xf] }
  0xf2   : > { %7684 = vmatprep.subr.bf16.mxu1 %v8101_v8  ;;  %v4677_v25 = vrot.slane %v4676_v14, 4  ;;  %v4705_v30 = vrot.slane %v4703_v22, 5  ;;  %v4709_v31 = vrot.slane %v4707_v47, 4  ;;  %v4718_v40 = vshrl.u32 %v6715_v34, 16 }
  0xf3   : > { %v4668_v20 = vsel %vm8237_vm2, %v4663_v60, %v4667_v54  ;;  %v4687_v36 = vrot.slane %v4686_v26, 4  ;;  %v4700_v37 = vor.u32 %v4699_v28, %v4696_v21  ;;  %v4715_v42 = vrot.slane %v4713_v32, 5  ;;  %v6723_v21 = vld [vmem:[%s8214_s22 + $0xc8] sm:$0x1]  ;;  %v8090_v26 = vld [vmem:[%s8214_s22 + $0x60] sm:$0xff]  }
  0xf4   : > { %v6752_v24 = vcombine.low %v4658_v10, %v4668_v20  ;;  %v4682_v35 = vsel %vm8237_vm2, %v4677_v25, %v4681_v11  ;;  %v4710_v27 = vor.u32 %v4709_v31, %v4705_v30  ;;  %v4721_v43 = vshll.u32 %v6715_v34, 16  ;;  %v6721_v11 = vld [vmem:[%s8214_s22 + $0xc0] sm:$0xf]  ;;  %v8105_v28 = vld [vmem:[%s9377_s1 + $0x128] sm:$0xff]  }
  0xf5   : > { %7692 = vmatpush3.bf16.msra.mxu1 %v8101_v8  ;;  %v4727_v41 = vshll.u32 %v6716_v38, 16  ;;  %v4692_v44 = vsel %vm8237_vm2, %v4687_v36, %v4691_v16  ;;  %v4701_v45 = vrot.slane %v4700_v37, 4  ;;  %v4720_v46 = vrot.slane %v4718_v40, 4  ;;  %v6724_v34 = vld [vmem:[%s8214_s22 + $0xcc] sm:$0xf] }
  0xf6   : > { %7685 = vmatprep.subr.bf16.mxu1 %v8102_v29  ;;  %7620 = vmatmul.mubr.bf16.gmra.mrb[16].mxu0 %v6752_v24  ;;  %v4731_v48 = vshrl.u32 %v6716_v38, 16  ;;  %v6753_v51 = vcombine.low %v4682_v35, %v4692_v44  ;;  %v4711_v52 = vrot.slane %v4710_v27, 4  ;;  %v4723_v53 = vrot.slane %v4721_v43, 5  ;;  %v6725_v35 = vld [vmem:[%s8214_s22 + $0xd0] sm:$0xf] }
  0xf7   : > { %v4729_v54 = vrot.slane %v4727_v41, 5  ;;  %v4706_v58 = vsel %vm8237_vm2, %v4701_v45, %v4705_v30  ;;  %v4737_v61 = vshll.u32 %v6717_v39, 16  ;;  %v4742_v1 = vshrl.u32 %v6718_v55, 16  ;;  %v8092_v36 = vld [vmem:[%s8214_s22 + $0x6c] sm:$0xff]   ;;  %v6726_v40 = vld [vmem:[%s8214_s22 + $0xd4] sm:$0x1] }
  0xf8   : > { %7416 = vmatmul.mubr.bf16.gmra.mrb[4].mxu1 %v8084_v17  ;;  %v4733_v59 = vrot.slane %v4731_v48, 4  ;;  %7623 = vmatprep.mubr.bf16.mxu0 %v6753_v51  ;;  %v4716_v63 = vsel %vm8237_vm2, %v4711_v52, %v4715_v42  ;;  %v4724_v0 = vor.u32 %v4723_v53, %v4720_v46  ;;  %v4745_v2 = vshll.u32 %v6718_v55, 16 }
  0xf9   : > { %7419 = vmatprep.mubr.bf16.mxu1 %v8086_v23  ;;  %7693 = vmatpush3.bf16.msra.mxu1 %v8102_v29  ;;  %v6754_v3 = vcombine.low %v4706_v58, %v4716_v63  ;;  %v4739_v5 = vrot.slane %v4737_v61, 5  ;;  %v4751_v6 = vshll.u32 %v6719_v56, 16  ;;  %v4744_v9 = vrot.slane %v4742_v1, 4  ;;  %v6767_v61 = vld [vmem:[%s8214_s22 + $0x18] sm:$0xe] }
  0xfa   : > { %7686 = vmatprep.subr.bf16.mxu1 %v8103_v50  ;;  %v4734_v18 = vor.u32 %v4733_v59, %v4729_v54  ;;  %v4725_v8 = vrot.slane %v4724_v0, 4  ;;  %v4747_v10 = vrot.slane %v4745_v2, 5  ;;  %v4755_v60 = vshrl.u32 %v6719_v56, 16  ;;  %v6768_v56 = vld [vmem:[%s8214_s22 + $0x1c] sm:$0xf] }
  0xfb   : > { %v4753_v13 = vrot.slane %v4751_v6, 5  ;;  %v4761_v14 = vshll.u32 %v6720_v62, 16  ;;  %v4766_v16 = vshrl.u32 %v6721_v11, 16  ;;  %v4769_v22 = vshll.u32 %v6721_v11, 16  ;;  %v6769_v0 = vld [vmem:[%s8214_s22 + $0x20] sm:$0x1] }
  0xfc   : > { %v4735_v12 = vrot.slane %v4734_v18, 4  ;;  %v4730_v17 = vsel %vm8237_vm2, %v4725_v8, %v4729_v54  ;;  %v4748_v19 = vor.u32 %v4747_v10, %v4744_v9  ;;  %v4757_v20 = vrot.slane %v4755_v60, 4  ;;  %v8093_v6 = vld [vmem:[%s8214_s22 + $0x78] sm:$0xff]   ;;  %v6770_v60 = vld [vmem:[%s8214_s22 + $0x24] sm:$0xe] }
  0xfd   : > { %7694 = vmatpush3.bf16.msra.mxu1 %v8103_v50  ;;  %v4763_v23 = vrot.slane %v4761_v14, 5  ;;  %v4768_v24 = vrot.slane %v4766_v16, 4  ;;  %v4775_v25 = vshll.u32 %v6722_v15, 16  ;;  %v4771_v32 = vrot.slane %v4769_v22, 5  ;;  %v8106_v50 = vld [vmem:[%s9377_s1 + $0x130] sm:$0xff]   ;;  %v8094_v16 = vld [vmem:[%s8214_s22 + $0x84] sm:$0xff]  }
  0xfe   : > { %7687 = vmatprep.subr.bf16.mxu1 %v8104_v7  ;;  %7624 = vmatmul.mubr.bf16.gmra.mrb[20].mxu0 %v6754_v3  ;;  %v4740_v47 = vsel %vm8237_vm2, %v4735_v12, %v4739_v5  ;;  %v4749_v30 = vrot.slane %v4748_v19, 4  ;;  %v4758_v31 = vor.u32 %v4757_v20, %v4753_v13  ;;  %v4779_v38 = vshrl.u32 %v6722_v15, 16  ;;  %v6771_v11 = vld [vmem:[%s8214_s22 + $0x28] sm:$0xf]  ;;  %v6772_v15 = vld [vmem:[%s8214_s22 + $0x2c] sm:$0x1] }
  0xff   : > { %v6755_v29 = vcombine.low %v4730_v17, %v4740_v47  ;;  %v4777_v37 = vrot.slane %v4775_v25, 5  ;;  %v4785_v39 = vshll.u32 %v6723_v21, 16  ;;  %v4790_v27 = vshrl.u32 %v6724_v34, 16  ;;  %v6773_v22 = vld [vmem:[%s8214_s22 + $0x30] sm:$0xe] }
 0x100   : > { %7420 = vmatmul.mubr.bf16.gmra.mrb[8].mxu1 %v8087_v49  ;;  %v4754_v42 = vsel %vm8237_vm2, %v4749_v30, %v4753_v13  ;;  %v4759_v43 = vrot.slane %v4758_v31, 4  ;;  %v4772_v41 = vor.u32 %v4771_v32, %v4768_v24  ;;  %v4793_v44 = vshll.u32 %v6724_v34, 16  ;;  %v6774_v25 = vld [vmem:[%s8214_s22 + $0x34] sm:$0xf] }
 0x101   : > { %7423 = vmatprep.mubr.bf16.mxu1 %v8089_v57  ;;  %7695 = vmatpush3.bf16.msra.mxu1 %v8104_v7  ;;  %v4781_v45 = vrot.slane %v4779_v38, 4  ;;  %v4787_v46 = vrot.slane %v4785_v39, 5  ;;  %v4792_v48 = vrot.slane %v4790_v27, 4  ;;  %v4799_v49 = vshll.u32 %v6725_v35, 16  ;;  %v8107_v7 = vld [vmem:[%s9377_s1 + $0x138] sm:$0xff]  }
 0x102   : > { %7688 = vmatprep.subr.bf16.mxu1 %v8105_v28  ;;  %7627 = vmatprep.mubr.bf16.mxu0 %v6755_v29  ;;  %v4764_v51 = vsel %vm8237_vm2, %v4759_v43, %v4763_v23  ;;  %v4773_v52 = vrot.slane %v4772_v41, 4  ;;  %v4795_v53 = vrot.slane %v4793_v44, 5  ;;  %v4803_v54 = vshrl.u32 %v6725_v35, 16  ;;  %v6778_v38 = vld [vmem:[%s8214_s22 + $0x44] sm:$0x1] }
 0x103   : > { %v6756_v55 = vcombine.low %v4754_v42, %v4764_v51  ;;  %v4782_v57 = vor.u32 %v4781_v45, %v4777_v37  ;;  %v4801_v58 = vrot.slane %v4799_v49, 5  ;;  %v4809_v59 = vshll.u32 %v6726_v40, 16  ;;  %v8095_v42 = vld [vmem:[%s8214_s22 + $0x90] sm:$0xff]   ;;  %v6779_v41 = vld [vmem:[%s8214_s22 + $0x48] sm:$0xe] }
 0x104   : > { %v4796_v62 = vor.u32 %v4795_v53, %v4792_v48  ;;  %v4805_v63 = vrot.slane %v4803_v54, 4  ;;  %v6815_v1 = vrot.slane %v6767_v61, 9  ;;  %v4778_v2 = vsel %vm8237_vm2, %v4773_v52, %v4777_v37  ;;  %v6777_v37 = vld [vmem:[%s8214_s22 + $0x40] sm:$0xf]  ;;  %v6780_v49 = vld [vmem:[%s8214_s22 + $0x4c] sm:$0xf] }
 0x105   : > { %7696 = vmatpush3.bf16.msra.mxu1 %v8105_v28  ;;  %v4783_v3 = vrot.slane %v4782_v57, 4  ;;  %v5297_v18 = vrot.slane %v6768_v56, 5  ;;  %v5300_v5 = vrot.slane %v6769_v0, 5  ;;  %v4811_v10 = vrot.slane %v4809_v59, 5  ;;  %v8096_v48 = vld [vmem:[%s8214_s22 + $0x9c] sm:$0xff]  }
 0x106   : > { %7689 = vmatprep.subr.bf16.mxu1 %v8106_v50  ;;  %7628 = vmatmul.mubr.bf16.gmra.mrb[24].mxu0 %v6756_v55  ;;  %v4797_v8 = vrot.slane %v4796_v62, 4  ;;  %v4806_v9 = vor.u32 %v4805_v63, %v4801_v58  ;;  %v5304_v21 = vrot.slane %v6771_v11, 5  ;;  %v6816_v23 = vrot.slane %v6770_v60, 9  ;;  %v6782_v57 = vld [vmem:[%s8214_s22 + $0x54] sm:$0xe] }
 0x107   : > { %v4788_v12 = vsel %vm8237_vm2, %v4783_v3, %v4787_v46  ;;  %v5298_v13 = vsel %vm8337_vm5, %v6815_v1, %v5297_v18  ;;  %v5299_v14 = vrot.slane %v5297_v18, 4  ;;  %v5307_v24 = vrot.slane %v6772_v15, 5  ;;  %v6784_v59 = vld [vmem:[%s8214_s22 + $0x5c] sm:$0x1]  ;;  %v6785_v18 = vld [vmem:[%s8214_s22 + $0x60] sm:$0xe] }
 0x108   : > { %7424 = vmatmul.mubr.bf16.gmra.mrb[12].mxu1 %v8090_v26  ;;  %v6757_v17 = vcombine.low %v4778_v2, %v4788_v12  ;;  %v4802_v19 = vsel %vm8237_vm2, %v4797_v8, %v4801_v58  ;;  %v4807_v20 = vrot.slane %v4806_v9, 4  ;;  %v6775_v26 = vld [vmem:[%s8214_s22 + $0x38] sm:$0x1]  ;;  %v5306_v30 = vrot.slane %v5304_v21, 4  ;;  %v6787_v8 = vld [vmem:[%s8214_s22 + $0x68] sm:$0x1] }
 0x109   : > { %7427 = vmatprep.mubr.bf16.mxu1 %v8092_v36  ;;  %7697 = vmatpush3.bf16.msra.mxu1 %v8106_v50  ;;  %v5301_v47 = vsel %vm8337_vm5, %v5299_v14, %v5300_v5  ;;  %v6817_v31 = vrot.slane %v6773_v22, 9  ;;  %v5311_v34 = vrot.slane %v6774_v25, 5  ;;  %v5314_v35 = vrot.slane %v6775_v26, 5  ;;  %v6776_v36 = vld [vmem:[%s8214_s22 + $0x3c] sm:$0xe]  ;;  %v8097_v15 = vld [vmem:[%s8214_s22 + $0xa8] sm:$0xff]  }
 0x10a   : > { %7690 = vmatprep.subr.bf16.mxu1 %v8107_v7  ;;  %7631 = vmatprep.mubr.bf16.mxu0 %v6757_v17  ;;  %v4812_v28 = vsel %vm8237_vm2, %v4807_v20, %v4811_v10  ;;  %v6847_v29 = vcombine.low %v5298_v13, %v5301_v47  ;;  %v6818_v39 = vrot.slane %v6776_v36, 9  ;;  %v5318_v40 = vrot.slane %v6777_v37, 5  ;;  %v6781_v50 = vld [vmem:[%s8214_s22 + $0x50] sm:$0x1]  ;;  %v6783_v58 = vld [vmem:[%s8214_s22 + $0x58] sm:$0xf] }
 0x10b   : > { %v6758_v32 = vcombine.low %v4802_v19, %v4812_v28  ;;  %v5313_v27 = vrot.slane %v5311_v34, 4  ;;  %v5321_v43 = vrot.slane %v6778_v38, 5  ;;  %v5305_v44 = vsel %vm8337_vm5, %v6816_v23, %v5304_v21  ;;  %v6786_v5 = vld [vmem:[%s8214_s22 + $0x64] sm:$0xf]  ;;  %v6788_v13 = vld [vmem:[%s8214_s22 + $0x6c] sm:$0xe] }
 0x10c   : > { %v5308_v45 = vsel %vm8337_vm5, %v5306_v30, %v5307_v24  ;;  %v5320_v46 = vrot.slane %v5318_v40, 4  ;;  %v6819_v51 = vrot.slane %v6779_v41, 9  ;;  %v5312_v52 = vsel %vm8337_vm5, %v6817_v31, %v5311_v34  ;;  %v6789_v19 = vld [vmem:[%s8214_s22 + $0x70] sm:$0xf]  ;;  %v6790_v20 = vld [vmem:[%s8214_s22 + $0x74] sm:$0x1] }
 0x10d   : > { %7698 = vmatpush3.bf16.msra.mxu1 %v8107_v7  ;;  %v5315_v53 = vsel %vm8337_vm5, %v5313_v27, %v5314_v35  ;;  %v5325_v54 = vrot.slane %v6780_v49, 5  ;;  %v5328_v55 = vrot.slane %v6781_v50, 5  ;;  %v6848_v61 = vcombine.low %v5305_v44, %v5308_v45  ;;  %v8098_v23 = vld [vmem:[%s8214_s22 + $0xb4] sm:$0xff]   ;;  %v6439_v26 = vld [vmem:[%s8214_s22 + $0x6c] sm:$0xf] }
 0x10e   : > { %7632 = vmatmul.mubr.bf16.gmra.mrb[28].mxu0 %v6758_v32  ;;  %v9051_v56 = vsel %vm8337_vm5, %v6818_v39, %v5318_v40  ;;  %v6820_v63 = vrot.slane %v6782_v57, 9  ;;  %v6849_v0 = vcombine.low %v5312_v52, %v5315_v53  ;;  %v9055_v1 = vsel %vm8337_vm5, %v5320_v46, %v5321_v43  ;;  %v6440_v28 = vld [vmem:[%s8214_s22 + $0x70] sm:$0xf]  ;;  %v6441_v31 = vld [vmem:[%s8214_s22 + $0x74] sm:$0x1] }
 0x10f   : > { %7651 = vmatprep.mubr.bf16.mxu0 %v6847_v29  ;;  %v5327_v62 = vrot.slane %v5325_v54, 4  ;;  %v5332_v2 = vrot.slane %v6783_v58, 5  ;;  %v5335_v3 = vrot.slane %v6784_v59, 5  ;;  %v6821_v9 = vrot.slane %v6785_v18, 9  ;;  %v6791_v35 = vld [vmem:[%s8214_s22 + $0x78] sm:$0xe] }
 0x110   : > { %7428 = vmatmul.mubr.bf16.gmra.mrb[16].mxu1 %v8093_v6  ;;  %v9061_v6 = vsel %vm8337_vm5, %v6819_v51, %v5325_v54  ;;  %v5339_v10 = vrot.slane %v6786_v5, 5  ;;  %v5342_v12 = vrot.slane %v6787_v8, 5  ;;  %v6850_v14 = vcombine.low %v9051_v56, %v9055_v1  ;;  %v6792_v40 = vld [vmem:[%s8214_s22 + $0x7c] sm:$0xf]  ;;  %v6793_v27 = vld [vmem:[%s8214_s22 + $0x80] sm:$0x1] }
 0x111   : > { %7431 = vmatprep.mubr.bf16.mxu1 %v8094_v16  ;;  %v9065_v7 = vsel %vm8337_vm5, %v5327_v62, %v5328_v55  ;;  %v9070_v60 = vsel %vm8337_vm5, %v6820_v63, %v5332_v2  ;;  %v5334_v11 = vrot.slane %v5332_v2, 4  ;;  %v6822_v21 = vrot.slane %v6788_v13, 9  ;;  %v6442_v45 = vld [vmem:[%s8214_s22 + $0x78] sm:$0xf]  ;;  %v6443_v51 = vld [vmem:[%s8214_s22 + $0x7c] sm:$0xf] }
 0x112   : > { %v9078_v16 = vsel %vm8337_vm5, %v6821_v9, %v5339_v10  ;;  %v5341_v17 = vrot.slane %v5339_v10, 4  ;;  %v6851_v22 = vcombine.low %v9061_v6, %v9065_v7  ;;  %v5346_v24 = vrot.slane %v6789_v19, 5  ;;  %v6444_v57 = vld [vmem:[%s8214_s22 + $0x80] sm:$0x1]  ;;  %v6794_v62 = vld [vmem:[%s8214_s22 + $0x84] sm:$0xe] }
 0x113   : > { %v9086_v47 = vsel %vm8337_vm5, %v5334_v11, %v5335_v3  ;;  %v5349_v25 = vrot.slane %v6790_v20, 5  ;;  %v2759_v32 = vshrl.u32 %v6439_v26, 16  ;;  %v2762_v34 = vshll.u32 %v6439_v26, 16  ;;  %v6795_v3 = vld [vmem:[%s8214_s22 + $0x88] sm:$0xf]  ;;  %v8099_v9 = vld [vmem:[%s8214_s22 + $0xc0] sm:$0xff]  }
 0x114   : > { %v6852_v29 = vcombine.low %v9070_v60, %v9086_v47  ;;  %v9095_v30 = vsel %vm8337_vm5, %v5341_v17, %v5342_v12  ;;  %v9103_v37 = vsel %vm8337_vm5, %v6822_v21, %v5346_v24  ;;  %v5348_v38 = vrot.slane %v5346_v24, 4  ;;  %v6796_v8 = vld [vmem:[%s8214_s22 + $0x8c] sm:$0x1]  ;;  %v6446_v21 = vld [vmem:[%s8214_s22 + $0x88] sm:$0xf] }
 0x115   : > { %v6853_v36 = vcombine.low %v9078_v16, %v9095_v30  ;;  %v2768_v39 = vshll.u32 %v6440_v28, 16  ;;  %v2764_v43 = vrot.slane %v2762_v34, 5  ;;  %v2772_v41 = vshrl.u32 %v6440_v28, 16 }
 0x116   : > { %7652 = vmatmul.mubr.bf16.vlgmr.msra.gmra.mrb[0].mxu0 %v6848_v61  ;;  %v2778_v44 = vshll.u32 %v6441_v31, 16  ;;  %v9110_v46 = vsel %vm8337_vm5, %v5348_v38, %v5349_v25  ;;  %v6823_v49 = vrot.slane %v6791_v35, 9  ;;  %v5353_v50 = vrot.slane %v6792_v40, 5  ;;  %v6447_v31 = vld [vmem:[%s8214_s22 + $0x8c] sm:$0x1] }
 0x117   : > { %7655 = vmatprep.mubr.bf16.mxu0 %v6849_v0  ;;  %v6854_v52 = vcombine.low %v9103_v37, %v9110_v46  ;;  %v2774_v54 = vrot.slane %v2772_v41, 4  ;;  %v5356_v61 = vrot.slane %v6793_v27, 5  ;;  %v2783_v56 = vshrl.u32 %v6442_v45, 16  ;;  %v6797_v27 = vld [vmem:[%s8214_s22 + $0x90] sm:$0xe] }
 0x118   : > { %7432 = vmatmul.mubr.bf16.gmra.mrb[20].mxu1 %v8095_v42  ;;  %v2761_v42 = vrot.slane %v2759_v32, 4  ;;  %v2780_v55 = vrot.slane %v2778_v44, 5  ;;  %v9118_v58 = vsel %vm8337_vm5, %v6823_v49, %v5353_v50  ;;  %v5355_v59 = vrot.slane %v5353_v50, 4 }
 0x119   : > { %7435 = vmatprep.mubr.bf16.mxu1 %v8096_v48  ;;  %v2770_v48 = vrot.slane %v2768_v39, 5  ;;  %v2786_v1 = vshll.u32 %v6442_v45, 16  ;;  %v2792_v2 = vshll.u32 %v6443_v51, 16  ;;  %v2785_v5 = vrot.slane %v2783_v56, 4  ;;  %v6798_v45 = vld [vmem:[%s8214_s22 + $0x94] sm:$0xf] }
 0x11a   : > { %v2765_v53 = vor.u32 %v2764_v43, %v2761_v42  ;;  %v9124_v18 = vsel %vm8337_vm5, %v5355_v59, %v5356_v61  ;;  %v2796_v6 = vshrl.u32 %v6443_v51, 16  ;;  %v2802_v7 = vshll.u32 %v6444_v57, 16  ;;  %v6449_v57 = vld [vmem:[%s8214_s22 + $0x94] sm:$0xf] }
 0x11b   : > { %v2775_v0 = vor.u32 %v2774_v54, %v2770_v48  ;;  %v6855_v12 = vcombine.low %v9118_v58, %v9124_v18  ;;  %v2788_v13 = vrot.slane %v2786_v1, 5  ;;  %v6824_v20 = vrot.slane %v6794_v62, 9  ;;  %v6448_v54 = vld [vmem:[%s8214_s22 + $0x90] sm:$0xf]  ;;  %v6800_v1 = vld [vmem:[%s8214_s22 + $0x9c] sm:$0xe] }
 0x11c   : > { %v2766_v63 = vrot.slane %v2765_v53, 4  ;;  %v2798_v17 = vrot.slane %v2796_v6, 4  ;;  %v2804_v19 = vrot.slane %v2802_v7, 5  ;;  %v5360_v24 = vrot.slane %v6795_v3, 5  ;;  %v6799_v53 = vld [vmem:[%s8214_s22 + $0x98] sm:$0x1] }
 0x11d   : > { %v2776_v11 = vrot.slane %v2775_v0, 4  ;;  %v5363_v25 = vrot.slane %v6796_v8, 5  ;;  %v2816_v40 = vshll.u32 %v6446_v21, 16  ;;  %v2820_v44 = vshrl.u32 %v6446_v21, 16  ;;  %v6801_v7 = vld [vmem:[%s8214_s22 + $0xa0] sm:$0xf] }
 0x11e   : > { %7656 = vmatmul.mubr.bf16.gmra.mrb[4].mxu0 %v6850_v14  ;;  %v2771_v10 = vsel %vm8237_vm2, %v2766_v63, %v2770_v48  ;;  %v6445_v14 = vld [vmem:[%s8214_s22 + $0x84] sm:$0xf]  ;;  %v9139_v38 = vsel %vm8337_vm5, %v6824_v20, %v5360_v24  ;;  %v5362_v39 = vrot.slane %v5360_v24, 4  ;;  %v2826_v51 = vshll.u32 %v6447_v31, 16  ;;  %v6450_v63 = vld [vmem:[%s8214_s22 + $0x98] sm:$0x1] }
 0x11f   : > { %7659 = vmatprep.mubr.bf16.mxu0 %v6851_v22  ;;  %v2781_v22 = vsel %vm8237_vm2, %v2776_v11, %v2780_v55  ;;  %v2807_v32 = vshrl.u32 %v6445_v14, 16  ;;  %v2810_v34 = vshll.u32 %v6445_v14, 16  ;;  %v2818_v50 = vrot.slane %v2816_v40, 5  ;;  %v6451_v20 = vld [vmem:[%s8214_s22 + $0x9c] sm:$0xf] }
 0x120   : > { %7436 = vmatmul.mubr.bf16.gmra.mrb[24].mxu1 %v8097_v15  ;;  %v2794_v15 = vrot.slane %v2792_v2, 5  ;;  %v6487_v26 = vcombine.low %v2771_v10, %v2781_v22  ;;  %v9150_v49 = vsel %vm8337_vm5, %v5362_v39, %v5363_v25  ;;  %v2822_v55 = vrot.slane %v2820_v44, 4  ;;  %v6452_v25 = vld [vmem:[%s8214_s22 + $0xa0] sm:$0xf]  ;;  %v6453_v39 = vld [vmem:[%s8214_s22 + $0xa4] sm:$0x1] }
 0x121   : > { %7439 = vmatprep.mubr.bf16.mxu1 %v8098_v23  ;;  %v2789_v23 = vor.u32 %v2788_v13, %v2785_v5  ;;  %v2809_v43 = vrot.slane %v2807_v32, 4  ;;  %v2812_v41 = vrot.slane %v2810_v34, 5  ;;  %v6856_v47 = vcombine.low %v9139_v38, %v9150_v49  ;;  %v6802_v13 = vld [vmem:[%s8214_s22 + $0xa4] sm:$0x1]  ;;  %v6804_v44 = vld [vmem:[%s8214_s22 + $0xac] sm:$0xf] }
 0x122   : > { %v2799_v28 = vor.u32 %v2798_v17, %v2794_v15  ;;  %v2828_v61 = vrot.slane %v2826_v51, 5  ;;  %v6825_v56 = vrot.slane %v6797_v27, 9  ;;  %v5367_v62 = vrot.slane %v6798_v45, 5 }
 0x123   : > { %v2790_v35 = vrot.slane %v2789_v23, 4  ;;  %v2823_v16 = vor.u32 %v2822_v55, %v2818_v50  ;;  %v5370_v30 = vrot.slane %v6799_v53, 5  ;;  %v2834_v5 = vshll.u32 %v6448_v54, 16  ;;  %v6805_v53 = vld [vmem:[%s8214_s22 + $0xb0] sm:$0x1] }
 0x124   : > { %v2800_v42 = vrot.slane %v2799_v28, 4  ;;  %v9166_v2 = vsel %vm8337_vm5, %v6825_v56, %v5367_v62  ;;  %v5369_v3 = vrot.slane %v5367_v62, 4  ;;  %v2840_v6 = vshll.u32 %v6449_v57, 16 }
 0x125   : > { %v2795_v48 = vsel %vm8237_vm2, %v2790_v35, %v2794_v15  ;;  %v2844_v11 = vshrl.u32 %v6449_v57, 16  ;;  %v2836_v15 = vrot.slane %v2834_v5, 5  ;;  %v6826_v24 = vrot.slane %v6800_v1, 9 }
 0x126   : > { %7660 = vmatmul.mubr.bf16.gmra.mrb[8].mxu0 %v6852_v29  ;;  %v2805_v60 = vsel %vm8237_vm2, %v2800_v42, %v2804_v19  ;;  %v2813_v29 = vor.u32 %v2812_v41, %v2809_v43  ;;  %v5371_v14 = vsel %vm8337_vm5, %v5369_v3, %v5370_v30  ;;  %v2842_v17 = vrot.slane %v2840_v6, 5  ;;  %v6803_v43 = vld [vmem:[%s8214_s22 + $0xa8] sm:$0xe] }
 0x127   : > { %7663 = vmatprep.mubr.bf16.mxu0 %v6853_v36  ;;  %v6488_v59 = vcombine.low %v2795_v48, %v2805_v60  ;;  %v2831_v36 = vshrl.u32 %v6448_v54, 16  ;;  %v2850_v19 = vshll.u32 %v6450_v63, 16  ;;  %v6857_v22 = vcombine.low %v9166_v2, %v5371_v14  ;;  %v6454_v54 = vld [vmem:[%s8214_s22 + $0xa8] sm:$0xf]  ;;  %v6806_v2 = vld [vmem:[%s8214_s22 + $0xb4] sm:$0xe] }
 0x128   : > { %7440 = vmatmul.mubr.bf16.gmra.mrb[28].mxu1 %v8099_v9  ;;  %v2814_v0 = vrot.slane %v2813_v29, 4  ;;  %v2824_v9 = vrot.slane %v2823_v16, 4  ;;  %v2846_v23 = vrot.slane %v2844_v11, 4  ;;  %v5374_v32 = vrot.slane %v6801_v7, 5  ;;  %v6808_v14 = vld [vmem:[%s8214_s22 + $0xbc] sm:$0x1] }
 0x129   : > { %7475 = vmatprep.mubr.bf16.mxu1 %v6487_v26  ;;  %v2833_v10 = vrot.slane %v2831_v36, 4  ;;  %v2852_v31 = vrot.slane %v2850_v19, 5  ;;  %v5377_v35 = vrot.slane %v6802_v13, 5  ;;  %v2855_v40 = vshrl.u32 %v6451_v20, 16 }
 0x12a   : > { %v2819_v8 = vsel %vm8237_vm2, %v2814_v0, %v2818_v50  ;;  %v2829_v21 = vsel %vm8237_vm2, %v2824_v9, %v2828_v61  ;;  %v2847_v34 = vor.u32 %v2846_v23, %v2842_v17  ;;  %v2858_v27 = vshll.u32 %v6451_v20, 16  ;;  %v6456_v0 = vld [vmem:[%s8214_s22 + $0xb0] sm:$0x1]  ;;  %v6458_v23 = vld [vmem:[%s8214_s22 + $0xb8] sm:$0xf] }
 0x12b   : > { %v6489_v26 = vcombine.low %v2819_v8, %v2829_v21  ;;  %v2837_v28 = vor.u32 %v2836_v15, %v2833_v10  ;;  %v9188_v46 = vsel %vm8337_vm5, %v6826_v24, %v5374_v32  ;;  %v2864_v42 = vshll.u32 %v6452_v25, 16  ;;  %v6807_v8 = vld [vmem:[%s8214_s22 + $0xb8] sm:$0xf] }
 0x12c   : > { %v2848_v58 = vrot.slane %v2847_v34, 4  ;;  %v2857_v18 = vrot.slane %v2855_v40, 4  ;;  %v2868_v41 = vshrl.u32 %v6452_v25, 16  ;;  %v2874_v51 = vshll.u32 %v6453_v39, 16  ;;  %v6459_v34 = vld [vmem:[%s8214_s22 + $0xbc] sm:$0x1] }
 0x12d   : > { %v2838_v37 = vrot.slane %v2837_v28, 4  ;;  %v2866_v50 = vrot.slane %v2864_v42, 5  ;;  %v6827_v62 = vrot.slane %v6803_v43, 9  ;;  %v5381_v63 = vrot.slane %v6804_v44, 5 }
 0x12e   : > { %7664 = vmatmul.mubr.bf16.gmra.mrb[12].mxu0 %v6854_v52  ;;  %v5376_v52 = vrot.slane %v5374_v32, 4  ;;  %v2853_v60 = vsel %vm8237_vm2, %v2848_v58, %v2852_v31  ;;  %v2870_v57 = vrot.slane %v2868_v41, 4  ;;  %v2876_v56 = vrot.slane %v2874_v51, 5  ;;  %v6460_v51 = vld [vmem:[%s8214_s22 + $0xc0] sm:$0xf] }
 0x12f   : > { %7667 = vmatprep.mubr.bf16.mxu0 %v6855_v12  ;;  %v2860_v12 = vrot.slane %v2858_v27, 5  ;;  %v2843_v45 = vsel %vm8237_vm2, %v2838_v37, %v2842_v17  ;;  %v5384_v36 = vrot.slane %v6805_v53, 5  ;;  %v2879_v1 = vshrl.u32 %v6454_v54, 16  ;;  %v6457_v17 = vld [vmem:[%s8214_s22 + $0xb4] sm:$0xf] }
 0x130   : > { %7476 = vmatmul.mubr.bf16.vlgmr.msra.gmra.mrb[16].mxu1 %v6488_v59  ;;  %v9196_v48 = vsel %vm8337_vm5, %v5376_v52, %v5377_v35  ;;  %v6455_v59 = vld [vmem:[%s8214_s22 + $0xac] sm:$0xf]  ;;  %v6490_v61 = vcombine.low %v2843_v45, %v2853_v60  ;;  %v2871_v30 = vor.u32 %v2870_v57, %v2866_v50  ;;  %v5382_v3 = vsel %vm8337_vm5, %v6827_v62, %v5381_v63  ;;  %v6809_v52 = vld [vmem:[%s8214_s22 + $0xc0] sm:$0xe] }
 0x131   : > { %7479 = vmatprep.mubr.bf16.mxu1 %v6489_v26  ;;  %v6858_v29 = vcombine.low %v9188_v46, %v9196_v48  ;;  %v2861_v55 = vor.u32 %v2860_v12, %v2857_v18  ;;  %v5383_v5 = vrot.slane %v5381_v63, 4  ;;  %v2882_v6 = vshll.u32 %v6454_v54, 16  ;;  %v6810_v12 = vld [vmem:[%s8214_s22 + $0xc4] sm:$0xf] }
 0x132   : > { %v2888_v7 = vshll.u32 %v6455_v59, 16  ;;  %v2872_v10 = vrot.slane %v2871_v30, 4  ;;  %v2881_v11 = vrot.slane %v2879_v1, 4  ;;  %v2892_v13 = vshrl.u32 %v6455_v59, 16 }
 0x133   : > { %v2862_v16 = vrot.slane %v2861_v55, 4  ;;  %v5385_v38 = vsel %vm8337_vm5, %v5383_v5, %v5384_v36  ;;  %v2884_v49 = vrot.slane %v2882_v6, 5  ;;  %v2898_v15 = vshll.u32 %v6456_v0, 16  ;;  %v6812_v5 = vld [vmem:[%s8214_s22 + $0xcc] sm:$0xe] }
 0x134   : > { %v2877_v19 = vsel %vm8237_vm2, %v2872_v10, %v2876_v56  ;;  %v6859_v20 = vcombine.low %v5382_v3, %v5385_v38  ;;  %v2894_v21 = vrot.slane %v2892_v13, 4  ;;  %v5388_v28 = vrot.slane %v6807_v8, 5  ;;  %v6813_v10 = vld [vmem:[%s8214_s22 + $0xd0] sm:$0xf] }
 0x135   : > { %v2867_v9 = vsel %vm8237_vm2, %v2862_v16, %v2866_v50  ;;  %v2885_v25 = vor.u32 %v2884_v49, %v2881_v11  ;;  %v2900_v26 = vrot.slane %v2898_v15, 5  ;;  %v5391_v32 = vrot.slane %v6808_v14, 5  ;;  %v6811_v50 = vld [vmem:[%s8214_s22 + $0xc8] sm:$0x1]  ;;  %v6814_v49 = vld [vmem:[%s8214_s22 + $0xd4] sm:$0x1] }
 0x136   : > { %7668 = vmatmul.mubr.bf16.gmra.mrb[16].mxu0 %v6856_v47  ;;  %v2890_v47 = vrot.slane %v2888_v7, 5  ;;  %v6491_v24 = vcombine.low %v2867_v9, %v2877_v19  ;;  %v2903_v35 = vshrl.u32 %v6457_v17, 16  ;;  %v2906_v39 = vshll.u32 %v6457_v17, 16  ;;  %v6462_v16 = vld [vmem:[%s8214_s22 + $0xc8] sm:$0x1] }
 0x137   : > { %7671 = vmatprep.mubr.bf16.mxu0 %v6857_v22  ;;  %v6828_v22 = vrot.slane %v6806_v2, 9  ;;  %v2886_v40 = vrot.slane %v2885_v25, 4  ;;  %v5390_v37 = vrot.slane %v5388_v28, 4  ;;  %v2912_v46 = vshll.u32 %v6458_v23, 16 }
 0x138   : > { %7480 = vmatmul.mubr.bf16.gmra.mrb[20].mxu1 %v6490_v61  ;;  %v2895_v31 = vor.u32 %v2894_v21, %v2890_v47  ;;  %v2905_v43 = vrot.slane %v2903_v35, 4  ;;  %v2908_v58 = vrot.slane %v2906_v39, 5  ;;  %v2916_v18 = vshrl.u32 %v6458_v23, 16 }
 0x139   : > { %7483 = vmatprep.mubr.bf16.mxu1 %v6491_v24  ;;  %v5389_v27 = vsel %vm8337_vm5, %v6828_v22, %v5388_v28  ;;  %v2891_v41 = vsel %vm8237_vm2, %v2886_v40, %v2890_v47  ;;  %v5392_v44 = vsel %vm8337_vm5, %v5390_v37, %v5391_v32  ;;  %v2914_v45 = vrot.slane %v2912_v46, 5 }
 0x13a   : > { %v2896_v42 = vrot.slane %v2895_v31, 4  ;;  %v2922_v48 = vshll.u32 %v6459_v34, 16  ;;  %v6860_v54 = vcombine.low %v5389_v27, %v5392_v44  ;;  %v2909_v60 = vor.u32 %v2908_v58, %v2905_v43 }
 0x13b   : > { %v2918_v55 = vrot.slane %v2916_v18, 4  ;;  %v6829_v61 = vrot.slane %v6809_v52, 9  ;;  %v5395_v56 = vrot.slane %v6810_v12, 5  ;;  %v5398_v0 = vrot.slane %v6811_v50, 5 }
 0x13c   : > { %v2901_v53 = vsel %vm8237_vm2, %v2896_v42, %v2900_v26  ;;  %v2924_v59 = vrot.slane %v2922_v48, 5  ;;  %v2910_v62 = vrot.slane %v2909_v60, 4  ;;  %v2927_v30 = vshrl.u32 %v6460_v51, 16 }
 0x13d   : > { %v6492_v57 = vcombine.low %v2891_v41, %v2901_v53  ;;  %v2919_v63 = vor.u32 %v2918_v55, %v2914_v45  ;;  %v5396_v36 = vsel %vm8337_vm5, %v6829_v61, %v5395_v56  ;;  %v5397_v1 = vrot.slane %v5395_v56, 4 }
 0x13e   : > { %7672 = vmatmul.mubr.bf16.gmra.mrb[20].mxu0 %v6858_v29  ;;  %v6461_v29 = vld [vmem:[%s8214_s22 + $0xc4] sm:$0xf]  ;;  %v2930_v2 = vshll.u32 %v6460_v51, 16  ;;  %v2915_v6 = vsel %vm8237_vm2, %v2910_v62, %v2914_v45  ;;  %v2929_v8 = vrot.slane %v2927_v30, 4  ;;  %v2946_v38 = vshll.u32 %v6462_v16, 16 }
 0x13f   : > { %7675 = vmatprep.mubr.bf16.mxu0 %v6859_v20  ;;  %v2936_v3 = vshll.u32 %v6461_v29, 16  ;;  %v2920_v7 = vrot.slane %v2919_v63, 4  ;;  %v2940_v9 = vshrl.u32 %v6461_v29, 16  ;;  %v5399_v11 = vsel %vm8337_vm5, %v5397_v1, %v5398_v0  ;;  %v9274_v29 = vld [vmem:[%s9379_s3] ss:$0 sm:$0xff] }
 0x140   : > { %7484 = vmatmul.mubr.bf16.gmra.mrb[24].mxu1 %v6492_v57  ;;  %v2932_v13 = vrot.slane %v2930_v2, 5  ;;  %v6861_v15 = vcombine.low %v5396_v36, %v5399_v11  ;;  %v6830_v19 = vrot.slane %v6812_v5, 9  ;;  %v5402_v22 = vrot.slane %v6813_v10, 5 }
 0x141   : > { %v2938_v14 = vrot.slane %v2936_v3, 5  ;;  %v2925_v47 = vsel %vm8237_vm2, %v2920_v7, %v2924_v59  ;;  %v2942_v17 = vrot.slane %v2940_v9, 4  ;;  %v2948_v24 = vrot.slane %v2946_v38, 5 }
 0x142   : > { %v6493_v20 = vcombine.low %v2915_v6, %v2925_v47  ;;  %v2933_v21 = vor.u32 %v2932_v13, %v2929_v8  ;;  %v5405_v25 = vrot.slane %v6814_v49, 5  ;;  %v5403_v28 = vsel %vm8337_vm5, %v6830_v19, %v5402_v22 }
 0x143   : > { %v2943_v23 = vor.u32 %v2942_v17, %v2938_v14  ;;  %v5404_v31 = vrot.slane %v5402_v22, 4 }
 0x144   : > { %7487 = vmatprep.mubr.bf16.mxu1 %v6493_v20  ;;  %v2934_v26 = vrot.slane %v2933_v21, 4 }
 0x145   : > { %v2944_v32 = vrot.slane %v2943_v23, 4  ;;  %v5406_v35 = vsel %vm8337_vm5, %v5404_v31, %v5405_v25 }
 0x146   : > { %7676 = vmatmul.mubr.bf16.gmra.mrb[24].mxu0 %v6860_v54  ;;  %v2939_v34 = vsel %vm8237_vm2, %v2934_v26, %v2938_v14  ;;  %v6862_v40 = vcombine.low %v5403_v28, %v5406_v35  ;;  %v9269_v54 = vld [vmem:[%s9378_s2] ss:$0 sm:$0xff] }
 0x147   : > { %7679 = vmatprep.mubr.bf16.mxu0 %v6861_v15  ;;  %v2949_v39 = vsel %vm8237_vm2, %v2944_v32, %v2948_v24 }
 0x148   : > { %v6494_v27 = vcombine.low %v2939_v34, %v2949_v39 }
 0x14a   : > { %7488 = vmatmul.mubr.bf16.gmra.mrb[28].mxu1 %v6494_v27 }
 0x14e   : > { %7680 = vmatmul.mubr.bf16.gmra.mrb[28].mxu0 %v6862_v40 }
 0x1c3   : > { %v7413_v37 = vpop.f32.mrb[0].mxu1 }
 0x1c4   : > { %v2295_v46 = vpop.f32.mrb[1].mxu1 }
 0x1c5   : > { %v7414_v52 = vpop.f32.mrb[2].mxu1 }
 0x1c6   : > { %v2298_v42 = vpop.f32.mrb[3].mxu1 }
 0x1cb   : > { %v7417_v43 = vpop.f32.mrb[4].mxu1 }
 0x1cc   : > { %v2311_v58 = vpop.f32.mrb[5].mxu1 }
 0x1cd   : > { %v7418_v18 = vpop.f32.mrb[6].mxu1 }
 0x1ce   : > { %v2314_v12 = vpop.f32.mrb[7].mxu1 }
 0x1d3   : > { %v7421_v41 = vpop.f32.mrb[8].mxu1 }
 0x1d4   : > { %v2327_v44 = vpop.f32.mrb[9].mxu1 }
 0x1d5   : > { %v7422_v45 = vpop.f32.mrb[10].mxu1 }
 0x1d6   : > { %v9256_v4 = vpop.f32.mrb[11].mxu1 }
 0x1db   : > { %v9258_v48 = vpop.f32.mrb[12].mxu1 }
 0x1dc   : > { %v9260_v33 = vpop.f32.mrb[13].mxu1 }
 0x1dd   : > { %v9262_v50 = vpop.f32.mrb[14].mxu1 }
 0x1de   : > { %v9264_v51 = vpop.f32.mrb[15].mxu1 }
 0x1e9   : > { %v7653_v53 = vpop.f32.mrb[0].mxu0 }
 0x1ea   : > { %v7699_v60 = vadd.f32 %v7653_v53, %v7413_v37  ;;  %v5570_v55 = vpop.f32.mrb[1].mxu0 }
 0x1eb   : > { %v7700_v57 = vadd.f32 %v5570_v55, %v2295_v46  ;;  %v7654_v59 = vpop.f32.mrb[2].mxu0 }
 0x1ec   : > { %v5834_v61 = vmul.f32 %v7699_v60, %v9269_v54  ;;  %v7701_v56 = vadd.f32 %v7654_v59, %v7414_v52  ;;  %v5573_v62 = vpop.f32.mrb[3].mxu0 }
 0x1ed   : > { %v5832_v63 = vmul.f32 %v7700_v57, %v9269_v54  ;;  %v7702_v0 = vadd.f32 %v5573_v62, %v2298_v42 }
 0x1ee   : > { %v5873_v16 = vadd.f32 %v9274_v29, %v5834_v61  ;;  %v5835_v30 = vmul.f32 %v7701_v56, %v9269_v54 }
 0x1ef   : > { %v5871_v36 = vadd.f32 %v9274_v29, %v5832_v63  ;;  %v5833_v1 = vmul.f32 %v7702_v0, %v9269_v54 }
 0x1f0   : > { %v5874_v2 = vadd.f32 %v9274_v29, %v5835_v30  ;;  %v5905_v6 = vmax.f32 %v5873_v16, 0.0 }
 0x1f1   : > { %v5872_v3 = vadd.f32 %v9274_v29, %v5833_v1  ;;  %v7657_v5 = vpop.f32.mrb[4].mxu0  ;;  %v5903_v10 = vmax.f32 %v5871_v36, 0.0 }
 0x1f2   : > { %v5906_v7 = vmax.f32 %v5874_v2, 0.0  ;;  %v7703_v8 = vadd.f32 %v7657_v5, %v7417_v43  ;;  %v5586_v9 = vpop.f32.mrb[5].mxu0 }
 0x1f3   : > { %v5904_v11 = vmax.f32 %v5872_v3, 0.0  ;;  %v7704_v13 = vadd.f32 %v5586_v9, %v2311_v58  ;;  %v7658_v14 = vpop.f32.mrb[6].mxu0 }
 0x1f4   : > { %v6948_v38 = vpack.c.bf16 %v5906_v7, %v5905_v6  ;;  %v5838_v49 = vmul.f32 %v7703_v8, %v9269_v54  ;;  %v7705_v47 = vadd.f32 %v7658_v14, %v7418_v18  ;;  %v5589_v15 = vpop.f32.mrb[7].mxu0 }
 0x1f5   : > { %v6943_v17 = vpack.c.bf16 %v5904_v11, %v5903_v10  ;;  %v5836_v19 = vmul.f32 %v7704_v13, %v9269_v54  ;;  %v7706_v20 = vadd.f32 %v5589_v15, %v2314_v12 }
 0x1f6   : > { %7020 = vst [vmem:[%s9288_s19 + $0x8] sm:$0xff] %v6948_v38   ;;  %v5877_v21 = vadd.f32 %v9274_v29, %v5838_v49  ;;  %v5839_v22 = vmul.f32 %v7705_v47, %v9269_v54 }
 0x1f7   : > { %6944 = vst [vmem:[%s9288_s19] sm:$0xff] %v6943_v17   ;;  %v5875_v23 = vadd.f32 %v9274_v29, %v5836_v19  ;;  %v5837_v24 = vmul.f32 %v7706_v20, %v9269_v54 }
 0x1f8   : > { %v5878_v25 = vadd.f32 %v9274_v29, %v5839_v22  ;;  %v5909_v31 = vmax.f32 %v5877_v21, 0.0 }
 0x1f9   : > { %v5876_v26 = vadd.f32 %v9274_v29, %v5837_v24  ;;  %v7661_v28 = vpop.f32.mrb[8].mxu0  ;;  %v5907_v39 = vmax.f32 %v5875_v23, 0.0 }
 0x1fa   : > { %v5910_v32 = vmax.f32 %v5878_v25, 0.0  ;;  %v7707_v34 = vadd.f32 %v7661_v28, %v7421_v41  ;;  %v5602_v35 = vpop.f32.mrb[9].mxu0 }
 0x1fb   : > { %v5908_v40 = vmax.f32 %v5876_v26, 0.0  ;;  %v7708_v27 = vadd.f32 %v5602_v35, %v2327_v44  ;;  %v7662_v37 = vpop.f32.mrb[10].mxu0 }
 0x1fc   : > { %v6958_v46 = vpack.c.bf16 %v5910_v32, %v5909_v31  ;;  %v5842_v52 = vmul.f32 %v7707_v34, %v9269_v54  ;;  %v7709_v42 = vadd.f32 %v7662_v37, %v7422_v45  ;;  %v5605_v43 = vpop.f32.mrb[11].mxu0 }
 0x1fd   : > { %v6953_v58 = vpack.c.bf16 %v5908_v40, %v5907_v39  ;;  %v5840_v18 = vmul.f32 %v7708_v27, %v9269_v54  ;;  %v7710_v12 = vadd.f32 %v5605_v43, %v9256_v4 }
 0x1fe   : > { %7022 = vst [vmem:[%s9288_s19 + $0x18] sm:$0xff] %v6958_v46   ;;  %v5881_v53 = vadd.f32 %v9274_v29, %v5842_v52  ;;  %v5843_v41 = vmul.f32 %v7709_v42, %v9269_v54 }
 0x1ff   : > { %7021 = vst [vmem:[%s9288_s19 + $0x10] sm:$0xff] %v6953_v58   ;;  %v5879_v60 = vadd.f32 %v9274_v29, %v5840_v18  ;;  %v5841_v44 = vmul.f32 %v7710_v12, %v9269_v54 }
 0x200   : > { %v5882_v57 = vadd.f32 %v9274_v29, %v5843_v41  ;;  %v5913_v62 = vmax.f32 %v5881_v53, 0.0 }
 0x201   : > { %v5880_v59 = vadd.f32 %v9274_v29, %v5841_v44  ;;  %v7665_v61 = vpop.f32.mrb[12].mxu0  ;;  %v5911_v30 = vmax.f32 %v5879_v60, 0.0 }
 0x202   : > { %v5914_v4 = vmax.f32 %v5882_v57, 0.0  ;;  %v7711_v63 = vadd.f32 %v7665_v61, %v9258_v48  ;;  %v5618_v0 = vpop.f32.mrb[13].mxu0 }
 0x203   : > { %v7477_v55 = vpop.f32.mrb[16].mxu1  ;;  %v5912_v36 = vmax.f32 %v5880_v59, 0.0  ;;  %v7712_v1 = vadd.f32 %v5618_v0, %v9260_v33  ;;  %v7666_v2 = vpop.f32.mrb[14].mxu0 }
 0x204   : > { %v3177_v45 = vpop.f32.mrb[17].mxu1  ;;  %v6968_v3 = vpack.c.bf16 %v5914_v4, %v5913_v62  ;;  %v5846_v5 = vmul.f32 %v7711_v63, %v9269_v54  ;;  %v7713_v6 = vadd.f32 %v7666_v2, %v9262_v50  ;;  %v5621_v7 = vpop.f32.mrb[15].mxu0 }
 0x205   : > { %v7478_v56 = vpop.f32.mrb[18].mxu1  ;;  %v6963_v8 = vpack.c.bf16 %v5912_v36, %v5911_v30  ;;  %v5844_v9 = vmul.f32 %v7712_v1, %v9269_v54  ;;  %v7714_v10 = vadd.f32 %v5621_v7, %v9264_v51 }
 0x206   : > { %v3180_v16 = vpop.f32.mrb[19].mxu1  ;;  %7024 = vst [vmem:[%s9288_s19 + $0x28] sm:$0xff] %v6968_v3   ;;  %v5885_v48 = vadd.f32 %v9274_v29, %v5846_v5  ;;  %v5847_v11 = vmul.f32 %v7713_v6, %v9269_v54 }
 0x207   : > { %7023 = vst [vmem:[%s9288_s19 + $0x20] sm:$0xff] %v6963_v8   ;;  %v5883_v33 = vadd.f32 %v9274_v29, %v5844_v9  ;;  %v5845_v13 = vmul.f32 %v7714_v10, %v9269_v54 }
 0x208   : > { %v5886_v14 = vadd.f32 %v9274_v29, %v5847_v11  ;;  %v5917_v47 = vmax.f32 %v5885_v48, 0.0 }
 0x209   : > { %v5884_v50 = vadd.f32 %v9274_v29, %v5845_v13  ;;  %v7669_v38 = vpop.f32.mrb[16].mxu0  ;;  %v5915_v20 = vmax.f32 %v5883_v33, 0.0 }
 0x20a   : > { %v5918_v15 = vmax.f32 %v5886_v14, 0.0  ;;  %v7715_v17 = vadd.f32 %v7669_v38, %v7477_v55  ;;  %v5634_v51 = vpop.f32.mrb[17].mxu0 }
 0x20b   : > { %v7481_v49 = vpop.f32.mrb[20].mxu1  ;;  %v5916_v21 = vmax.f32 %v5884_v50, 0.0  ;;  %v7716_v22 = vadd.f32 %v5634_v51, %v3177_v45  ;;  %v7670_v23 = vpop.f32.mrb[18].mxu0 }
 0x20c   : > { %v3193_v19 = vpop.f32.mrb[21].mxu1  ;;  %v6978_v25 = vpack.c.bf16 %v5918_v15, %v5917_v47  ;;  %v5850_v26 = vmul.f32 %v7715_v17, %v9269_v54  ;;  %v7717_v28 = vadd.f32 %v7670_v23, %v7478_v56  ;;  %v5637_v31 = vpop.f32.mrb[19].mxu0 }
 0x20d   : > { %v7482_v24 = vpop.f32.mrb[22].mxu1  ;;  %v6973_v34 = vpack.c.bf16 %v5916_v21, %v5915_v20  ;;  %v5848_v35 = vmul.f32 %v7716_v22, %v9269_v54  ;;  %v7718_v39 = vadd.f32 %v5637_v31, %v3180_v16 }
 0x20e   : > { %v3196_v32 = vpop.f32.mrb[23].mxu1  ;;  %7026 = vst [vmem:[%s9288_s19 + $0x38] sm:$0xff] %v6978_v25   ;;  %v5889_v40 = vadd.f32 %v9274_v29, %v5850_v26  ;;  %v5851_v27 = vmul.f32 %v7717_v28, %v9269_v54 }
 0x20f   : > { %7025 = vst [vmem:[%s9288_s19 + $0x30] sm:$0xff] %v6973_v34   ;;  %v5887_v37 = vadd.f32 %v9274_v29, %v5848_v35  ;;  %v5849_v46 = vmul.f32 %v7718_v39, %v9269_v54 }
 0x210   : > { %v5890_v52 = vadd.f32 %v9274_v29, %v5851_v27  ;;  %v5921_v58 = vmax.f32 %v5889_v40, 0.0 }
 0x211   : > { %v5888_v42 = vadd.f32 %v9274_v29, %v5849_v46  ;;  %v7673_v43 = vpop.f32.mrb[20].mxu0  ;;  %v5919_v41 = vmax.f32 %v5887_v37, 0.0 }
 0x212   : > { %v5922_v18 = vmax.f32 %v5890_v52, 0.0  ;;  %v7719_v12 = vadd.f32 %v7673_v43, %v7481_v49  ;;  %v5650_v53 = vpop.f32.mrb[21].mxu0 }
 0x213   : > { %v5920_v60 = vmax.f32 %v5888_v42, 0.0  ;;  %v7720_v44 = vadd.f32 %v5650_v53, %v3193_v19  ;;  %v7674_v55 = vpop.f32.mrb[22].mxu0  ;;  %v7485_v63 = vpop.f32.mrb[24].mxu1 }
 0x214   : > { %v6988_v57 = vpack.c.bf16 %v5922_v18, %v5921_v58  ;;  %v5854_v45 = vmul.f32 %v7719_v12, %v9269_v54  ;;  %v7721_v59 = vadd.f32 %v7674_v55, %v7482_v24  ;;  %v5653_v61 = vpop.f32.mrb[23].mxu0  ;;  %v3209_v30 = vpop.f32.mrb[25].mxu1 }
 0x215   : > { %v6983_v56 = vpack.c.bf16 %v5920_v60, %v5919_v41  ;;  %v5852_v62 = vmul.f32 %v7720_v44, %v9269_v54  ;;  %v7722_v4 = vadd.f32 %v5653_v61, %v3196_v32  ;;  %v7486_v2 = vpop.f32.mrb[26].mxu1 }
 0x216   : > { %7028 = vst [vmem:[%s9288_s19 + $0x48] sm:$0xff] %v6988_v57   ;;  %v5893_v0 = vadd.f32 %v9274_v29, %v5854_v45  ;;  %v5855_v16 = vmul.f32 %v7721_v59, %v9269_v54  ;;  %v3212_v5 = vpop.f32.mrb[27].mxu1 }
 0x217   : > { %7027 = vst [vmem:[%s9288_s19 + $0x40] sm:$0xff] %v6983_v56   ;;  %v5891_v36 = vadd.f32 %v9274_v29, %v5852_v62  ;;  %v5853_v1 = vmul.f32 %v7722_v4, %v9269_v54 }
 0x218   : > { %v5894_v3 = vadd.f32 %v9274_v29, %v5855_v16  ;;  %v5925_v8 = vmax.f32 %v5893_v0, 0.0 }
 0x219   : > { %v5892_v6 = vadd.f32 %v9274_v29, %v5853_v1  ;;  %v7677_v7 = vpop.f32.mrb[24].mxu0  ;;  %v5923_v11 = vmax.f32 %v5891_v36, 0.0 }
 0x21a   : > { %v5926_v9 = vmax.f32 %v5894_v3, 0.0  ;;  %v7723_v10 = vadd.f32 %v7677_v7, %v7485_v63  ;;  %v5666_v48 = vpop.f32.mrb[25].mxu0 }
 0x21b   : > { %v5924_v33 = vmax.f32 %v5892_v6, 0.0  ;;  %v7724_v13 = vadd.f32 %v5666_v48, %v3209_v30  ;;  %v7678_v14 = vpop.f32.mrb[26].mxu0 }
 0x21c   : > { %v6998_v50 = vpack.c.bf16 %v5926_v9, %v5925_v8  ;;  %v5858_v38 = vmul.f32 %v7723_v10, %v9269_v54  ;;  %v7725_v49 = vadd.f32 %v7678_v14, %v7486_v2  ;;  %v5669_v47 = vpop.f32.mrb[27].mxu0 }
 0x21d   : > { %v6993_v15 = vpack.c.bf16 %v5924_v33, %v5923_v11  ;;  %v5856_v17 = vmul.f32 %v7724_v13, %v9269_v54  ;;  %v7726_v51 = vadd.f32 %v5669_v47, %v3212_v5  ;;  %v7489_v25 = vpop.f32.mrb[28].mxu1 }
 0x21e   : > { %7030 = vst [vmem:[%s9288_s19 + $0x58] sm:$0xff] %v6998_v50   ;;  %v5897_v19 = vadd.f32 %v9274_v29, %v5858_v38  ;;  %v5859_v20 = vmul.f32 %v7725_v49, %v9269_v54  ;;  %v3225_v34 = vpop.f32.mrb[29].mxu1 }
 0x21f   : > { %7029 = vst [vmem:[%s9288_s19 + $0x50] sm:$0xff] %v6993_v15   ;;  %v5895_v21 = vadd.f32 %v9274_v29, %v5856_v17  ;;  %v5857_v22 = vmul.f32 %v7726_v51, %v9269_v54  ;;  %v7490_v37 = vpop.f32.mrb[30].mxu1 }
 0x220   : > { %v5898_v23 = vadd.f32 %v9274_v29, %v5859_v20  ;;  %v5929_v28 = vmax.f32 %v5897_v19, 0.0  ;;  %v3228_v58 = vpop.f32.mrb[31].mxu1 }
 0x221   : > { %v5896_v24 = vadd.f32 %v9274_v29, %v5857_v22  ;;  %v7681_v26 = vpop.f32.mrb[28].mxu0  ;;  %v5927_v39 = vmax.f32 %v5895_v21, 0.0 }
 0x222   : > { %v5930_v31 = vmax.f32 %v5898_v23, 0.0  ;;  %v7727_v32 = vadd.f32 %v7681_v26, %v7489_v25  ;;  %v5682_v35 = vpop.f32.mrb[29].mxu0 }
 0x223   : > { %v5928_v40 = vmax.f32 %v5896_v24, 0.0  ;;  %v7728_v27 = vadd.f32 %v5682_v35, %v3225_v34  ;;  %v7682_v46 = vpop.f32.mrb[30].mxu0 }
 0x224   : > { %v7008_v52 = vpack.c.bf16 %v5930_v31, %v5929_v28  ;;  %v5862_v42 = vmul.f32 %v7727_v32, %v9269_v54  ;;  %v7729_v43 = vadd.f32 %v7682_v46, %v7490_v37  ;;  %v5685_v18 = vpop.f32.mrb[31].mxu0 }
 0x225   : > { %v7003_v12 = vpack.c.bf16 %v5928_v40, %v5927_v39  ;;  %v5860_v53 = vmul.f32 %v7728_v27, %v9269_v54  ;;  %v7730_v41 = vadd.f32 %v5685_v18, %v3228_v58 }
 0x226   : > { %7032 = vst [vmem:[%s9288_s19 + $0x68] sm:$0xff] %v7008_v52   ;;  %v5901_v60 = vadd.f32 %v9274_v29, %v5862_v42  ;;  %v5863_v44 = vmul.f32 %v7729_v43, %v9269_v54 }
 0x227   : > { %7031 = vst [vmem:[%s9288_s19 + $0x60] sm:$0xff] %v7003_v12   ;;  %v5899_v55 = vadd.f32 %v9274_v29, %v5860_v53  ;;  %v5861_v57 = vmul.f32 %v7730_v41, %v9269_v54 }
 0x228   : > { %v5902_v45 = vadd.f32 %v9274_v29, %v5863_v44  ;;  %v5933_v61 = vmax.f32 %v5901_v60, 0.0 }
 0x229   : > { %v5900_v59 = vadd.f32 %v9274_v29, %v5861_v57  ;;  %v5931_v62 = vmax.f32 %v5899_v55, 0.0 }
 0x22a   : > { %v5934_v56 = vmax.f32 %v5902_v45, 0.0 }
 0x22b   : > { %v5932_v4 = vmax.f32 %v5900_v59, 0.0 }
 0x22c   : > { %v7018_v63 = vpack.c.bf16 %v5934_v56, %v5933_v61 }
 0x22d   : > { %v7013_v0 = vpack.c.bf16 %v5932_v4, %v5931_v62 }
 0x22e   : > { %7034 = vst [vmem:[%s9288_s19 + $0x78] sm:$0xff] %v7018_v63  }
 0x22f   : > { %7033 = vst [vmem:[%s9288_s19 + $0x70] sm:$0xff] %v7013_v0  }
 0x230 PF: > { %s14_s17 = sadd.s32 1, %s8130_s17   ;;  %s9385_s15 = smov %s8126_s16 }
 0x231   : > { %p11_p5 = scmp.ge.s32.totalorder %s14_s17, 4   ;;  %s9386_s16 = smov %s9388_s18 }
 0x233   :  { %13 = sbr.rel (!%p11_p5) target bundleno = 2 (0x2), region = 85 }

</bundles_post_ra>
